<compile_context>
chip_gen: v7x
topology: tpu7x:2x2x1
jax: 0.10.0
libtpu: 0.0.40
codegen_flags: <defaults>
</compile_context>

<pallas_src>
import jax
import jax.numpy as jnp
from jax.experimental import pallas as pl
from jax.experimental.pallas import tpu as pltpu


def _attention_kernel(enc_ref, dec_ref, mask_ref, wh_ref, ws_ref, bs_ref, v_ref,
                      ctx_ref, attn_ref):
    # per-(batch, dec-tile) views
    enc = enc_ref[0]                      # (Lp, He)
    dec = dec_ref[0]                      # (Td, Hd)
    mask = mask_ref[0]                    # (1, Lp)
    A = wh_ref.shape[1]

    # --- projections (MXU) ---
    pe = jnp.dot(enc, wh_ref[...], preferred_element_type=jnp.float32)            # (Lp, A)
    pd = jnp.dot(dec, ws_ref[...], preferred_element_type=jnp.float32) + bs_ref[...]  # (Td, A)

    # --- additive attention logits ---
    # logits[t, l] = sum_a v[a] * tanh(pd[t, a] + pe[l, a])
    # selector vector applied as VPU multiply + lane reduce (no 1-column MXU matmul).
    add = jnp.tanh(pd[:, None, :] + pe[None, :, :])                               # (Td, Lp, A)
    v_row = v_ref[...].reshape(1, 1, A)
    logits = jnp.sum(add * v_row, axis=-1)                                         # (Td, Lp)

    # --- softmax over encoder positions, then pad-mask + renormalize ---
    m = jnp.max(logits, axis=-1, keepdims=True)
    e = jnp.exp(logits - m)
    p = e * pl.reciprocal(jnp.sum(e, axis=-1, keepdims=True))                      # softmax
    p = p * mask                                                                   # zero padded / masked positions
    renorm = p * pl.reciprocal(jnp.sum(p, axis=-1, keepdims=True))                 # renormalize

    attn_ref[0] = renorm.astype(attn_ref.dtype)
    # context[t, h] = sum_l renorm[t, l] * enc[l, h]   (MXU)
    ctx_ref[0] = jnp.dot(renorm, enc, preferred_element_type=jnp.float32).astype(ctx_ref.dtype)


def attention_forward(encoded_seq, decoder_state, input_pad_mask, wh, ws, bs, v,
                      *, dec_tile=None):
    """Pallas implementation of Attention.forward.

    Args:
      encoded_seq:    (B, Lenc, He) float
      decoder_state:  (B, Ldec, Hd) float
      input_pad_mask: (B, Lenc) float (1 = keep, 0 = pad)
      wh: (A, He)  Wh_layer.weight   (no bias)
      ws: (A, Hd)  Ws_layer.weight
      bs: (A,)     Ws_layer.bias
      v:  (1, A)   selector_vector_layer.weight (no bias)
    Returns: (context_vector (B, Ldec, He), attn_weights_renormalized (B, Ldec, Lenc))
    """
    B, Lenc, He = encoded_seq.shape
    _, Ldec, Hd = decoder_state.shape
    A = wh.shape[0]

    f32 = jnp.float32
    enc = encoded_seq.astype(f32)
    dec = decoder_state.astype(f32)
    mask = input_pad_mask.astype(f32)

    # Pad encoder length to a lane-dense multiple of 128 (exact: padded positions
    # get mask 0 and zero encoder rows, so outputs for valid positions are unchanged).
    Lp = pl.cdiv(Lenc, 128) * 128
    if Lp != Lenc:
        pad = Lp - Lenc
        enc = jnp.pad(enc, ((0, 0), (0, pad), (0, 0)))
        mask = jnp.pad(mask, ((0, 0), (0, pad)))
    mask = mask.reshape(B, 1, Lp)

    # Decoder-time tiling: full slab if small, 128-row tiles when it divides cleanly.
    if dec_tile is None:
        dec_tile = 128 if (Ldec > 128 and Ldec % 128 == 0) else Ldec
    num_dec_tiles = Ldec // dec_tile

    # Parameter reshapes (plain JAX glue): torch Linear computes x @ W.T.
    wh_t = wh.T.astype(f32)                  # (He, A)
    ws_t = ws.T.astype(f32)                  # (Hd, A)
    bs2 = jnp.asarray(bs, f32).reshape(1, A)
    v2 = jnp.asarray(v, f32).reshape(1, A)

    grid_spec = pltpu.PrefetchScalarGridSpec(
        num_scalar_prefetch=0,
        grid=(B, num_dec_tiles),
        in_specs=[
            pl.BlockSpec((1, Lp, He), lambda b, t: (b, 0, 0)),        # encoded_seq
            pl.BlockSpec((1, dec_tile, Hd), lambda b, t: (b, t, 0)),  # decoder_state
            pl.BlockSpec((1, 1, Lp), lambda b, t: (b, 0, 0)),         # pad mask
            pl.BlockSpec((He, A), lambda b, t: (0, 0)),               # Wh^T (resident)
            pl.BlockSpec((Hd, A), lambda b, t: (0, 0)),               # Ws^T (resident)
            pl.BlockSpec((1, A), lambda b, t: (0, 0)),                # bias
            pl.BlockSpec((1, A), lambda b, t: (0, 0)),                # selector vector
        ],
        out_specs=[
            pl.BlockSpec((1, dec_tile, He), lambda b, t: (b, t, 0)),  # context
            pl.BlockSpec((1, dec_tile, Lp), lambda b, t: (b, t, 0)),  # attn weights
        ],
    )

    ctx, attn = pl.pallas_call(
        _attention_kernel,
        out_shape=(
            jax.ShapeDtypeStruct((B, Ldec, He), f32),
            jax.ShapeDtypeStruct((B, Ldec, Lp), f32),
        ),
        grid_spec=grid_spec,
        compiler_params=pltpu.CompilerParams(
            dimension_semantics=("parallel", "parallel")),
    )(enc, dec, mask, wh_t, ws_t, bs2, v2)

    # slice off the lane padding of the attention output
    return ctx, attn[:, :, :Lenc]


def reference(encoded_seq, decoder_state, input_pad_mask, wh, ws, bs, v):
    """Pure-JAX reference matching the PyTorch forward op order."""
    pd = decoder_state @ ws.T + bs                                    # (B, Ldec, A)
    pe = encoded_seq @ wh.T                                           # (B, Lenc, A)
    added = jnp.tanh(pd[:, :, None, :] + pe[:, None, :, :])           # (B, Ldec, Lenc, A)
    logits = jnp.einsum('btla,a->btl', added, jnp.asarray(v).reshape(-1))
    attn = jax.nn.softmax(logits, axis=-1)
    attn2 = attn * input_pad_mask[:, None, :]
    renorm = attn2 / jnp.sum(attn2, axis=-1, keepdims=True)
    ctx = jnp.einsum('btl,blh->bth', renorm, encoded_seq)
    return ctx, renorm


if __name__ == "__main__":
    # small shapes consistent with the module
    B, Lenc, Ldec = 2, 16, 8
    total_encoder_hidden_size = 16
    total_decoder_hidden_size = 16
    attn_vec_size = 32

    key = jax.random.PRNGKey(0)
    ks = jax.random.split(key, 6)
    encoded_seq = jax.random.normal(ks[0], (B, Lenc, total_encoder_hidden_size), jnp.float32)
    decoder_state = jax.random.normal(ks[1], (B, Ldec, total_decoder_hidden_size), jnp.float32)
    # pad mask: second batch element has 5 padded encoder positions
    lens = jnp.array([Lenc, Lenc - 5])
    input_pad_mask = (jnp.arange(Lenc)[None, :] < lens[:, None]).astype(jnp.float32)

    # deterministic parameter init (torch Linear layouts)
    wh = jax.random.normal(ks[2], (attn_vec_size, total_encoder_hidden_size), jnp.float32) * 0.1
    ws = jax.random.normal(ks[3], (attn_vec_size, total_decoder_hidden_size), jnp.float32) * 0.1
    bs = jax.random.normal(ks[4], (attn_vec_size,), jnp.float32) * 0.1
    v = jax.random.normal(ks[5], (1, attn_vec_size), jnp.float32) * 0.1

    ctx, attn = attention_forward(encoded_seq, decoder_state, input_pad_mask, wh, ws, bs, v)
    jax.block_until_ready((ctx, attn))

    ctx_ref, attn_ref = reference(encoded_seq, decoder_state, input_pad_mask, wh, ws, bs, v)
    assert ctx.shape == (B, Ldec, total_encoder_hidden_size)
    assert attn.shape == (B, Ldec, Lenc)
    assert jnp.allclose(ctx, ctx_ref, atol=1e-5, rtol=1e-4), "context mismatch"
    assert jnp.allclose(attn, attn_ref, atol=1e-5, rtol=1e-4), "attn mismatch"

    print("KERNEL_OK")
</pallas_src>

<mosaic_0001>
module attributes {stable_mosaic.version = 11 : i64} {
  func.func @_attention_kernel(%arg0: i32, %arg1: i32, %arg2: memref<1x128x16xf32, #tpu.memory_space<vmem>>, %arg3: memref<1x8x16xf32, #tpu.memory_space<vmem>>, %arg4: memref<1x1x128xf32, #tpu.memory_space<vmem>>, %arg5: memref<16x32xf32, #tpu.memory_space<vmem>>, %arg6: memref<16x32xf32, #tpu.memory_space<vmem>>, %arg7: memref<1x32xf32, #tpu.memory_space<vmem>>, %arg8: memref<1x32xf32, #tpu.memory_space<vmem>>, %arg9: memref<1x8x16xf32, #tpu.memory_space<vmem>>, %arg10: memref<1x8x128xf32, #tpu.memory_space<vmem>>) attributes {dimension_semantics = [#tpu.dimension_semantics<parallel>, #tpu.dimension_semantics<parallel>], iteration_bounds = array<i64: 2, 1>, scalar_prefetch = 0 : i64, scratch_operands = 0 : i64, tpu.core_type = #tpu.core_type<tc>, window_params = [{transform_indices = @transform_0, window_bounds = array<i64: 1, 128, 16>}, {transform_indices = @transform_1, window_bounds = array<i64: 1, 8, 16>}, {transform_indices = @transform_2, window_bounds = array<i64: 1, 1, 128>}, {pipeline_mode = #tpu.pipeline_mode<synchronous>, transform_indices = @transform_3, window_bounds = array<i64: 16, 32>}, {pipeline_mode = #tpu.pipeline_mode<synchronous>, transform_indices = @transform_4, window_bounds = array<i64: 16, 32>}, {pipeline_mode = #tpu.pipeline_mode<synchronous>, transform_indices = @transform_5, window_bounds = array<i64: 1, 32>}, {pipeline_mode = #tpu.pipeline_mode<synchronous>, transform_indices = @transform_6, window_bounds = array<i64: 1, 32>}, {transform_indices = @transform_7, window_bounds = array<i64: 1, 8, 16>}, {transform_indices = @transform_8, window_bounds = array<i64: 1, 8, 128>}]} {
    %c0 = arith.constant 0 : index
    %c0_0 = arith.constant 0 : index
    %c0_1 = arith.constant 0 : index
    %0 = vector.load %arg2[%c0, %c0_0, %c0_1] : memref<1x128x16xf32, #tpu.memory_space<vmem>>, vector<1x128x16xf32>
    %1 = vector.shape_cast %0 : vector<1x128x16xf32> to vector<128x16xf32>
    %c0_2 = arith.constant 0 : index
    %c0_3 = arith.constant 0 : index
    %c0_4 = arith.constant 0 : index
    %2 = vector.load %arg3[%c0_2, %c0_3, %c0_4] : memref<1x8x16xf32, #tpu.memory_space<vmem>>, vector<1x8x16xf32>
    %3 = vector.shape_cast %2 : vector<1x8x16xf32> to vector<8x16xf32>
    %c0_5 = arith.constant 0 : index
    %c0_6 = arith.constant 0 : index
    %c0_7 = arith.constant 0 : index
    %4 = vector.load %arg4[%c0_5, %c0_6, %c0_7] : memref<1x1x128xf32, #tpu.memory_space<vmem>>, vector<1x1x128xf32>
    %5 = vector.shape_cast %4 : vector<1x1x128xf32> to vector<1x128xf32>
    %c0_8 = arith.constant 0 : index
    %c0_9 = arith.constant 0 : index
    %6 = vector.load %arg5[%c0_8, %c0_9] : memref<16x32xf32, #tpu.memory_space<vmem>>, vector<16x32xf32>
    %cst = arith.constant dense<0.000000e+00> : vector<128x32xf32>
    %7 = tpu.matmul %1, %6, %cst {dimension_numbers = #tpu.dot_dimension_numbers<[1], [0], [0], [1], [0, 0, 1, 1], [], []>} : vector<128x16xf32>, vector<16x32xf32>, vector<128x32xf32> -> vector<128x32xf32>
    %c0_10 = arith.constant 0 : index
    %c0_11 = arith.constant 0 : index
    %8 = vector.load %arg6[%c0_10, %c0_11] : memref<16x32xf32, #tpu.memory_space<vmem>>, vector<16x32xf32>
    %cst_12 = arith.constant dense<0.000000e+00> : vector<8x32xf32>
    %9 = tpu.matmul %3, %8, %cst_12 {dimension_numbers = #tpu.dot_dimension_numbers<[1], [0], [0], [1], [0, 0, 1, 1], [], []>} : vector<8x16xf32>, vector<16x32xf32>, vector<8x32xf32> -> vector<8x32xf32>
    %c0_13 = arith.constant 0 : index
    %c0_14 = arith.constant 0 : index
    %10 = vector.load %arg7[%c0_13, %c0_14] : memref<1x32xf32, #tpu.memory_space<vmem>>, vector<1x32xf32>
    %11 = vector.broadcast %10 : vector<1x32xf32> to vector<8x32xf32>
    %12 = arith.addf %9, %11 : vector<8x32xf32>
    %13 = vector.shape_cast %12 : vector<8x32xf32> to vector<8x1x32xf32>
    %14 = vector.shape_cast %7 : vector<128x32xf32> to vector<1x128x32xf32>
    %15 = vector.broadcast %13 : vector<8x1x32xf32> to vector<8x128x32xf32>
    %16 = vector.broadcast %14 : vector<1x128x32xf32> to vector<8x128x32xf32>
    %17 = arith.addf %15, %16 : vector<8x128x32xf32>
    %18 = math.tanh %17 : vector<8x128x32xf32>
    %c0_15 = arith.constant 0 : index
    %c0_16 = arith.constant 0 : index
    %19 = vector.load %arg8[%c0_15, %c0_16] : memref<1x32xf32, #tpu.memory_space<vmem>>, vector<1x32xf32>
    %20 = vector.shape_cast %19 : vector<1x32xf32> to vector<1x1x32xf32>
    %21 = vector.broadcast %20 : vector<1x1x32xf32> to vector<8x128x32xf32>
    %22 = arith.mulf %18, %21 : vector<8x128x32xf32>
    %cst_17 = arith.constant dense<0.000000e+00> : vector<8x128xf32>
    %23 = vector.multi_reduction <add>, %22, %cst_17 [2] : vector<8x128x32xf32> to vector<8x128xf32>
    %cst_18 = arith.constant dense<0xFF800000> : vector<8xf32>
    %24 = vector.multi_reduction <maximumf>, %23, %cst_18 [1] : vector<8x128xf32> to vector<8xf32>
    %25 = vector.shape_cast %24 : vector<8xf32> to vector<8x1xf32>
    %26 = vector.broadcast %25 : vector<8x1xf32> to vector<8x128xf32>
    %27 = arith.subf %23, %26 : vector<8x128xf32>
    %28 = math.exp %27 : vector<8x128xf32>
    %cst_19 = arith.constant dense<0.000000e+00> : vector<8xf32>
    %29 = vector.multi_reduction <add>, %28, %cst_19 [1] : vector<8x128xf32> to vector<8xf32>
    %30 = vector.shape_cast %29 : vector<8xf32> to vector<8x1xf32>
    %31 = tpu.reciprocal %30 : vector<8x1xf32> -> vector<8x1xf32>
    %32 = vector.broadcast %31 : vector<8x1xf32> to vector<8x128xf32>
    %33 = arith.mulf %28, %32 : vector<8x128xf32>
    %34 = vector.broadcast %5 : vector<1x128xf32> to vector<8x128xf32>
    %35 = arith.mulf %33, %34 : vector<8x128xf32>
    %cst_20 = arith.constant dense<0.000000e+00> : vector<8xf32>
    %36 = vector.multi_reduction <add>, %35, %cst_20 [1] : vector<8x128xf32> to vector<8xf32>
    %37 = vector.shape_cast %36 : vector<8xf32> to vector<8x1xf32>
    %38 = tpu.reciprocal %37 : vector<8x1xf32> -> vector<8x1xf32>
    %39 = vector.broadcast %38 : vector<8x1xf32> to vector<8x128xf32>
    %40 = arith.mulf %35, %39 : vector<8x128xf32>
    %c0_21 = arith.constant 0 : index
    %c0_22 = arith.constant 0 : index
    %c0_23 = arith.constant 0 : index
    %41 = vector.load %arg10[%c0_21, %c0_22, %c0_23] : memref<1x8x128xf32, #tpu.memory_space<vmem>>, vector<1x8x128xf32>
    %42 = vector.shape_cast %41 : vector<1x8x128xf32> to vector<8x128xf32>
    %43 = vector.shape_cast %40 : vector<8x128xf32> to vector<1x8x128xf32>
    tpu.vector_store %arg10[%c0_21, %c0_22, %c0_23], %43 {strides = array<i32>} : memref<1x8x128xf32, #tpu.memory_space<vmem>>, vector<1x8x128xf32>,
    %cst_24 = arith.constant dense<0.000000e+00> : vector<8x16xf32>
    %44 = tpu.matmul %40, %1, %cst_24 {dimension_numbers = #tpu.dot_dimension_numbers<[1], [0], [0], [1], [0, 0, 1, 1], [], []>} : vector<8x128xf32>, vector<128x16xf32>, vector<8x16xf32> -> vector<8x16xf32>
    %c0_25 = arith.constant 0 : index
    %c0_26 = arith.constant 0 : index
    %c0_27 = arith.constant 0 : index
    %45 = vector.load %arg9[%c0_25, %c0_26, %c0_27] : memref<1x8x16xf32, #tpu.memory_space<vmem>>, vector<1x8x16xf32>
    %46 = vector.shape_cast %45 : vector<1x8x16xf32> to vector<8x16xf32>
    %47 = vector.shape_cast %44 : vector<8x16xf32> to vector<1x8x16xf32>
    tpu.vector_store %arg9[%c0_25, %c0_26, %c0_27], %47 {strides = array<i32>} : memref<1x8x16xf32, #tpu.memory_space<vmem>>, vector<1x8x16xf32>,
    return
  }
  func.func @transform_0(%arg0: i32, %arg1: i32) -> (i32, i32, i32) {
    %c0_i32 = arith.constant 0 : i32
    %c0_i32_0 = arith.constant 0 : i32
    %c0_i32_1 = arith.constant 0 : i32
    return %arg0, %c0_i32, %c0_i32_0 : i32, i32, i32
  }
  func.func @transform_1(%arg0: i32, %arg1: i32) -> (i32, i32, i32) {
    %c0_i32 = arith.constant 0 : i32
    %c0_i32_0 = arith.constant 0 : i32
    return %arg0, %arg1, %c0_i32 : i32, i32, i32
  }
  func.func @transform_2(%arg0: i32, %arg1: i32) -> (i32, i32, i32) {
    %c0_i32 = arith.constant 0 : i32
    %c0_i32_0 = arith.constant 0 : i32
    %c0_i32_1 = arith.constant 0 : i32
    return %arg0, %c0_i32, %c0_i32_0 : i32, i32, i32
  }
  func.func @transform_3(%arg0: i32, %arg1: i32) -> (i32, i32) {
    %c0_i32 = arith.constant 0 : i32
    %c0_i32_0 = arith.constant 0 : i32
    %c0_i32_1 = arith.constant 0 : i32
    return %c0_i32, %c0_i32_0 : i32, i32
  }
  func.func @transform_4(%arg0: i32, %arg1: i32) -> (i32, i32) {
    %c0_i32 = arith.constant 0 : i32
    %c0_i32_0 = arith.constant 0 : i32
    %c0_i32_1 = arith.constant 0 : i32
    return %c0_i32, %c0_i32_0 : i32, i32
  }
  func.func @transform_5(%arg0: i32, %arg1: i32) -> (i32, i32) {
    %c0_i32 = arith.constant 0 : i32
    %c0_i32_0 = arith.constant 0 : i32
    %c0_i32_1 = arith.constant 0 : i32
    return %c0_i32, %c0_i32_0 : i32, i32
  }
  func.func @transform_6(%arg0: i32, %arg1: i32) -> (i32, i32) {
    %c0_i32 = arith.constant 0 : i32
    %c0_i32_0 = arith.constant 0 : i32
    %c0_i32_1 = arith.constant 0 : i32
    return %c0_i32, %c0_i32_0 : i32, i32
  }
  func.func @transform_7(%arg0: i32, %arg1: i32) -> (i32, i32, i32) {
    %c0_i32 = arith.constant 0 : i32
    %c0_i32_0 = arith.constant 0 : i32
    return %arg0, %arg1, %c0_i32 : i32, i32, i32
  }
  func.func @transform_8(%arg0: i32, %arg1: i32) -> (i32, i32, i32) {
    %c0_i32 = arith.constant 0 : i32
    %c0_i32_0 = arith.constant 0 : i32
    return %arg0, %arg1, %c0_i32 : i32, i32, i32
  }
}

</mosaic_0001>

<bundles_post_ra>
// kernel: tpu_custom_call.1
= control target key start
LH: loop header
LB: loop body
LE: loop exit
PB: predicated region body
PF: predicated region fallthrough
CT: control target
= control target key end

     0   :  { %14 = vsyncpa [#allocation3], 0  ;;  %s12878_s0 = inlined_call_operand.vmem [shape: f32[2,128,16], index: 0, kind: input, shape index: {}]   ;;  %s12879_s1 = inlined_call_operand.vmem [shape: f32[2,8,16], index: 1, kind: input, shape index: {}]   ;;  %s12880_s2 = inlined_call_operand.vmem [shape: f32[2,1,128], index: 2, kind: input, shape index: {}]   ;;  %s12881_s3 = inlined_call_operand.vmem [shape: f32[16,32], index: 3, kind: input, shape index: {}]   ;;  %s12882_s4 = inlined_call_operand.vmem [shape: f32[16,32], index: 4, kind: input, shape index: {}]   ;;  %s12883_s5 = inlined_call_operand.vmem [shape: f32[1,32], index: 5, kind: input, shape index: {}]   ;;  %s12884_s6 = inlined_call_operand.vmem [shape: f32[1,32], index: 6, kind: input, shape index: {}]   ;;  %s12885_s7 = inlined_call_operand.hbm [shape: f32[2,8,16], index: 7, kind: output, shape index: {0}]   ;;  %s12886_s8 = inlined_call_operand.hbm [shape: f32[2,8,128], index: 8, kind: output, shape index: {1}]  }
   0x1   :  { %16 = vsyncpa [#allocation3 + $0x1], 0 }
   0x2   :  { %17 = vsyncpa [#allocation5], 0 }
   0x3   :  { %19 = vsyncpa [#allocation5 + $0x1], 0  ;;  %s7938_s27 = smov 0   ;;  %s7940_s28 = smov 0  }
   0x4   :  { %s7942_s29 = smov 0   ;;  %s7944_s30 = smov 0  }
   0x5   :  { %s7946_s9 = smov 0   ;;  %s7948_s10 = smov 0  }
   0x6 LB: > { %s7012_s11 = sadd.s32 4294967295, %s7884_s10   ;;  %s7013_s12 = sadd.s32 4294967294, %s7884_s10   ;;  %s7884_s10 = sphi %s7948_s10, %s25_s10   ;;  %s7880_s9 = sphi %s7946_s9, %s14542_s9   ;;  %s7876_s30 = sphi %s7944_s30, %s14541_s30   ;;  %s7872_s29 = sphi %s7942_s29, %s14540_s29   ;;  %s7868_s28 = sphi %s7940_s28, %s14539_s28   ;;  %s7864_s27 = sphi %s7938_s27, %s14538_s27  }
   0x7   : > { %s37_s13 = sadd.s32 1, %s7880_s9  ;;  %s210_s14 = sadd.s32 1, %s7872_s29 }
   0x8   : > { %p39_p0 = scmp.ge.s32.totalorder %s37_s13, 2  ;;  %p220_p1 = scmp.ne.s32.totalorder %s7872_s29, %s7868_s28 }
   0x9   : > { %p221_p2 = scmp.eq.s32.totalorder %s7012_s11, 1  ;;  %p226_p3 = scmp.ne.s32.totalorder %s7868_s28, %s7864_s27 }
   0xa   : > { %s14544_s13 = smov (%p39_p0, %s37_s13), 0  ;;  %p227_p5 = scmp.eq.s32.totalorder %s7013_s12, 1 }
   0xb   : > { %p7978_p4 = por %p221_p2, %p220_p1  ;;  %s205_s16 = ssub.s32 %s7880_s9, %s14544_s13 }
   0xc   : > { %p7016_p6 = scmp.ge.s32.totalorder %s7884_s10, 1  ;;  %p208_p7 = scmp.eq.s32.totalorder %s205_s16, 0 }
   0xd   : > { %p7985_p8 = por %p227_p5, %p226_p3  ;;  %p309_p9 = scmp.lt.s32.totalorder %s7884_s10, 3 }
   0xe   : > { %s7991_s18 = scalar_select %p208_p7, %s7872_s29, %s210_s14  }
   0xf   : > { %p310_p10 = pnand %p7016_p6, %p309_p9 }
  0x11   : > { %313 = sbr.rel (%p310_p10) target bundleno = 2563 (0xa03), region = 48 }
  0x18   : > { %v391_v0 = vld [vmem:[%s12881_s3] sm:$0xff]  ;;  %v392_v1 = vld [vmem:[%s12881_s3 + $0x8] sm:$0xff]  ;;  %v7886_v3 = vmov 0.0|0.0   ;;  %vm7887_vm0 = vmmov 0   ;;  %v7888_v6 = vmov 0.0   ;;  %p358_p11 = scmp.lt.s32.totalorder %s7876_s30, 1  ;;  %v12887_v36 = vlaneseq }
  0x19   : > { %v587_v2 = vld [vmem:[%s12882_s4] sm:$0xff]  ;;  %7161 = vmatprep.subr.bf16.mxu1 %v7886_v3  ;;  %v7157_v4 = vpack.c.bf16 %v392_v1, %v391_v0  ;;  %v588_v5 = vld [vmem:[%s12882_s4 + $0x8] sm:$0xff]  ;;  %7119 = vmatprep.mubr.msk.f32.mxu1 %vm7887_vm0, %v7888_v6  ;;  %vm13011_vm1 = vcmask 130048   ;;  %v7889_v34 = vmov 1966171168   ;;  %vm1150_vm2 = vcmask 261120  }
  0x1a   : > { %v7162_v7 = vpack.c.bf16 %v588_v5, %v587_v2  ;;  %s359_s11 = scalar_select %p358_p11, %s7876_s30, 1  ;;  %v672_v35 = vunpack.c.l.s4 %v7889_v34  ;;  %v8068_v38 = vshrl.u32 %v12887_v36, 7  ;;  %v7038_v39 = vld [vmem:[%s12883_s5] ss:$0 sm:$0xff]  ;;  %vm1674_vm3 = vcmask 130112  }
  0x1b   : > { %7158 = vmatprep.subr.bf16.mxu0 %v7157_v4  ;;  %vm1681_vm4 = vcmask 195712   ;;  %vm1688_vm5 = vcmask 261312   ;;  %vm1695_vm6 = vcmask 326912   ;;  %vm13183_vm7 = vcmask 392512   ;;  %s12780_s21 = sand.u32 1, %s7868_s28   ;;  %s13323_s24 = sshll.u32 %s7876_s30, 7 }
  0x1c   : > { %7163 = vmatpush3.bf16.msra.mxu1 %v7162_v7  ;;  %7160 = vmatpush3.bf16.msra.mxu0 %v7157_v4  ;;  %s7048_s12 = sshll.u32 %s359_s11, 7  ;;  %s7021_s14 = sshll.u32 %s359_s11, 3  ;;  %v673_v37 = vunpack.c.0.s8 %v672_v35  ;;  %v8085_v47 = vsub.s32 0, %v8068_v38  ;;  %vm13185_vm8 = vcmask 458112   ;;  %vm13184_vm9 = vcmask 523712  }
  0x1d   : > { %7164 = vmatprep.subr.bf16.mxu0 %v7886_v3  ;;  %s8014_s20 = scalar_lea.vmem %s12878_s0, %s7048_s12  ;;  %s369_s23 = scalar_lea.vmem %s12879_s1, %s7021_s14  ;;  %vm13021_vm10 = vcmask 589312   ;;  %vm13013_vm11 = vcmask 654912   ;;  %vm13012_vm12 = vcmask 720512   ;;  %vm13014_vm13 = vcmask 786112  }
  0x1e   : > { %v373_v8 = vld [vmem:[%s8014_s20] sm:$0xff]  ;;  %v374_v9 = vld [vmem:[%s8014_s20 + $0x8] sm:$0xff]  ;;  %v375_v12 = vld [vmem:[%s8014_s20 + $0x10] sm:$0xff]  ;;  %s8029_s26 = scalar_lea.vmem %s12880_s2, %s359_s11  ;;  %v8074_v40 = vsub.s32 %v673_v37, %v8068_v38  ;;  %13326 = vst [vmem:[#allocation8_spill] sm:$0xff] %v8085_v47  ;;  %vm1751_vm14 = vcmask 851712   ;;  %vm1758_vm15 = vcmask 917312   ;;  %s12802_s11 = scalar_lea.hbm %s12886_s8, %s13323_s24 }
  0x1f   : > { %v389_v10 = vld [vmem:[%s369_s23] sm:$0xff]  ;;  %7091 = vmatprep.mubr.msk.f32.mxu0 %vm13011_vm1, %v373_v8  ;;  %v7165_v11 = vpack.c.bf16 %v374_v9, %v373_v8  ;;  %v376_v13 = vld [vmem:[%s8014_s20 + $0x18] sm:$0xff]  ;;  %v378_v17 = vld [vmem:[%s8014_s20 + $0x28] sm:$0xff]  ;;  %s13322_s22 = sshll.u32 %s12780_s21, 3  ;;  %s6859_s14 = scalar_lea.sflag [#allocation5], %s12780_s21 }
  0x20   : > { %7120 = vmatmul.mubr.msk.f32.vlgmr.msra.gmra.mrb[0].mxu1 %vm13011_vm1, %v389_v10  ;;  %7092 = vmatmul.mubr.msk.f32.vlgmr.msra.gmra.mrb[0].mxu0 %vm13011_vm1, %v374_v9  ;;  %v7168_v14 = vpack.c.bf16 %v376_v13, %v375_v12  ;;  %v377_v15 = vld [vmem:[%s8014_s20 + $0x20] sm:$0xff]  ;;  %v379_v19 = vld [vmem:[%s8014_s20 + $0x30] sm:$0xff]  ;;  %v380_v20 = vld [vmem:[%s8014_s20 + $0x38] sm:$0xff]  ;;  %s357_s23 = scalar_lea.vmem [#allocation4], %s13322_s22  ;;  %s7891_s19 = smov [#allocation4]  }
  0x21   : > { %7094 = vmatprep.mubr.msk.f32.mxu0 %vm13011_vm1, %v375_v12  ;;  %7166 = vmatpush3.bf16.msra.mxu0 %v7165_v11  ;;  %v7041_v16 = vld [vmem:[%s8029_s26] ss:$0 sm:$0xff]  ;;  %v7171_v18 = vpack.c.bf16 %v378_v17, %v377_v15  ;;  %v7174_v21 = vpack.c.bf16 %v380_v20, %v379_v19  ;;  %v382_v23 = vld [vmem:[%s8014_s20 + $0x48] sm:$0xff]  ;;  %v383_v25 = vld [vmem:[%s8014_s20 + $0x50] sm:$0xff]  ;;  %s6887_s12 = sshll.u32 %s357_s23, 4  ;;  %s6888_s12 = int_to_ptr.vmem [resolvable:$true] %s6887_s12 }
  0x22   : > { %7167 = vmatprep.subr.bf16.mxu0 %v7886_v3  ;;  %4099 = vbcast.lane.b32.xlu1 %v7041_v16, 256  ;;  %v381_v22 = vld [vmem:[%s8014_s20 + $0x40] sm:$0xff]  ;;  %v384_v26 = vld [vmem:[%s8014_s20 + $0x58] sm:$0xff]  ;;  %v386_v29 = vld [vmem:[%s8014_s20 + $0x68] sm:$0xff]  ;;  %s7774_s16 = scalar_lea.vmem %s6888_s12, 128 }
  0x23   : > { %v7177_v24 = vpack.c.bf16 %v382_v23, %v381_v22  ;;  %v7180_v27 = vpack.c.bf16 %v384_v26, %v383_v25  ;;  %v385_v28 = vld [vmem:[%s8014_s20 + $0x60] sm:$0xff]  ;;  %v387_v31 = vld [vmem:[%s8014_s20 + $0x70] sm:$0xff]  ;;  %v388_v32 = vld [vmem:[%s8014_s20 + $0x78] sm:$0xff]  ;;  %p7775_p12 = scmp.ne.s32.totalorder %s6888_s12, %s7774_s16  ;;  %s7778_s20 = sshll.u32 %s7891_s19, 4  ;;  %s7779_s20 = int_to_ptr.vmem [resolvable:$false] %s7778_s20 }
  0x24   : > { %7095 = vmatmul.mubr.msk.f32.gmra.mrb[2].mxu0 %vm13011_vm1, %v376_v13  ;;  %v7183_v30 = vpack.c.bf16 %v386_v29, %v385_v28  ;;  %v7186_v33 = vpack.c.bf16 %v388_v32, %v387_v31  ;;  %s7780_s22 = scalar_lea.vmem %s7779_s20, 256  ;;  %p7781_p1 = scmp.lt.s32.totalorder %s6888_s12, %s7779_s20 }
  0x25   : > { %7097 = vmatprep.mubr.msk.f32.mxu0 %vm13011_vm1, %v377_v15  ;;  %7169 = vmatpush3.bf16.msra.mxu0 %v7168_v14  ;;  %p7776_p13 = pnand %p7775_p12, %p7978_p4  ;;  %p7782_p2 = scmp.lt.s32.totalorder %s7780_s22, %s7774_s16 }
  0x26   : > { %7170 = vmatprep.subr.bf16.mxu0 %v7886_v3  ;;  %4103 = vbcast.lane.b32.xlu1 %v7041_v16, 264 }
  0x27   : > { %p7777_p0 = pneg %p7776_p13  ;;  %p7783_p3 = por %p7782_p2, %p7781_p1 }
  0x28   : > { %7098 = vmatmul.mubr.msk.f32.gmra.mrb[4].mxu0 %vm13011_vm1, %v378_v17 }
  0x29   : > { %7100 = vmatprep.mubr.msk.f32.mxu0 %vm13011_vm1, %v379_v19  ;;  %7172 = vmatpush3.bf16.msra.mxu0 %v7171_v18  ;;  %p7784_p5 = pnand %p7783_p3, %p7777_p0 }
  0x2a   : > { %7173 = vmatprep.subr.bf16.mxu0 %v7886_v3  ;;  %4107 = vbcast.lane.b32.xlu1 %v7041_v16, 272 }
  0x2c   : > { %7101 = vmatmul.mubr.msk.f32.gmra.mrb[6].mxu0 %vm13011_vm1, %v380_v20 }
  0x2d   : > { %7103 = vmatprep.mubr.msk.f32.mxu0 %vm13011_vm1, %v381_v22  ;;  %7175 = vmatpush3.bf16.msra.mxu0 %v7174_v21 }
  0x2e   : > { %7176 = vmatprep.subr.bf16.mxu0 %v7886_v3 }
  0x30   : > { %7104 = vmatmul.mubr.msk.f32.gmra.mrb[8].mxu0 %vm13011_vm1, %v382_v23 }
  0x31   : > { %7106 = vmatprep.mubr.msk.f32.mxu0 %vm13011_vm1, %v383_v25  ;;  %7178 = vmatpush3.bf16.msra.mxu0 %v7177_v24 }
  0x32   : > { %7179 = vmatprep.subr.bf16.mxu0 %v7886_v3 }
  0x34   : > { %7107 = vmatmul.mubr.msk.f32.gmra.mrb[10].mxu0 %vm13011_vm1, %v384_v26 }
  0x35   : > { %7109 = vmatprep.mubr.msk.f32.mxu0 %vm13011_vm1, %v385_v28  ;;  %7181 = vmatpush3.bf16.msra.mxu0 %v7180_v27 }
  0x36   : > { %7182 = vmatprep.subr.bf16.mxu0 %v7886_v3 }
  0x38   : > { %7110 = vmatmul.mubr.msk.f32.gmra.mrb[12].mxu0 %vm13011_vm1, %v386_v29 }
  0x39   : > { %7112 = vmatprep.mubr.msk.f32.mxu0 %vm13011_vm1, %v387_v31  ;;  %7184 = vmatpush3.bf16.msra.mxu0 %v7183_v30 }
  0x3a   : > { %7185 = vmatprep.subr.bf16.mxu0 %v7886_v3 }
  0x3c   : > { %7113 = vmatmul.mubr.msk.f32.gmra.mrb[14].mxu0 %vm13011_vm1, %v388_v32  ;;  %vm13022_vm1 = vcmask 1041409  }
  0x3d   : > { %7187 = vmatpush3.bf16.msra.mxu0 %v7186_v33  ;;  %7154 = vmatprep.mubr.msk.f32.mxu0 %vm7887_vm0, %v7888_v6  ;;  %v8133_v6 = vld [vmem:[%s12884_s6] ss:$0 sm:$0xff]  ;;  %vm1765_vm0 = vcmask 982912  }
  0xf3   : > { %v665_v41 = vpop.f32.mrb[0].mxu1  ;;  %v8078_v44 = vpop.f32.mrb[0].mxu0 }
  0xf4   : > { %v8076_v42 = vadd.f32 %v7038_v39, %v665_v41  ;;  %v7121_v43 = vpop.f32.mrb[1].mxu1  ;;  %v8080_v45 = vpop.f32.mrb[1].mxu0 }
  0xf6   : > { %v677_v46 = vrot.slane %v8076_v42, %v8074_v40  ;;  %v670_v13 = vcombine.high %v8076_v42, %v8076_v42 }
  0xf7   : > { %v8088_v50 = vpop.f32.mrb[2].mxu0 }
  0xf8   : > { %v685_v48 = vcombine.high %v677_v46, %v677_v46  ;;  %v693_v49 = vrot.slane %v677_v46, %v8074_v40  ;;  %v8090_v51 = vpop.f32.mrb[3].mxu0  ;;  %v8163_v29 = vrot.slane %v670_v13, %v8074_v40 }
  0xfa   : > { %v8093_v52 = vrot.slane %v685_v48, %v8074_v40  ;;  %v8096_v53 = vrot.slane %v693_v49, %v8085_v47  ;;  %v715_v5 = vcombine.high %v693_v49, %v693_v49  ;;  %v8179_v43 = vrot.slane %v8163_v29, %v8074_v40 }
  0xfb   : > { %v8098_v54 = vpop.f32.mrb[4].mxu0 }
  0xfc   : > { %v8100_v55 = vpop.f32.mrb[5].mxu0  ;;  %v759_v56 = vadd.f32 %v8096_v53, %v8080_v45  ;;  %v761_v57 = vadd.f32 %v8096_v53, %v8090_v51  ;;  %v8108_v58 = vrot.slane %v8093_v52, %v8085_v47  ;;  %v760_v59 = vadd.f32 %v8078_v44, %v8096_v53 }
  0xfd   : > { %v762_v60 = vadd.f32 %v8088_v50, %v8096_v53  ;;  %v764_v61 = vadd.f32 %v8098_v54, %v8096_v53  ;;  %v763_v63 = vadd.f32 %v8096_v53, %v8100_v55  ;;  %v8147_v16 = vrot.slane %v715_v5, %v8085_v47 }
  0xfe   : > { %7255 = vtanh.f32 %v759_v56  ;;  %v775_v1 = vadd.f32 %v8108_v58, %v8080_v45  ;;  %v776_v3 = vadd.f32 %v8078_v44, %v8108_v58  ;;  %v777_v7 = vadd.f32 %v8108_v58, %v8090_v51 }
  0xff   : > { %v8116_v62 = vpop.f32.mrb[6].mxu0  ;;  %7257 = vtanh.f32 %v761_v57  ;;  %v778_v9 = vadd.f32 %v8088_v50, %v8108_v58  ;;  %v779_v18 = vadd.f32 %v8108_v58, %v8100_v55  ;;  %v780_v23 = vadd.f32 %v8098_v54, %v8108_v58 }
 0x100   : > { %v8120_v0 = vpop.f32.mrb[7].mxu0  ;;  %7259 = vtanh.f32 %v760_v59  ;;  %v791_v30 = vadd.f32 %v8147_v16, %v8080_v45  ;;  %v792_v34 = vadd.f32 %v8078_v44, %v8147_v16  ;;  %v793_v46 = vadd.f32 %v8147_v16, %v8090_v51 }
 0x101   : > { %7261 = vtanh.f32 %v762_v60  ;;  %v794_v56 = vadd.f32 %v8088_v50, %v8147_v16 }
 0x102   : > { %7263 = vtanh.f32 %v764_v61 }
 0x103   : > { %v8124_v2 = vpop.f32.mrb[8].mxu0  ;;  %7265 = vtanh.f32 %v763_v63  ;;  %v8191_v63 = vrot.slane %v8179_v43, %v8085_v47 }
 0x104   : > { %v8128_v4 = vpop.f32.mrb[9].mxu0  ;;  %7267 = vtanh.f32 %v775_v1  ;;  %v795_v1 = vadd.f32 %v8147_v16, %v8100_v55 }
 0x105   : > { %7269 = vtanh.f32 %v776_v3 }
 0x106   : > { %7271 = vtanh.f32 %v777_v7  ;;  %v796_v7 = vadd.f32 %v8098_v54, %v8147_v16 }
 0x107   : > { %v8137_v8 = vpop.f32.mrb[10].mxu0  ;;  %7273 = vtanh.f32 %v778_v9 }
 0x108   : > { %v7256_v10 = vpop.eup %7255  ;;  %v8141_v11 = vpop.f32.mrb[11].mxu0  ;;  %7275 = vtanh.f32 %v779_v18  ;;  %v824_v18 = vadd.f32 %v8078_v44, %v8191_v63 }
 0x109   : > { %v7258_v12 = vpop.eup %7257  ;;  %v1022_v14 = vmul.f32 %v7256_v10, %v8133_v6  ;;  %7277 = vtanh.f32 %v780_v23 }
 0x10a   : > { %v7260_v15 = vpop.eup %7259  ;;  %v1024_v17 = vmul.f32 %v7258_v12, %v8133_v6  ;;  %7279 = vtanh.f32 %v791_v30  ;;  %v826_v30 = vadd.f32 %v8088_v50, %v8191_v63 }
 0x10b   : > { %v7262_v19 = vpop.eup %7261  ;;  %v1151_v20 = vsel %vm1150_vm2, %v1022_v14, 0.0  ;;  %v8153_v21 = vpop.f32.mrb[12].mxu0  ;;  %v1023_v22 = vmul.f32 %v7260_v15, %v8133_v6  ;;  %7281 = vtanh.f32 %v792_v34  ;;  %v823_v14 = vadd.f32 %v8191_v63, %v8080_v45 }
 0x10c   : > { %v7264_v24 = vpop.eup %7263  ;;  %1152 = vadd.xlane.f32.xlu0 %v1151_v20  ;;  %v1157_v25 = vsel %vm1150_vm2, %v1024_v17, 0.0  ;;  %v8159_v26 = vpop.f32.mrb[13].mxu0  ;;  %v1025_v27 = vmul.f32 %v7262_v19, %v8133_v6  ;;  %7283 = vtanh.f32 %v793_v46  ;;  %v828_v46 = vadd.f32 %v8098_v54, %v8191_v63 }
 0x10d   : > { %v7266_v28 = vpop.eup %7265  ;;  %1158 = vadd.xlane.f32.xlu1 %v1157_v25  ;;  %v1154_v31 = vsel %vm1150_vm2, %v1023_v22, 0.0  ;;  %v1027_v41 = vmul.f32 %v7264_v24, %v8133_v6  ;;  %7285 = vtanh.f32 %v794_v56  ;;  %v717_v24 = vcombine.high %v8093_v52, %v8093_v52 }
 0x10e   : > { %v1026_v33 = vmul.f32 %v7266_v28, %v8133_v6  ;;  %v7268_v35 = vpop.eup %7267  ;;  %v1160_v37 = vsel %vm1150_vm2, %v1025_v27, 0.0  ;;  %7287 = vtanh.f32 %v795_v1  ;;  %v825_v25 = vadd.f32 %v8191_v63, %v8090_v51 }
 0x10f   : > { %v8168_v32 = vpop.f32.mrb[14].mxu0  ;;  %v7270_v42 = vpop.eup %7269  ;;  %v1038_v49 = vmul.f32 %v7268_v35, %v8133_v6  ;;  %v1166_v59 = vsel %vm1150_vm2, %v1027_v41, 0.0  ;;  %7289 = vtanh.f32 %v796_v7  ;;  %v8220_v52 = vrot.slane %v717_v24, %v8085_v47 }
 0x110   : > { %1155 = vadd.xlane.f32.xlu0 %v1154_v31  ;;  %v8174_v39 = vpop.f32.mrb[15].mxu0  ;;  %v1163_v48 = vsel %vm1150_vm2, %v1026_v33, 0.0  ;;  %v7272_v57 = vpop.eup %7271  ;;  %v1039_v60 = vmul.f32 %v7270_v42, %v8133_v6  ;;  %7291 = vtanh.f32 %v823_v14 }
 0x111   : > { %1161 = vadd.xlane.f32.xlu1 %v1160_v37  ;;  %v7274_v61 = vpop.eup %7273  ;;  %v1199_v3 = vsel %vm1150_vm2, %v1038_v49, 0.0  ;;  %v1040_v5 = vmul.f32 %v7272_v57, %v8133_v6  ;;  %7293 = vtanh.f32 %v824_v18  ;;  %v827_v37 = vadd.f32 %v8191_v63, %v8100_v55 }
 0x112   : > { %v7276_v9 = vpop.eup %7275  ;;  %v1202_v10 = vsel %vm1150_vm2, %v1039_v60, 0.0  ;;  %v1041_v12 = vmul.f32 %v7274_v61, %v8133_v6  ;;  %7295 = vtanh.f32 %v825_v25  ;;  %v807_v60 = vadd.f32 %v8220_v52, %v8080_v45 }
 0x113   : > { %v7278_v13 = vpop.eup %7277  ;;  %v1205_v15 = vsel %vm1150_vm2, %v1040_v5, 0.0  ;;  %v1042_v17 = vmul.f32 %v7276_v9, %v8133_v6  ;;  %7297 = vtanh.f32 %v826_v30  ;;  %v812_v25 = vadd.f32 %v8098_v54, %v8220_v52 }
 0x114   : > { %1164 = vadd.xlane.f32.xlu0 %v1163_v48  ;;  %v7280_v19 = vpop.eup %7279  ;;  %v1208_v20 = vsel %vm1150_vm2, %v1041_v12, 0.0  ;;  %v1043_v22 = vmul.f32 %v7278_v13, %v8133_v6  ;;  %7299 = vtanh.f32 %v827_v37  ;;  %v809_v12 = vadd.f32 %v8220_v52, %v8090_v51 }
 0x115   : > { %1167 = vadd.xlane.f32.xlu1 %v1166_v59  ;;  %v7282_v23 = vpop.eup %7281  ;;  %v1211_v27 = vsel %vm1150_vm2, %v1042_v17, 0.0  ;;  %v1054_v28 = vmul.f32 %v7280_v19, %v8133_v6  ;;  %v686_v59 = vcombine.high %v8163_v29, %v8163_v29  ;;  %7301 = vtanh.f32 %v828_v46 }
 0x116   : > { %v7284_v31 = vpop.eup %7283  ;;  %v1214_v33 = vsel %vm1150_vm2, %v1043_v22, 0.0  ;;  %v1055_v34 = vmul.f32 %v7282_v23, %v8133_v6  ;;  %7303 = vtanh.f32 %v807_v60  ;;  %v811_v22 = vadd.f32 %v8220_v52, %v8100_v55 }
 0x117   : > { %v7286_v35 = vpop.eup %7285  ;;  %v1247_v41 = vsel %vm1150_vm2, %v1054_v28, 0.0  ;;  %v1056_v42 = vmul.f32 %v7284_v31, %v8133_v6  ;;  %v8241_v29 = vrot.slane %v686_v59, %v8074_v40 }
 0x118   : > { %1200 = vadd.xlane.f32.xlu0 %v1199_v3  ;;  %v7288_v48 = vpop.eup %7287  ;;  %v1250_v49 = vsel %vm1150_vm2, %v1055_v34, 0.0  ;;  %v1057_v56 = vmul.f32 %v7286_v35, %v8133_v6  ;;  %v808_v3 = vadd.f32 %v8078_v44, %v8220_v52 }
 0x119   : > { %1203 = vadd.xlane.f32.xlu1 %v1202_v10  ;;  %v7290_v57 = vpop.eup %7289  ;;  %v1253_v61 = vsel %vm1150_vm2, %v1056_v42, 0.0  ;;  %v1058_v1 = vmul.f32 %v7288_v48, %v8133_v6 }
 0x11a   : > { %v7292_v5 = vpop.eup %7291  ;;  %v1256_v7 = vsel %vm1150_vm2, %v1057_v56, 0.0  ;;  %v1059_v9 = vmul.f32 %v7290_v57, %v8133_v6  ;;  %7305 = vtanh.f32 %v808_v3 }
 0x11b   : > { %v7294_v10 = vpop.eup %7293  ;;  %v1259_v13 = vsel %vm1150_vm2, %v1058_v1, 0.0  ;;  %v1086_v14 = vmul.f32 %v7292_v5, %v8133_v6  ;;  %7307 = vtanh.f32 %v809_v12 }
 0x11c   : > { %1206 = vadd.xlane.f32.xlu0 %v1205_v15  ;;  %v810_v15 = vadd.f32 %v8088_v50, %v8220_v52  ;;  %v7296_v17 = vpop.eup %7295  ;;  %v1262_v18 = vsel %vm1150_vm2, %v1059_v9, 0.0  ;;  %v1087_v19 = vmul.f32 %v7294_v10, %v8133_v6 }
 0x11d   : > { %1209 = vadd.xlane.f32.xlu1 %v1208_v20  ;;  %v7298_v40 = vpop.eup %7297  ;;  %v8253_v20 = vrot.slane %v8241_v29, %v8085_v47  ;;  %v1343_v23 = vsel %vm1150_vm2, %v1086_v14, 0.0  ;;  %v1088_v24 = vmul.f32 %v7296_v17, %v8133_v6 }
 0x11e   : > { %7309 = vtanh.f32 %v810_v15  ;;  %v1346_v28 = vsel %vm1150_vm2, %v1087_v19, 0.0  ;;  %v1089_v30 = vmul.f32 %v7298_v40, %v8133_v6 }
 0x11f   : > { %7311 = vtanh.f32 %v811_v22  ;;  %v1349_v34 = vsel %vm1150_vm2, %v1088_v24, 0.0  ;;  %v840_v37 = vadd.f32 %v8078_v44, %v8253_v20  ;;  %v841_v56 = vadd.f32 %v8253_v20, %v8090_v51 }
 0x120   : > { %1212 = vadd.xlane.f32.xlu0 %v1211_v27  ;;  %v7300_v27 = vpop.eup %7299  ;;  %7313 = vtanh.f32 %v812_v25  ;;  %v1352_v42 = vsel %vm1150_vm2, %v1089_v30, 0.0  ;;  %v842_v60 = vadd.f32 %v8088_v50, %v8253_v20  ;;  %v844_v12 = vadd.f32 %v8098_v54, %v8253_v20 }
 0x121   : > { %1215 = vadd.xlane.f32.xlu1 %v1214_v33  ;;  %v7302_v31 = vpop.eup %7301  ;;  %v839_v33 = vadd.f32 %v8253_v20, %v8080_v45  ;;  %v1090_v35 = vmul.f32 %v7300_v27, %v8133_v6 }
 0x122   : > { %v1091_v46 = vmul.f32 %v7302_v31, %v8133_v6 }
 0x123   : > { %7315 = vtanh.f32 %v839_v33  ;;  %v1355_v57 = vsel %vm1150_vm2, %v1090_v35, 0.0 }
 0x124   : > { %1248 = vadd.xlane.f32.xlu0 %v1247_v41  ;;  %v7304_v41 = vpop.eup %7303  ;;  %7317 = vtanh.f32 %v840_v37  ;;  %v1358_v1 = vsel %vm1150_vm2, %v1091_v46, 0.0 }
 0x125   : > { %1251 = vadd.xlane.f32.xlu1 %v1250_v49  ;;  %v7306_v48 = vpop.eup %7305  ;;  %v716_v49 = vcombine.high %v8179_v43, %v8179_v43  ;;  %v1070_v59 = vmul.f32 %v7304_v41, %v8133_v6  ;;  %7319 = vtanh.f32 %v841_v56 }
 0x126   : > { %v1071_v3 = vmul.f32 %v7306_v48, %v8133_v6  ;;  %7321 = vtanh.f32 %v842_v60 }
 0x127   : > { %v8282_v43 = vrot.slane %v716_v49, %v8085_v47  ;;  %v1295_v9 = vsel %vm1150_vm2, %v1070_v59, 0.0 }
 0x128   : > { %1254 = vadd.xlane.f32.xlu0 %v1253_v61  ;;  %v7308_v61 = vpop.eup %7307  ;;  %v1298_v14 = vsel %vm1150_vm2, %v1071_v3, 0.0 }
 0x129   : > { %1257 = vadd.xlane.f32.xlu1 %v1256_v7  ;;  %v7310_v5 = vpop.eup %7309  ;;  %v843_v7 = vadd.f32 %v8253_v20, %v8100_v55  ;;  %v1072_v10 = vmul.f32 %v7308_v61, %v8133_v6  ;;  %v856_v22 = vadd.f32 %v8078_v44, %v8282_v43  ;;  %v858_v33 = vadd.f32 %v8088_v50, %v8282_v43 }
 0x12a   : > { %v1073_v15 = vmul.f32 %v7310_v5, %v8133_v6  ;;  %v860_v49 = vadd.f32 %v8098_v54, %v8282_v43  ;;  %v765_v61 = vadd.f32 %v8096_v53, %v8120_v0  ;;  %v766_v5 = vadd.f32 %v8116_v62, %v8096_v53 }
 0x12b   : > { %7323 = vtanh.f32 %v843_v7  ;;  %v1301_v19 = vsel %vm1150_vm2, %v1072_v10, 0.0 }
 0x12c   : > { %1260 = vadd.xlane.f32.xlu0 %v1259_v13  ;;  %v7312_v13 = vpop.eup %7311  ;;  %7325 = vtanh.f32 %v844_v12  ;;  %v1304_v24 = vsel %vm1150_vm2, %v1073_v15, 0.0 }
 0x12d   : > { %1263 = vadd.xlane.f32.xlu1 %v1262_v18  ;;  %v7314_v17 = vpop.eup %7313  ;;  %v855_v18 = vadd.f32 %v8282_v43, %v8080_v45  ;;  %v1074_v40 = vmul.f32 %v7312_v13, %v8133_v6  ;;  %v781_v13 = vadd.f32 %v8108_v58, %v8120_v0 }
 0x12e   : > { %v1075_v25 = vmul.f32 %v7314_v17, %v8133_v6  ;;  %v782_v17 = vadd.f32 %v8116_v62, %v8108_v58 }
 0x12f   : > { %7327 = vtanh.f32 %v855_v18  ;;  %v1307_v30 = vsel %vm1150_vm2, %v1074_v40, 0.0 }
 0x130   : > { %1344 = vadd.xlane.f32.xlu0 %v1343_v23  ;;  %v7316_v23 = vpop.eup %7315  ;;  %7329 = vtanh.f32 %v856_v22  ;;  %v1310_v35 = vsel %vm1150_vm2, %v1075_v25, 0.0 }
 0x131   : > { %1347 = vadd.xlane.f32.xlu1 %v1346_v28  ;;  %v7318_v27 = vpop.eup %7317  ;;  %v857_v28 = vadd.f32 %v8282_v43, %v8090_v51  ;;  %v1102_v31 = vmul.f32 %v7316_v23, %v8133_v6  ;;  %v797_v23 = vadd.f32 %v8147_v16, %v8120_v0 }
 0x132   : > { %v1103_v37 = vmul.f32 %v7318_v27, %v8133_v6  ;;  %v798_v27 = vadd.f32 %v8116_v62, %v8147_v16 }
 0x133   : > { %7331 = vtanh.f32 %v857_v28  ;;  %v1391_v46 = vsel %vm1150_vm2, %v1102_v31, 0.0 }
 0x134   : > { %1350 = vadd.xlane.f32.xlu0 %v1349_v34  ;;  %v7320_v34 = vpop.eup %7319  ;;  %7333 = vtanh.f32 %v858_v33 }
 0x135   : > { %1353 = vadd.xlane.f32.xlu1 %v1352_v42  ;;  %v7322_v41 = vpop.eup %7321  ;;  %v859_v42 = vadd.f32 %v8282_v43, %v8100_v55  ;;  %v1104_v48 = vmul.f32 %v7320_v34, %v8133_v6  ;;  %v813_v34 = vadd.f32 %v8220_v52, %v8120_v0 }
 0x136   : > { %v7324_v56 = vpop.eup %7323  ;;  %v1105_v59 = vmul.f32 %v7322_v41, %v8133_v6  ;;  %v814_v41 = vadd.f32 %v8116_v62, %v8220_v52 }
 0x137   : > { %v7326_v60 = vpop.eup %7325  ;;  %7335 = vtanh.f32 %v859_v42  ;;  %v1106_v3 = vmul.f32 %v7324_v56, %v8133_v6  ;;  %v829_v56 = vadd.f32 %v8191_v63, %v8120_v0 }
 0x138   : > { %1356 = vadd.xlane.f32.xlu0 %v1355_v57  ;;  %v1394_v57 = vsel %vm1150_vm2, %v1103_v37, 0.0  ;;  %7337 = vtanh.f32 %v860_v49  ;;  %v1107_v10 = vmul.f32 %v7326_v60, %v8133_v6  ;;  %v830_v60 = vadd.f32 %v8116_v62, %v8191_v63 }
 0x139   : > { %1359 = vadd.xlane.f32.xlu1 %v1358_v1  ;;  %v1397_v1 = vsel %vm1150_vm2, %v1104_v48, 0.0  ;;  %v7328_v7 = vpop.eup %7327  ;;  %7339 = vtanh.f32 %v765_v61 }
 0x13a   : > { %v7330_v12 = vpop.eup %7329  ;;  %v1118_v15 = vmul.f32 %v7328_v7, %v8133_v6  ;;  %7341 = vtanh.f32 %v766_v5  ;;  %v718_v7 = vcombine.high %v8241_v29, %v8241_v29 }
 0x13b   : > { %v1119_v40 = vmul.f32 %v7330_v12, %v8133_v6  ;;  %7343 = vtanh.f32 %v781_v13  ;;  %v846_v13 = vadd.f32 %v8116_v62, %v8253_v20 }
 0x13c   : > { %1296 = vadd.xlane.f32.xlu0 %v1295_v9  ;;  %v1400_v9 = vsel %vm1150_vm2, %v1105_v59, 0.0  ;;  %7345 = vtanh.f32 %v782_v17  ;;  %v8367_v29 = vrot.slane %v718_v7, %v8085_v47 }
 0x13d   : > { %1299 = vadd.xlane.f32.xlu1 %v1298_v14  ;;  %v1403_v14 = vsel %vm1150_vm2, %v1106_v3, 0.0  ;;  %v7332_v18 = vpop.eup %7331  ;;  %7347 = vtanh.f32 %v797_v23  ;;  %v862_v23 = vadd.f32 %v8116_v62, %v8282_v43 }
 0x13e   : > { %v7334_v22 = vpop.eup %7333  ;;  %v1120_v25 = vmul.f32 %v7332_v18, %v8133_v6  ;;  %7349 = vtanh.f32 %v798_v27 }
 0x13f   : > { %v1121_v31 = vmul.f32 %v7334_v22, %v8133_v6  ;;  %7351 = vtanh.f32 %v813_v34  ;;  %v872_v34 = vadd.f32 %v8078_v44, %v8367_v29  ;;  %v874_v44 = vadd.f32 %v8088_v50, %v8367_v29 }
 0x140   : > { %1302 = vadd.xlane.f32.xlu0 %v1301_v19  ;;  %v1406_v19 = vsel %vm1150_vm2, %v1107_v10, 0.0  ;;  %7353 = vtanh.f32 %v814_v41  ;;  %v876_v50 = vadd.f32 %v8098_v54, %v8367_v29  ;;  %v878_v54 = vadd.f32 %v8116_v62, %v8367_v29 }
 0x141   : > { %1305 = vadd.xlane.f32.xlu1 %v1304_v24  ;;  %v1439_v24 = vsel %vm1150_vm2, %v1118_v15, 0.0  ;;  %v7336_v28 = vpop.eup %7335  ;;  %7355 = vtanh.f32 %v829_v56  ;;  %v768_v62 = vadd.f32 %v8124_v2, %v8096_v53 }
 0x142   : > { %v7338_v33 = vpop.eup %7337  ;;  %v1122_v37 = vmul.f32 %v7336_v28, %v8133_v6  ;;  %7357 = vtanh.f32 %v830_v60 }
 0x143   : > { %v7340_v42 = vpop.eup %7339  ;;  %v1123_v48 = vmul.f32 %v7338_v33, %v8133_v6 }
 0x144   : > { %1308 = vadd.xlane.f32.xlu0 %v1307_v30  ;;  %v1442_v30 = vsel %vm1150_vm2, %v1119_v40, 0.0  ;;  %v7342_v49 = vpop.eup %7341  ;;  %v1028_v59 = vmul.f32 %v7340_v42, %v8133_v6 }
 0x145   : > { %1311 = vadd.xlane.f32.xlu1 %v1310_v35  ;;  %v1445_v35 = vsel %vm1150_vm2, %v1120_v25, 0.0  ;;  %v7344_v61 = vpop.eup %7343  ;;  %v1029_v3 = vmul.f32 %v7342_v49, %v8133_v6 }
 0x146   : > { %v7346_v5 = vpop.eup %7345  ;;  %v1169_v10 = vsel %vm1150_vm2, %v1028_v59, 0.0  ;;  %v1044_v12 = vmul.f32 %v7344_v61, %v8133_v6 }
 0x147   : > { %v1172_v15 = vsel %vm1150_vm2, %v1029_v3, 0.0  ;;  %v1045_v17 = vmul.f32 %v7346_v5, %v8133_v6 }
 0x148   : > { %1392 = vadd.xlane.f32.xlu0 %v1391_v46  ;;  %v1448_v46 = vsel %vm1150_vm2, %v1121_v31, 0.0  ;;  %v1217_v40 = vsel %vm1150_vm2, %v1044_v12, 0.0 }
 0x149   : > { %1395 = vadd.xlane.f32.xlu1 %v1394_v57  ;;  %v1451_v57 = vsel %vm1150_vm2, %v1122_v37, 0.0  ;;  %v1220_v25 = vsel %vm1150_vm2, %v1045_v17, 0.0 }
 0x14c   : > { %1398 = vadd.xlane.f32.xlu0 %v1397_v1  ;;  %v1454_v1 = vsel %vm1150_vm2, %v1123_v48, 0.0 }
 0x14d   : > { %1401 = vadd.xlane.f32.xlu1 %v1400_v9  ;;  %v845_v9 = vadd.f32 %v8253_v20, %v8120_v0 }
 0x14f   : > { %7359 = vtanh.f32 %v845_v9 }
 0x150   : > { %1404 = vadd.xlane.f32.xlu0 %v1403_v14  ;;  %v7348_v14 = vpop.eup %7347  ;;  %7361 = vtanh.f32 %v846_v13 }
 0x151   : > { %1407 = vadd.xlane.f32.xlu1 %v1406_v19  ;;  %v7350_v18 = vpop.eup %7349  ;;  %v861_v19 = vadd.f32 %v8282_v43, %v8120_v0  ;;  %v1060_v22 = vmul.f32 %v7348_v14, %v8133_v6 }
 0x152   : > { %v1061_v27 = vmul.f32 %v7350_v18, %v8133_v6 }
 0x153   : > { %7363 = vtanh.f32 %v861_v19  ;;  %v1265_v31 = vsel %vm1150_vm2, %v1060_v22, 0.0 }
 0x154   : > { %1440 = vadd.xlane.f32.xlu0 %v1439_v24  ;;  %v7352_v24 = vpop.eup %7351  ;;  %7365 = vtanh.f32 %v862_v23  ;;  %v1268_v37 = vsel %vm1150_vm2, %v1061_v27, 0.0 }
 0x155   : > { %1443 = vadd.xlane.f32.xlu1 %v1442_v30  ;;  %v7354_v28 = vpop.eup %7353  ;;  %v871_v30 = vadd.f32 %v8367_v29, %v8080_v45  ;;  %v1076_v33 = vmul.f32 %v7352_v24, %v8133_v6  ;;  %v873_v45 = vadd.f32 %v8367_v29, %v8090_v51  ;;  %v875_v51 = vadd.f32 %v8367_v29, %v8100_v55 }
 0x156   : > { %v1077_v41 = vmul.f32 %v7354_v28, %v8133_v6  ;;  %v877_v55 = vadd.f32 %v8367_v29, %v8120_v0  ;;  %v767_v0 = vadd.f32 %v8096_v53, %v8128_v4  ;;  %v783_v24 = vadd.f32 %v8108_v58, %v8128_v4 }
 0x157   : > { %7367 = vtanh.f32 %v871_v30  ;;  %v784_v28 = vadd.f32 %v8124_v2, %v8108_v58 }
 0x158   : > { %1446 = vadd.xlane.f32.xlu0 %v1445_v35  ;;  %v7356_v35 = vpop.eup %7355  ;;  %7369 = vtanh.f32 %v872_v34  ;;  %v1316_v56 = vsel %vm1150_vm2, %v1077_v41, 0.0 }
 0x159   : > { %1449 = vadd.xlane.f32.xlu1 %v1448_v46  ;;  %v7358_v42 = vpop.eup %7357  ;;  %v1313_v46 = vsel %vm1150_vm2, %v1076_v33, 0.0  ;;  %v1092_v48 = vmul.f32 %v7356_v35, %v8133_v6  ;;  %7371 = vtanh.f32 %v873_v45  ;;  %v799_v35 = vadd.f32 %v8147_v16, %v8128_v4 }
 0x15a   : > { %v7360_v49 = vpop.eup %7359  ;;  %7373 = vtanh.f32 %v874_v44 }
 0x15b   : > { %v7362_v59 = vpop.eup %7361  ;;  %v1361_v60 = vsel %vm1150_vm2, %v1092_v48, 0.0  ;;  %v1108_v61 = vmul.f32 %v7360_v49, %v8133_v6  ;;  %7375 = vtanh.f32 %v875_v51  ;;  %v815_v49 = vadd.f32 %v8220_v52, %v8128_v4 }
 0x15c   : > { %1452 = vadd.xlane.f32.xlu0 %v1451_v57  ;;  %v1093_v57 = vmul.f32 %v7358_v42, %v8133_v6  ;;  %v1109_v5 = vmul.f32 %v7362_v59, %v8133_v6  ;;  %7377 = vtanh.f32 %v876_v50  ;;  %v800_v42 = vadd.f32 %v8124_v2, %v8147_v16 }
 0x15d   : > { %1455 = vadd.xlane.f32.xlu1 %v1454_v1  ;;  %v7364_v1 = vpop.eup %7363  ;;  %v1409_v9 = vsel %vm1150_vm2, %v1108_v61, 0.0  ;;  %7379 = vtanh.f32 %v877_v55  ;;  %v816_v59 = vadd.f32 %v8124_v2, %v8220_v52 }
 0x15e   : > { %v1364_v3 = vsel %vm1150_vm2, %v1093_v57, 0.0  ;;  %v7366_v7 = vpop.eup %7365  ;;  %v1412_v13 = vsel %vm1150_vm2, %v1109_v5, 0.0  ;;  %7381 = vtanh.f32 %v878_v54 }
 0x15f   : > { %v1125_v14 = vmul.f32 %v7366_v7, %v8133_v6  ;;  %7383 = vtanh.f32 %v767_v0  ;;  %v832_v7 = vadd.f32 %v8124_v2, %v8191_v63  ;;  %v848_v0 = vadd.f32 %v8124_v2, %v8253_v20 }
 0x160   : > { %1170 = vadd.xlane.f32.xlu0 %v1169_v10  ;;  %v1124_v10 = vmul.f32 %v7364_v1, %v8133_v6  ;;  %7385 = vtanh.f32 %v768_v62  ;;  %v831_v1 = vadd.f32 %v8191_v63, %v8128_v4 }
 0x161   : > { %1173 = vadd.xlane.f32.xlu1 %v1172_v15  ;;  %v7368_v12 = vpop.eup %7367  ;;  %7387 = vtanh.f32 %v783_v24  ;;  %v864_v24 = vadd.f32 %v8124_v2, %v8282_v43 }
 0x162   : > { %v7370_v15 = vpop.eup %7369  ;;  %v1457_v17 = vsel %vm1150_vm2, %v1124_v10, 0.0  ;;  %v1134_v18 = vmul.f32 %v7368_v12, %v8133_v6  ;;  %7389 = vtanh.f32 %v784_v28  ;;  %v8449_v12 = vpop.permute.xlu1 %4099 }
 0x163   : > { %v7372_v19 = vpop.eup %7371  ;;  %v1135_v22 = vmul.f32 %v7370_v15, %v8133_v6  ;;  %7391 = vtanh.f32 %v799_v35  ;;  %13327 = vst [vmem:[#allocation9_spill] sm:$0xff] %v8449_v12 }
 0x164   : > { %1218 = vadd.xlane.f32.xlu0 %v1217_v40  ;;  %v1460_v40 = vsel %vm1150_vm2, %v1125_v14, 0.0  ;;  %v7374_v23 = vpop.eup %7373  ;;  %v1136_v27 = vmul.f32 %v7372_v19, %v8133_v6  ;;  %7393 = vtanh.f32 %v800_v42 }
 0x165   : > { %1221 = vadd.xlane.f32.xlu1 %v1220_v25  ;;  %v1487_v25 = vsel %vm1150_vm2, %v1134_v18, 0.0  ;;  %v7376_v30 = vpop.eup %7375  ;;  %v1137_v33 = vmul.f32 %v7374_v23, %v8133_v6  ;;  %7395 = vtanh.f32 %v815_v49 }
 0x166   : > { %v7378_v34 = vpop.eup %7377  ;;  %v1138_v41 = vmul.f32 %v7376_v30, %v8133_v6  ;;  %7397 = vtanh.f32 %v816_v59 }
 0x167   : > { %v7380_v45 = vpop.eup %7379  ;;  %v1139_v48 = vmul.f32 %v7378_v34, %v8133_v6  ;;  %7399 = vtanh.f32 %v831_v1 }
 0x168   : > { %1266 = vadd.xlane.f32.xlu0 %v1265_v31  ;;  %v1490_v31 = vsel %vm1150_vm2, %v1135_v22, 0.0  ;;  %v7382_v44 = vpop.eup %7381  ;;  %v1140_v57 = vmul.f32 %v7380_v45, %v8133_v6  ;;  %7401 = vtanh.f32 %v832_v7 }
 0x169   : > { %1269 = vadd.xlane.f32.xlu1 %v1268_v37  ;;  %v1493_v37 = vsel %vm1150_vm2, %v1136_v27, 0.0  ;;  %v7384_v51 = vpop.eup %7383  ;;  %v1141_v61 = vmul.f32 %v7382_v44, %v8133_v6  ;;  %v8465_v27 = vpop.permute.xlu1 %4103 }
 0x16a   : > { %v7386_v50 = vpop.eup %7385  ;;  %v1030_v5 = vmul.f32 %v7384_v51, %v8133_v6  ;;  %13328 = vst [vmem:[#allocation10_spill] sm:$0xff] %v8465_v27 }
 0x16b   : > { %v7388_v55 = vpop.eup %7387  ;;  %v1031_v10 = vmul.f32 %v7386_v50, %v8133_v6  ;;  %v785_v50 = vadd.f32 %v8108_v58, %v8141_v11 }
 0x16c   : > { %1314 = vadd.xlane.f32.xlu0 %v1313_v46  ;;  %v1496_v46 = vsel %vm1150_vm2, %v1137_v33, 0.0  ;;  %v7390_v54 = vpop.eup %7389  ;;  %v1175_v14 = vsel %vm1150_vm2, %v1030_v5, 0.0  ;;  %v1046_v15 = vmul.f32 %v7388_v55, %v8133_v6  ;;  %v879_v33 = vadd.f32 %v8367_v29, %v8128_v4 }
 0x16d   : > { %1317 = vadd.xlane.f32.xlu1 %v1316_v56  ;;  %v1499_v56 = vsel %vm1150_vm2, %v1138_v41, 0.0  ;;  %v1178_v18 = vsel %vm1150_vm2, %v1031_v10, 0.0  ;;  %v1047_v62 = vmul.f32 %v7390_v54, %v8133_v6  ;;  %v786_v5 = vadd.f32 %v8137_v8, %v8108_v58 }
 0x16e   : > { %v1223_v22 = vsel %vm1150_vm2, %v1046_v15, 0.0 }
 0x16f   : > { %v1226_v28 = vsel %vm1150_vm2, %v1047_v62, 0.0 }
 0x170   : > { %1362 = vadd.xlane.f32.xlu0 %v1361_v60  ;;  %v1502_v60 = vsel %vm1150_vm2, %v1139_v48, 0.0  ;;  %v8477_v48 = vpop.permute.xlu1 %4107 }
 0x171   : > { %1365 = vadd.xlane.f32.xlu1 %v1364_v3  ;;  %v1505_v3 = vsel %vm1150_vm2, %v1140_v57, 0.0  ;;  %13329 = vst [vmem:[#allocation11_spill] sm:$0xff] %v8477_v48 }
 0x174   : > { %1410 = vadd.xlane.f32.xlu0 %v1409_v9  ;;  %v1508_v9 = vsel %vm1150_vm2, %v1141_v61, 0.0 }
 0x175   : > { %1413 = vadd.xlane.f32.xlu1 %v1412_v13  ;;  %v847_v13 = vadd.f32 %v8253_v20, %v8128_v4 }
 0x177   : > { %7403 = vtanh.f32 %v847_v13 }
 0x178   : > { %1458 = vadd.xlane.f32.xlu0 %v1457_v17  ;;  %v7392_v17 = vpop.eup %7391  ;;  %7405 = vtanh.f32 %v848_v0 }
 0x179   : > { %1461 = vadd.xlane.f32.xlu1 %v1460_v40  ;;  %v7394_v19 = vpop.eup %7393  ;;  %v863_v40 = vadd.f32 %v8282_v43, %v8128_v4  ;;  %v1062_v23 = vmul.f32 %v7392_v17, %v8133_v6  ;;  %v769_v4 = vadd.f32 %v8096_v53, %v8141_v11  ;;  %v802_v17 = vadd.f32 %v8137_v8, %v8147_v16 }
 0x17a   : > { %v1063_v30 = vmul.f32 %v7394_v19, %v8133_v6 }
 0x17b   : > { %7407 = vtanh.f32 %v863_v40  ;;  %v1271_v34 = vsel %vm1150_vm2, %v1062_v23, 0.0 }
 0x17c   : > { %1488 = vadd.xlane.f32.xlu0 %v1487_v25  ;;  %v7396_v25 = vpop.eup %7395  ;;  %7409 = vtanh.f32 %v864_v24  ;;  %v1274_v42 = vsel %vm1150_vm2, %v1063_v30, 0.0  ;;  %v817_v24 = vadd.f32 %v8220_v52, %v8141_v11  ;;  %v818_v30 = vadd.f32 %v8137_v8, %v8220_v52 }
 0x17d   : > { %1491 = vadd.xlane.f32.xlu1 %v1490_v31  ;;  %v7398_v31 = vpop.eup %7397  ;;  %v1078_v35 = vmul.f32 %v7396_v25, %v8133_v6  ;;  %7411 = vtanh.f32 %v879_v33 }
 0x17e   : > { %v7400_v41 = vpop.eup %7399  ;;  %v1079_v45 = vmul.f32 %v7398_v31, %v8133_v6 }
 0x17f   : > { %v1319_v44 = vsel %vm1150_vm2, %v1078_v35, 0.0  ;;  %v1094_v49 = vmul.f32 %v7400_v41, %v8133_v6 }
 0x180   : > { %1494 = vadd.xlane.f32.xlu0 %v1493_v37  ;;  %v880_v37 = vadd.f32 %v8124_v2, %v8367_v29  ;;  %v770_v2 = vadd.f32 %v8137_v8, %v8096_v53  ;;  %v1322_v57 = vsel %vm1150_vm2, %v1079_v45, 0.0 }
 0x181   : > { %1497 = vadd.xlane.f32.xlu1 %v1496_v46  ;;  %v7402_v46 = vpop.eup %7401  ;;  %v1367_v1 = vsel %vm1150_vm2, %v1094_v49, 0.0 }
 0x182   : > { %7413 = vtanh.f32 %v880_v37  ;;  %v1095_v59 = vmul.f32 %v7402_v46, %v8133_v6  ;;  %v8533_v46 = vld [vmem:[%s12884_s6] ss:$0 sm:$0xff] }
 0x183   : > { %7415 = vtanh.f32 %v769_v4 }
 0x184   : > { %1500 = vadd.xlane.f32.xlu0 %v1499_v56  ;;  %v7404_v56 = vpop.eup %7403  ;;  %7417 = vtanh.f32 %v770_v2  ;;  %v1370_v55 = vsel %vm1150_vm2, %v1095_v59, 0.0 }
 0x185   : > { %1503 = vadd.xlane.f32.xlu1 %v1502_v60  ;;  %v7406_v51 = vpop.eup %7405  ;;  %7419 = vtanh.f32 %v785_v50 }
 0x186   : > { %v7408_v7 = vpop.eup %7407  ;;  %7421 = vtanh.f32 %v786_v5 }
 0x187   : > { %v7410_v10 = vpop.eup %7409  ;;  %v1126_v0 = vmul.f32 %v7408_v7, %v8133_v6 }
 0x188   : > { %1506 = vadd.xlane.f32.xlu0 %v1505_v3  ;;  %v1110_v3 = vmul.f32 %v7404_v56, %v8133_v6  ;;  %v1127_v19 = vmul.f32 %v7410_v10, %v8133_v6 }
 0x189   : > { %1509 = vadd.xlane.f32.xlu1 %v1508_v9  ;;  %v1111_v9 = vmul.f32 %v7406_v51, %v8133_v6  ;;  %v1463_v25 = vsel %vm1150_vm2, %v1126_v0, 0.0  ;;  %v849_v51 = vadd.f32 %v8253_v20, %v8141_v11 }
 0x18a   : > { %v1415_v15 = vsel %vm1150_vm2, %v1110_v3, 0.0  ;;  %v1466_v33 = vsel %vm1150_vm2, %v1127_v19, 0.0  ;;  %v850_v3 = vadd.f32 %v8137_v8, %v8253_v20 }
 0x18b   : > { %v1418_v62 = vsel %vm1150_vm2, %v1111_v9, 0.0 }
 0x18c   : > { %1176 = vadd.xlane.f32.xlu0 %v1175_v14  ;;  %v801_v14 = vadd.f32 %v8147_v16, %v8141_v11 }
 0x18d   : > { %1179 = vadd.xlane.f32.xlu1 %v1178_v18  ;;  %v7412_v18 = vpop.eup %7411 }
 0x18e   : > { %v7414_v40 = vpop.eup %7413  ;;  %7423 = vtanh.f32 %v801_v14 }
 0x18f   : > { %7425 = vtanh.f32 %v802_v17  ;;  %v7416_v31 = vpop.eup %7415 }
 0x190   : > { %1224 = vadd.xlane.f32.xlu0 %v1223_v22  ;;  %v7418_v35 = vpop.eup %7417  ;;  %7427 = vtanh.f32 %v817_v24  ;;  %v1032_v4 = vmul.f32 %v8533_v46, %v7416_v31 }
 0x191   : > { %1227 = vadd.xlane.f32.xlu1 %v1226_v28  ;;  %v1142_v28 = vmul.f32 %v7412_v18, %v8133_v6  ;;  %7429 = vtanh.f32 %v818_v30  ;;  %v1033_v2 = vmul.f32 %v8533_v46, %v7418_v35  ;;  %v866_v18 = vadd.f32 %v8137_v8, %v8282_v43 }
 0x192   : > { %v1181_v50 = vsel %vm1150_vm2, %v1032_v4, 0.0  ;;  %v881_v30 = vadd.f32 %v8367_v29, %v8141_v11 }
 0x193   : > { %v1511_v45 = vsel %vm1150_vm2, %v1142_v28, 0.0  ;;  %v1184_v7 = vsel %vm1150_vm2, %v1033_v2, 0.0  ;;  %v772_v2 = vadd.f32 %v8153_v21, %v8096_v53 }
 0x194   : > { %1272 = vadd.xlane.f32.xlu0 %v1271_v34  ;;  %v1143_v34 = vmul.f32 %v7414_v40, %v8133_v6  ;;  %v834_v6 = vadd.f32 %v8137_v8, %v8191_v63 }
 0x195   : > { %1275 = vadd.xlane.f32.xlu1 %v1274_v42  ;;  %v833_v42 = vadd.f32 %v8191_v63, %v8141_v11 }
 0x196   : > { %v1514_v49 = vsel %vm1150_vm2, %v1143_v34, 0.0  ;;  %v882_v34 = vadd.f32 %v8137_v8, %v8367_v29 }
 0x197   : > { %7431 = vtanh.f32 %v833_v42 }
 0x198   : > { %1320 = vadd.xlane.f32.xlu0 %v1319_v44  ;;  %v7420_v44 = vpop.eup %7419  ;;  %7433 = vtanh.f32 %v834_v6 }
 0x199   : > { %1323 = vadd.xlane.f32.xlu1 %v1322_v57  ;;  %v8487_v60 = vpop.xlane.xlu0 %1152  ;;  %v7422_v56 = vpop.eup %7421  ;;  %7435 = vtanh.f32 %v849_v51 }
 0x19a   : > { %13330 = vst [vmem:[#allocation12_spill] sm:$0xff] %v8487_v60  ;;  %v8489_v61 = vpop.xlane.xlu1 %1158  ;;  %v7424_v5 = vpop.eup %7423  ;;  %7437 = vtanh.f32 %v850_v3 }
 0x19b   : > { %13331 = vst [vmem:[#allocation13_spill] sm:$0xff] %v8489_v61  ;;  %v7426_v9 = vpop.eup %7425  ;;  %v1064_v17 = vmul.f32 %v8533_v46, %v7424_v5 }
 0x19c   : > { %1368 = vadd.xlane.f32.xlu0 %v1367_v1  ;;  %v1048_v1 = vmul.f32 %v8533_v46, %v7420_v44  ;;  %v1065_v40 = vmul.f32 %v8533_v46, %v7426_v9 }
 0x19d   : > { %1371 = vadd.xlane.f32.xlu1 %v1370_v55  ;;  %v8499_v54 = vpop.xlane.xlu0 %1155  ;;  %v1049_v55 = vmul.f32 %v8533_v46, %v7422_v56  ;;  %v1277_v31 = vsel %vm1150_vm2, %v1064_v17, 0.0 }
 0x19e   : > { %13332 = vst [vmem:[#allocation14_spill] sm:$0xff] %v8499_v54  ;;  %v8501_v13 = vpop.xlane.xlu1 %1161  ;;  %v1229_v0 = vsel %vm1150_vm2, %v1048_v1, 0.0  ;;  %v1280_v42 = vsel %vm1150_vm2, %v1065_v40, 0.0 }
 0x19f   : > { %13333 = vst [vmem:[#allocation15_spill] sm:$0xff] %v8501_v13  ;;  %v1232_v19 = vsel %vm1150_vm2, %v1049_v55, 0.0 }
 0x1a0   : > { %1416 = vadd.xlane.f32.xlu0 %v1415_v15  ;;  %v865_v15 = vadd.f32 %v8282_v43, %v8141_v11  ;;  %v771_v11 = vadd.f32 %v8096_v53, %v8159_v26 }
 0x1a1   : > { %1419 = vadd.xlane.f32.xlu1 %v1418_v62  ;;  %v8511_v22 = vpop.xlane.xlu0 %1164  ;;  %v7428_v62 = vpop.eup %7427 }
 0x1a2   : > { %v8513_v23 = vpop.xlane.xlu1 %1167  ;;  %v7430_v24 = vpop.eup %7429  ;;  %7439 = vtanh.f32 %v865_v15  ;;  %v788_v15 = vadd.f32 %v8153_v21, %v8108_v58 }
 0x1a3   : > { %7441 = vtanh.f32 %v866_v18  ;;  %v7432_v35 = vpop.eup %7431 }
 0x1a4   : > { %1464 = vadd.xlane.f32.xlu0 %v1463_v25  ;;  %v7434_v4 = vpop.eup %7433  ;;  %7443 = vtanh.f32 %v881_v30  ;;  %v1096_v8 = vmul.f32 %v8533_v46, %v7432_v35 }
 0x1a5   : > { %1467 = vadd.xlane.f32.xlu1 %v1466_v33  ;;  %v8523_v37 = vpop.xlane.xlu0 %1200  ;;  %v1080_v33 = vmul.f32 %v8533_v46, %v7428_v62  ;;  %7445 = vtanh.f32 %v882_v34  ;;  %v7436_v56 = vpop.eup %7435 }
 0x1a6   : > { %13334 = vst [vmem:[#allocation16_spill] sm:$0xff] %v8523_v37  ;;  %v8525_v41 = vpop.xlane.xlu1 %1203  ;;  %v7438_v1 = vpop.eup %7437  ;;  %7447 = vtanh.f32 %v771_v11  ;;  %v1373_v55 = vsel %vm1150_vm2, %v1096_v8, 0.0  ;;  %v1112_v9 = vmul.f32 %v8533_v46, %v7436_v56  ;;  %v820_v56 = vadd.f32 %v8153_v21, %v8220_v52 }
 0x1a7   : > { %13335 = vst [vmem:[#allocation17_spill] sm:$0xff] %v8525_v41  ;;  %7449 = vtanh.f32 %v772_v2  ;;  %v1113_v18 = vmul.f32 %v8533_v46, %v7438_v1 }
 0x1a8   : > { %1512 = vadd.xlane.f32.xlu0 %v1511_v45  ;;  %v1081_v45 = vmul.f32 %v8533_v46, %v7430_v24  ;;  %v803_v24 = vadd.f32 %v8147_v16, %v8159_v26  ;;  %v1421_v30 = vsel %vm1150_vm2, %v1112_v9, 0.0 }
 0x1a9   : > { %1515 = vadd.xlane.f32.xlu1 %v1514_v49  ;;  %v8540_v57 = vpop.xlane.xlu0 %1206  ;;  %v1325_v49 = vsel %vm1150_vm2, %v1080_v33, 0.0  ;;  %v804_v33 = vadd.f32 %v8153_v21, %v8147_v16  ;;  %v1424_v35 = vsel %vm1150_vm2, %v1113_v18, 0.0  ;;  %v836_v18 = vadd.f32 %v8153_v21, %v8191_v63 }
 0x1aa   : > { %13336 = vst [vmem:[#allocation18_spill] sm:$0xff] %v8540_v57  ;;  %v8542_v59 = vpop.xlane.xlu1 %1209  ;;  %v1328_v51 = vsel %vm1150_vm2, %v1081_v45, 0.0 }
 0x1ab   : > { %13337 = vst [vmem:[#allocation19_spill] sm:$0xff] %v8542_v59 }
 0x1ac   : > { %1182 = vadd.xlane.f32.xlu0 %v1181_v50  ;;  %v1097_v50 = vmul.f32 %v8533_v46, %v7434_v4 }
 0x1ad   : > { %1185 = vadd.xlane.f32.xlu1 %v1184_v7  ;;  %v8552_v10 = vpop.xlane.xlu0 %1212  ;;  %v787_v7 = vadd.f32 %v8108_v58, %v8159_v26 }
 0x1ae   : > { %v8554_v14 = vpop.xlane.xlu1 %1215  ;;  %v1376_v17 = vsel %vm1150_vm2, %v1097_v50, 0.0 }
 0x1af   : > { %13338 = vst [vmem:[#allocation20_spill] sm:$0xff] %v8554_v14  ;;  %7451 = vtanh.f32 %v787_v7 }
 0x1b0   : > { %1230 = vadd.xlane.f32.xlu0 %v1229_v0  ;;  %v7440_v0 = vpop.eup %7439  ;;  %7453 = vtanh.f32 %v788_v15  ;;  %v835_v15 = vadd.f32 %v8191_v63, %v8159_v26 }
 0x1b1   : > { %1233 = vadd.xlane.f32.xlu1 %v1232_v19  ;;  %v8564_v25 = vpop.xlane.xlu0 %1248  ;;  %v7442_v62 = vpop.eup %7441  ;;  %7455 = vtanh.f32 %v803_v24 }
 0x1b2   : > { %13339 = vst [vmem:[#allocation21_spill] sm:$0xff] %v8564_v25  ;;  %v8566_v28 = vpop.xlane.xlu1 %1251  ;;  %v7444_v34 = vpop.eup %7443  ;;  %7457 = vtanh.f32 %v804_v33 }
 0x1b3   : > { %13340 = vst [vmem:[#allocation22_spill] sm:$0xff] %v8566_v28  ;;  %v7446_v45 = vpop.eup %7445  ;;  %v1144_v2 = vmul.f32 %v8533_v46, %v7444_v34 }
 0x1b4   : > { %1278 = vadd.xlane.f32.xlu0 %v1277_v31  ;;  %v1128_v31 = vmul.f32 %v8533_v46, %v7440_v0  ;;  %v1145_v1 = vmul.f32 %v8533_v46, %v7446_v45 }
 0x1b5   : > { %1281 = vadd.xlane.f32.xlu1 %v1280_v42  ;;  %v8576_v6 = vpop.xlane.xlu0 %1254  ;;  %v1129_v42 = vmul.f32 %v8533_v46, %v7442_v62  ;;  %v1517_v0 = vsel %vm1150_vm2, %v1144_v2, 0.0 }
 0x1b6   : > { %13341 = vst [vmem:[#allocation23_spill] sm:$0xff] %v8576_v6  ;;  %v8578_v44 = vpop.xlane.xlu1 %1257  ;;  %v1469_v8 = vsel %vm1150_vm2, %v1128_v31, 0.0  ;;  %v1520_v24 = vsel %vm1150_vm2, %v1145_v1, 0.0 }
 0x1b7   : > { %13342 = vst [vmem:[#allocation24_spill] sm:$0xff] %v8578_v44  ;;  %v1472_v50 = vsel %vm1150_vm2, %v1129_v42, 0.0 }
 0x1b8   : > { %1326 = vadd.xlane.f32.xlu0 %v1325_v49  ;;  %v819_v49 = vadd.f32 %v8220_v52, %v8159_v26 }
 0x1b9   : > { %1329 = vadd.xlane.f32.xlu1 %v1328_v51  ;;  %v8588_v3 = vpop.xlane.xlu0 %1260  ;;  %v7448_v51 = vpop.eup %7447 }
 0x1ba   : > { %13343 = vst [vmem:[#allocation25_spill] sm:$0xff] %v8588_v3  ;;  %v8590_v5 = vpop.xlane.xlu1 %1263  ;;  %v7450_v7 = vpop.eup %7449  ;;  %7459 = vtanh.f32 %v819_v49  ;;  %v852_v49 = vadd.f32 %v8153_v21, %v8253_v20 }
 0x1bb   : > { %13344 = vst [vmem:[#allocation26_spill] sm:$0xff] %v8590_v5  ;;  %7461 = vtanh.f32 %v820_v56  ;;  %v7452_v62 = vpop.eup %7451 }
 0x1bc   : > { %1374 = vadd.xlane.f32.xlu0 %v1373_v55  ;;  %v7454_v31 = vpop.eup %7453  ;;  %7463 = vtanh.f32 %v835_v15  ;;  %v1050_v45 = vmul.f32 %v8533_v46, %v7452_v62 }
 0x1bd   : > { %1377 = vadd.xlane.f32.xlu1 %v1376_v17  ;;  %v8600_v19 = vpop.xlane.xlu0 %1344  ;;  %v1034_v17 = vmul.f32 %v8533_v46, %v7448_v51  ;;  %7465 = vtanh.f32 %v836_v18  ;;  %v1051_v56 = vmul.f32 %v8533_v46, %v7454_v31 }
 0x1be   : > { %13345 = vst [vmem:[#allocation27_spill] sm:$0xff] %v8600_v19  ;;  %v8602_v40 = vpop.xlane.xlu1 %1347  ;;  %v1235_v15 = vsel %vm1150_vm2, %v1050_v45, 0.0 }
 0x1bf   : > { %13346 = vst [vmem:[#allocation28_spill] sm:$0xff] %v8602_v40  ;;  %v1187_v42 = vsel %vm1150_vm2, %v1034_v17, 0.0  ;;  %v868_v17 = vadd.f32 %v8153_v21, %v8282_v43  ;;  %v1238_v62 = vsel %vm1150_vm2, %v1051_v56, 0.0 }
 0x1c0   : > { %1422 = vadd.xlane.f32.xlu0 %v1421_v30  ;;  %v1035_v30 = vmul.f32 %v8533_v46, %v7450_v7  ;;  %v867_v7 = vadd.f32 %v8282_v43, %v8159_v26 }
 0x1c1   : > { %1425 = vadd.xlane.f32.xlu1 %v1424_v35  ;;  %v8612_v4 = vpop.xlane.xlu0 %1350  ;;  %v851_v35 = vadd.f32 %v8253_v20, %v8159_v26 }
 0x1c2   : > { %13347 = vst [vmem:[#allocation29_spill] sm:$0xff] %v8612_v4  ;;  %v8614_v11 = vpop.xlane.xlu1 %1353  ;;  %v1190_v2 = vsel %vm1150_vm2, %v1035_v30, 0.0 }
 0x1c3   : > { %13348 = vst [vmem:[#allocation30_spill] sm:$0xff] %v8614_v11  ;;  %7467 = vtanh.f32 %v851_v35 }
 0x1c4   : > { %1470 = vadd.xlane.f32.xlu0 %v1469_v8  ;;  %v7456_v8 = vpop.eup %7455  ;;  %7469 = vtanh.f32 %v852_v49 }
 0x1c5   : > { %1473 = vadd.xlane.f32.xlu1 %v1472_v50  ;;  %v8624_v55 = vpop.xlane.xlu0 %1356  ;;  %v7458_v51 = vpop.eup %7457  ;;  %7471 = vtanh.f32 %v867_v7 }
 0x1c6   : > { %13349 = vst [vmem:[#allocation31_spill] sm:$0xff] %v8624_v55  ;;  %v8626_v9 = vpop.xlane.xlu1 %1359  ;;  %v7460_v18 = vpop.eup %7459  ;;  %7473 = vtanh.f32 %v868_v17  ;;  %v774_v17 = vadd.f32 %v8168_v32, %v8096_v53 }
 0x1c7   : > { %13350 = vst [vmem:[#allocation32_spill] sm:$0xff] %v8626_v9  ;;  %v7462_v30 = vpop.eup %7461  ;;  %v1082_v49 = vmul.f32 %v8533_v46, %v7460_v18 }
 0x1c8   : > { %1518 = vadd.xlane.f32.xlu0 %v1517_v0  ;;  %v1066_v0 = vmul.f32 %v8533_v46, %v7456_v8  ;;  %v884_v8 = vadd.f32 %v8153_v21, %v8367_v29 }
 0x1c9   : > { %1521 = vadd.xlane.f32.xlu1 %v1520_v24  ;;  %v8636_v33 = vpop.xlane.xlu0 %1296  ;;  %v1067_v24 = vmul.f32 %v8533_v46, %v7458_v51  ;;  %v1083_v51 = vmul.f32 %v8533_v46, %v7462_v30 }
 0x1ca   : > { %13351 = vst [vmem:[#allocation33_spill] sm:$0xff] %v8636_v33  ;;  %v8638_v34 = vpop.xlane.xlu1 %1299  ;;  %v1283_v45 = vsel %vm1150_vm2, %v1066_v0, 0.0  ;;  %v1331_v0 = vsel %vm1150_vm2, %v1082_v49, 0.0  ;;  %v789_v49 = vadd.f32 %v8108_v58, %v8174_v39 }
 0x1cb   : > { %13352 = vst [vmem:[#allocation34_spill] sm:$0xff] %v8638_v34  ;;  %v1286_v56 = vsel %vm1150_vm2, %v1067_v24, 0.0  ;;  %v1334_v24 = vsel %vm1150_vm2, %v1083_v51, 0.0 }
 0x1cc   : > { %1188 = vadd.xlane.f32.xlu0 %v1187_v42  ;;  %v883_v42 = vadd.f32 %v8367_v29, %v8159_v26  ;;  %v773_v26 = vadd.f32 %v8096_v53, %v8174_v39 }
 0x1cd   : > { %1191 = vadd.xlane.f32.xlu1 %v1190_v2  ;;  %v8648_v50 = vpop.xlane.xlu0 %1302  ;;  %v7464_v2 = vpop.eup %7463 }
 0x1ce   : > { %13353 = vst [vmem:[#allocation35_spill] sm:$0xff] %v8648_v50  ;;  %v8650_v1 = vpop.xlane.xlu1 %1305  ;;  %7475 = vtanh.f32 %v883_v42  ;;  %v1098_v21 = vmul.f32 %v8533_v46, %v7464_v2  ;;  %v790_v2 = vadd.f32 %v8168_v32, %v8108_v58 }
 0x1cf   : > { %13354 = vst [vmem:[#allocation36_spill] sm:$0xff] %v8650_v1  ;;  %7477 = vtanh.f32 %v884_v8 }
 0x1d0   : > { %1236 = vadd.xlane.f32.xlu0 %v1235_v15  ;;  %v7466_v15 = vpop.eup %7465  ;;  %7479 = vtanh.f32 %v773_v26  ;;  %v1379_v8 = vsel %vm1150_vm2, %v1098_v21, 0.0  ;;  %v805_v21 = vadd.f32 %v8147_v16, %v8174_v39 }
 0x1d1   : > { %1239 = vadd.xlane.f32.xlu1 %v1238_v62  ;;  %v8660_v31 = vpop.xlane.xlu0 %1308  ;;  %v7468_v18 = vpop.eup %7467  ;;  %v1099_v30 = vmul.f32 %v8533_v46, %v7466_v15  ;;  %7481 = vtanh.f32 %v774_v17 }
 0x1d2   : > { %13355 = vst [vmem:[#allocation37_spill] sm:$0xff] %v8660_v31  ;;  %v8662_v35 = vpop.xlane.xlu1 %1311  ;;  %v1114_v53 = vmul.f32 %v8533_v46, %v7468_v18  ;;  %7483 = vtanh.f32 %v789_v49  ;;  %v806_v18 = vadd.f32 %v8168_v32, %v8147_v16 }
 0x1d3   : > { %13356 = vst [vmem:[#allocation38_spill] sm:$0xff] %v8662_v35  ;;  %v1382_v15 = vsel %vm1150_vm2, %v1099_v30, 0.0  ;;  %7485 = vtanh.f32 %v790_v2 }
 0x1d4   : > { %1284 = vadd.xlane.f32.xlu0 %v1283_v45  ;;  %v7470_v45 = vpop.eup %7469  ;;  %v1427_v17 = vsel %vm1150_vm2, %v1114_v53, 0.0  ;;  %7487 = vtanh.f32 %v805_v21  ;;  %v821_v53 = vadd.f32 %v8220_v52, %v8174_v39 }
 0x1d5   : > { %1287 = vadd.xlane.f32.xlu1 %v1286_v56  ;;  %v8672_v7 = vpop.xlane.xlu0 %1392  ;;  %v7472_v51 = vpop.eup %7471  ;;  %7489 = vtanh.f32 %v806_v18 }
 0x1d6   : > { %13357 = vst [vmem:[#allocation39_spill] sm:$0xff] %v8672_v7  ;;  %v8674_v62 = vpop.xlane.xlu1 %1395  ;;  %v1130_v58 = vmul.f32 %v8533_v46, %v7472_v51  ;;  %v822_v51 = vadd.f32 %v8168_v32, %v8220_v52  ;;  %7491 = vtanh.f32 %v821_v53 }
 0x1d7   : > { %13358 = vst [vmem:[#allocation40_spill] sm:$0xff] %v8674_v62 }
 0x1d8   : > { %1332 = vadd.xlane.f32.xlu0 %v1331_v0  ;;  %v1115_v0 = vmul.f32 %v8533_v46, %v7470_v45  ;;  %v1475_v2 = vsel %vm1150_vm2, %v1130_v58, 0.0  ;;  %v837_v58 = vadd.f32 %v8191_v63, %v8174_v39  ;;  %7493 = vtanh.f32 %v822_v51 }
 0x1d9   : > { %1335 = vadd.xlane.f32.xlu1 %v1334_v24  ;;  %v8684_v42 = vpop.xlane.xlu0 %1398  ;;  %v7474_v24 = vpop.eup %7473 }
 0x1da   : > { %13359 = vst [vmem:[#allocation41_spill] sm:$0xff] %v8684_v42  ;;  %v8686_v56 = vpop.xlane.xlu1 %1401  ;;  %v7476_v30 = vpop.eup %7475  ;;  %v1430_v45 = vsel %vm1150_vm2, %v1115_v0, 0.0  ;;  %7495 = vtanh.f32 %v837_v58 }
 0x1db   : > { %13360 = vst [vmem:[#allocation42_spill] sm:$0xff] %v8686_v56  ;;  %v1146_v16 = vmul.f32 %v8533_v46, %v7476_v30  ;;  %v838_v30 = vadd.f32 %v8168_v32, %v8191_v63 }
 0x1dc   : > { %1380 = vadd.xlane.f32.xlu0 %v1379_v8  ;;  %v1131_v8 = vmul.f32 %v8533_v46, %v7474_v24 }
 0x1dd   : > { %1383 = vadd.xlane.f32.xlu1 %v1382_v15  ;;  %v8696_v26 = vpop.xlane.xlu0 %1404  ;;  %v7478_v15 = vpop.eup %7477  ;;  %v1523_v18 = vsel %vm1150_vm2, %v1146_v16, 0.0  ;;  %v853_v16 = vadd.f32 %v8253_v20, %v8174_v39  ;;  %7497 = vtanh.f32 %v838_v30 }
 0x1de   : > { %13361 = vst [vmem:[#allocation43_spill] sm:$0xff] %v8696_v26  ;;  %v8698_v36 = vpop.xlane.xlu1 %1407  ;;  %v7480_v0 = vpop.eup %7479  ;;  %v1478_v24 = vsel %vm1150_vm2, %v1131_v8, 0.0 }
 0x1df   : > { %13362 = vst [vmem:[#allocation44_spill] sm:$0xff] %v8698_v36  ;;  %v1036_v52 = vmul.f32 %v8533_v46, %v7480_v0  ;;  %v854_v0 = vadd.f32 %v8168_v32, %v8253_v20  ;;  %7499 = vtanh.f32 %v853_v16 }
 0x1e0   : > { %1428 = vadd.xlane.f32.xlu0 %v1427_v17  ;;  %v1147_v17 = vmul.f32 %v8533_v46, %v7478_v15 }
 0x1e1   : > { %1431 = vadd.xlane.f32.xlu1 %v1430_v45  ;;  %v8708_v49 = vpop.xlane.xlu0 %1440  ;;  %v7482_v45 = vpop.eup %7481  ;;  %v1193_v51 = vsel %vm1150_vm2, %v1036_v52, 0.0  ;;  %v869_v52 = vadd.f32 %v8282_v43, %v8174_v39  ;;  %7501 = vtanh.f32 %v854_v0 }
 0x1e2   : > { %13363 = vst [vmem:[#allocation45_spill] sm:$0xff] %v8708_v49  ;;  %v8710_v48 = vpop.xlane.xlu1 %1443  ;;  %v7484_v8 = vpop.eup %7483  ;;  %v1526_v15 = vsel %vm1150_vm2, %v1147_v17, 0.0 }
 0x1e3   : > { %13364 = vst [vmem:[#allocation46_spill] sm:$0xff] %v8710_v48  ;;  %v1052_v63 = vmul.f32 %v8533_v46, %v7484_v8  ;;  %v870_v8 = vadd.f32 %v8168_v32, %v8282_v43  ;;  %7503 = vtanh.f32 %v869_v52 }
 0x1e4   : > { %1476 = vadd.xlane.f32.xlu0 %v1475_v2  ;;  %v1037_v2 = vmul.f32 %v8533_v46, %v7482_v45 }
 0x1e5   : > { %1479 = vadd.xlane.f32.xlu1 %v1478_v24  ;;  %v8720_v21 = vpop.xlane.xlu0 %1446  ;;  %v7486_v24 = vpop.eup %7485  ;;  %v1241_v30 = vsel %vm1150_vm2, %v1052_v63, 0.0  ;;  %v885_v63 = vadd.f32 %v8367_v29, %v8174_v39  ;;  %7505 = vtanh.f32 %v870_v8 }
 0x1e6   : > { %13365 = vst [vmem:[#allocation47_spill] sm:$0xff] %v8720_v21  ;;  %v8722_v12 = vpop.xlane.xlu1 %1449  ;;  %v7488_v17 = vpop.eup %7487  ;;  %v1196_v45 = vsel %vm1150_vm2, %v1037_v2, 0.0 }
 0x1e7   : > { %13366 = vst [vmem:[#allocation48_spill] sm:$0xff] %v8722_v12  ;;  %v1068_v20 = vmul.f32 %v8533_v46, %v7488_v17  ;;  %v886_v17 = vadd.f32 %v8168_v32, %v8367_v29  ;;  %7507 = vtanh.f32 %v885_v63 }
 0x1e8   : > { %1524 = vadd.xlane.f32.xlu0 %v1523_v18  ;;  %v1053_v18 = vmul.f32 %v8533_v46, %v7486_v24 }
 0x1e9   : > { %1527 = vadd.xlane.f32.xlu1 %v1526_v15  ;;  %v8732_v53 = vpop.xlane.xlu0 %1452  ;;  %v7490_v15 = vpop.eup %7489  ;;  %v1289_v0 = vsel %vm1150_vm2, %v1068_v20, 0.0  ;;  %7509 = vtanh.f32 %v886_v17 }
 0x1ea   : > { %13367 = vst [vmem:[#allocation49_spill] sm:$0xff] %v8732_v53  ;;  %v8734_v27 = vpop.xlane.xlu1 %1455  ;;  %v7492_v2 = vpop.eup %7491  ;;  %v1244_v24 = vsel %vm1150_vm2, %v1053_v18, 0.0 }
 0x1eb   : > { %13368 = vst [vmem:[#allocation50_spill] sm:$0xff] %v8734_v27  ;;  %v1084_v43 = vmul.f32 %v8533_v46, %v7492_v2 }
 0x1ec   : > { %1194 = vadd.xlane.f32.xlu0 %v1193_v51  ;;  %v1069_v51 = vmul.f32 %v8533_v46, %v7490_v15 }
 0x1ed   : > { %1197 = vadd.xlane.f32.xlu1 %v1196_v45  ;;  %v8744_v58 = vpop.xlane.xlu0 %1170  ;;  %v7494_v45 = vpop.eup %7493  ;;  %v1337_v39 = vsel %vm1150_vm2, %v1084_v43, 0.0 }
 0x1ee   : > { %13369 = vst [vmem:[#allocation51_spill] sm:$0xff] %v8744_v58  ;;  %v8746_v47 = vpop.xlane.xlu1 %1173  ;;  %v7496_v18 = vpop.eup %7495  ;;  %v1292_v15 = vsel %vm1150_vm2, %v1069_v51, 0.0 }
 0x1ef   : > { %13370 = vst [vmem:[#allocation52_spill] sm:$0xff] %v8746_v47  ;;  %v1100_v20 = vmul.f32 %v8533_v46, %v7496_v18 }
 0x1f0   : > { %1242 = vadd.xlane.f32.xlu0 %v1241_v30  ;;  %v1085_v30 = vmul.f32 %v8533_v46, %v7494_v45 }
 0x1f1   : > { %1245 = vadd.xlane.f32.xlu1 %v1244_v24  ;;  %v8756_v16 = vpop.xlane.xlu0 %1218  ;;  %v7498_v24 = vpop.eup %7497 }
 0x1f2   : > { %13371 = vst [vmem:[#allocation53_spill] sm:$0xff] %v8756_v16  ;;  %v8758_v47 = vpop.xlane.xlu1 %1221  ;;  %v7500_v8 = vpop.eup %7499  ;;  %v1340_v32 = vsel %vm1150_vm2, %v1085_v30, 0.0  ;;  %v1101_v29 = vmul.f32 %v8533_v46, %v7498_v24 }
 0x1f3   : > { %13372 = vst [vmem:[#allocation54_spill] sm:$0xff] %v8758_v47  ;;  %v7502_v2 = vpop.eup %7501  ;;  %v1116_v63 = vmul.f32 %v8533_v46, %v7500_v8 }
 0x1f4   : > { %1290 = vadd.xlane.f32.xlu0 %v1289_v0  ;;  %v1385_v0 = vsel %vm1150_vm2, %v1100_v20, 0.0  ;;  %v7504_v43 = vpop.eup %7503  ;;  %v1388_v18 = vsel %vm1150_vm2, %v1101_v29, 0.0  ;;  %v1117_v17 = vmul.f32 %v8533_v46, %v7502_v2 }
 0x1f5   : > { %1293 = vadd.xlane.f32.xlu1 %v1292_v15  ;;  %v8768_v52 = vpop.xlane.xlu0 %1266  ;;  %v7506_v15 = vpop.eup %7505 }
 0x1f6   : > { %13373 = vst [vmem:[#allocation55_spill] sm:$0xff] %v8768_v52  ;;  %v8770_v47 = vpop.xlane.xlu1 %1269  ;;  %v1436_v20 = vsel %vm1150_vm2, %v1117_v17, 0.0  ;;  %v1133_v8 = vmul.f32 %v8533_v46, %v7506_v15 }
 0x1f7   : > { %13374 = vst [vmem:[#allocation56_spill] sm:$0xff] %v8770_v47 }
 0x1f8   : > { %1338 = vadd.xlane.f32.xlu0 %v1337_v39  ;;  %v1433_v39 = vsel %vm1150_vm2, %v1116_v63, 0.0  ;;  %v1484_v63 = vsel %vm1150_vm2, %v1133_v8, 0.0 }
 0x1f9   : > { %1341 = vadd.xlane.f32.xlu1 %v1340_v32  ;;  %v8776_v51 = vpop.xlane.xlu0 %1314  ;;  %v1132_v32 = vmul.f32 %v8533_v46, %v7504_v43 }
 0x1fa   : > { %13375 = vst [vmem:[#allocation57_spill] sm:$0xff] %v8776_v51  ;;  %v8778_v45 = vpop.xlane.xlu1 %1317 }
 0x1fb   : > { %13376 = vst [vmem:[#allocation58_spill] sm:$0xff] %v8778_v45  ;;  %v7508_v45 = vpop.eup %7507 }
 0x1fc   : > { %1386 = vadd.xlane.f32.xlu0 %v1385_v0  ;;  %v7510_v29 = vpop.eup %7509 }
 0x1fd   : > { %1389 = vadd.xlane.f32.xlu1 %v1388_v18  ;;  %v8784_v30 = vpop.xlane.xlu0 %1362  ;;  %v1481_v18 = vsel %vm1150_vm2, %v1132_v32, 0.0  ;;  %v1149_v43 = vmul.f32 %v8533_v46, %v7510_v29 }
 0x1fe   : > { %13377 = vst [vmem:[#allocation59_spill] sm:$0xff] %v8784_v30  ;;  %v8786_v24 = vpop.xlane.xlu1 %1365 }
 0x1ff   : > { %13378 = vst [vmem:[#allocation60_spill] sm:$0xff] %v8786_v24  ;;  %v1148_v24 = vmul.f32 %v8533_v46, %v7508_v45 }
 0x200   : > { %1434 = vadd.xlane.f32.xlu0 %v1433_v39 }
 0x201   : > { %1437 = vadd.xlane.f32.xlu1 %v1436_v20  ;;  %v8792_v0 = vpop.xlane.xlu0 %1410  ;;  %v1529_v39 = vsel %vm1150_vm2, %v1148_v24, 0.0  ;;  %v1532_v20 = vsel %vm1150_vm2, %v1149_v43, 0.0  ;;  %vm1772_vm2 = vcmask 1048512  }
 0x202   : > { %13379 = vst [vmem:[#allocation61_spill] sm:$0xff] %v8792_v0  ;;  %v8794_v2 = vpop.xlane.xlu1 %1413 }
 0x203   : > { %13380 = vst [vmem:[#allocation62_spill] sm:$0xff] %v8794_v2 }
 0x204   : > { %1482 = vadd.xlane.f32.xlu0 %v1481_v18 }
 0x205   : > { %1485 = vadd.xlane.f32.xlu1 %v1484_v63  ;;  %v8800_v17 = vpop.xlane.xlu0 %1458 }
 0x206   : > { %13381 = vst [vmem:[#allocation63_spill] sm:$0xff] %v8800_v17  ;;  %v8802_v15 = vpop.xlane.xlu1 %1461 }
 0x207   : > { %13382 = vst [vmem:[#allocation64_spill] sm:$0xff] %v8802_v15 }
 0x208   : > { %1530 = vadd.xlane.f32.xlu0 %v1529_v39  ;;  %v7772_v39 = vld [vmem:[%s8029_s26] ss:$0 sm:$0xff] }
 0x209   : > { %1533 = vadd.xlane.f32.xlu1 %v1532_v20  ;;  %v8806_v32 = vpop.xlane.xlu0 %1488 }
 0x20a   : > { %13383 = vst [vmem:[#allocation65_spill] sm:$0xff] %v8806_v32  ;;  %v8808_v45 = vpop.xlane.xlu1 %1491 }
 0x20b   : > { %13384 = vst [vmem:[#allocation66_spill] sm:$0xff] %v8808_v45 }
 0x20d   : > { %v8810_v8 = vpop.xlane.xlu0 %1494 }
 0x20e   : > { %13385 = vst [vmem:[#allocation67_spill] sm:$0xff] %v8810_v8  ;;  %v8812_v18 = vpop.xlane.xlu1 %1497 }
 0x20f   : > { %13386 = vst [vmem:[#allocation68_spill] sm:$0xff] %v8812_v18 }
 0x211   : > { %v8814_v46 = vpop.xlane.xlu0 %1500 }
 0x212   : > { %13387 = vst [vmem:[#allocation69_spill] sm:$0xff] %v8814_v46  ;;  %v8816_v29 = vpop.xlane.xlu1 %1503 }
 0x213   : > { %13388 = vst [vmem:[#allocation70_spill] sm:$0xff] %v8816_v29 }
 0x215   : > { %v8818_v63 = vpop.xlane.xlu0 %1506 }
 0x216   : > { %13389 = vst [vmem:[#allocation71_spill] sm:$0xff] %v8818_v63  ;;  %v8820_v15 = vpop.xlane.xlu1 %1509 }
 0x217   : > { %13390 = vst [vmem:[#allocation72_spill] sm:$0xff] %v8820_v15 }
 0x219   : > { %v8822_v24 = vpop.xlane.xlu0 %1176 }
 0x21a   : > { %13391 = vst [vmem:[#allocation73_spill] sm:$0xff] %v8822_v24  ;;  %v8824_v43 = vpop.xlane.xlu1 %1179  ;;  %4111 = vbcast.lane.b32.xlu1 %v7772_v39, 280 }
 0x21b   : > { %13392 = vst [vmem:[#allocation74_spill] sm:$0xff] %v8824_v43 }
 0x21d   : > { %v8827_v20 = vpop.xlane.xlu0 %1224 }
 0x21e   : > { %13393 = vst [vmem:[#allocation75_spill] sm:$0xff] %v8827_v20  ;;  %v8829_v2 = vpop.xlane.xlu1 %1227  ;;  %4131 = vbcast.lane.b32.xlu0 %v7772_v39, 320  ;;  %4115 = vbcast.lane.b32.xlu1 %v7772_v39, 288 }
 0x21f   : > { %13394 = vst [vmem:[#allocation76_spill] sm:$0xff] %v8829_v2 }
 0x221   : > { %v8831_v17 = vpop.xlane.xlu0 %1272 }
 0x222   : > { %13395 = vst [vmem:[#allocation77_spill] sm:$0xff] %v8831_v17  ;;  %v8833_v0 = vpop.xlane.xlu1 %1275  ;;  %4119 = vbcast.lane.b32.xlu1 %v7772_v39, 296 }
 0x223   : > { %13396 = vst [vmem:[#allocation78_spill] sm:$0xff] %v8833_v0 }
 0x225   : > { %v8835_v63 = vpop.xlane.xlu0 %1320 }
 0x226   : > { %13397 = vst [vmem:[#allocation79_spill] sm:$0xff] %v8835_v63  ;;  %v8837_v15 = vpop.xlane.xlu1 %1323  ;;  %4123 = vbcast.lane.b32.xlu1 %v7772_v39, 304 }
 0x227   : > { %13398 = vst [vmem:[#allocation80_spill] sm:$0xff] %v8837_v15 }
 0x229   : > { %v8839_v24 = vpop.xlane.xlu0 %1368 }
 0x22a   : > { %13399 = vst [vmem:[#allocation81_spill] sm:$0xff] %v8839_v24  ;;  %v8841_v43 = vpop.xlane.xlu1 %1371  ;;  %4127 = vbcast.lane.b32.xlu1 %v7772_v39, 312 }
 0x22b   : > { %13400 = vst [vmem:[#allocation82_spill] sm:$0xff] %v8841_v43 }
 0x22d   : > { %v8843_v20 = vpop.xlane.xlu0 %1416 }
 0x22e   : > { %13401 = vst [vmem:[#allocation83_spill] sm:$0xff] %v8843_v20  ;;  %v8845_v2 = vpop.xlane.xlu1 %1419  ;;  %4135 = vbcast.lane.b32.xlu1 %v7772_v39, 328 }
 0x22f   : > { %13402 = vst [vmem:[#allocation84_spill] sm:$0xff] %v8845_v2 }
 0x231   : > { %v8847_v29 = vpop.xlane.xlu0 %1464 }
 0x232   : > { %13403 = vst [vmem:[#allocation85_spill] sm:$0xff] %v8847_v29  ;;  %v8849_v17 = vpop.xlane.xlu1 %1467  ;;  %4139 = vbcast.lane.b32.xlu1 %v7772_v39, 336  ;;  %v13415_v39 = vlaneseq }
 0x233   : > { %13404 = vst [vmem:[#allocation86_spill] sm:$0xff] %v8849_v17 }
 0x235   : > { %v8851_v0 = vpop.xlane.xlu0 %1512 }
 0x236   : > { %13405 = vst [vmem:[#allocation87_spill] sm:$0xff] %v8851_v0  ;;  %v8853_v63 = vpop.xlane.xlu1 %1515  ;;  %v1664_v0 = vand.u32 127, %v13415_v39 }
 0x237   : > { %13406 = vst [vmem:[#allocation88_spill] sm:$0xff] %v8853_v63 }
 0x238   : > { %v1669_v18 = vadd.s32 4294967288, %v1664_v0  ;;  %v1704_v39 = vadd.s32 4294967248, %v1664_v0  ;;  %v1711_v30 = vadd.s32 4294967240, %v1664_v0  ;;  %v1718_v51 = vadd.s32 4294967232, %v1664_v0 }
 0x239   : > { %v8855_v15 = vpop.xlane.xlu0 %1182  ;;  %v1725_v52 = vadd.s32 4294967224, %v1664_v0  ;;  %v1746_v36 = vadd.s32 4294967200, %v1664_v0  ;;  %v1753_v32 = vadd.s32 4294967192, %v1664_v0  ;;  %v1760_v45 = vadd.s32 4294967184, %v1664_v0 }
 0x23a   : > { %13407 = vst [vmem:[#allocation89_spill] sm:$0xff] %v8855_v15  ;;  %v8857_v24 = vpop.xlane.xlu1 %1185 }
 0x23b   : > { %13408 = vst [vmem:[#allocation90_spill] sm:$0xff] %v8857_v24  ;;  %v8877_v24 = vsub.s32 %v1669_v18, %v8068_v38 }
 0x23d   : > { %v8859_v43 = vpop.xlane.xlu0 %1230  ;;  %13418 = vst [vmem:[#allocation99_spill] sm:$0xff] %v8877_v24 }
 0x23e   : > { %13409 = vst [vmem:[#allocation91_spill] sm:$0xff] %v8859_v43  ;;  %v8861_v46 = vpop.xlane.xlu1 %1233 }
 0x23f   : > { %13410 = vst [vmem:[#allocation92_spill] sm:$0xff] %v8861_v46  ;;  %v1676_v46 = vadd.s32 4294967280, %v1664_v0 }
 0x241   : > { %v8863_v20 = vpop.xlane.xlu0 %1278  ;;  %v8891_v18 = vsub.s32 %v1676_v46, %v8068_v38  ;;  %v8907_v46 = vsub.s32 %v1704_v39, %v8068_v38  ;;  %v1781_v39 = vrot.slane %v8525_v41, %v8877_v24 }
 0x242   : > { %13411 = vst [vmem:[#allocation93_spill] sm:$0xff] %v8863_v20  ;;  %v8865_v2 = vpop.xlane.xlu1 %1281  ;;  %v1683_v20 = vadd.s32 4294967272, %v1664_v0 }
 0x243   : > { %13412 = vst [vmem:[#allocation94_spill] sm:$0xff] %v8865_v2  ;;  %v8884_v2 = vsub.s32 %v1664_v0, %v8068_v38  ;;  %13423 = vst [vmem:[#allocation104_spill] sm:$0xff] %v8891_v18  ;;  %v1680_v16 = vrot.slane %v8489_v61, %v8891_v18 }
 0x244   : > { %13428 = vst [vmem:[#allocation109_spill] sm:$0xff] %v8907_v46  ;;  %v8924_v46 = vsub.s32 %v1718_v51, %v8068_v38  ;;  %v8942_v51 = vsub.s32 %v1753_v32, %v8068_v38 }
 0x245   : > { %v8867_v29 = vpop.xlane.xlu0 %1326  ;;  %13421 = vst [vmem:[#allocation102_spill] sm:$0xff] %v8884_v2 }
 0x246   : > { %13413 = vst [vmem:[#allocation95_spill] sm:$0xff] %v8867_v29  ;;  %v8869_v17 = vpop.xlane.xlu1 %1329  ;;  %v1697_v29 = vadd.s32 4294967256, %v1664_v0  ;;  %13432 = vst [vmem:[#allocation113_spill] sm:$0xff] %v8924_v46 }
 0x247   : > { %13414 = vst [vmem:[#allocation96_spill] sm:$0xff] %v8869_v17  ;;  %v1690_v17 = vadd.s32 4294967264, %v1664_v0  ;;  %13437 = vst [vmem:[#allocation118_spill] sm:$0xff] %v8942_v51 }
 0x248   : > { %v8902_v8 = vsub.s32 %v1697_v29, %v8068_v38  ;;  %v8913_v29 = vsub.s32 %v1711_v30, %v8068_v38  ;;  %v1786_v30 = vrot.slane %v8540_v57, %v8891_v18  ;;  %v1860_v57 = vrot.slane %v8566_v28, %v8877_v24 }
 0x249   : > { %v8872_v63 = vpop.xlane.xlu0 %1374  ;;  %v8899_v27 = vsub.s32 %v1690_v17, %v8068_v38 }
 0x24a   : > { %13416 = vst [vmem:[#allocation97_spill] sm:$0xff] %v8872_v63  ;;  %v8874_v15 = vpop.xlane.xlu1 %1377  ;;  %v1673_v63 = vrot.slane %v8499_v54, %v8877_v24  ;;  %13427 = vst [vmem:[#allocation108_spill] sm:$0xff] %v8902_v8  ;;  %v1668_v54 = vrot.slane %v8487_v60, %v8884_v2  ;;  %v1777_v60 = vrot.slane %v8523_v37, %v8884_v2 }
 0x24b   : > { %13417 = vst [vmem:[#allocation98_spill] sm:$0xff] %v8874_v15  ;;  %13426 = vst [vmem:[#allocation107_spill] sm:$0xff] %v8899_v27  ;;  %v1701_v28 = vrot.slane %v8513_v23, %v8902_v8 }
 0x24c   : > { %13430 = vst [vmem:[#allocation111_spill] sm:$0xff] %v8913_v29 }
 0x24d   : > { %v8879_v43 = vpop.xlane.xlu0 %1422 }
 0x24e   : > { %13419 = vst [vmem:[#allocation100_spill] sm:$0xff] %v8879_v43  ;;  %v8881_v47 = vpop.xlane.xlu1 %1425  ;;  %v8894_v43 = vsub.s32 %v1683_v20, %v8068_v38  ;;  %v1739_v20 = vadd.s32 4294967208, %v1664_v0 }
 0x24f   : > { %13420 = vst [vmem:[#allocation101_spill] sm:$0xff] %v8881_v47 }
 0x250   : > { %13424 = vst [vmem:[#allocation105_spill] sm:$0xff] %v8894_v43  ;;  %v8935_v41 = vsub.s32 %v1739_v20, %v8068_v38  ;;  %v1694_v20 = vrot.slane %v8511_v22, %v8899_v27 }
 0x251   : > { %v8888_v15 = vpop.xlane.xlu0 %1470 }
 0x252   : > { %13422 = vst [vmem:[#allocation103_spill] sm:$0xff] %v8888_v15  ;;  %v8896_v47 = vpop.xlane.xlu1 %1473  ;;  %v1732_v15 = vadd.s32 4294967216, %v1664_v0  ;;  %13435 = vst [vmem:[#allocation116_spill] sm:$0xff] %v8935_v41 }
 0x253   : > { %13425 = vst [vmem:[#allocation106_spill] sm:$0xff] %v8896_v47  ;;  %v1675_v47 = vsel %vm1674_vm3, %v1673_v63, %v1668_v54  ;;  %v8927_v54 = vsub.s32 %v1725_v52, %v8068_v38  ;;  %v1767_v63 = vadd.s32 4294967176, %v1664_v0  ;;  %v8945_v52 = vsub.s32 %v1760_v45, %v8068_v38 }
 0x254   : > { %v8932_v61 = vsub.s32 %v1732_v15, %v8068_v38  ;;  %v1682_v37 = vsel %vm1681_vm4, %v1680_v16, %v1675_v47  ;;  %v1687_v0 = vrot.slane %v8501_v13, %v8894_v43  ;;  %v1782_v47 = vsel %vm1674_vm3, %v1781_v39, %v1777_v60 }
 0x255   : > { %v8910_v17 = vpop.xlane.xlu0 %1518  ;;  %13433 = vst [vmem:[#allocation114_spill] sm:$0xff] %v8927_v54  ;;  %13438 = vst [vmem:[#allocation119_spill] sm:$0xff] %v8945_v52  ;;  %v1787_v45 = vsel %vm1681_vm4, %v1786_v30, %v1782_v47  ;;  %v1856_v13 = vrot.slane %v8564_v25, %v8884_v2  ;;  %v8965_v52 = vsub.s32 %v1767_v63, %v8068_v38 }
 0x256   : > { %13429 = vst [vmem:[#allocation110_spill] sm:$0xff] %v8910_v17  ;;  %v8921_v58 = vpop.xlane.xlu1 %1521  ;;  %13434 = vst [vmem:[#allocation115_spill] sm:$0xff] %v8932_v61  ;;  %v1689_v32 = vsel %vm1688_vm5, %v1687_v0, %v1682_v37  ;;  %v1865_v60 = vrot.slane %v8576_v6, %v8891_v18  ;;  %v2018_v39 = vrot.slane %v8602_v40, %v8877_v24 }
 0x257   : > { %13431 = vst [vmem:[#allocation112_spill] sm:$0xff] %v8921_v58  ;;  %v8939_v58 = vsub.s32 %v1746_v36, %v8068_v38  ;;  %v1791_v36 = vrot.slane %v8542_v59, %v8894_v43  ;;  %13439 = vst [vmem:[#allocation120_spill] sm:$0xff] %v8965_v52  ;;  %v2014_v37 = vrot.slane %v8600_v19, %v8884_v2 }
 0x258   : > { %v2023_v30 = vrot.slane %v8612_v4, %v8891_v18  ;;  %v1939_v0 = vrot.slane %v8638_v34, %v8877_v24  ;;  %v1935_v47 = vrot.slane %v8636_v33, %v8884_v2  ;;  %v1696_v40 = vsel %vm1695_vm6, %v1694_v20, %v1689_v32 }
 0x259   : > { %13436 = vst [vmem:[#allocation117_spill] sm:$0xff] %v8939_v58  ;;  %v8949_v15 = vpop.xlane.xlu0 %1188  ;;  %v1792_v59 = vsel %vm1688_vm5, %v1791_v36, %v1787_v45  ;;  %v1944_v19 = vrot.slane %v8648_v50, %v8891_v18  ;;  %v1801_v34 = vrot.slane %v8554_v14, %v8902_v8  ;;  %v1796_v33 = vrot.slane %v8552_v10, %v8899_v27 }
 0x25a   : > { %v8956_v16 = vpop.xlane.xlu1 %1191  ;;  %v1861_v6 = vsel %vm1674_vm3, %v1860_v57, %v1856_v13  ;;  %v1870_v25 = vrot.slane %v8578_v44, %v8894_v43  ;;  %v1875_v36 = vrot.slane %v8588_v3, %v8899_v27  ;;  %v2019_v32 = vsel %vm1674_vm3, %v2018_v39, %v2014_v37 }
 0x25b   : > { %v1866_v20 = vsel %vm1681_vm4, %v1865_v60, %v1861_v6  ;;  %v2028_v45 = vrot.slane %v8614_v11, %v8894_v43  ;;  %v2024_v50 = vsel %vm1681_vm4, %v2023_v30, %v2019_v32  ;;  %v2033_v14 = vrot.slane %v8624_v55, %v8899_v27  ;;  %v13454_v55 = vld [vmem:[#allocation68_spill] sm:$0xff] }
 0x25c   : > { %v1940_v13 = vsel %vm1674_vm3, %v1939_v0, %v1935_v47  ;;  %v1949_v57 = vrot.slane %v8650_v1, %v8894_v43  ;;  %v1954_v60 = vrot.slane %v8660_v31, %v8899_v27  ;;  %v2097_v39 = vrot.slane %v8674_v62, %v8877_v24  ;;  %v13457_v31 = vld [vmem:[#allocation69_spill] sm:$0xff] }
 0x25d   : > { %v8979_v63 = vpop.xlane.xlu0 %1236  ;;  %v1945_v6 = vsel %vm1681_vm4, %v1944_v19, %v1940_v13  ;;  %v2093_v37 = vrot.slane %v8672_v7, %v8884_v2  ;;  %v1871_v0 = vsel %vm1688_vm5, %v1870_v25, %v1866_v20  ;;  %v2102_v47 = vrot.slane %v8684_v42, %v8891_v18 }
 0x25e   : > { %v8987_v4 = vpop.xlane.xlu1 %1239  ;;  %v2176_v19 = vrot.slane %v8710_v48, %v8877_v24  ;;  %v2172_v32 = vrot.slane %v8708_v49, %v8884_v2  ;;  %v1797_v13 = vsel %vm1695_vm6, %v1796_v33, %v1792_v59  ;;  %v1880_v62 = vrot.slane %v8590_v5, %v8902_v8 }
 0x25f   : > { %v1876_v11 = vsel %vm1695_vm6, %v1875_v36, %v1871_v0  ;;  %v2181_v7 = vrot.slane %v8720_v21, %v8891_v18  ;;  %v2038_v25 = vrot.slane %v8626_v9, %v8902_v8  ;;  %v2029_v20 = vsel %vm1688_vm5, %v2028_v45, %v2024_v50 }
 0x260   : > { %v1959_v48 = vrot.slane %v8662_v35, %v8902_v8  ;;  %v1950_v49 = vsel %vm1688_vm5, %v1949_v57, %v1945_v6  ;;  %v2034_v59 = vsel %vm1695_vm6, %v2033_v14, %v2029_v20  ;;  %v2098_v36 = vsel %vm1674_vm3, %v2097_v39, %v2093_v37  ;;  %v13440_v37 = vld [vmem:[#allocation109_spill] sm:$0xff]  ;;  %v13441_v20 = vld [vmem:[#allocation51_spill] sm:$0xff] }
 0x261   : > { %v9008_v44 = vpop.xlane.xlu0 %1284  ;;  %v1955_v33 = vsel %vm1695_vm6, %v1954_v60, %v1950_v49  ;;  %v2107_v0 = vrot.slane %v8686_v56, %v8894_v43  ;;  %v2103_v50 = vsel %vm1681_vm4, %v2102_v47, %v2098_v36  ;;  %v2177_v45 = vsel %vm1674_vm3, %v2176_v19, %v2172_v32 }
 0x262   : > { %v9017_v30 = vpop.xlane.xlu1 %1287  ;;  %v2186_v57 = vrot.slane %v8722_v12, %v8894_v43  ;;  %v1703_v6 = vsel %vm13183_vm7, %v1701_v28, %v1696_v40  ;;  %v2112_v14 = vrot.slane %v8696_v26, %v8899_v27  ;;  %v2182_v49 = vsel %vm1681_vm4, %v2181_v7, %v2177_v45  ;;  %v13442_v7 = vld [vmem:[#allocation53_spill] sm:$0xff]  ;;  %v13443_v12 = vld [vmem:[#allocation66_spill] sm:$0xff] }
 0x263   : > { %v2191_v60 = vrot.slane %v8732_v53, %v8899_v27  ;;  %v1802_v39 = vsel %vm13183_vm7, %v1801_v34, %v1797_v13  ;;  %v1708_v47 = vrot.slane %v13441_v20, %v13440_v37  ;;  %v1881_v19 = vsel %vm13183_vm7, %v1880_v62, %v1876_v11  ;;  %v13444_v34 = vld [vmem:[#allocation65_spill] sm:$0xff]  ;;  %v13445_v11 = vld [vmem:[#allocation44_spill] sm:$0xff]  ;;  %v13451_v26 = vld [vmem:[#allocation54_spill] sm:$0xff] }
 0x264   : > { %v1960_v32 = vsel %vm13183_vm7, %v1959_v48, %v1955_v33  ;;  %v2039_v36 = vsel %vm13183_vm7, %v2038_v25, %v2034_v59  ;;  %v2108_v40 = vsel %vm1688_vm5, %v2107_v0, %v2103_v50  ;;  %v1806_v45 = vrot.slane %v13442_v7, %v13440_v37  ;;  %v13446_v25 = vld [vmem:[#allocation55_spill] sm:$0xff] }
 0x265   : > { %v9038_v42 = vpop.xlane.xlu0 %1332  ;;  %v2255_v53 = vrot.slane %v13443_v12, %v8877_v24  ;;  %v2251_v13 = vrot.slane %v13444_v34, %v8884_v2  ;;  %v2117_v48 = vrot.slane %v13445_v11, %v8902_v8  ;;  %v2187_v62 = vsel %vm1688_vm5, %v2186_v57, %v2182_v49  ;;  %v13447_v33 = vld [vmem:[#allocation67_spill] sm:$0xff]  ;;  %v13448_v24 = vld [vmem:[#allocation50_spill] sm:$0xff]  ;;  %v13449_v34 = vld [vmem:[#allocation57_spill] sm:$0xff] }
 0x266   : > { %v9045_v21 = vpop.xlane.xlu1 %1335  ;;  %v1885_v59 = vrot.slane %v13446_v25, %v13440_v37  ;;  %v2260_v0 = vrot.slane %v13447_v33, %v8891_v18  ;;  %v2113_v50 = vsel %vm1695_vm6, %v2112_v14, %v2108_v40  ;;  %v2196_v12 = vrot.slane %v13448_v24, %v8902_v8  ;;  %v13450_v11 = vld [vmem:[#allocation52_spill] sm:$0xff]  ;;  %v13452_v18 = vld [vmem:[#allocation59_spill] sm:$0xff]  ;;  %v13475_v25 = vld [vmem:[#allocation78_spill] sm:$0xff] }
 0x267   : > { %v2192_v2 = vsel %vm1695_vm6, %v2191_v60, %v2187_v62  ;;  %v1964_v9 = vrot.slane %v13449_v34, %v13440_v37  ;;  %v1715_v57 = vrot.slane %v13450_v11, %v8913_v29  ;;  %v1710_v49 = vsel %vm13185_vm8, %v1708_v47, %v1703_v6  ;;  %v13453_v60 = vld [vmem:[#allocation56_spill] sm:$0xff]  ;;  %v13456_v47 = vld [vmem:[#allocation58_spill] sm:$0xff] }
 0x268   : > { %v1811_v35 = vrot.slane %v13451_v26, %v8913_v29  ;;  %v2043_v14 = vrot.slane %v13452_v18, %v13440_v37  ;;  %v1807_v24 = vsel %vm13185_vm8, %v1806_v45, %v1802_v39  ;;  %v1890_v62 = vrot.slane %v13453_v60, %v8913_v29  ;;  %v13472_v60 = vld [vmem:[#allocation72_spill] sm:$0xff] }
 0x269   : > { %v9063_v28 = vpop.xlane.xlu0 %1380  ;;  %v2256_v33 = vsel %vm1674_vm3, %v2255_v53, %v2251_v13  ;;  %v2265_v1 = vrot.slane %v13454_v55, %v8894_v43  ;;  %v1886_v6 = vsel %vm13185_vm8, %v1885_v59, %v1881_v19  ;;  %v1969_v5 = vrot.slane %v13456_v47, %v8913_v29  ;;  %v13458_v53 = vld [vmem:[#allocation60_spill] sm:$0xff]  ;;  %v13459_v59 = vld [vmem:[#allocation61_spill] sm:$0xff] }
 0x26a   : > { %v9072_v56 = vpop.xlane.xlu1 %1383  ;;  %v2261_v18 = vsel %vm1681_vm4, %v2260_v0, %v2256_v33  ;;  %v2270_v39 = vrot.slane %v13457_v31, %v8899_v27  ;;  %v1965_v45 = vsel %vm13185_vm8, %v1964_v9, %v1960_v32  ;;  %v2048_v13 = vrot.slane %v13458_v53, %v8913_v29  ;;  %v13461_v9 = vld [vmem:[#allocation63_spill] sm:$0xff]  ;;  %v13462_v31 = vld [vmem:[#allocation70_spill] sm:$0xff] }
 0x26b   : > { %v2118_v43 = vsel %vm13183_vm7, %v2117_v48, %v2113_v50  ;;  %v2197_v55 = vsel %vm13183_vm7, %v2196_v12, %v2192_v2  ;;  %v2044_v19 = vsel %vm13185_vm8, %v2043_v14, %v2039_v36  ;;  %v2122_v47 = vrot.slane %v13459_v59, %v13440_v37  ;;  %v13464_v50 = vld [vmem:[#allocation71_spill] sm:$0xff]  ;;  %v13466_v14 = vld [vmem:[#allocation62_spill] sm:$0xff] }
 0x26c   : > { %v1717_v33 = vsel %vm13184_vm9, %v1715_v57, %v1710_v49  ;;  %v1812_v0 = vsel %vm13184_vm9, %v1811_v35, %v1807_v24  ;;  %v2201_v32 = vrot.slane %v13461_v9, %v13440_v37  ;;  %v2275_v53 = vrot.slane %v13462_v31, %v8902_v8  ;;  %v13465_v35 = vld [vmem:[#allocation73_spill] sm:$0xff]  ;;  %v13467_v8 = vld [vmem:[#allocation75_spill] sm:$0xff] }
 0x26d   : > { %v9094_v40 = vpop.xlane.xlu0 %1428  ;;  %v2266_v48 = vsel %vm1688_vm5, %v2265_v1, %v2261_v18  ;;  %v1891_v12 = vsel %vm13184_vm9, %v1890_v62, %v1886_v6  ;;  %v2280_v57 = vrot.slane %v13464_v50, %v13440_v37  ;;  %v1722_v24 = vrot.slane %v13465_v35, %v8924_v46  ;;  %v13468_v18 = vld [vmem:[#allocation77_spill] sm:$0xff]  ;;  %v13470_v31 = vld [vmem:[#allocation79_spill] sm:$0xff] }
 0x26e   : > { %v9102_v34 = vpop.xlane.xlu1 %1431  ;;  %v2271_v36 = vsel %vm1695_vm6, %v2270_v39, %v2266_v48  ;;  %v1970_v49 = vsel %vm13184_vm9, %v1969_v5, %v1965_v45  ;;  %v2127_v9 = vrot.slane %v13466_v14, %v8913_v29  ;;  %v1816_v1 = vrot.slane %v13467_v8, %v8924_v46  ;;  %v13469_v48 = vld [vmem:[#allocation64_spill] sm:$0xff]  ;;  %v13471_v45 = vld [vmem:[#allocation81_spill] sm:$0xff]  ;;  %v13491_v8 = vld [vmem:[#allocation94_spill] sm:$0xff] }
 0x26f   : > { %13455 = vst [vmem:[#allocation51_spill] sm:$0xff] %v9102_v34  ;;  %v1895_v62 = vrot.slane %v13468_v18, %v8924_v46  ;;  %v2049_v6 = vsel %vm13184_vm9, %v2048_v13, %v2044_v19  ;;  %v2123_v39 = vsel %vm13185_vm8, %v2122_v47, %v2118_v43  ;;  %v2206_v37 = vrot.slane %v13469_v48, %v8913_v29  ;;  %v13473_v43 = vld [vmem:[#allocation74_spill] sm:$0xff] }
 0x270   : > { %v1974_v5 = vrot.slane %v13470_v31, %v8924_v46  ;;  %v2053_v50 = vrot.slane %v13471_v45, %v8924_v46  ;;  %v2202_v59 = vsel %vm13185_vm8, %v2201_v32, %v2197_v55  ;;  %v2285_v18 = vrot.slane %v13472_v60, %v8913_v29  ;;  %v13474_v45 = vld [vmem:[#allocation76_spill] sm:$0xff]  ;;  %v13477_v60 = vld [vmem:[#allocation82_spill] sm:$0xff] }
 0x271   : > { %v9120_v27 = vpop.xlane.xlu0 %1476  ;;  %v2276_v13 = vsel %vm13183_vm7, %v2275_v53, %v2271_v36  ;;  %v1729_v47 = vrot.slane %v13473_v43, %v8927_v54  ;;  %v1724_v31 = vsel %vm13021_vm10, %v1722_v24, %v1717_v33  ;;  %v1821_v26 = vrot.slane %v13474_v45, %v8927_v54  ;;  %v13476_v36 = vld [vmem:[#allocation80_spill] sm:$0xff] }
 0x272   : > { %13460 = vst [vmem:[#allocation53_spill] sm:$0xff] %v9120_v27  ;;  %v9128_v2 = vpop.xlane.xlu1 %1479  ;;  %v2281_v48 = vsel %vm13185_vm8, %v2280_v57, %v2276_v13  ;;  %v1900_v55 = vrot.slane %v13475_v25, %v8927_v54  ;;  %v1817_v32 = vsel %vm13021_vm10, %v1816_v1, %v1812_v0  ;;  %v1896_v53 = vsel %vm13021_vm10, %v1895_v62, %v1891_v12  ;;  %v13478_v13 = vld [vmem:[#allocation83_spill] sm:$0xff]  ;;  %v13479_v12 = vld [vmem:[#allocation85_spill] sm:$0xff] }
 0x273   : > { %13463 = vst [vmem:[#allocation52_spill] sm:$0xff] %v9128_v2  ;;  %v1979_v29 = vrot.slane %v13476_v36, %v8927_v54  ;;  %v2058_v3 = vrot.slane %v13477_v60, %v8927_v54  ;;  %v1975_v57 = vsel %vm13021_vm10, %v1974_v5, %v1970_v49  ;;  %v2054_v33 = vsel %vm13021_vm10, %v2053_v50, %v2049_v6  ;;  %v13480_v50 = vld [vmem:[#allocation87_spill] sm:$0xff] }
 0x274   : > { %v2128_v24 = vsel %vm13184_vm9, %v2127_v9, %v2123_v39  ;;  %v2132_v25 = vrot.slane %v13478_v13, %v8924_v46  ;;  %v2207_v0 = vsel %vm13184_vm9, %v2206_v37, %v2202_v59  ;;  %v2211_v1 = vrot.slane %v13479_v12, %v8924_v46  ;;  %v13481_v9 = vld [vmem:[#allocation89_spill] sm:$0xff]  ;;  %v13482_v37 = vld [vmem:[#allocation91_spill] sm:$0xff] }
 0x275   : > { %v9150_v14 = vpop.xlane.xlu0 %1524  ;;  %v2286_v62 = vsel %vm13184_vm9, %v2285_v18, %v2281_v48  ;;  %v1731_v60 = vsel %vm13013_vm11, %v1729_v47, %v1724_v31  ;;  %v2290_v49 = vrot.slane %v13480_v50, %v8924_v46  ;;  %v1736_v6 = vrot.slane %v13481_v9, %v8932_v61  ;;  %v13483_v12 = vld [vmem:[#allocation93_spill] sm:$0xff]  ;;  %v13484_v47 = vld [vmem:[#allocation84_spill] sm:$0xff] }
 0x276   : > { %v9158_v19 = vpop.xlane.xlu1 %1527  ;;  %v1822_v39 = vsel %vm13013_vm11, %v1821_v26, %v1817_v32  ;;  %v1901_v5 = vsel %vm13013_vm11, %v1900_v55, %v1896_v53  ;;  %v1826_v59 = vrot.slane %v13482_v37, %v8932_v61  ;;  %v1905_v18 = vrot.slane %v13483_v12, %v8932_v61  ;;  %v13485_v26 = vld [vmem:[#allocation95_spill] sm:$0xff]  ;;  %v13486_v55 = vld [vmem:[#allocation97_spill] sm:$0xff]  ;;  %v13487_v12 = vld [vmem:[#allocation86_spill] sm:$0xff] }
 0x277   : > { %v1980_v31 = vsel %vm13013_vm11, %v1979_v29, %v1975_v57  ;;  %v2059_v48 = vsel %vm13013_vm11, %v2058_v3, %v2054_v33  ;;  %v2137_v46 = vrot.slane %v13484_v47, %v8927_v54  ;;  %v2133_v50 = vsel %vm13021_vm10, %v2132_v25, %v2128_v24  ;;  %v13488_v3 = vld [vmem:[#allocation88_spill] sm:$0xff]  ;;  %v13489_v33 = vld [vmem:[#allocation90_spill] sm:$0xff] }
 0x278   : > { %v1984_v32 = vrot.slane %v13485_v26, %v8932_v61  ;;  %v2063_v53 = vrot.slane %v13486_v55, %v8932_v61  ;;  %v2216_v37 = vrot.slane %v13487_v12, %v8927_v54  ;;  %v2212_v29 = vsel %vm13021_vm10, %v2211_v1, %v2207_v0  ;;  %v13490_v55 = vld [vmem:[#allocation92_spill] sm:$0xff] }
 0x279   : > { %v9177_v45 = vpop.xlane.xlu0 %1194  ;;  %v2295_v57 = vrot.slane %v13488_v3, %v8927_v54  ;;  %v1743_v47 = vrot.slane %v13489_v33, %v8935_v41  ;;  %v2291_v24 = vsel %vm13021_vm10, %v2290_v49, %v2286_v62  ;;  %v1738_v26 = vsel %vm13012_vm12, %v1736_v6, %v1731_v60  ;;  %v13492_v54 = vld [vmem:[#allocation96_spill] sm:$0xff]  ;;  %v13493_v33 = vld [vmem:[#allocation98_spill] sm:$0xff] }
 0x27a   : > { %v9184_v36 = vpop.xlane.xlu1 %1197  ;;  %v1831_v43 = vrot.slane %v13490_v55, %v8935_v41  ;;  %v1910_v12 = vrot.slane %v13491_v8, %v8935_v41  ;;  %v1827_v0 = vsel %vm13012_vm12, %v1826_v59, %v1822_v39  ;;  %v1906_v1 = vsel %vm13012_vm12, %v1905_v18, %v1901_v5  ;;  %v13494_v6 = vld [vmem:[#allocation100_spill] sm:$0xff]  ;;  %v13495_v5 = vld [vmem:[#allocation103_spill] sm:$0xff] }
 0x27b   : > { %v1989_v3 = vrot.slane %v13492_v54, %v8935_v41  ;;  %v2068_v35 = vrot.slane %v13493_v33, %v8935_v41  ;;  %v1985_v62 = vsel %vm13012_vm12, %v1984_v32, %v1980_v31  ;;  %v2064_v60 = vsel %vm13012_vm12, %v2063_v53, %v2059_v48  ;;  %v13496_v53 = vld [vmem:[#allocation101_spill] sm:$0xff] }
 0x27c   : > { %v2138_v49 = vsel %vm13013_vm11, %v2137_v46, %v2133_v50  ;;  %v2142_v8 = vrot.slane %v13494_v6, %v8932_v61  ;;  %v2217_v39 = vsel %vm13013_vm11, %v2216_v37, %v2212_v29  ;;  %v2221_v59 = vrot.slane %v13495_v5, %v8932_v61 }
 0x27d   : > { %v9205_v13 = vpop.xlane.xlu0 %1242  ;;  %v2296_v18 = vsel %vm13013_vm11, %v2295_v57, %v2291_v24  ;;  %v1745_v33 = vsel %vm13014_vm13, %v1743_v47, %v1738_v26  ;;  %v2300_v31 = vrot.slane %v8910_v17, %v8932_v61  ;;  %v1750_v46 = vrot.slane %v8949_v15, %v8939_v58 }
 0x27e   : > { %v9214_v25 = vpop.xlane.xlu1 %1245  ;;  %v1832_v50 = vsel %vm13014_vm13, %v1831_v43, %v1827_v0  ;;  %v1911_v48 = vsel %vm13014_vm13, %v1910_v12, %v1906_v1  ;;  %v1836_v37 = vrot.slane %v8979_v63, %v8939_v58  ;;  %v1915_v32 = vrot.slane %v9008_v44, %v8939_v58  ;;  %v13497_v0 = vld [vmem:[#allocation106_spill] sm:$0xff] }
 0x27f   : > { %v1990_v47 = vsel %vm13014_vm13, %v1989_v3, %v1985_v62  ;;  %v2069_v26 = vsel %vm13014_vm13, %v2068_v35, %v2064_v60  ;;  %v2147_v29 = vrot.slane %v13496_v53, %v8935_v41  ;;  %v2143_v57 = vsel %vm13012_vm12, %v2142_v8, %v2138_v49  ;;  %v13498_v35 = vld [vmem:[#allocation112_spill] sm:$0xff]  ;;  %v13499_v53 = vld [vmem:[#allocation119_spill] sm:$0xff] }
 0x280   : > { %v1994_v43 = vrot.slane %v9038_v42, %v8939_v58  ;;  %v2073_v12 = vrot.slane %v9063_v28, %v8939_v58  ;;  %v2226_v1 = vrot.slane %v13497_v0, %v8935_v41  ;;  %v2222_v3 = vsel %vm13012_vm12, %v2221_v59, %v2217_v39 }
 0x281   : > { %v9233_v55 = vpop.xlane.xlu0 %1290  ;;  %v2305_v62 = vrot.slane %v13498_v35, %v8935_v41  ;;  %v1757_v8 = vrot.slane %v8956_v16, %v8942_v51  ;;  %v2301_v49 = vsel %vm13012_vm12, %v2300_v31, %v2296_v18  ;;  %v1752_v61 = vsel %vm1751_vm14, %v1750_v46, %v1745_v33 }
 0x282   : > { %v9240_v54 = vpop.xlane.xlu1 %1293  ;;  %v1841_v17 = vrot.slane %v8987_v4, %v8942_v51  ;;  %v1920_v0 = vrot.slane %v9017_v30, %v8942_v51  ;;  %v1837_v39 = vsel %vm1751_vm14, %v1836_v37, %v1832_v50  ;;  %v1916_v59 = vsel %vm1751_vm14, %v1915_v32, %v1911_v48 }
 0x283   : > { %v1999_v41 = vrot.slane %v9045_v21, %v8942_v51  ;;  %v2078_v35 = vrot.slane %v9072_v56, %v8942_v51  ;;  %v1995_v18 = vsel %vm1751_vm14, %v1994_v43, %v1990_v47  ;;  %v2074_v33 = vsel %vm1751_vm14, %v2073_v12, %v2069_v26 }
 0x284   : > { %v2148_v31 = vsel %vm13014_vm13, %v2147_v29, %v2143_v57  ;;  %v2152_v46 = vrot.slane %v9094_v40, %v8939_v58  ;;  %v2227_v48 = vsel %vm13014_vm13, %v2226_v1, %v2222_v3  ;;  %v2306_v37 = vsel %vm13014_vm13, %v2305_v62, %v2301_v49 }
 0x285   : > { %v9261_v24 = vpop.xlane.xlu0 %1338  ;;  %v1759_v32 = vsel %vm1758_vm15, %v1757_v8, %v1752_v61  ;;  %v1846_v5 = vrot.slane %v9205_v13, %v13499_v53  ;;  %vm13023_vm12 = vcmask 1042434   ;;  %v2231_v26 = vrot.slane %v9120_v27, %v8939_v58 }
 0x286   : > { %v9270_v60 = vpop.xlane.xlu1 %1341  ;;  %v1842_v29 = vsel %vm1758_vm15, %v1841_v17, %v1837_v39  ;;  %v1921_v57 = vsel %vm1758_vm15, %v1920_v0, %v1916_v59  ;;  %v1925_v43 = vrot.slane %v9233_v55, %v13499_v53  ;;  %vm2331_vm11 = vcmask 1043459  }
 0x287   : > { %v1764_v61 = vrot.slane %v9177_v45, %v13499_v53  ;;  %v2000_v12 = vsel %vm1758_vm15, %v1999_v41, %v1995_v18  ;;  %v2004_v1 = vrot.slane %v9261_v24, %v13499_v53  ;;  %v2079_v3 = vsel %vm1758_vm15, %v2078_v35, %v2074_v33 }
 0x288   : > { %vm2333_vm13 = vcmask 1044484   ;;  %v2157_v17 = vrot.slane %v9102_v34, %v8942_v51  ;;  %v2153_v0 = vsel %vm1751_vm14, %v2152_v46, %v2148_v31  ;;  %v1851_v62 = vrot.slane %v9214_v25, %v8965_v52 }
 0x289   : > { %v9289_v50 = vpop.xlane.xlu0 %1386  ;;  %v2236_v41 = vrot.slane %v9128_v2, %v8942_v51  ;;  %v1847_v39 = vsel %vm1765_vm0, %v1846_v5, %v1842_v29  ;;  %v1930_v35 = vrot.slane %v9240_v54, %v8965_v52  ;;  %v2232_v33 = vsel %vm1751_vm14, %v2231_v26, %v2227_v48 }
 0x28a   : > { %v9296_v47 = vpop.xlane.xlu1 %1389  ;;  %v2083_v8 = vrot.slane %v9289_v50, %v13499_v53  ;;  %v1771_v31 = vrot.slane %v9184_v36, %v8965_v52  ;;  %v1926_v46 = vsel %vm1765_vm0, %v1925_v43, %v1921_v57  ;;  %v2009_v2 = vrot.slane %v9270_v60, %v8965_v52 }
 0x28b   : > { %v2310_v5 = vrot.slane %v9150_v14, %v8939_v58  ;;  %v1766_v29 = vsel %vm1765_vm0, %v1764_v61, %v1759_v32  ;;  %v2005_v34 = vsel %vm1765_vm0, %v2004_v1, %v2000_v12  ;;  %v2088_v27 = vrot.slane %v9296_v47, %v8965_v52 }
 0x28c   : > { %v1852_v48 = vsel %vm1772_vm2, %v1851_v62, %v1847_v39  ;;  %v2084_v26 = vsel %vm1765_vm0, %v2083_v8, %v2079_v3  ;;  %v2158_v43 = vsel %vm1758_vm15, %v2157_v17, %v2153_v0  ;;  %v1931_v58 = vsel %vm1772_vm2, %v1930_v35, %v1926_v46 }
 0x28d   : > { %v9317_v49 = vpop.xlane.xlu0 %1434  ;;  %v2237_v12 = vsel %vm1758_vm15, %v2236_v41, %v2232_v33  ;;  %v2315_v3 = vrot.slane %v9158_v19, %v8942_v51  ;;  %v1773_v62 = vsel %vm1772_vm2, %v1771_v31, %v1766_v29  ;;  %v2010_v17 = vsel %vm1772_vm2, %v2009_v2, %v2005_v34 }
 0x28e   : > { %13500 = vst [vmem:[#allocation89_spill] sm:$0xff] %v9317_v49  ;;  %v9324_v59 = vpop.xlane.xlu1 %1437  ;;  %v2162_v18 = vrot.slane %v9317_v49, %v13499_v53  ;;  %v2311_v8 = vsel %vm1751_vm14, %v2310_v5, %v2306_v37  ;;  %v2328_v39 = vsel %vm13022_vm1, %v1852_v48, %v1773_v62  ;;  %v2089_v35 = vsel %vm1772_vm2, %v2088_v27, %v2084_v26 }
 0x28f   : > { %v2167_v57 = vrot.slane %v9324_v59, %v8965_v52  ;;  %vm13182_vm10 = vcmask 1045509   ;;  %vm13181_vm1 = vcmask 1046534  }
 0x290   : > { %v2163_v32 = vsel %vm1765_vm0, %v2162_v18, %v2158_v43  ;;  %v2330_v18 = vsel %vm13023_vm12, %v1931_v58, %v2328_v39  ;;  %v2316_v58 = vsel %vm1758_vm15, %v2315_v3, %v2311_v8  ;;  %vm13180_vm12 = vcmask 1047559   ;;  %v13502_v3 = vld [vmem:[#allocation8_spill] sm:$0xff] }
 0x291   : > { %v9345_v49 = vpop.xlane.xlu0 %1482  ;;  %v2168_v46 = vsel %vm1772_vm2, %v2167_v57, %v2163_v32  ;;  %v2332_v37 = vsel %vm2331_vm11, %v2010_v17, %v2330_v18  ;;  %v7890_v32 = vmov 0   ;;  %v13503_v17 = vld [vmem:[#allocation14_spill] sm:$0xff]  ;;  %v13504_v8 = vld [vmem:[#allocation12_spill] sm:$0xff] }
 0x292   : > { %v9349_v61 = vpop.xlane.xlu1 %1485  ;;  %v2241_v1 = vrot.slane %v9345_v49, %v13499_v53  ;;  %v2334_v5 = vsel %vm2333_vm13, %v2089_v35, %v2332_v37  ;;  %7254 = vset.pattern.permute.xlu0 %v7890_v32  ;;  %7253 = vset.pattern.permute.xlu1 %v7890_v32  ;;  %v13508_v32 = vld [vmem:[#allocation16_spill] sm:$0xff] }
 0x293   : > { %v2246_v0 = vrot.slane %v9349_v61, %v8965_v52  ;;  %v2336_v48 = vsel %vm13182_vm10, %v2168_v46, %v2334_v5  ;;  %v13507_v5 = vld [vmem:[#allocation15_spill] sm:$0xff]  ;;  %vm13807_vm10 = vcmask 654912  }
 0x294   : > { %v2242_v41 = vsel %vm1765_vm0, %v2241_v1, %v2237_v12 }
 0x295   : > { %v9365_v33 = vpop.xlane.xlu0 %1530  ;;  %v2247_v2 = vsel %vm1772_vm2, %v2246_v0, %v2242_v41  ;;  %v13505_v41 = vld [vmem:[#allocation13_spill] sm:$0xff] }
 0x296   : > { %v9368_v31 = vpop.xlane.xlu1 %1533  ;;  %v2320_v34 = vrot.slane %v9365_v33, %v13499_v53  ;;  %v2338_v57 = vsel %vm13181_vm1, %v2247_v2, %v2336_v48  ;;  %v9400_v2 = vsub.s32 1, %v8068_v38  ;;  %vm13805_vm1 = vcmask 589312  }
 0x297   : > { %v2325_v27 = vrot.slane %v9368_v31, %v8965_v52 }
 0x298   : > { %v2321_v29 = vsel %vm1765_vm0, %v2320_v34, %v2316_v58  ;;  %13506 = vst [vmem:[#allocation14_spill] sm:$0xff] %v9400_v2 }
 0x299   : > { %v2326_v26 = vsel %vm1772_vm2, %v2325_v27, %v2321_v29  ;;  %v9383_v12 = vpop.permute.xlu0 %4131 }
 0x29a   : > { %v2340_v43 = vsel %vm13180_vm12, %v2326_v26, %v2338_v57  ;;  %13501 = vst [vmem:[#allocation100_spill] sm:$0xff] %v9383_v12  ;;  %vm13801_vm12 = vcmask 589312  }
 0x29b   : > { %2342 = vmax.xlane.f32.xlu0 %v2340_v43 }
 0x328   : > { %v9385_v1 = vpop.xlane.xlu0 %2342 }
 0x329   : > { %v9389_v62 = vrot.slane %v9385_v1, %v13502_v3 }
 0x32b   : > { %v2386_v0 = vsub.f32 %v13503_v17, %v9389_v62  ;;  %v2385_v39 = vsub.f32 %v13504_v8, %v9389_v62  ;;  %v2395_v35 = vsub.f32 %v13481_v9, %v9389_v62  ;;  %v2387_v18 = vsub.f32 %v13505_v41, %v9389_v62 }
 0x32c   : > { %v2397_v27 = vsub.f32 %v8949_v15, %v9389_v62  ;;  %v2388_v29 = vsub.f32 %v13507_v5, %v9389_v62  ;;  %v9408_v9 = vrot.slane %v9385_v1, %v9400_v2  ;;  %v2399_v26 = vsub.f32 %v9177_v45, %v9389_v62  ;;  %v13511_v45 = vld [vmem:[#allocation18_spill] sm:$0xff] }
 0x32d   : > { %v2515_v46 = vmul.f32 1.442695, %v2386_v0  ;;  %v2513_v34 = vmul.f32 1.442695, %v2385_v39  ;;  %v2533_v37 = vmul.f32 1.442695, %v2395_v35  ;;  %v2389_v43 = vsub.f32 %v8511_v22, %v9389_v62 }
 0x32e   : > { %v2517_v58 = vmul.f32 1.442695, %v2387_v18  ;;  %v2537_v48 = vmul.f32 1.442695, %v2397_v27  ;;  %v2519_v57 = vmul.f32 1.442695, %v2388_v29  ;;  %v2401_v17 = vsub.f32 %v13508_v32, %v9408_v9 }
 0x32f   : > { %7511 = vpow2.f32 %v2515_v46  ;;  %v2541_v15 = vmul.f32 1.442695, %v2399_v26  ;;  %v2521_v0 = vmul.f32 1.442695, %v2389_v43  ;;  %v2390_v8 = vsub.f32 %v8513_v23, %v9389_v62 }
 0x330   : > { %7513 = vpow2.f32 %v2513_v34  ;;  %v2545_v22 = vmul.f32 1.442695, %v2401_v17  ;;  %v2403_v41 = vsub.f32 %v13511_v45, %v9408_v9  ;;  %v2391_v46 = vsub.f32 %v13441_v20, %v9389_v62  ;;  %v13519_v17 = vld [vmem:[#allocation75_spill] sm:$0xff] }
 0x331   : > { %7515 = vpow2.f32 %v2533_v37  ;;  %v2523_v18 = vmul.f32 1.442695, %v2390_v8  ;;  %v2405_v27 = vsub.f32 %v8552_v10, %v9408_v9  ;;  %v2392_v5 = vsub.f32 %v13450_v11, %v9389_v62  ;;  %v13520_v8 = vld [vmem:[#allocation74_spill] sm:$0xff] }
 0x332   : > { %7517 = vpow2.f32 %v2517_v58  ;;  %v2549_v37 = vmul.f32 1.442695, %v2403_v41  ;;  %v2525_v58 = vmul.f32 1.442695, %v2391_v46  ;;  %v2407_v26 = vsub.f32 %v13442_v7, %v9408_v9  ;;  %v13523_v46 = vld [vmem:[#allocation91_spill] sm:$0xff] }
 0x333   : > { %7519 = vpow2.f32 %v2537_v48  ;;  %v2553_v48 = vmul.f32 1.442695, %v2405_v27  ;;  %v2527_v10 = vmul.f32 1.442695, %v2392_v5 }
 0x334   : > { %7521 = vpow2.f32 %v2519_v57  ;;  %v13516_v57 = vld [vmem:[#allocation73_spill] sm:$0xff]  ;;  %v2557_v32 = vmul.f32 1.442695, %v2407_v26 }
 0x335   : > { %7523 = vpow2.f32 %v2541_v15  ;;  %v2393_v43 = vsub.f32 %v13516_v57, %v9389_v62 }
 0x336   : > { %7525 = vpow2.f32 %v2521_v0  ;;  %v2409_v0 = vsub.f32 %v13519_v17, %v9408_v9  ;;  %v2398_v17 = vsub.f32 %v8956_v16, %v9389_v62  ;;  %v2400_v16 = vsub.f32 %v9184_v36, %v9389_v62 }
 0x337   : > { %7527 = vpow2.f32 %v2545_v22  ;;  %v2529_v7 = vmul.f32 1.442695, %v2393_v43  ;;  %v2394_v22 = vsub.f32 %v13520_v8, %v9389_v62  ;;  %v2413_v43 = vsub.f32 %v8979_v63, %v9408_v9 }
 0x338   : > { %7529 = vpow2.f32 %v2523_v18  ;;  %v2561_v18 = vmul.f32 1.442695, %v2409_v0  ;;  %v2415_v63 = vsub.f32 %v9205_v13, %v9408_v9  ;;  %v2543_v13 = vmul.f32 1.442695, %v2400_v16 }
 0x339   : > { %v9418_v39 = vpop.eup %7511  ;;  %7531 = vpow2.f32 %v2549_v37  ;;  %v2411_v37 = vsub.f32 %v13523_v46, %v9408_v9  ;;  %v2531_v27 = vmul.f32 1.442695, %v2394_v22  ;;  %v2569_v22 = vmul.f32 1.442695, %v2413_v43 }
 0x33a   : > { %13509 = vst [vmem:[#allocation12_spill] sm:$0xff] %v9418_v39  ;;  %v9420_v35 = vpop.eup %7513  ;;  %2901 = vperm.xlu0 %7254, %v9418_v39   ;;  %7533 = vpow2.f32 %v2525_v58  ;;  %v13524_v58 = vld [vmem:[#allocation90_spill] sm:$0xff] }
 0x33b   : > { %13510 = vst [vmem:[#allocation13_spill] sm:$0xff] %v9420_v35  ;;  %2898 = vperm.xlu1 %7253, %v9420_v35   ;;  %v9428_v34 = vpop.eup %7515  ;;  %7535 = vpow2.f32 %v2553_v48  ;;  %v2396_v5 = vsub.f32 %v13524_v58, %v9389_v62  ;;  %v2565_v57 = vmul.f32 1.442695, %v2411_v37  ;;  %v13532_v58 = vld [vmem:[#allocation21_spill] sm:$0xff] }
 0x33c   : > { %13512 = vst [vmem:[#allocation15_spill] sm:$0xff] %v9428_v34  ;;  %v9430_v23 = vpop.eup %7517  ;;  %7537 = vpow2.f32 %v2527_v10  ;;  %v9474_v10 = vsub.s32 2, %v8068_v38 }
 0x33d   : > { %13513 = vst [vmem:[#allocation16_spill] sm:$0xff] %v9430_v23  ;;  %v9438_v29 = vpop.eup %7519  ;;  %7539 = vpow2.f32 %v2557_v32  ;;  %v2535_v32 = vmul.f32 1.442695, %v2396_v5 }
 0x33e   : > { %2928 = vperm.xlu0 %7254, %v9428_v34   ;;  %13514 = vst [vmem:[#allocation18_spill] sm:$0xff] %v9438_v29  ;;  %v9440_v20 = vpop.eup %7521  ;;  %7541 = vpow2.f32 %v2529_v7  ;;  %13527 = vst [vmem:[#allocation123_spill] sm:$0xff] %v9474_v10  ;;  %v9488_v8 = vrot.slane %v9385_v1, %v9474_v10 }
 0x33f   : > { %2904 = vperm.xlu1 %7253, %v9430_v23   ;;  %13515 = vst [vmem:[#allocation121_spill] sm:$0xff] %v9440_v20  ;;  %v9448_v15 = vpop.eup %7523  ;;  %7543 = vpow2.f32 %v2561_v18  ;;  %v2539_v18 = vmul.f32 1.442695, %v2398_v17  ;;  %v13536_v17 = vld [vmem:[#allocation23_spill] sm:$0xff] }
 0x340   : > { %13517 = vst [vmem:[#allocation73_spill] sm:$0xff] %v9448_v15  ;;  %v9450_v11 = vpop.eup %7525  ;;  %7545 = vpow2.f32 %v2531_v27  ;;  %v2573_v27 = vmul.f32 1.442695, %v2415_v63  ;;  %v2417_v5 = vsub.f32 %v13532_v58, %v9488_v8 }
 0x341   : > { %13518 = vst [vmem:[#allocation122_spill] sm:$0xff] %v9450_v11  ;;  %v9458_v45 = vpop.eup %7527  ;;  %7547 = vpow2.f32 %v2565_v57  ;;  %v13533_v57 = vld [vmem:[#allocation17_spill] sm:$0xff] }
 0x342   : > { %2934 = vperm.xlu0 %7254, %v9438_v29   ;;  %13521 = vst [vmem:[#allocation75_spill] sm:$0xff] %v9458_v45  ;;  %v9460_v41 = vpop.eup %7529  ;;  %7549 = vpow2.f32 %v2535_v32  ;;  %v2402_v43 = vsub.f32 %v13533_v57, %v9408_v9  ;;  %v2577_v62 = vmul.f32 1.442695, %v2417_v5 }
 0x343   : > { %2907 = vperm.xlu1 %7253, %v9440_v20   ;;  %13522 = vst [vmem:[#allocation74_spill] sm:$0xff] %v9460_v41  ;;  %v9468_v48 = vpop.eup %7531  ;;  %7551 = vpow2.f32 %v2569_v22  ;;  %v2419_v22 = vsub.f32 %v13536_v17, %v9488_v8 }
 0x344   : > { %13525 = vst [vmem:[#allocation91_spill] sm:$0xff] %v9468_v48  ;;  %v9470_v26 = vpop.eup %7533  ;;  %7553 = vpow2.f32 %v2539_v18  ;;  %v2547_v63 = vmul.f32 1.442695, %v2402_v43  ;;  %v13537_v18 = vld [vmem:[#allocation19_spill] sm:$0xff] }
 0x345   : > { %13526 = vst [vmem:[#allocation90_spill] sm:$0xff] %v9470_v26  ;;  %v9481_v0 = vpop.eup %7535  ;;  %7555 = vpow2.f32 %v2573_v27  ;;  %v2404_v16 = vsub.f32 %v13537_v18, %v9408_v9  ;;  %v2581_v10 = vmul.f32 1.442695, %v2419_v22  ;;  %v13540_v27 = vld [vmem:[#allocation25_spill] sm:$0xff] }
 0x346   : > { %2940 = vperm.xlu0 %7254, %v9448_v15   ;;  %13528 = vst [vmem:[#allocation124_spill] sm:$0xff] %v9481_v0  ;;  %v9483_v7 = vpop.eup %7537  ;;  %7557 = vpow2.f32 %v2543_v13  ;;  %v2421_v5 = vsub.f32 %v13540_v27, %v9488_v8  ;;  %v13541_v13 = vld [vmem:[#allocation20_spill] sm:$0xff] }
 0x347   : > { %2910 = vperm.xlu1 %7253, %v9450_v11   ;;  %13529 = vst [vmem:[#allocation125_spill] sm:$0xff] %v9483_v7  ;;  %v9495_v46 = vpop.eup %7539  ;;  %7559 = vpow2.f32 %v2577_v62  ;;  %v2551_v17 = vmul.f32 1.442695, %v2404_v16  ;;  %v2406_v43 = vsub.f32 %v13541_v13, %v9408_v9  ;;  %v13544_v62 = vld [vmem:[#allocation55_spill] sm:$0xff] }
 0x348   : > { %13530 = vst [vmem:[#allocation126_spill] sm:$0xff] %v9495_v46  ;;  %v9497_v37 = vpop.eup %7541  ;;  %7561 = vpow2.f32 %v2547_v63  ;;  %v2423_v22 = vsub.f32 %v13544_v62, %v9488_v8  ;;  %v13545_v63 = vld [vmem:[#allocation54_spill] sm:$0xff] }
 0x349   : > { %13531 = vst [vmem:[#allocation127_spill] sm:$0xff] %v9497_v37  ;;  %v9505_v32 = vpop.eup %7543  ;;  %7563 = vpow2.f32 %v2581_v10  ;;  %v2555_v27 = vmul.f32 1.442695, %v2406_v43  ;;  %v2408_v16 = vsub.f32 %v13545_v63, %v9408_v9  ;;  %v13548_v10 = vld [vmem:[#allocation77_spill] sm:$0xff] }
 0x34a   : > { %2946 = vperm.xlu0 %7254, %v9458_v45   ;;  %13534 = vst [vmem:[#allocation21_spill] sm:$0xff] %v9505_v32  ;;  %v9507_v36 = vpop.eup %7545  ;;  %7565 = vpow2.f32 %v2551_v17  ;;  %v13549_v17 = vld [vmem:[#allocation76_spill] sm:$0xff] }
 0x34b   : > { %2913 = vperm.xlu1 %7253, %v9460_v41   ;;  %13535 = vst [vmem:[#allocation17_spill] sm:$0xff] %v9507_v36  ;;  %v9515_v58 = vpop.eup %7547  ;;  %v2559_v62 = vmul.f32 1.442695, %v2408_v16  ;;  %v2410_v43 = vsub.f32 %v13549_v17, %v9408_v9 }
 0x34c   : > { %13538 = vst [vmem:[#allocation23_spill] sm:$0xff] %v9515_v58  ;;  %v9517_v57 = vpop.eup %7549 }
 0x34d   : > { %13539 = vst [vmem:[#allocation19_spill] sm:$0xff] %v9517_v57 }
 0x34e   : > { %2952 = vperm.xlu0 %7254, %v9468_v48  }
 0x34f   : > { %2916 = vperm.xlu1 %7253, %v9470_v26  }
 0x352   : > { %2958 = vperm.xlu0 %7254, %v9481_v0  }
 0x353   : > { %2919 = vperm.xlu1 %7253, %v9483_v7  }
 0x356   : > { %2964 = vperm.xlu0 %7254, %v9495_v46  }
 0x357   : > { %2922 = vperm.xlu1 %7253, %v9497_v37  }
 0x35a   : > { %2970 = vperm.xlu0 %7254, %v9505_v32   ;;  %v9525_v32 = vpop.eup %7551 }
 0x35b   : > { %2925 = vperm.xlu1 %7253, %v9507_v36   ;;  %13542 = vst [vmem:[#allocation25_spill] sm:$0xff] %v9525_v32  ;;  %v9527_v18 = vpop.eup %7553 }
 0x35c   : > { %13543 = vst [vmem:[#allocation20_spill] sm:$0xff] %v9527_v18  ;;  %v9535_v46 = vpop.eup %7555 }
 0x35d   : > { %13546 = vst [vmem:[#allocation55_spill] sm:$0xff] %v9535_v46  ;;  %v9537_v13 = vpop.eup %7557 }
 0x35e   : > { %2976 = vperm.xlu0 %7254, %v9515_v58   ;;  %v2585_v58 = vmul.f32 1.442695, %v2421_v5  ;;  %13547 = vst [vmem:[#allocation54_spill] sm:$0xff] %v9537_v13  ;;  %v2425_v5 = vsub.f32 %v13548_v10, %v9488_v8  ;;  %v9545_v0 = vpop.eup %7559  ;;  %v2563_v10 = vmul.f32 1.442695, %v2410_v43  ;;  %v2414_v43 = vsub.f32 %v8987_v4, %v9408_v9 }
 0x35f   : > { %2931 = vperm.xlu1 %7253, %v9517_v57   ;;  %13550 = vst [vmem:[#allocation77_spill] sm:$0xff] %v9545_v0  ;;  %v9547_v63 = vpop.eup %7561  ;;  %v2416_v4 = vsub.f32 %v9214_v25, %v9408_v9 }
 0x360   : > { %7567 = vpow2.f32 %v2585_v58  ;;  %13551 = vst [vmem:[#allocation76_spill] sm:$0xff] %v9547_v63  ;;  %v13552_v58 = vld [vmem:[#allocation93_spill] sm:$0xff]  ;;  %v9555_v48 = vpop.eup %7563 }
 0x361   : > { %7569 = vpow2.f32 %v2555_v27  ;;  %v13553_v27 = vld [vmem:[#allocation92_spill] sm:$0xff]  ;;  %13554 = vst [vmem:[#allocation93_spill] sm:$0xff] %v9555_v48  ;;  %v9557_v17 = vpop.eup %7565 }
 0x362   : > { %2982 = vperm.xlu0 %7254, %v9525_v32   ;;  %v2589_v32 = vmul.f32 1.442695, %v2423_v22  ;;  %v2427_v22 = vsub.f32 %v13552_v58, %v9488_v8  ;;  %v2412_v16 = vsub.f32 %v13553_v27, %v9408_v9  ;;  %13555 = vst [vmem:[#allocation92_spill] sm:$0xff] %v9557_v17 }
 0x363   : > { %2937 = vperm.xlu1 %7253, %v9527_v18  }
 0x364   : > { %7571 = vpow2.f32 %v2589_v32  ;;  %v2597_v32 = vmul.f32 1.442695, %v2427_v22  ;;  %v2571_v22 = vmul.f32 1.442695, %v2414_v43 }
 0x365   : > { %7573 = vpow2.f32 %v2559_v62  ;;  %v2567_v62 = vmul.f32 1.442695, %v2412_v16 }
 0x366   : > { %2988 = vperm.xlu0 %7254, %v9535_v46   ;;  %v2593_v46 = vmul.f32 1.442695, %v2425_v5  ;;  %v2429_v5 = vsub.f32 %v9008_v44, %v9488_v8  ;;  %v2431_v44 = vsub.f32 %v9233_v55, %v9488_v8  ;;  %v2575_v55 = vmul.f32 1.442695, %v2416_v4 }
 0x367   : > { %2943 = vperm.xlu1 %7253, %v9537_v13  }
 0x368   : > { %7575 = vpow2.f32 %v2593_v46  ;;  %v2601_v46 = vmul.f32 1.442695, %v2429_v5 }
 0x369   : > { %7577 = vpow2.f32 %v2563_v10 }
 0x36a   : > { %2994 = vperm.xlu0 %7254, %v9545_v0   ;;  %v9561_v0 = vsub.s32 3, %v8068_v38  ;;  %v9568_v58 = vpop.eup %7567  ;;  %7579 = vpow2.f32 %v2597_v32  ;;  %v13561_v32 = vld [vmem:[#allocation33_spill] sm:$0xff] }
 0x36b   : > { %2949 = vperm.xlu1 %7253, %v9547_v63   ;;  %13557 = vst [vmem:[#allocation129_spill] sm:$0xff] %v9568_v58  ;;  %v9570_v27 = vpop.eup %7569  ;;  %7581 = vpow2.f32 %v2567_v62  ;;  %v13562_v62 = vld [vmem:[#allocation22_spill] sm:$0xff] }
 0x36c   : > { %13556 = vst [vmem:[#allocation128_spill] sm:$0xff] %v9561_v0  ;;  %13558 = vst [vmem:[#allocation130_spill] sm:$0xff] %v9570_v27  ;;  %7583 = vpow2.f32 %v2601_v46  ;;  %v2418_v43 = vsub.f32 %v13562_v62, %v9488_v8  ;;  %v13565_v46 = vld [vmem:[#allocation35_spill] sm:$0xff] }
 0x36d   : > { %7585 = vpow2.f32 %v2571_v22  ;;  %v13566_v22 = vld [vmem:[#allocation24_spill] sm:$0xff] }
 0x36e   : > { %3000 = vperm.xlu0 %7254, %v9555_v48   ;;  %v9575_v48 = vrot.slane %v9385_v1, %v9561_v0  ;;  %v9582_v10 = vpop.eup %7571  ;;  %v2605_v0 = vmul.f32 1.442695, %v2431_v44  ;;  %v2420_v4 = vsub.f32 %v13566_v22, %v9488_v8 }
 0x36f   : > { %2955 = vperm.xlu1 %7253, %v9557_v17   ;;  %13559 = vst [vmem:[#allocation131_spill] sm:$0xff] %v9582_v10  ;;  %v9584_v16 = vpop.eup %7573 }
 0x370   : > { %13560 = vst [vmem:[#allocation132_spill] sm:$0xff] %v9584_v16  ;;  %v2433_v5 = vsub.f32 %v13561_v32, %v9575_v48  ;;  %7587 = vpow2.f32 %v2605_v0  ;;  %v2435_v44 = vsub.f32 %v13565_v46, %v9575_v48  ;;  %v2579_v32 = vmul.f32 1.442695, %v2418_v43  ;;  %v13569_v0 = vld [vmem:[#allocation37_spill] sm:$0xff] }
 0x371   : > { %7589 = vpow2.f32 %v2575_v55  ;;  %v2583_v46 = vmul.f32 1.442695, %v2420_v4  ;;  %v13570_v55 = vld [vmem:[#allocation26_spill] sm:$0xff] }
 0x372   : > { %3006 = vperm.xlu0 %7254, %v9568_v58   ;;  %v9592_v58 = vpop.eup %7575  ;;  %v2609_v9 = vmul.f32 1.442695, %v2433_v5  ;;  %v2437_v5 = vsub.f32 %v13569_v0, %v9575_v48  ;;  %v2422_v43 = vsub.f32 %v13570_v55, %v9488_v8 }
 0x373   : > { %2961 = vperm.xlu1 %7253, %v9570_v27   ;;  %13563 = vst [vmem:[#allocation33_spill] sm:$0xff] %v9592_v58  ;;  %v9594_v25 = vpop.eup %7577 }
 0x374   : > { %13564 = vst [vmem:[#allocation22_spill] sm:$0xff] %v9594_v25  ;;  %7591 = vpow2.f32 %v2609_v9  ;;  %v13573_v9 = vld [vmem:[#allocation57_spill] sm:$0xff]  ;;  %v2587_v0 = vmul.f32 1.442695, %v2422_v43 }
 0x375   : > { %7593 = vpow2.f32 %v2579_v32  ;;  %v13574_v32 = vld [vmem:[#allocation56_spill] sm:$0xff] }
 0x376   : > { %3012 = vperm.xlu0 %7254, %v9582_v10   ;;  %v9602_v10 = vpop.eup %7579  ;;  %v2424_v4 = vsub.f32 %v13574_v32, %v9488_v8 }
 0x377   : > { %2967 = vperm.xlu1 %7253, %v9584_v16   ;;  %13567 = vst [vmem:[#allocation35_spill] sm:$0xff] %v9602_v10  ;;  %v9604_v62 = vpop.eup %7581 }
 0x378   : > { %13568 = vst [vmem:[#allocation24_spill] sm:$0xff] %v9604_v62 }
 0x37a   : > { %3018 = vperm.xlu0 %7254, %v9592_v58   ;;  %v2613_v58 = vmul.f32 1.442695, %v2435_v44  ;;  %v2439_v44 = vsub.f32 %v13573_v9, %v9575_v48  ;;  %v2591_v9 = vmul.f32 1.442695, %v2424_v4 }
 0x37b   : > { %2973 = vperm.xlu1 %7253, %v9594_v25   ;;  %v9612_v25 = vpop.eup %7583 }
 0x37c   : > { %13571 = vst [vmem:[#allocation37_spill] sm:$0xff] %v9612_v25  ;;  %v9614_v22 = vpop.eup %7585  ;;  %7595 = vpow2.f32 %v2613_v58  ;;  %v13577_v58 = vld [vmem:[#allocation79_spill] sm:$0xff] }
 0x37d   : > { %13572 = vst [vmem:[#allocation26_spill] sm:$0xff] %v9614_v22  ;;  %7597 = vpow2.f32 %v2583_v46  ;;  %v13578_v46 = vld [vmem:[#allocation78_spill] sm:$0xff] }
 0x37e   : > { %3024 = vperm.xlu0 %7254, %v9602_v10   ;;  %v2617_v10 = vmul.f32 1.442695, %v2437_v5  ;;  %v2441_v5 = vsub.f32 %v13577_v58, %v9575_v48  ;;  %v2426_v43 = vsub.f32 %v13578_v46, %v9488_v8 }
 0x37f   : > { %2979 = vperm.xlu1 %7253, %v9604_v62   ;;  %v9622_v62 = vpop.eup %7587 }
 0x380   : > { %13575 = vst [vmem:[#allocation57_spill] sm:$0xff] %v9622_v62  ;;  %v9624_v55 = vpop.eup %7589  ;;  %7599 = vpow2.f32 %v2617_v10  ;;  %v13581_v10 = vld [vmem:[#allocation95_spill] sm:$0xff]  ;;  %v2595_v58 = vmul.f32 1.442695, %v2426_v43  ;;  %v2430_v43 = vsub.f32 %v9017_v30, %v9488_v8 }
 0x381   : > { %13576 = vst [vmem:[#allocation56_spill] sm:$0xff] %v9624_v55  ;;  %7601 = vpow2.f32 %v2587_v0  ;;  %v13582_v0 = vld [vmem:[#allocation94_spill] sm:$0xff] }
 0x382   : > { %3030 = vperm.xlu0 %7254, %v9612_v25   ;;  %v2621_v25 = vmul.f32 1.442695, %v2439_v44  ;;  %v2443_v44 = vsub.f32 %v13581_v10, %v9575_v48  ;;  %v2428_v4 = vsub.f32 %v13582_v0, %v9488_v8  ;;  %v2603_v30 = vmul.f32 1.442695, %v2430_v43 }
 0x383   : > { %2985 = vperm.xlu1 %7253, %v9614_v22   ;;  %v9632_v22 = vpop.eup %7591 }
 0x384   : > { %13579 = vst [vmem:[#allocation79_spill] sm:$0xff] %v9632_v22  ;;  %v9634_v32 = vpop.eup %7593  ;;  %7603 = vpow2.f32 %v2621_v25  ;;  %v2629_v25 = vmul.f32 1.442695, %v2443_v44  ;;  %v2447_v44 = vsub.f32 %v9261_v24, %v9575_v48 }
 0x385   : > { %13580 = vst [vmem:[#allocation78_spill] sm:$0xff] %v9634_v32  ;;  %7605 = vpow2.f32 %v2591_v9  ;;  %v2599_v9 = vmul.f32 1.442695, %v2428_v4 }
 0x386   : > { %3036 = vperm.xlu0 %7254, %v9622_v62   ;;  %v2625_v62 = vmul.f32 1.442695, %v2441_v5  ;;  %v2445_v5 = vsub.f32 %v9038_v42, %v9575_v48 }
 0x387   : > { %2991 = vperm.xlu1 %7253, %v9624_v55   ;;  %v9642_v55 = vpop.eup %7595 }
 0x388   : > { %13583 = vst [vmem:[#allocation95_spill] sm:$0xff] %v9642_v55  ;;  %v9644_v46 = vpop.eup %7597  ;;  %7607 = vpow2.f32 %v2625_v62  ;;  %v2633_v42 = vmul.f32 1.442695, %v2445_v5 }
 0x389   : > { %13584 = vst [vmem:[#allocation94_spill] sm:$0xff] %v9644_v46  ;;  %7609 = vpow2.f32 %v2595_v58  ;;  %v2432_v58 = vsub.f32 %v9240_v54, %v9488_v8 }
 0x38a   : > { %3042 = vperm.xlu0 %7254, %v9632_v22   ;;  %v9648_v22 = vsub.s32 4, %v8068_v38  ;;  %v9655_v10 = vpop.eup %7599  ;;  %7611 = vpow2.f32 %v2629_v25  ;;  %v13591_v25 = vld [vmem:[#allocation27_spill] sm:$0xff] }
 0x38b   : > { %2997 = vperm.xlu1 %7253, %v9634_v32   ;;  %13586 = vst [vmem:[#allocation134_spill] sm:$0xff] %v9655_v10  ;;  %v9657_v0 = vpop.eup %7601  ;;  %7613 = vpow2.f32 %v2599_v9  ;;  %v2607_v24 = vmul.f32 1.442695, %v2432_v58  ;;  %v13593_v9 = vld [vmem:[#allocation34_spill] sm:$0xff] }
 0x38c   : > { %13585 = vst [vmem:[#allocation133_spill] sm:$0xff] %v9648_v22  ;;  %13587 = vst [vmem:[#allocation135_spill] sm:$0xff] %v9657_v0  ;;  %v9664_v62 = vrot.slane %v9385_v1, %v9648_v22  ;;  %7615 = vpow2.f32 %v2633_v42  ;;  %v2637_v22 = vmul.f32 1.442695, %v2447_v44  ;;  %v2434_v54 = vsub.f32 %v13593_v9, %v9575_v48  ;;  %v13596_v44 = vld [vmem:[#allocation29_spill] sm:$0xff] }
 0x38d   : > { %7617 = vpow2.f32 %v2603_v30  ;;  %v13597_v30 = vld [vmem:[#allocation36_spill] sm:$0xff] }
 0x38e   : > { %3048 = vperm.xlu0 %7254, %v9642_v55   ;;  %v9659_v55 = vpop.permute.xlu1 %4111  ;;  %v9671_v4 = vpop.eup %7603  ;;  %v2449_v5 = vsub.f32 %v13591_v25, %v9664_v62  ;;  %7619 = vpow2.f32 %v2637_v22  ;;  %v2451_v25 = vsub.f32 %v13596_v44, %v9664_v62  ;;  %v2436_v58 = vsub.f32 %v13597_v30, %v9575_v48 }
 0x38f   : > { %3003 = vperm.xlu1 %7253, %v9644_v46   ;;  %13588 = vst [vmem:[#allocation136_spill] sm:$0xff] %v9659_v55  ;;  %13589 = vst [vmem:[#allocation137_spill] sm:$0xff] %v9671_v4  ;;  %v9673_v46 = vpop.eup %7605  ;;  %7621 = vpow2.f32 %v2607_v24 }
 0x390   : > { %13590 = vst [vmem:[#allocation138_spill] sm:$0xff] %v9673_v46  ;;  %v2641_v42 = vmul.f32 1.442695, %v2449_v5  ;;  %v2645_v22 = vmul.f32 1.442695, %v2451_v25  ;;  %v13601_v5 = vld [vmem:[#allocation31_spill] sm:$0xff] }
 0x391   : > { %v2453_v44 = vsub.f32 %v13601_v5, %v9664_v62  ;;  %v2615_v24 = vmul.f32 1.442695, %v2436_v58  ;;  %v13607_v58 = vld [vmem:[#allocation58_spill] sm:$0xff] }
 0x392   : > { %3054 = vperm.xlu0 %7254, %v9655_v10   ;;  %v9679_v10 = vpop.permute.xlu1 %4115  ;;  %v9683_v8 = vpop.eup %7607  ;;  %7623 = vpow2.f32 %v2641_v42  ;;  %v13605_v42 = vld [vmem:[#allocation59_spill] sm:$0xff]  ;;  %v2440_v5 = vsub.f32 %v13607_v58, %v9575_v48 }
 0x393   : > { %3009 = vperm.xlu1 %7253, %v9657_v0   ;;  %13592 = vst [vmem:[#allocation27_spill] sm:$0xff] %v9679_v10  ;;  %13594 = vst [vmem:[#allocation34_spill] sm:$0xff] %v9683_v8  ;;  %v9685_v43 = vpop.eup %7609  ;;  %v2455_v25 = vsub.f32 %v13605_v42, %v9664_v62 }
 0x394   : > { %13595 = vst [vmem:[#allocation139_spill] sm:$0xff] %v9685_v43 }
 0x396   : > { %3060 = vperm.xlu0 %7254, %v9671_v4   ;;  %v2611_v4 = vmul.f32 1.442695, %v2434_v54  ;;  %v9697_v0 = vpop.permute.xlu1 %4119  ;;  %v13602_v54 = vld [vmem:[#allocation38_spill] sm:$0xff] }
 0x397   : > { %3015 = vperm.xlu1 %7253, %v9673_v46   ;;  %v9693_v46 = vpop.eup %7611  ;;  %13600 = vst [vmem:[#allocation140_spill] sm:$0xff] %v9697_v0  ;;  %v2438_v30 = vsub.f32 %v13602_v54, %v9575_v48 }
 0x398   : > { %13598 = vst [vmem:[#allocation29_spill] sm:$0xff] %v9693_v46  ;;  %v9695_v9 = vpop.eup %7613  ;;  %7625 = vpow2.f32 %v2611_v4 }
 0x399   : > { %13599 = vst [vmem:[#allocation36_spill] sm:$0xff] %v9695_v9  ;;  %7627 = vpow2.f32 %v2645_v22  ;;  %v2619_v4 = vmul.f32 1.442695, %v2438_v30  ;;  %v2653_v22 = vmul.f32 1.442695, %v2455_v25  ;;  %v13615_v25 = vld [vmem:[#allocation97_spill] sm:$0xff] }
 0x39a   : > { %3066 = vperm.xlu0 %7254, %v9683_v8   ;;  %v9705_v8 = vpop.eup %7615  ;;  %7629 = vpow2.f32 %v2615_v24  ;;  %v13611_v24 = vld [vmem:[#allocation80_spill] sm:$0xff] }
 0x39b   : > { %3021 = vperm.xlu1 %7253, %v9685_v43   ;;  %13603 = vst [vmem:[#allocation31_spill] sm:$0xff] %v9705_v8  ;;  %v9707_v43 = vpop.eup %7617  ;;  %v2442_v30 = vsub.f32 %v13611_v24, %v9575_v48 }
 0x39c   : > { %13604 = vst [vmem:[#allocation38_spill] sm:$0xff] %v9707_v43  ;;  %v9717_v54 = vpop.eup %7619 }
 0x39d   : > { %13608 = vst [vmem:[#allocation58_spill] sm:$0xff] %v9717_v54  ;;  %v9719_v32 = vpop.eup %7621 }
 0x39e   : > { %3072 = vperm.xlu0 %7254, %v9693_v46   ;;  %v2649_v46 = vmul.f32 1.442695, %v2453_v44  ;;  %13609 = vst [vmem:[#allocation141_spill] sm:$0xff] %v9719_v32  ;;  %v13610_v44 = vld [vmem:[#allocation81_spill] sm:$0xff] }
 0x39f   : > { %3027 = vperm.xlu1 %7253, %v9695_v9   ;;  %v9713_v9 = vpop.permute.xlu1 %4123  ;;  %v2457_v42 = vsub.f32 %v13610_v44, %v9664_v62  ;;  %v2459_v44 = vsub.f32 %v13615_v25, %v9664_v62  ;;  %v2446_v25 = vsub.f32 %v9045_v21, %v9575_v48  ;;  %v2448_v21 = vsub.f32 %v9270_v60, %v9575_v48 }
 0x3a0   : > { %13606 = vst [vmem:[#allocation59_spill] sm:$0xff] %v9713_v9  ;;  %7631 = vpow2.f32 %v2649_v46 }
 0x3a1   : > { %7633 = vpow2.f32 %v2619_v4  ;;  %v2657_v46 = vmul.f32 1.442695, %v2457_v42  ;;  %v2627_v4 = vmul.f32 1.442695, %v2442_v30 }
 0x3a2   : > { %3078 = vperm.xlu0 %7254, %v9705_v8   ;;  %v2623_v8 = vmul.f32 1.442695, %v2440_v5  ;;  %7635 = vpow2.f32 %v2653_v22  ;;  %v13616_v5 = vld [vmem:[#allocation96_spill] sm:$0xff]  ;;  %v2661_v22 = vmul.f32 1.442695, %v2459_v44  ;;  %v2463_v44 = vsub.f32 %v9289_v50, %v9664_v62 }
 0x3a3   : > { %3033 = vperm.xlu1 %7253, %v9707_v43   ;;  %v9727_v43 = vpop.eup %7623  ;;  %v9731_v16 = vpop.permute.xlu1 %4127  ;;  %v2444_v24 = vsub.f32 %v13616_v5, %v9575_v48 }
 0x3a4   : > { %13612 = vst [vmem:[#allocation81_spill] sm:$0xff] %v9727_v43  ;;  %v9729_v58 = vpop.eup %7625  ;;  %13614 = vst [vmem:[#allocation142_spill] sm:$0xff] %v9731_v16  ;;  %7637 = vpow2.f32 %v2623_v8  ;;  %v2461_v8 = vsub.f32 %v9063_v28, %v9664_v62 }
 0x3a5   : > { %13613 = vst [vmem:[#allocation80_spill] sm:$0xff] %v9729_v58  ;;  %7639 = vpow2.f32 %v2657_v46  ;;  %v2631_v30 = vmul.f32 1.442695, %v2444_v24 }
 0x3a6   : > { %3084 = vperm.xlu0 %7254, %v9717_v54   ;;  %v9739_v54 = vpop.eup %7627  ;;  %7641 = vpow2.f32 %v2627_v4  ;;  %v2665_v28 = vmul.f32 1.442695, %v2461_v8  ;;  %v2635_v4 = vmul.f32 1.442695, %v2446_v25  ;;  %v13626_v8 = vld [vmem:[#allocation39_spill] sm:$0xff]  ;;  %v13627_v25 = vld [vmem:[#allocation28_spill] sm:$0xff] }
 0x3a7   : > { %3039 = vperm.xlu1 %7253, %v9719_v32   ;;  %13617 = vst [vmem:[#allocation97_spill] sm:$0xff] %v9739_v54  ;;  %v9741_v32 = vpop.eup %7629  ;;  %v9750_v42 = vpop.permute.xlu1 %4135  ;;  %7643 = vpow2.f32 %v2661_v22  ;;  %v2669_v22 = vmul.f32 1.442695, %v2463_v44  ;;  %v2450_v60 = vsub.f32 %v13627_v25, %v9664_v62  ;;  %v13630_v44 = vld [vmem:[#allocation41_spill] sm:$0xff] }
 0x3a8   : > { %13618 = vst [vmem:[#allocation96_spill] sm:$0xff] %v9741_v32  ;;  %13620 = vst [vmem:[#allocation144_spill] sm:$0xff] %v9750_v42  ;;  %7645 = vpow2.f32 %v2631_v30  ;;  %v2639_v30 = vmul.f32 1.442695, %v2448_v21 }
 0x3a9   : > { %7647 = vpow2.f32 %v2665_v28  ;;  %v2643_v21 = vmul.f32 1.442695, %v2450_v60 }
 0x3aa   : > { %3090 = vperm.xlu0 %7254, %v9727_v43   ;;  %v9745_v43 = vsub.s32 5, %v8068_v38  ;;  %v9754_v5 = vpop.eup %7631  ;;  %7649 = vpow2.f32 %v2635_v4 }
 0x3ab   : > { %3045 = vperm.xlu1 %7253, %v9729_v58   ;;  %13621 = vst [vmem:[#allocation145_spill] sm:$0xff] %v9754_v5  ;;  %7651 = vpow2.f32 %v2669_v22 }
 0x3ac   : > { %13619 = vst [vmem:[#allocation143_spill] sm:$0xff] %v9745_v43  ;;  %v9761_v46 = vrot.slane %v9385_v1, %v9745_v43  ;;  %7653 = vpow2.f32 %v2639_v30 }
 0x3ae   : > { %3096 = vperm.xlu0 %7254, %v9739_v54   ;;  %v9756_v54 = vpop.eup %7633  ;;  %v2465_v50 = vsub.f32 %v13626_v8, %v9761_v46  ;;  %v2467_v4 = vsub.f32 %v13630_v44, %v9761_v46  ;;  %v13631_v8 = vld [vmem:[#allocation30_spill] sm:$0xff]  ;;  %v13635_v44 = vld [vmem:[#allocation32_spill] sm:$0xff] }
 0x3af   : > { %3051 = vperm.xlu1 %7253, %v9741_v32   ;;  %13622 = vst [vmem:[#allocation146_spill] sm:$0xff] %v9756_v54  ;;  %v9768_v24 = vpop.eup %7635  ;;  %v2452_v25 = vsub.f32 %v13631_v8, %v9664_v62  ;;  %v2454_v8 = vsub.f32 %v13635_v44, %v9664_v62 }
 0x3b0   : > { %13623 = vst [vmem:[#allocation147_spill] sm:$0xff] %v9768_v24  ;;  %v9770_v32 = vpop.eup %7637  ;;  %v2673_v28 = vmul.f32 1.442695, %v2465_v50  ;;  %v2677_v22 = vmul.f32 1.442695, %v2467_v4  ;;  %v13634_v50 = vld [vmem:[#allocation43_spill] sm:$0xff] }
 0x3b1   : > { %13624 = vst [vmem:[#allocation148_spill] sm:$0xff] %v9770_v32  ;;  %v9780_v48 = vpop.eup %7639  ;;  %v2469_v30 = vsub.f32 %v13634_v50, %v9761_v46  ;;  %v2647_v60 = vmul.f32 1.442695, %v2452_v25  ;;  %v13638_v4 = vld [vmem:[#allocation61_spill] sm:$0xff]  ;;  %v2651_v25 = vmul.f32 1.442695, %v2454_v8 }
 0x3b2   : > { %3102 = vperm.xlu0 %7254, %v9754_v5   ;;  %v9772_v5 = vpop.permute.xlu1 %4139  ;;  %13628 = vst [vmem:[#allocation39_spill] sm:$0xff] %v9780_v48  ;;  %7655 = vpow2.f32 %v2673_v28  ;;  %v13639_v50 = vld [vmem:[#allocation60_spill] sm:$0xff] }
 0x3b3   : > { %3057 = vperm.xlu1 %7253, %v9756_v54   ;;  %13625 = vst [vmem:[#allocation149_spill] sm:$0xff] %v9772_v5  ;;  %v9784_v54 = vpop.eup %7641  ;;  %7657 = vpow2.f32 %v2643_v21  ;;  %v2681_v28 = vmul.f32 1.442695, %v2469_v30  ;;  %v2471_v21 = vsub.f32 %v13638_v4, %v9761_v46  ;;  %v2456_v44 = vsub.f32 %v13639_v50, %v9664_v62  ;;  %v13642_v30 = vld [vmem:[#allocation83_spill] sm:$0xff]  ;;  %v13643_v4 = vld [vmem:[#allocation82_spill] sm:$0xff] }
 0x3b4   : > { %13629 = vst [vmem:[#allocation28_spill] sm:$0xff] %v9784_v54  ;;  %7659 = vpow2.f32 %v2677_v22  ;;  %v2458_v50 = vsub.f32 %v13643_v4, %v9664_v62 }
 0x3b5   : > { %7661 = vpow2.f32 %v2647_v60  ;;  %v2685_v22 = vmul.f32 1.442695, %v2471_v21  ;;  %v2473_v60 = vsub.f32 %v13642_v30, %v9761_v46  ;;  %v2655_v8 = vmul.f32 1.442695, %v2456_v44  ;;  %v13646_v44 = vld [vmem:[#allocation98_spill] sm:$0xff] }
 0x3b6   : > { %3108 = vperm.xlu0 %7254, %v9768_v24   ;;  %v9794_v24 = vpop.eup %7643  ;;  %7663 = vpow2.f32 %v2681_v28  ;;  %v2475_v21 = vsub.f32 %v13494_v6, %v9761_v46  ;;  %v2460_v30 = vsub.f32 %v13646_v44, %v9664_v62 }
 0x3b7   : > { %3063 = vperm.xlu1 %7253, %v9770_v32   ;;  %13632 = vst [vmem:[#allocation41_spill] sm:$0xff] %v9794_v24  ;;  %v9798_v27 = vpop.eup %7645  ;;  %7665 = vpow2.f32 %v2651_v25  ;;  %v2689_v28 = vmul.f32 1.442695, %v2473_v60  ;;  %v2659_v25 = vmul.f32 1.442695, %v2458_v50  ;;  %v2477_v60 = vsub.f32 %v9094_v40, %v9761_v46 }
 0x3b8   : > { %13633 = vst [vmem:[#allocation30_spill] sm:$0xff] %v9798_v27  ;;  %7667 = vpow2.f32 %v2685_v22  ;;  %v9860_v22 = vsub.s32 6, %v8068_v38  ;;  %v2693_v6 = vmul.f32 1.442695, %v2475_v21  ;;  %v2462_v50 = vsub.f32 %v9072_v56, %v9664_v62  ;;  %v13652_v56 = vld [vmem:[#allocation89_spill] sm:$0xff] }
 0x3b9   : > { %v9782_v43 = vpop.permute.xlu0 %2901  ;;  %7669 = vpow2.f32 %v2655_v8  ;;  %v2663_v8 = vmul.f32 1.442695, %v2460_v30  ;;  %v2697_v40 = vmul.f32 1.442695, %v2477_v60  ;;  %v2479_v21 = vsub.f32 %v13652_v56, %v9761_v46  ;;  %v13655_v60 = vld [vmem:[#allocation45_spill] sm:$0xff] }
 0x3ba   : > { %v9786_v58 = vpop.permute.xlu1 %2898  ;;  %3114 = vperm.xlu0 %7254, %v9780_v48   ;;  %v9808_v48 = vpop.eup %7647  ;;  %13649 = vst [vmem:[#allocation151_spill] sm:$0xff] %v9860_v22  ;;  %7671 = vpow2.f32 %v2689_v28  ;;  %v9878_v28 = vrot.slane %v9385_v1, %v9860_v22  ;;  %v2464_v30 = vsub.f32 %v9296_v47, %v9664_v62  ;;  %v13656_v47 = vld [vmem:[#allocation40_spill] sm:$0xff] }
 0x3bb   : > { %3069 = vperm.xlu1 %7253, %v9784_v54   ;;  %13636 = vst [vmem:[#allocation43_spill] sm:$0xff] %v9808_v48  ;;  %v9812_v63 = vpop.eup %7649  ;;  %7673 = vpow2.f32 %v2659_v25  ;;  %v2667_v25 = vmul.f32 1.442695, %v2462_v50  ;;  %v2466_v62 = vsub.f32 %v13656_v47, %v9761_v46 }
 0x3bc   : > { %13637 = vst [vmem:[#allocation32_spill] sm:$0xff] %v9812_v63  ;;  %7675 = vpow2.f32 %v2693_v6  ;;  %v2701_v6 = vmul.f32 1.442695, %v2479_v21  ;;  %v2671_v50 = vmul.f32 1.442695, %v2464_v30  ;;  %v13659_v21 = vld [vmem:[#allocation47_spill] sm:$0xff] }
 0x3bd   : > { %v9796_v32 = vpop.permute.xlu0 %2928  ;;  %7677 = vpow2.f32 %v2663_v8  ;;  %v2481_v8 = vsub.f32 %v13655_v60, %v9878_v28  ;;  %v2675_v30 = vmul.f32 1.442695, %v2466_v62  ;;  %v13660_v60 = vld [vmem:[#allocation42_spill] sm:$0xff] }
 0x3be   : > { %v9800_v17 = vpop.permute.xlu1 %2904  ;;  %3120 = vperm.xlu0 %7254, %v9794_v24   ;;  %v9822_v24 = vpop.eup %7651  ;;  %7679 = vpow2.f32 %v2697_v40  ;;  %v2468_v47 = vsub.f32 %v13660_v60, %v9761_v46 }
 0x3bf   : > { %3075 = vperm.xlu1 %7253, %v9798_v27   ;;  %13640 = vst [vmem:[#allocation61_spill] sm:$0xff] %v9822_v24  ;;  %v9826_v13 = vpop.eup %7653  ;;  %7681 = vpow2.f32 %v2667_v25  ;;  %v2705_v40 = vmul.f32 1.442695, %v2481_v8  ;;  %v2483_v25 = vsub.f32 %v13659_v21, %v9878_v28  ;;  %v13663_v8 = vld [vmem:[#allocation49_spill] sm:$0xff]  ;;  %v13664_v21 = vld [vmem:[#allocation44_spill] sm:$0xff] }
 0x3c0   : > { %13641 = vst [vmem:[#allocation60_spill] sm:$0xff] %v9826_v13  ;;  %7683 = vpow2.f32 %v2701_v6  ;;  %v2679_v62 = vmul.f32 1.442695, %v2468_v47  ;;  %v2470_v60 = vsub.f32 %v13664_v21, %v9761_v46 }
 0x3c1   : > { %v9810_v54 = vpop.permute.xlu0 %2934  ;;  %7685 = vpow2.f32 %v2671_v50  ;;  %v2709_v6 = vmul.f32 1.442695, %v2483_v25  ;;  %v2485_v50 = vsub.f32 %v13663_v8, %v9878_v28  ;;  %v13667_v25 = vld [vmem:[#allocation63_spill] sm:$0xff]  ;;  %v13668_v8 = vld [vmem:[#allocation62_spill] sm:$0xff] }
 0x3c2   : > { %v9814_v45 = vpop.permute.xlu1 %2907  ;;  %3126 = vperm.xlu0 %7254, %v9808_v48   ;;  %v9836_v48 = vpop.eup %7655  ;;  %7687 = vpow2.f32 %v2705_v40  ;;  %v2683_v47 = vmul.f32 1.442695, %v2470_v60  ;;  %v2472_v21 = vsub.f32 %v13668_v8, %v9761_v46 }
 0x3c3   : > { %3081 = vperm.xlu1 %7253, %v9812_v63   ;;  %13644 = vst [vmem:[#allocation83_spill] sm:$0xff] %v9836_v48  ;;  %v9840_v2 = vpop.eup %7657  ;;  %7689 = vpow2.f32 %v2675_v30  ;;  %v2713_v40 = vmul.f32 1.442695, %v2485_v50  ;;  %v2487_v30 = vsub.f32 %v13667_v25, %v9878_v28  ;;  %v13673_v50 = vld [vmem:[#allocation85_spill] sm:$0xff]  ;;  %v13674_v25 = vld [vmem:[#allocation84_spill] sm:$0xff] }
 0x3c4   : > { %13645 = vst [vmem:[#allocation82_spill] sm:$0xff] %v9840_v2  ;;  %v9850_v4 = vpop.eup %7659  ;;  %7691 = vpow2.f32 %v2709_v6  ;;  %v2687_v60 = vmul.f32 1.442695, %v2472_v21  ;;  %v2474_v8 = vsub.f32 %v13674_v25, %v9761_v46 }
 0x3c5   : > { %v9824_v27 = vpop.permute.xlu0 %2940  ;;  %13647 = vst [vmem:[#allocation98_spill] sm:$0xff] %v9850_v4  ;;  %v2717_v6 = vmul.f32 1.442695, %v2487_v30  ;;  %v13677_v30 = vld [vmem:[#allocation103_spill] sm:$0xff] }
 0x3c6   : > { %v9828_v15 = vpop.permute.xlu1 %2910  ;;  %3132 = vperm.xlu0 %7254, %v9822_v24   ;;  %v2691_v21 = vmul.f32 1.442695, %v2474_v8 }
 0x3c7   : > { %3087 = vperm.xlu1 %7253, %v9826_v13   ;;  %v9854_v13 = vpop.eup %7661  ;;  %7693 = vpow2.f32 %v2679_v62  ;;  %v2489_v62 = vsub.f32 %v13673_v50, %v9878_v28  ;;  %v13678_v50 = vld [vmem:[#allocation101_spill] sm:$0xff] }
 0x3c8   : > { %13648 = vst [vmem:[#allocation150_spill] sm:$0xff] %v9854_v13  ;;  %v9867_v44 = vpop.eup %7663  ;;  %7695 = vpow2.f32 %v2713_v40  ;;  %v2476_v25 = vsub.f32 %v13678_v50, %v9761_v46  ;;  %v13683_v50 = vld [vmem:[#allocation51_spill] sm:$0xff] }
 0x3c9   : > { %v9838_v63 = vpop.permute.xlu0 %2946  ;;  %13650 = vst [vmem:[#allocation152_spill] sm:$0xff] %v9867_v44  ;;  %v2721_v40 = vmul.f32 1.442695, %v2489_v62 }
 0x3ca   : > { %v9842_v18 = vpop.permute.xlu1 %2913  ;;  %3138 = vperm.xlu0 %7254, %v9836_v48  }
 0x3cb   : > { %3093 = vperm.xlu1 %7253, %v9840_v2  }
 0x3cd   : > { %v9852_v24 = vpop.permute.xlu0 %2952 }
 0x3ce   : > { %v9856_v29 = vpop.permute.xlu1 %2916  ;;  %3144 = vperm.xlu0 %7254, %v9850_v4   ;;  %v9871_v4 = vpop.eup %7665  ;;  %7697 = vpow2.f32 %v2683_v47  ;;  %v2491_v47 = vsub.f32 %v13677_v30, %v9878_v28  ;;  %v2695_v30 = vmul.f32 1.442695, %v2476_v25 }
 0x3cf   : > { %3099 = vperm.xlu1 %7253, %v9854_v13   ;;  %13651 = vst [vmem:[#allocation153_spill] sm:$0xff] %v9871_v4  ;;  %v9885_v13 = vpop.eup %7667  ;;  %7699 = vpow2.f32 %v2717_v6  ;;  %v9979_v6 = vsub.s32 7, %v8068_v38 }
 0x3d0   : > { %13653 = vst [vmem:[#allocation89_spill] sm:$0xff] %v9885_v13  ;;  %v2725_v62 = vmul.f32 1.442695, %v2491_v47 }
 0x3d1   : > { %v9869_v48 = vpop.permute.xlu0 %2958  ;;  %13681 = vst [vmem:[#allocation157_spill] sm:$0xff] %v9979_v6 }
 0x3d2   : > { %v9873_v2 = vpop.permute.xlu1 %2919  ;;  %3150 = vperm.xlu0 %7254, %v9867_v44   ;;  %v9889_v44 = vpop.eup %7669  ;;  %7701 = vpow2.f32 %v2687_v60  ;;  %v13682_v60 = vld [vmem:[#allocation53_spill] sm:$0xff] }
 0x3d3   : > { %3105 = vperm.xlu1 %7253, %v9871_v4   ;;  %13654 = vst [vmem:[#allocation154_spill] sm:$0xff] %v9889_v44  ;;  %v9899_v56 = vpop.eup %7671  ;;  %7703 = vpow2.f32 %v2721_v40  ;;  %v2493_v8 = vsub.f32 %v13682_v60, %v9878_v28  ;;  %v9997_v40 = vrot.slane %v9385_v1, %v9979_v6  ;;  %v2480_v60 = vsub.f32 %v9324_v59, %v9761_v46  ;;  %v13689_v59 = vld [vmem:[#allocation46_spill] sm:$0xff] }
 0x3d4   : > { %13657 = vst [vmem:[#allocation45_spill] sm:$0xff] %v9899_v56  ;;  %v9903_v57 = vpop.eup %7673  ;;  %7705 = vpow2.f32 %v2691_v21  ;;  %v2495_v21 = vsub.f32 %v9345_v49, %v9878_v28  ;;  %v13688_v49 = vld [vmem:[#allocation65_spill] sm:$0xff] }
 0x3d5   : > { %v9887_v5 = vpop.permute.xlu0 %2964  ;;  %13658 = vst [vmem:[#allocation40_spill] sm:$0xff] %v9903_v57  ;;  %v2729_v47 = vmul.f32 1.442695, %v2493_v8  ;;  %v2703_v8 = vmul.f32 1.442695, %v2480_v60  ;;  %v2510_v52 = vsub.f32 %v9158_v19, %v9997_v40 }
 0x3d6   : > { %v9891_v22 = vpop.permute.xlu1 %2922  ;;  %3156 = vperm.xlu0 %7254, %v9885_v13   ;;  %v9913_v13 = vpop.eup %7675  ;;  %7707 = vpow2.f32 %v2725_v62  ;;  %v2733_v62 = vmul.f32 1.442695, %v2495_v21  ;;  %v13692_v21 = vld [vmem:[#allocation67_spill] sm:$0xff] }
 0x3d7   : > { %3111 = vperm.xlu1 %7253, %v9889_v44   ;;  %13661 = vst [vmem:[#allocation47_spill] sm:$0xff] %v9913_v13  ;;  %v9917_v12 = vpop.eup %7677  ;;  %7709 = vpow2.f32 %v2695_v30 }
 0x3d8   : > { %13662 = vst [vmem:[#allocation42_spill] sm:$0xff] %v9917_v12 }
 0x3d9   : > { %v9901_v4 = vpop.permute.xlu0 %2970 }
 0x3da   : > { %v9905_v34 = vpop.permute.xlu1 %2925  ;;  %3162 = vperm.xlu0 %7254, %v9899_v56   ;;  %v9927_v56 = vpop.eup %7679  ;;  %7711 = vpow2.f32 %v2729_v47 }
 0x3db   : > { %3117 = vperm.xlu1 %7253, %v9903_v57   ;;  %13665 = vst [vmem:[#allocation49_spill] sm:$0xff] %v9927_v56  ;;  %v9931_v37 = vpop.eup %7681 }
 0x3dc   : > { %13666 = vst [vmem:[#allocation44_spill] sm:$0xff] %v9931_v37 }
 0x3dd   : > { %v9915_v44 = vpop.permute.xlu0 %2976 }
 0x3de   : > { %v9919_v42 = vpop.permute.xlu1 %2931  ;;  %3168 = vperm.xlu0 %7254, %v9913_v13   ;;  %v9941_v13 = vpop.eup %7683 }
 0x3df   : > { %3123 = vperm.xlu1 %7253, %v9917_v12   ;;  %13669 = vst [vmem:[#allocation63_spill] sm:$0xff] %v9941_v13  ;;  %v9945_v9 = vpop.eup %7685 }
 0x3e0   : > { %13671 = vst [vmem:[#allocation155_spill] sm:$0xff] %v9945_v9 }
 0x3e1   : > { %v9929_v57 = vpop.permute.xlu0 %2982 }
 0x3e2   : > { %v9933_v36 = vpop.permute.xlu1 %2937  ;;  %3174 = vperm.xlu0 %7254, %v9927_v56   ;;  %v9955_v56 = vpop.eup %7687 }
 0x3e3   : > { %3129 = vperm.xlu1 %7253, %v9931_v37   ;;  %13675 = vst [vmem:[#allocation85_spill] sm:$0xff] %v9955_v56  ;;  %v9959_v26 = vpop.eup %7689 }
 0x3e4   : > { %13676 = vst [vmem:[#allocation84_spill] sm:$0xff] %v9959_v26 }
 0x3e5   : > { %v9943_v12 = vpop.permute.xlu0 %2988 }
 0x3e6   : > { %13670 = vst [vmem:[#allocation62_spill] sm:$0xff] %v9943_v12  ;;  %v9947_v16 = vpop.permute.xlu1 %2943  ;;  %3180 = vperm.xlu0 %7254, %v9941_v13   ;;  %v9969_v13 = vpop.eup %7691 }
 0x3e7   : > { %13672 = vst [vmem:[#allocation156_spill] sm:$0xff] %v9947_v16  ;;  %3135 = vperm.xlu1 %7253, %v9945_v9   ;;  %13679 = vst [vmem:[#allocation103_spill] sm:$0xff] %v9969_v13  ;;  %v9973_v10 = vpop.eup %7693 }
 0x3e8   : > { %13680 = vst [vmem:[#allocation101_spill] sm:$0xff] %v9973_v10 }
 0x3e9   : > { %v9957_v37 = vpop.permute.xlu0 %2994 }
 0x3ea   : > { %v9961_v7 = vpop.permute.xlu1 %2949  ;;  %3186 = vperm.xlu0 %7254, %v9955_v56   ;;  %v2478_v56 = vsub.f32 %v13683_v50, %v9761_v46  ;;  %v2482_v46 = vsub.f32 %v13689_v59, %v9878_v28 }
 0x3eb   : > { %3141 = vperm.xlu1 %7253, %v9959_v26   ;;  %v9986_v26 = vpop.eup %7695 }
 0x3ec   : > { %13684 = vst [vmem:[#allocation53_spill] sm:$0xff] %v9986_v26  ;;  %v2699_v25 = vmul.f32 1.442695, %v2478_v56  ;;  %v2497_v56 = vsub.f32 %v13688_v49, %v9997_v40  ;;  %v2707_v60 = vmul.f32 1.442695, %v2482_v46  ;;  %v13693_v49 = vld [vmem:[#allocation48_spill] sm:$0xff] }
 0x3ed   : > { %v9971_v9 = vpop.permute.xlu0 %3000  ;;  %v2484_v59 = vsub.f32 %v13693_v49, %v9878_v28 }
 0x3ee   : > { %v9975_v0 = vpop.permute.xlu1 %2955  ;;  %3192 = vperm.xlu0 %7254, %v9969_v13   ;;  %v9990_v13 = vpop.eup %7697  ;;  %7713 = vpow2.f32 %v2699_v25  ;;  %v2737_v47 = vmul.f32 1.442695, %v2497_v56  ;;  %v2499_v25 = vsub.f32 %v13692_v21, %v9997_v40  ;;  %v13696_v56 = vld [vmem:[#allocation69_spill] sm:$0xff]  ;;  %v13697_v21 = vld [vmem:[#allocation50_spill] sm:$0xff] }
 0x3ef   : > { %3147 = vperm.xlu1 %7253, %v9973_v10   ;;  %13685 = vst [vmem:[#allocation51_spill] sm:$0xff] %v9990_v13  ;;  %v10004_v50 = vpop.eup %7699  ;;  %7715 = vpow2.f32 %v2733_v62  ;;  %v2711_v46 = vmul.f32 1.442695, %v2484_v59  ;;  %v2486_v49 = vsub.f32 %v13697_v21, %v9878_v28 }
 0x3f0   : > { %13686 = vst [vmem:[#allocation158_spill] sm:$0xff] %v10004_v50  ;;  %7717 = vpow2.f32 %v2703_v8  ;;  %v2741_v62 = vmul.f32 1.442695, %v2499_v25  ;;  %v2501_v8 = vsub.f32 %v13696_v56, %v9997_v40  ;;  %v13701_v25 = vld [vmem:[#allocation71_spill] sm:$0xff]  ;;  %v13702_v56 = vld [vmem:[#allocation64_spill] sm:$0xff] }
 0x3f1   : > { %v9988_v11 = vpop.permute.xlu0 %3006  ;;  %7719 = vpow2.f32 %v2737_v47  ;;  %v2715_v59 = vmul.f32 1.442695, %v2486_v49  ;;  %v2488_v21 = vsub.f32 %v13702_v56, %v9878_v28 }
 0x3f2   : > { %v9992_v38 = vpop.permute.xlu1 %2961  ;;  %3198 = vperm.xlu0 %7254, %v9986_v26   ;;  %v10008_v26 = vpop.eup %7701  ;;  %7721 = vpow2.f32 %v2707_v60  ;;  %v2745_v47 = vmul.f32 1.442695, %v2501_v8  ;;  %v2503_v60 = vsub.f32 %v13701_v25, %v9997_v40  ;;  %v13707_v8 = vld [vmem:[#allocation87_spill] sm:$0xff]  ;;  %v13708_v25 = vld [vmem:[#allocation86_spill] sm:$0xff] }
 0x3f3   : > { %3153 = vperm.xlu1 %7253, %v9990_v13   ;;  %13687 = vst [vmem:[#allocation159_spill] sm:$0xff] %v10008_v26  ;;  %v10018_v30 = vpop.eup %7703  ;;  %7723 = vpow2.f32 %v2741_v62  ;;  %v2719_v49 = vmul.f32 1.442695, %v2488_v21  ;;  %v2490_v56 = vsub.f32 %v13708_v25, %v9878_v28 }
 0x3f4   : > { %13690 = vst [vmem:[#allocation65_spill] sm:$0xff] %v10018_v30  ;;  %v10022_v13 = vpop.eup %7705  ;;  %7725 = vpow2.f32 %v2711_v46  ;;  %v2749_v62 = vmul.f32 1.442695, %v2503_v60  ;;  %v2505_v46 = vsub.f32 %v13707_v8, %v9997_v40  ;;  %v13711_v60 = vld [vmem:[#allocation110_spill] sm:$0xff] }
 0x3f5   : > { %v10006_v10 = vpop.permute.xlu0 %3012  ;;  %13691 = vst [vmem:[#allocation46_spill] sm:$0xff] %v10022_v13  ;;  %7727 = vpow2.f32 %v2745_v47  ;;  %v2723_v21 = vmul.f32 1.442695, %v2490_v56  ;;  %v13712_v8 = vld [vmem:[#allocation106_spill] sm:$0xff]  ;;  %v13715_v56 = vld [vmem:[#allocation52_spill] sm:$0xff] }
 0x3f6   : > { %v10010_v1 = vpop.permute.xlu1 %2967  ;;  %3204 = vperm.xlu0 %7254, %v10004_v50   ;;  %v10032_v50 = vpop.eup %7707  ;;  %7729 = vpow2.f32 %v2715_v59  ;;  %v2753_v47 = vmul.f32 1.442695, %v2505_v46  ;;  %v2507_v59 = vsub.f32 %v13711_v60, %v9997_v40  ;;  %v2492_v25 = vsub.f32 %v13712_v8, %v9878_v28 }
 0x3f7   : > { %3159 = vperm.xlu1 %7253, %v10008_v26   ;;  %13694 = vst [vmem:[#allocation67_spill] sm:$0xff] %v10032_v50  ;;  %v10036_v55 = vpop.eup %7709  ;;  %7731 = vpow2.f32 %v2749_v62  ;;  %v2509_v46 = vsub.f32 %v9150_v14, %v9997_v40  ;;  %v2494_v60 = vsub.f32 %v13715_v56, %v9878_v28  ;;  %v2511_v14 = vsub.f32 %v9365_v33, %v9997_v40 }
 0x3f8   : > { %13695 = vst [vmem:[#allocation48_spill] sm:$0xff] %v10036_v55  ;;  %7733 = vpow2.f32 %v2719_v49  ;;  %v2757_v62 = vmul.f32 1.442695, %v2507_v59  ;;  %v2727_v49 = vmul.f32 1.442695, %v2492_v25 }
 0x3f9   : > { %v10020_v6 = vpop.permute.xlu0 %3018  ;;  %7735 = vpow2.f32 %v2753_v47  ;;  %v2761_v47 = vmul.f32 1.442695, %v2509_v46  ;;  %v2731_v59 = vmul.f32 1.442695, %v2494_v60  ;;  %v13721_v46 = vld [vmem:[#allocation66_spill] sm:$0xff] }
 0x3fa   : > { %v10024_v41 = vpop.permute.xlu1 %2973  ;;  %3210 = vperm.xlu0 %7254, %v10018_v30   ;;  %v10046_v30 = vpop.eup %7711  ;;  %7737 = vpow2.f32 %v2723_v21  ;;  %v2496_v21 = vsub.f32 %v9349_v61, %v9878_v28 }
 0x3fb   : > { %3165 = vperm.xlu1 %7253, %v10022_v13   ;;  %13698 = vst [vmem:[#allocation69_spill] sm:$0xff] %v10046_v30  ;;  %v10050_v20 = vpop.eup %7713  ;;  %7739 = vpow2.f32 %v2757_v62  ;;  %v2765_v62 = vmul.f32 1.442695, %v2511_v14  ;;  %v13725_v14 = vld [vmem:[#allocation68_spill] sm:$0xff] }
 0x3fc   : > { %13700 = vst [vmem:[#allocation160_spill] sm:$0xff] %v10050_v20  ;;  %7741 = vpow2.f32 %v2727_v49  ;;  %v2735_v33 = vmul.f32 1.442695, %v2496_v21  ;;  %v2498_v49 = vsub.f32 %v13721_v46, %v9997_v40 }
 0x3fd   : > { %v10034_v26 = vpop.permute.xlu0 %3024  ;;  %7743 = vpow2.f32 %v2761_v47 }
 0x3fe   : > { %v10038_v23 = vpop.permute.xlu1 %2979  ;;  %3216 = vperm.xlu0 %7254, %v10032_v50   ;;  %v10060_v50 = vpop.eup %7715  ;;  %7745 = vpow2.f32 %v2731_v59  ;;  %v2739_v47 = vmul.f32 1.442695, %v2498_v49  ;;  %v2500_v59 = vsub.f32 %v13725_v14, %v9997_v40 }
 0x3ff   : > { %3171 = vperm.xlu1 %7253, %v10036_v55   ;;  %13703 = vst [vmem:[#allocation71_spill] sm:$0xff] %v10060_v50  ;;  %v10064_v39 = vpop.eup %7717  ;;  %7747 = vpow2.f32 %v2765_v62  ;;  %v13729_v62 = vld [vmem:[#allocation70_spill] sm:$0xff] }
 0x400   : > { %13705 = vst [vmem:[#allocation161_spill] sm:$0xff] %v10064_v39  ;;  %7749 = vpow2.f32 %v2735_v33  ;;  %v2502_v33 = vsub.f32 %v13729_v62, %v9997_v40 }
 0x401   : > { %v10048_v13 = vpop.permute.xlu0 %3030 }
 0x402   : > { %13699 = vst [vmem:[#allocation50_spill] sm:$0xff] %v10048_v13  ;;  %v10052_v35 = vpop.permute.xlu1 %2985  ;;  %3222 = vperm.xlu0 %7254, %v10046_v30   ;;  %v10074_v30 = vpop.eup %7719  ;;  %7751 = vpow2.f32 %v2739_v47  ;;  %v13734_v47 = vld [vmem:[#allocation72_spill] sm:$0xff] }
 0x403   : > { %3177 = vperm.xlu1 %7253, %v10050_v20   ;;  %13709 = vst [vmem:[#allocation87_spill] sm:$0xff] %v10074_v30 }
 0x405   : > { %v10062_v55 = vpop.permute.xlu0 %3036 }
 0x406   : > { %13704 = vst [vmem:[#allocation64_spill] sm:$0xff] %v10062_v55  ;;  %v10066_v3 = vpop.permute.xlu1 %2991  ;;  %3228 = vperm.xlu0 %7254, %v10060_v50   ;;  %v10078_v55 = vpop.eup %7721 }
 0x407   : > { %13706 = vst [vmem:[#allocation162_spill] sm:$0xff] %v10066_v3  ;;  %3183 = vperm.xlu1 %7253, %v10064_v39   ;;  %13710 = vst [vmem:[#allocation86_spill] sm:$0xff] %v10078_v55  ;;  %v10088_v50 = vpop.eup %7723 }
 0x408   : > { %13713 = vst [vmem:[#allocation110_spill] sm:$0xff] %v10088_v50  ;;  %v10092_v3 = vpop.eup %7725 }
 0x409   : > { %v10076_v20 = vpop.permute.xlu0 %3042  ;;  %13714 = vst [vmem:[#allocation106_spill] sm:$0xff] %v10092_v3  ;;  %v10102_v8 = vpop.eup %7727 }
 0x40a   : > { %v10080_v12 = vpop.permute.xlu1 %2997  ;;  %3234 = vperm.xlu0 %7254, %v10074_v30   ;;  %13716 = vst [vmem:[#allocation52_spill] sm:$0xff] %v10102_v8 }
 0x40b   : > { %3189 = vperm.xlu1 %7253, %v10078_v55   ;;  %v10106_v55 = vpop.eup %7729 }
 0x40c   : > { %13717 = vst [vmem:[#allocation163_spill] sm:$0xff] %v10106_v55  ;;  %v10116_v25 = vpop.eup %7731 }
 0x40d   : > { %v10090_v39 = vpop.permute.xlu0 %3048  ;;  %13718 = vst [vmem:[#allocation164_spill] sm:$0xff] %v10116_v25 }
 0x40e   : > { %v10094_v13 = vpop.permute.xlu1 %3003  ;;  %3240 = vperm.xlu0 %7254, %v10088_v50   ;;  %v10120_v50 = vpop.eup %7733 }
 0x40f   : > { %3195 = vperm.xlu1 %7253, %v10092_v3   ;;  %13720 = vst [vmem:[#allocation166_spill] sm:$0xff] %v10120_v50  ;;  %v10128_v61 = vpop.eup %7735 }
 0x410   : > { %13722 = vst [vmem:[#allocation66_spill] sm:$0xff] %v10128_v61  ;;  %v10132_v60 = vpop.eup %7737 }
 0x411   : > { %v10104_v30 = vpop.permute.xlu0 %3054  ;;  %13724 = vst [vmem:[#allocation168_spill] sm:$0xff] %v10132_v60  ;;  %v10140_v21 = vpop.eup %7739 }
 0x412   : > { %v10108_v16 = vpop.permute.xlu1 %3009  ;;  %3246 = vperm.xlu0 %7254, %v10102_v8   ;;  %13726 = vst [vmem:[#allocation68_spill] sm:$0xff] %v10140_v21 }
 0x413   : > { %3201 = vperm.xlu1 %7253, %v10106_v55  }
 0x415   : > { %v10118_v56 = vpop.permute.xlu0 %3060 }
 0x416   : > { %13719 = vst [vmem:[#allocation165_spill] sm:$0xff] %v10118_v56  ;;  %v10122_v3 = vpop.permute.xlu1 %3015  ;;  %3252 = vperm.xlu0 %7254, %v10116_v25   ;;  %v10144_v25 = vpop.eup %7741 }
 0x417   : > { %3207 = vperm.xlu1 %7253, %v10120_v50   ;;  %13728 = vst [vmem:[#allocation170_spill] sm:$0xff] %v10144_v25  ;;  %v10152_v49 = vpop.eup %7743 }
 0x418   : > { %13730 = vst [vmem:[#allocation70_spill] sm:$0xff] %v10152_v49 }
 0x419   : > { %v10130_v28 = vpop.permute.xlu0 %3066 }
 0x41a   : > { %13723 = vst [vmem:[#allocation167_spill] sm:$0xff] %v10130_v28  ;;  %v10134_v8 = vpop.permute.xlu1 %3021  ;;  %3258 = vperm.xlu0 %7254, %v10128_v61   ;;  %v2743_v61 = vmul.f32 1.442695, %v2500_v59  ;;  %v2504_v59 = vsub.f32 %v13734_v47, %v9997_v40 }
 0x41b   : > { %3213 = vperm.xlu1 %7253, %v10132_v60   ;;  %v10156_v60 = vpop.eup %7745 }
 0x41c   : > { %13732 = vst [vmem:[#allocation172_spill] sm:$0xff] %v10156_v60  ;;  %7753 = vpow2.f32 %v2743_v61  ;;  %v13739_v61 = vld [vmem:[#allocation88_spill] sm:$0xff] }
 0x41d   : > { %v10142_v46 = vpop.permute.xlu0 %3072 }
 0x41e   : > { %13727 = vst [vmem:[#allocation169_spill] sm:$0xff] %v10142_v46  ;;  %v10146_v50 = vpop.permute.xlu1 %3027  ;;  %3264 = vperm.xlu0 %7254, %v10140_v21   ;;  %v2747_v21 = vmul.f32 1.442695, %v2502_v33  ;;  %v2506_v33 = vsub.f32 %v13739_v61, %v9997_v40 }
 0x41f   : > { %3219 = vperm.xlu1 %7253, %v10144_v25   ;;  %v10164_v25 = vpop.eup %7747 }
 0x420   : > { %13735 = vst [vmem:[#allocation72_spill] sm:$0xff] %v10164_v25  ;;  %v10168_v46 = vpop.eup %7749  ;;  %7755 = vpow2.f32 %v2747_v21 }
 0x421   : > { %v10154_v14 = vpop.permute.xlu0 %3078  ;;  %13737 = vst [vmem:[#allocation175_spill] sm:$0xff] %v10168_v46  ;;  %v10178_v47 = vpop.eup %7751 }
 0x422   : > { %13731 = vst [vmem:[#allocation171_spill] sm:$0xff] %v10154_v14  ;;  %v10158_v55 = vpop.permute.xlu1 %3033  ;;  %3270 = vperm.xlu0 %7254, %v10152_v49   ;;  %v2751_v49 = vmul.f32 1.442695, %v2504_v59  ;;  %13741 = vst [vmem:[#allocation177_spill] sm:$0xff] %v10178_v47 }
 0x423   : > { %13733 = vst [vmem:[#allocation173_spill] sm:$0xff] %v10158_v55  ;;  %3225 = vperm.xlu1 %7253, %v10156_v60  }
 0x424   : > { %7757 = vpow2.f32 %v2751_v49 }
 0x425   : > { %v10166_v62 = vpop.permute.xlu0 %3084 }
 0x426   : > { %13736 = vst [vmem:[#allocation174_spill] sm:$0xff] %v10166_v62  ;;  %v10170_v14 = vpop.permute.xlu1 %3039  ;;  %3276 = vperm.xlu0 %7254, %v10164_v25   ;;  %v7773_v62 = vld [vmem:[%s8029_s26] ss:$0 sm:$0xff]  ;;  %v10188_v59 = vpop.eup %7753 }
 0x427   : > { %13738 = vst [vmem:[#allocation176_spill] sm:$0xff] %v10170_v14  ;;  %3231 = vperm.xlu1 %7253, %v10168_v46   ;;  %v2755_v14 = vmul.f32 1.442695, %v2506_v33  ;;  %v13742_v25 = vld [vmem:[#allocation112_spill] sm:$0xff]  ;;  %13744 = vst [vmem:[#allocation178_spill] sm:$0xff] %v10188_v59 }
 0x428   : > { %v2508_v46 = vsub.f32 %v13742_v25, %v9997_v40  ;;  %v2763_v25 = vmul.f32 1.442695, %v2510_v52 }
 0x429   : > { %v10176_v60 = vpop.permute.xlu0 %3090  ;;  %7759 = vpow2.f32 %v2755_v14 }
 0x42a   : > { %13740 = vst [vmem:[#allocation88_spill] sm:$0xff] %v10176_v60  ;;  %v10180_v28 = vpop.permute.xlu1 %3045  ;;  %4155 = vbcast.lane.b32.xlu0 %v7773_v62, 368  ;;  %v2759_v60 = vmul.f32 1.442695, %v2508_v46  ;;  %v10197_v49 = vpop.eup %7755 }
 0x42b   : > { %3237 = vperm.xlu1 %7253, %v10178_v47   ;;  %13746 = vst [vmem:[#allocation180_spill] sm:$0xff] %v10197_v49  ;;  %v2512_v47 = vsub.f32 %v9368_v31, %v9997_v40 }
 0x42c   : > { %7761 = vpow2.f32 %v2759_v60 }
 0x42d   : > { %v10186_v21 = vpop.permute.xlu0 %3096  ;;  %7763 = vpow2.f32 %v2763_v25  ;;  %v2767_v19 = vmul.f32 1.442695, %v2512_v47 }
 0x42e   : > { %13743 = vst [vmem:[#allocation112_spill] sm:$0xff] %v10186_v21  ;;  %v10190_v61 = vpop.permute.xlu1 %3051  ;;  %v10206_v14 = vpop.eup %7757 }
 0x42f   : > { %3243 = vperm.xlu1 %7253, %v10188_v59   ;;  %13748 = vst [vmem:[#allocation182_spill] sm:$0xff] %v10206_v14  ;;  %7765 = vpow2.f32 %v2767_v19 }
 0x431   : > { %v10195_v55 = vpop.permute.xlu0 %3102 }
 0x432   : > { %13745 = vst [vmem:[#allocation179_spill] sm:$0xff] %v10195_v55  ;;  %v10199_v33 = vpop.permute.xlu1 %3057 }
 0x433   : > { %3249 = vperm.xlu1 %7253, %v10197_v49   ;;  %v10213_v55 = vpop.eup %7759 }
 0x434   : > { %13750 = vst [vmem:[#allocation184_spill] sm:$0xff] %v10213_v55 }
 0x435   : > { %v10204_v21 = vpop.permute.xlu0 %3108 }
 0x436   : > { %13747 = vst [vmem:[#allocation181_spill] sm:$0xff] %v10204_v21  ;;  %v10208_v46 = vpop.permute.xlu1 %3063  ;;  %v10220_v31 = vpop.eup %7761 }
 0x437   : > { %3255 = vperm.xlu1 %7253, %v10206_v14   ;;  %13753 = vst [vmem:[#allocation187_spill] sm:$0xff] %v10220_v31  ;;  %v10227_v47 = vpop.eup %7763 }
 0x438   : > { %13756 = vst [vmem:[#allocation190_spill] sm:$0xff] %v10227_v47 }
 0x439   : > { %v10211_v59 = vpop.permute.xlu0 %3114 }
 0x43a   : > { %13749 = vst [vmem:[#allocation183_spill] sm:$0xff] %v10211_v59  ;;  %v10215_v49 = vpop.permute.xlu1 %3069 }
 0x43b   : > { %13751 = vst [vmem:[#allocation185_spill] sm:$0xff] %v10215_v49  ;;  %3261 = vperm.xlu1 %7253, %v10213_v55   ;;  %v10234_v55 = vpop.eup %7765  ;;  %v13795_v49 = vld [vmem:[#allocation107_spill] sm:$0xff] }
 0x43c   : > { %13759 = vst [vmem:[#allocation193_spill] sm:$0xff] %v10234_v55 }
 0x43d   : > { %v10218_v52 = vpop.permute.xlu0 %3120 }
 0x43e   : > { %13752 = vst [vmem:[#allocation186_spill] sm:$0xff] %v10218_v52  ;;  %v10222_v40 = vpop.permute.xlu1 %3075 }
 0x43f   : > { %13754 = vst [vmem:[#allocation188_spill] sm:$0xff] %v10222_v40  ;;  %3267 = vperm.xlu1 %7253, %v10220_v31  }
 0x441   : > { %v10225_v60 = vpop.permute.xlu0 %3126 }
 0x442   : > { %13755 = vst [vmem:[#allocation189_spill] sm:$0xff] %v10225_v60  ;;  %v10229_v25 = vpop.permute.xlu1 %3081 }
 0x443   : > { %13757 = vst [vmem:[#allocation191_spill] sm:$0xff] %v10229_v25  ;;  %3273 = vperm.xlu1 %7253, %v10227_v47  }
 0x445   : > { %v10232_v14 = vpop.permute.xlu0 %3132 }
 0x446   : > { %13758 = vst [vmem:[#allocation192_spill] sm:$0xff] %v10232_v14  ;;  %v10236_v19 = vpop.permute.xlu1 %3087 }
 0x447   : > { %13760 = vst [vmem:[#allocation194_spill] sm:$0xff] %v10236_v19  ;;  %3279 = vperm.xlu1 %7253, %v10234_v55  }
 0x449   : > { %v10239_v52 = vpop.permute.xlu0 %3138 }
 0x44a   : > { %13761 = vst [vmem:[#allocation195_spill] sm:$0xff] %v10239_v52  ;;  %v10241_v59 = vpop.permute.xlu1 %3093 }
 0x44b   : > { %13762 = vst [vmem:[#allocation196_spill] sm:$0xff] %v10241_v59  ;;  %4143 = vbcast.lane.b32.xlu1 %v7773_v62, 344 }
 0x44d   : > { %v10243_v31 = vpop.permute.xlu0 %3144 }
 0x44e   : > { %13763 = vst [vmem:[#allocation197_spill] sm:$0xff] %v10243_v31  ;;  %v10245_v60 = vpop.permute.xlu1 %3099 }
 0x44f   : > { %13764 = vst [vmem:[#allocation198_spill] sm:$0xff] %v10245_v60  ;;  %4147 = vbcast.lane.b32.xlu1 %v7773_v62, 352 }
 0x451   : > { %v10247_v25 = vpop.permute.xlu0 %3150 }
 0x452   : > { %13765 = vst [vmem:[#allocation199_spill] sm:$0xff] %v10247_v25  ;;  %v10249_v47 = vpop.permute.xlu1 %3105 }
 0x453   : > { %13766 = vst [vmem:[#allocation200_spill] sm:$0xff] %v10249_v47  ;;  %4151 = vbcast.lane.b32.xlu1 %v7773_v62, 360 }
 0x455   : > { %v10251_v14 = vpop.permute.xlu0 %3156 }
 0x456   : > { %13767 = vst [vmem:[#allocation201_spill] sm:$0xff] %v10251_v14  ;;  %v10253_v19 = vpop.permute.xlu1 %3111 }
 0x457   : > { %13768 = vst [vmem:[#allocation202_spill] sm:$0xff] %v10253_v19  ;;  %4159 = vbcast.lane.b32.xlu1 %v7773_v62, 376 }
 0x459   : > { %v10255_v55 = vpop.permute.xlu0 %3162 }
 0x45a   : > { %13769 = vst [vmem:[#allocation203_spill] sm:$0xff] %v10255_v55  ;;  %v10257_v52 = vpop.permute.xlu1 %3117 }
 0x45b   : > { %13770 = vst [vmem:[#allocation204_spill] sm:$0xff] %v10257_v52 }
 0x45d   : > { %v10259_v21 = vpop.permute.xlu0 %3168 }
 0x45e   : > { %13771 = vst [vmem:[#allocation205_spill] sm:$0xff] %v10259_v21  ;;  %v10261_v31 = vpop.permute.xlu1 %3123 }
 0x45f   : > { %13772 = vst [vmem:[#allocation206_spill] sm:$0xff] %v10261_v31 }
 0x461   : > { %v10263_v60 = vpop.permute.xlu0 %3174 }
 0x462   : > { %13773 = vst [vmem:[#allocation207_spill] sm:$0xff] %v10263_v60  ;;  %v10265_v40 = vpop.permute.xlu1 %3129 }
 0x463   : > { %13774 = vst [vmem:[#allocation208_spill] sm:$0xff] %v10265_v40 }
 0x465   : > { %v10267_v25 = vpop.permute.xlu0 %3180 }
 0x466   : > { %13775 = vst [vmem:[#allocation209_spill] sm:$0xff] %v10267_v25  ;;  %v10269_v47 = vpop.permute.xlu1 %3135 }
 0x467   : > { %13776 = vst [vmem:[#allocation210_spill] sm:$0xff] %v10269_v47 }
 0x469   : > { %v10271_v14 = vpop.permute.xlu0 %3186 }
 0x46a   : > { %13777 = vst [vmem:[#allocation211_spill] sm:$0xff] %v10271_v14  ;;  %v10273_v19 = vpop.permute.xlu1 %3141 }
 0x46b   : > { %13778 = vst [vmem:[#allocation212_spill] sm:$0xff] %v10273_v19  ;;  %v13789_v19 = vld [vmem:[#allocation99_spill] sm:$0xff] }
 0x46d   : > { %v10277_v55 = vpop.permute.xlu0 %3192 }
 0x46e   : > { %v10275_v62 = vpop.permute.xlu1 %3147  ;;  %13780 = vst [vmem:[#allocation214_spill] sm:$0xff] %v10277_v55  ;;  %v13790_v55 = vld [vmem:[#allocation102_spill] sm:$0xff] }
 0x46f   : > { %13779 = vst [vmem:[#allocation213_spill] sm:$0xff] %v10275_v62  ;;  %v3367_v62 = vrot.slane %v9961_v7, %v13789_v19  ;;  %v13793_v7 = vld [vmem:[#allocation105_spill] sm:$0xff] }
 0x470   : > { %v3377_v59 = vrot.slane %v9975_v0, %v13793_v7 }
 0x471   : > { %v10281_v21 = vpop.permute.xlu0 %3198 }
 0x472   : > { %v10279_v52 = vpop.permute.xlu1 %3153  ;;  %13782 = vst [vmem:[#allocation216_spill] sm:$0xff] %v10281_v21  ;;  %v3284_v21 = vrot.slane %v9786_v58, %v13790_v55  ;;  %v3298_v58 = vrot.slane %v9814_v45, %v13793_v7  ;;  %v3456_v45 = vrot.slane %v10094_v13, %v13793_v7  ;;  %v3382_v13 = vrot.slane %v9869_v48, %v13795_v49 }
 0x473   : > { %13781 = vst [vmem:[#allocation215_spill] sm:$0xff] %v10279_v52  ;;  %v3288_v52 = vrot.slane %v9782_v43, %v13789_v19 }
 0x475   : > { %v10287_v40 = vpop.permute.xlu0 %3204 }
 0x476   : > { %v10283_v31 = vpop.permute.xlu1 %3159  ;;  %13785 = vst [vmem:[#allocation219_spill] sm:$0xff] %v10287_v40 }
 0x477   : > { %13783 = vst [vmem:[#allocation217_spill] sm:$0xff] %v10283_v31  ;;  %v13791_v31 = vld [vmem:[#allocation104_spill] sm:$0xff] }
 0x478   : > { %v3293_v40 = vrot.slane %v9800_v17, %v13791_v31  ;;  %v3442_v17 = vrot.slane %v9957_v37, %v13790_v55  ;;  %v3451_v37 = vrot.slane %v9971_v9, %v13791_v31 }
 0x479   : > { %v10291_v47 = vpop.permute.xlu0 %3210 }
 0x47a   : > { %v10285_v60 = vpop.permute.xlu1 %3165  ;;  %13787 = vst [vmem:[#allocation221_spill] sm:$0xff] %v10291_v47 }
 0x47b   : > { %13784 = vst [vmem:[#allocation218_spill] sm:$0xff] %v10285_v60  ;;  %v3363_v60 = vrot.slane %v9838_v63, %v13790_v55  ;;  %v3372_v63 = vrot.slane %v9852_v24, %v13791_v31  ;;  %v13796_v24 = vld [vmem:[#allocation108_spill] sm:$0xff] }
 0x47c   : > { %v3308_v56 = vrot.slane %v9842_v18, %v13796_v24 }
 0x47d   : > { %v10312_v43 = vpop.permute.xlu0 %3216 }
 0x47e   : > { %v10289_v25 = vpop.permute.xlu1 %3171  ;;  %13794 = vst [vmem:[#allocation102_spill] sm:$0xff] %v10312_v43 }
 0x47f   : > { %13786 = vst [vmem:[#allocation220_spill] sm:$0xff] %v10289_v25  ;;  %v3446_v25 = vrot.slane %v10080_v12, %v13789_v19  ;;  %v3289_v12 = vsel %vm1674_vm3, %v3288_v52, %v3284_v21  ;;  %v13797_v52 = vld [vmem:[#allocation109_spill] sm:$0xff] }
 0x482   : > { %v10293_v14 = vpop.permute.xlu1 %3177 }
 0x483   : > { %13788 = vst [vmem:[#allocation222_spill] sm:$0xff] %v10293_v14  ;;  %v3368_v14 = vsel %vm1674_vm3, %v3367_v62, %v3363_v60  ;;  %v3294_v60 = vsel %vm1681_vm4, %v3293_v40, %v3289_v12  ;;  %v3447_v62 = vsel %vm1674_vm3, %v3446_v25, %v3442_v17  ;;  %v3313_v40 = vrot.slane %v9856_v29, %v13797_v52  ;;  %v10346_v17 = vpop.permute.xlu0 %3222 }
 0x484   : > { %v3373_v0 = vsel %vm1681_vm4, %v3372_v63, %v3368_v14  ;;  %v3299_v14 = vsel %vm1688_vm5, %v3298_v58, %v3294_v60  ;;  %v13798_v63 = vld [vmem:[#allocation111_spill] sm:$0xff]  ;;  %v3452_v9 = vsel %vm1681_vm4, %v3451_v37, %v3447_v62  ;;  %v3466_v29 = vrot.slane %v10108_v16, %v13796_v24 }
 0x485   : > { %v3378_v21 = vsel %vm1688_vm5, %v3377_v59, %v3373_v0  ;;  %v3318_v18 = vrot.slane %v9873_v2, %v13798_v63  ;;  %v13799_v59 = vld [vmem:[#allocation113_spill] sm:$0xff]  ;;  %v3457_v12 = vsel %vm1688_vm5, %v3456_v45, %v3452_v9  ;;  %v3461_v2 = vrot.slane %v9988_v11, %v13795_v49  ;;  %v13800_v45 = vld [vmem:[#allocation114_spill] sm:$0xff]  ;;  %v13803_v9 = vld [vmem:[#allocation116_spill] sm:$0xff] }
 0x486   : > { %v10307_v47 = vpop.permute.xlu1 %3183  ;;  %v3383_v58 = vsel %vm1695_vm6, %v3382_v13, %v3378_v21  ;;  %v3397_v0 = vrot.slane %v10010_v1, %v13798_v63  ;;  %v3392_v62 = vrot.slane %v9887_v5, %v13797_v52  ;;  %v3328_v16 = vrot.slane %v9905_v34, %v13800_v45 }
 0x487   : > { %13792 = vst [vmem:[#allocation99_spill] sm:$0xff] %v10307_v47  ;;  %v3303_v47 = vrot.slane %v9828_v15, %v13795_v49  ;;  %v3387_v15 = vrot.slane %v9992_v38, %v13796_v24  ;;  %v3323_v38 = vrot.slane %v9891_v22, %v13799_v59  ;;  %v3525_v11 = vrot.slane %v10180_v28, %v13789_v19 }
 0x488   : > { %v3471_v34 = vrot.slane %v10006_v10, %v13797_v52  ;;  %v3407_v13 = vrot.slane %v10024_v41, %v13800_v45  ;;  %v3521_v28 = vrot.slane %v10076_v20, %v13790_v55  ;;  %v3535_v20 = vrot.slane %v10190_v61, %v13793_v7 }
 0x489   : > { %v3304_v25 = vsel %vm1695_vm6, %v3303_v47, %v3299_v14  ;;  %v3388_v60 = vsel %vm13183_vm7, %v3387_v15, %v3383_v58  ;;  %v3476_v14 = vrot.slane %v10122_v3, %v13798_v63  ;;  %v13804_v58 = vld [vmem:[#allocation115_spill] sm:$0xff]  ;;  %v3417_v61 = vrot.slane %v10038_v23, %v13803_v9 }
 0x48a   : > { %v10328_v43 = vpop.permute.xlu1 %3189  ;;  %v3309_v47 = vsel %vm13183_vm7, %v3308_v56, %v3304_v25  ;;  %v3462_v56 = vsel %vm1695_vm6, %v3461_v2, %v3457_v12  ;;  %v3393_v15 = vsel %vm13185_vm8, %v3392_v62, %v3388_v60  ;;  %v10385_v25 = vpop.permute.xlu0 %3228  ;;  %v3333_v10 = vrot.slane %v9796_v32, %v13804_v58 }
 0x48b   : > { %v3314_v22 = vsel %vm13185_vm8, %v3313_v40, %v3309_v47  ;;  %v3467_v1 = vsel %vm13183_vm7, %v3466_v29, %v3462_v56  ;;  %v3398_v40 = vsel %vm13184_vm9, %v3397_v0, %v3393_v15  ;;  %v3526_v41 = vsel %vm1674_vm3, %v3525_v11, %v3521_v28 }
 0x48c   : > { %v3319_v37 = vsel %vm13184_vm9, %v3318_v18, %v3314_v22  ;;  %v3402_v18 = vrot.slane %v9901_v4, %v13799_v59  ;;  %v3472_v12 = vsel %vm13185_vm8, %v3471_v34, %v3467_v1  ;;  %v3530_v4 = vrot.slane %v10090_v39, %v13791_v31  ;;  %v13808_v22 = vld [vmem:[#allocation117_spill] sm:$0xff] }
 0x48d   : > { %v3324_v21 = vsel %vm13801_vm12, %v3323_v38, %v3319_v37  ;;  %vm13802_vm12 = vcmask 654912   ;;  %v3338_v38 = vrot.slane %v9919_v42, %v13803_v9  ;;  %v3477_v47 = vsel %vm13184_vm9, %v3476_v14, %v3472_v12 }
 0x48e   : > { %v10354_v48 = vpop.permute.xlu1 %3195  ;;  %v3329_v3 = vsel %vm13802_vm12, %v3328_v16, %v3324_v21  ;;  %v3403_v29 = vsel %vm13805_vm1, %v3402_v18, %v3398_v40  ;;  %v3486_v42 = vrot.slane %v10134_v8, %v13800_v45  ;;  %vm13806_vm12 = vcmask 720512   ;;  %v10424_v11 = vpop.permute.xlu0 %3234 }
 0x48f   : > { %v3334_v32 = vsel %vm13806_vm12, %v3333_v10, %v3329_v3  ;;  %v3481_v60 = vrot.slane %v10020_v6, %v13799_v59  ;;  %v3408_v0 = vsel %vm13807_vm10, %v3407_v13, %v3403_v29  ;;  %v3343_v39 = vrot.slane %v9810_v54, %v13808_v22 }
 0x490   : > { %v3412_v62 = vrot.slane %v9915_v44, %v13804_v58  ;;  %vm13809_vm1 = vcmask 786112   ;;  %v3531_v16 = vsel %vm1681_vm4, %v3530_v4, %v3526_v41  ;;  %v3348_v37 = vrot.slane %v9933_v36, %v8942_v51  ;;  %v13817_v41 = vld [vmem:[#allocation120_spill] sm:$0xff]  ;;  %v13819_v4 = vld [vmem:[#allocation50_spill] sm:$0xff] }
 0x491   : > { %v3339_v8 = vsel %vm13809_vm1, %v3338_v38, %v3334_v32  ;;  %vm13810_vm12 = vcmask 589312   ;;  %v3536_v56 = vsel %vm1688_vm5, %v3535_v20, %v3531_v16  ;;  %v3545_v23 = vrot.slane %v10199_v33, %v13796_v24  ;;  %v13816_v38 = vld [vmem:[#allocation173_spill] sm:$0xff]  ;;  %v13818_v20 = vld [vmem:[#allocation156_spill] sm:$0xff] }
 0x492   : > { %v10376_v5 = vpop.permute.xlu1 %3201  ;;  %v3482_v6 = vsel %vm13810_vm12, %v3481_v60, %v3477_v47  ;;  %vm13811_vm10 = vcmask 720512   ;;  %v3540_v44 = vrot.slane %v10104_v30, %v13795_v49  ;;  %vm13812_vm1 = vcmask 654912   ;;  %v10465_v60 = vpop.permute.xlu0 %3240 }
 0x493   : > { %v3413_v54 = vsel %vm13811_vm10, %v3412_v62, %v3408_v0  ;;  %v3487_v21 = vsel %vm13812_vm1, %v3486_v42, %v3482_v6  ;;  %v3496_v15 = vrot.slane %v10146_v50, %v13803_v9  ;;  %v3491_v1 = vrot.slane %v10034_v26, %v13804_v58  ;;  %v13820_v42 = vld [vmem:[#allocation162_spill] sm:$0xff] }
 0x494   : > { %vm13813_vm12 = vcmask 786112   ;;  %v3427_v33 = vrot.slane %v10052_v35, %v8942_v51  ;;  %v3353_v34 = vrot.slane %v9824_v27, %v13499_v53  ;;  %v3422_v30 = vrot.slane %v9929_v57, %v13808_v22  ;;  %v13814_v27 = vld [vmem:[#allocation165_spill] sm:$0xff]  ;;  %v13821_v0 = vld [vmem:[#allocation62_spill] sm:$0xff] }
 0x495   : > { %v3418_v14 = vsel %vm13813_vm12, %v3417_v61, %v3413_v54  ;;  %v3344_v40 = vsel %vm1751_vm14, %v3343_v39, %v3339_v8  ;;  %v3541_v50 = vsel %vm1695_vm6, %v3540_v44, %v3536_v56  ;;  %v3492_v28 = vsel %vm13811_vm10, %v3491_v1, %v3487_v21  ;;  %vm13815_vm1 = vmmov %vm13813_vm12  ;;  %v13824_v21 = vld [vmem:[#allocation176_spill] sm:$0xff] }
 0x496   : > { %v10404_v2 = vpop.permute.xlu1 %3207  ;;  %v3349_v13 = vsel %vm1758_vm15, %v3348_v37, %v3344_v40  ;;  %v3546_v26 = vsel %vm13183_vm7, %v3545_v23, %v3541_v50  ;;  %v3555_v18 = vrot.slane %v10208_v46, %v13798_v63  ;;  %v3423_v35 = vsel %vm1751_vm14, %v3422_v30, %v3418_v14  ;;  %v13822_v37 = vld [vmem:[#allocation185_spill] sm:$0xff]  ;;  %v13823_v23 = vld [vmem:[#allocation167_spill] sm:$0xff] }
 0x497   : > { %v3550_v3 = vrot.slane %v13814_v27, %v13797_v52  ;;  %v3497_v57 = vsel %vm13815_vm1, %v3496_v15, %v3492_v28  ;;  %v3506_v10 = vrot.slane %v13816_v38, %v8942_v51  ;;  %v3358_v29 = vrot.slane %v13818_v20, %v13817_v41  ;;  %v13826_v40 = vld [vmem:[#allocation169_spill] sm:$0xff]  ;;  %v13830_v27 = vld [vmem:[#allocation196_spill] sm:$0xff] }
 0x498   : > { %v3501_v47 = vrot.slane %v13819_v4, %v13808_v22  ;;  %v3428_v46 = vsel %vm1758_vm15, %v3427_v33, %v3423_v35  ;;  %v3437_v32 = vrot.slane %v13820_v42, %v13817_v41  ;;  %v3432_v61 = vrot.slane %v13821_v0, %v13499_v53  ;;  %v13825_v33 = vld [vmem:[#allocation64_spill] sm:$0xff] }
 0x499   : > { %v3551_v39 = vsel %vm13185_vm8, %v3550_v3, %v3546_v26  ;;  %v3354_v62 = vsel %vm1765_vm0, %v3353_v34, %v3349_v13  ;;  %v3565_v6 = vrot.slane %v13822_v37, %v13800_v45  ;;  %v3560_v54 = vrot.slane %v13823_v23, %v13799_v59  ;;  %v13827_v13 = vld [vmem:[#allocation171_spill] sm:$0xff]  ;;  %v13828_v26 = vld [vmem:[#allocation174_spill] sm:$0xff]  ;;  %v13834_v42 = vld [vmem:[#allocation88_spill] sm:$0xff] }
 0x49a   : > { %v10432_v36 = vpop.permute.xlu1 %3213  ;;  %v3502_v8 = vsel %vm1751_vm14, %v3501_v47, %v3497_v57  ;;  %v3556_v16 = vsel %vm13184_vm9, %v3555_v18, %v3551_v39  ;;  %v3433_v56 = vsel %vm1765_vm0, %v3432_v61, %v3428_v46  ;;  %v3516_v15 = vrot.slane %v13824_v21, %v13817_v41  ;;  %v10506_v47 = vpop.permute.xlu0 %3246  ;;  %v13835_v0 = vld [vmem:[#allocation112_spill] sm:$0xff]  ;;  %v13837_v37 = vld [vmem:[#allocation181_spill] sm:$0xff] }
 0x49b   : > { %v3507_v44 = vsel %vm1758_vm15, %v3506_v10, %v3502_v8  ;;  %v10484_v14 = vsel %vm1772_vm2, %v3358_v29, %v3354_v62  ;;  %v3511_v34 = vrot.slane %v13825_v33, %v13499_v53  ;;  %v10489_v30 = vsel %vm1772_vm2, %v3437_v32, %v3433_v56  ;;  %v13832_v10 = vld [vmem:[#allocation188_spill] sm:$0xff]  ;;  %v13836_v8 = vld [vmem:[#allocation179_spill] sm:$0xff] }
 0x49c   : > { %v3570_v50 = vrot.slane %v13826_v40, %v13804_v58  ;;  %v3580_v28 = vrot.slane %v13827_v13, %v13808_v22  ;;  %v3590_v18 = vrot.slane %v13828_v26, %v13499_v53  ;;  %vm13829_vm12 = vcmask 589312   ;;  %v13833_v29 = vld [vmem:[#allocation212_spill] sm:$0xff]  ;;  %v13838_v56 = vld [vmem:[#allocation183_spill] sm:$0xff]  ;;  %v13843_v13 = vld [vmem:[#allocation186_spill] sm:$0xff] }
 0x49d   : > { %v3561_v35 = vsel %vm13829_vm12, %v3560_v54, %v3556_v16  ;;  %v3604_v3 = vrot.slane %v13830_v27, %v13789_v19  ;;  %v3512_v57 = vsel %vm1765_vm0, %v3511_v34, %v3507_v44  ;;  %vm13831_vm10 = vcmask 654912   ;;  %v13839_v54 = vld [vmem:[#allocation195_spill] sm:$0xff] }
 0x49e   : > { %v10456_v12 = vpop.permute.xlu1 %3219  ;;  %v3566_v38 = vsel %vm13831_vm10, %v3565_v6, %v3561_v35  ;;  %v3575_v20 = vrot.slane %v13832_v10, %v13803_v9  ;;  %v3683_v4 = vrot.slane %v13833_v29, %v13789_v19  ;;  %v10509_v46 = vsel %vm1772_vm2, %v3516_v15, %v3512_v57  ;;  %v13842_v34 = vld [vmem:[#allocation211_spill] sm:$0xff]  ;;  %v13845_v10 = vld [vmem:[#allocation213_spill] sm:$0xff] }
 0x49f   : > { %v3600_v32 = vrot.slane %v13834_v42, %v13790_v55  ;;  %v3609_v61 = vrot.slane %v13835_v0, %v13791_v31  ;;  %v3762_v39 = vrot.slane %v10328_v43, %v13789_v19  ;;  %v3619_v16 = vrot.slane %v13836_v8, %v13795_v49  ;;  %v13841_v43 = vld [vmem:[#allocation198_spill] sm:$0xff] }
 0x4a0   : > { %v3629_v6 = vrot.slane %v13837_v37, %v13797_v52  ;;  %v3639_v23 = vrot.slane %v13838_v56, %v13799_v59  ;;  %v3679_v44 = vrot.slane %v13839_v54, %v13790_v55  ;;  %vm13840_vm1 = vcmask 720512   ;;  %v13868_v56 = vld [vmem:[#allocation220_spill] sm:$0xff] }
 0x4a1   : > { %v3571_v21 = vsel %vm13840_vm1, %v3570_v50, %v3566_v38  ;;  %v3605_v15 = vsel %vm1674_vm3, %v3604_v3, %v3600_v32  ;;  %v3614_v33 = vrot.slane %v13841_v43, %v13793_v7  ;;  %v3758_v40 = vrot.slane %v13842_v34, %v13790_v55  ;;  %v13846_v50 = vld [vmem:[#allocation189_spill] sm:$0xff] }
 0x4a2   : > { %v10481_v1 = vpop.permute.xlu1 %3225  ;;  %v3649_v35 = vrot.slane %v13843_v13, %v13804_v58  ;;  %vm13844_vm12 = vcmask 786112   ;;  %v3684_v57 = vsel %vm1674_vm3, %v3683_v4, %v3679_v44  ;;  %v3693_v29 = vrot.slane %v13845_v10, %v13793_v7  ;;  %v13847_v3 = vld [vmem:[#allocation197_spill] sm:$0xff]  ;;  %v3253_v44 = vpop.permute.xlu0 %3252  ;;  %v13877_v13 = vld [vmem:[#allocation222_spill] sm:$0xff] }
 0x4a3   : > { %v3576_v27 = vsel %vm13844_vm12, %v3575_v20, %v3571_v21  ;;  %v3659_v38 = vrot.slane %v13846_v50, %v13808_v22  ;;  %v3688_v42 = vrot.slane %v13847_v3, %v13791_v31  ;;  %v3763_v32 = vsel %vm1674_vm3, %v3762_v39, %v3758_v40  ;;  %v13848_v20 = vld [vmem:[#allocation214_spill] sm:$0xff]  ;;  %v13849_v39 = vld [vmem:[#allocation200_spill] sm:$0xff]  ;;  %v13884_v50 = vld [vmem:[#allocation99_spill] sm:$0xff] }
 0x4a4   : > { %v3772_v0 = vrot.slane %v10354_v48, %v13793_v7  ;;  %v3610_v37 = vsel %vm1681_vm4, %v3609_v61, %v3605_v15  ;;  %v3767_v4 = vrot.slane %v13848_v20, %v13791_v31  ;;  %v3837_v54 = vrot.slane %v10424_v11, %v13790_v55  ;;  %v13850_v15 = vld [vmem:[#allocation215_spill] sm:$0xff] }
 0x4a5   : > { %v3581_v43 = vsel %vm1751_vm14, %v3580_v28, %v3576_v27  ;;  %v3615_v34 = vsel %vm1688_vm5, %v3614_v33, %v3610_v37  ;;  %v3624_v40 = vrot.slane %v13849_v39, %v13796_v24  ;;  %v3689_v48 = vsel %vm1681_vm4, %v3688_v42, %v3684_v57 }
 0x4a6   : > { %v10517_v62 = vpop.permute.xlu1 %3231  ;;  %v3694_v61 = vsel %vm1688_vm5, %v3693_v29, %v3689_v48  ;;  %v3703_v10 = vrot.slane %v13850_v15, %v13796_v24  ;;  %v3768_v3 = vsel %vm1681_vm4, %v3767_v4, %v3763_v32  ;;  %v3846_v28 = vrot.slane %v10465_v60, %v13791_v31  ;;  %v13852_v29 = vld [vmem:[#allocation191_spill] sm:$0xff]  ;;  %v13853_v32 = vld [vmem:[#allocation216_spill] sm:$0xff]  ;;  %v13854_v60 = vld [vmem:[#allocation202_spill] sm:$0xff] }
 0x4a7   : > { %v3773_v33 = vsel %vm1688_vm5, %v3772_v0, %v3768_v3  ;;  %v3782_v27 = vrot.slane %v10376_v5, %v13796_v24  ;;  %v3585_v42 = vrot.slane %v13852_v29, %v8942_v51  ;;  %v3620_v37 = vsel %vm1695_vm6, %v3619_v16, %v3615_v34  ;;  %v13855_v15 = vld [vmem:[#allocation217_spill] sm:$0xff]  ;;  %v3259_v34 = vpop.permute.xlu0 %3258 }
 0x4a8   : > { %v3777_v4 = vrot.slane %v13853_v32, %v13795_v49  ;;  %v3634_v39 = vrot.slane %v13854_v60, %v13798_v63  ;;  %v3713_v3 = vrot.slane %v13855_v15, %v13798_v63  ;;  %v3856_v29 = vrot.slane %v10506_v47, %v13795_v49 }
 0x4a9   : > { %vm13862_vm10 = vcmask 589312   ;;  %vm13864_vm1 = vcmask 654912  }
 0x4aa   : > { %v3238_v8 = vpop.permute.xlu1 %3237  ;;  %v3778_v16 = vsel %vm1695_vm6, %v3777_v4, %v3773_v33  ;;  %v13857_v33 = vld [vmem:[#allocation219_spill] sm:$0xff]  ;;  %vm13866_vm12 = vmmov %vm13862_vm10 }
 0x4ab   : > { %v3841_v21 = vrot.slane %v3238_v8, %v13789_v19  ;;  %v13851_v8 = vld [vmem:[#allocation199_spill] sm:$0xff] }
 0x4ac   : > { %v3698_v20 = vrot.slane %v13851_v8, %v13795_v49 }
 0x4ad   : > { %v3842_v11 = vsel %vm1674_vm3, %v3841_v21, %v3837_v54  ;;  %v3625_v21 = vsel %vm13183_vm7, %v3624_v40, %v3620_v37  ;;  %v3787_v37 = vrot.slane %v13857_v33, %v13797_v52 }
 0x4ae   : > { %v3244_v57 = vpop.permute.xlu1 %3243  ;;  %v3699_v0 = vsel %vm1695_vm6, %v3698_v20, %v3694_v61  ;;  %v3847_v5 = vsel %vm1681_vm4, %v3846_v28, %v3842_v11  ;;  %v3783_v61 = vsel %vm13183_vm7, %v3782_v27, %v3778_v16  ;;  %v3792_v11 = vrot.slane %v10404_v2, %v13798_v63 }
 0x4af   : > { %v3851_v54 = vrot.slane %v3244_v57, %v13793_v7  ;;  %v3704_v48 = vsel %vm13183_vm7, %v3703_v10, %v3699_v0  ;;  %v13856_v57 = vld [vmem:[#allocation201_spill] sm:$0xff]  ;;  %v3586_v20 = vsel %vm1758_vm15, %v3585_v42, %v3581_v43  ;;  %v3630_v28 = vsel %vm13185_vm8, %v3629_v6, %v3625_v21  ;;  %v13859_v43 = vld [vmem:[#allocation218_spill] sm:$0xff]  ;;  %v13860_v0 = vld [vmem:[#allocation203_spill] sm:$0xff] }
 0x4b0   : > { %v3708_v40 = vrot.slane %v13856_v57, %v13797_v52  ;;  %v3635_v4 = vsel %vm13184_vm9, %v3634_v39, %v3630_v28  ;;  %v3723_v42 = vrot.slane %v13859_v43, %v13800_v45  ;;  %v3788_v6 = vsel %vm13185_vm8, %v3787_v37, %v3783_v61  ;;  %v3265_v61 = vpop.permute.xlu0 %3264 }
 0x4b1   : > { %v3852_v8 = vsel %vm1688_vm5, %v3851_v54, %v3847_v5  ;;  %v13858_v54 = vld [vmem:[#allocation204_spill] sm:$0xff]  ;;  %v3718_v5 = vrot.slane %v13860_v0, %v13799_v59  ;;  %v3866_v39 = vrot.slane %v3253_v44, %v13797_v52  ;;  %v3793_v15 = vsel %vm13184_vm9, %v3792_v11, %v3788_v6 }
 0x4b2   : > { %v3250_v10 = vpop.permute.xlu1 %3249  ;;  %v3644_v47 = vrot.slane %v13858_v54, %v13800_v45  ;;  %v3709_v27 = vsel %vm13185_vm8, %v3708_v40, %v3704_v48  ;;  %v3857_v60 = vsel %vm1695_vm6, %v3856_v29, %v3852_v8  ;;  %v3802_v48 = vrot.slane %v10432_v36, %v13800_v45  ;;  %v13863_v40 = vld [vmem:[#allocation221_spill] sm:$0xff] }
 0x4b3   : > { %v3861_v32 = vrot.slane %v3250_v10, %v13796_v24  ;;  %v3714_v2 = vsel %vm13184_vm9, %v3713_v3, %v3709_v27  ;;  %v13861_v3 = vld [vmem:[#allocation192_spill] sm:$0xff]  ;;  %v3640_v57 = vsel %vm13862_vm10, %v3639_v23, %v3635_v4  ;;  %v3797_v29 = vrot.slane %v13863_v40, %v13799_v59  ;;  %v13865_v10 = vld [vmem:[#allocation206_spill] sm:$0xff]  ;;  %v13869_v54 = vld [vmem:[#allocation205_spill] sm:$0xff] }
 0x4b4   : > { %v3669_v8 = vrot.slane %v13861_v3, %v13499_v53  ;;  %v3645_v11 = vsel %vm13864_vm1, %v3644_v47, %v3640_v57  ;;  %v3654_v36 = vrot.slane %v13865_v10, %v13803_v9  ;;  %v3719_v28 = vsel %vm13866_vm12, %v3718_v5, %v3714_v2  ;;  %v13879_v3 = vld [vmem:[#allocation207_spill] sm:$0xff]  ;;  %v13881_v10 = vld [vmem:[#allocation194_spill] sm:$0xff] }
 0x4b5   : > { %v3862_v21 = vsel %vm13183_vm7, %v3861_v32, %v3857_v60  ;;  %vm13867_vm7 = vmmov %vm13864_vm1  ;;  %v3733_v23 = vrot.slane %v13868_v56, %v13803_v9  ;;  %v3798_v32 = vsel %vm13862_vm10, %v3797_v29, %v3793_v15  ;;  %v3728_v27 = vrot.slane %v13869_v54, %v13804_v58  ;;  %v13882_v56 = vld [vmem:[#allocation210_spill] sm:$0xff] }
 0x4b6   : > { %v3256_v16 = vpop.permute.xlu1 %3255  ;;  %v3867_v33 = vsel %vm13185_vm8, %v3866_v39, %v3862_v21  ;;  %v3724_v37 = vsel %vm13867_vm7, %v3723_v42, %v3719_v28  ;;  %v3876_v47 = vrot.slane %v3259_v34, %v13799_v59  ;;  %v3803_v60 = vsel %vm13864_vm1, %v3802_v48, %v3798_v32  ;;  %v13871_v21 = vld [vmem:[#allocation102_spill] sm:$0xff]  ;;  %v3271_v48 = vpop.permute.xlu0 %3270 }
 0x4b7   : > { %v3871_v44 = vrot.slane %v3256_v16, %v13798_v63  ;;  %v3812_v2 = vrot.slane %v10456_v12, %v13803_v9  ;;  %v3591_v42 = vsel %vm1765_vm0, %v3590_v18, %v3586_v20  ;;  %vm13870_vm7 = vcmask 720512   ;;  %v13873_v12 = vld [vmem:[#allocation208_spill] sm:$0xff] }
 0x4b8   : > { %v3650_v6 = vsel %vm13870_vm7, %v3649_v35, %v3645_v11  ;;  %v3807_v0 = vrot.slane %v13871_v21, %v13804_v58  ;;  %vm13872_vm12 = vcmask 786112   ;;  %v3664_v39 = vrot.slane %v13873_v12, %v8942_v51  ;;  %vm13874_vm10 = vmmov %vm13870_vm7 }
 0x4b9   : > { %v3872_v4 = vsel %vm13184_vm9, %v3871_v44, %v3867_v33  ;;  %v3655_v5 = vsel %vm13872_vm12, %v3654_v36, %v3650_v6  ;;  %v3729_v15 = vsel %vm13874_vm10, %v3728_v27, %v3724_v37  ;;  %vm13875_vm1 = vcmask 589312   ;;  %vm13876_vm9 = vmmov %vm13872_vm12  ;;  %v13885_v27 = vld [vmem:[#allocation209_spill] sm:$0xff] }
 0x4ba   : > { %v3262_v43 = vpop.permute.xlu1 %3261  ;;  %v3877_v26 = vsel %vm13875_vm1, %v3876_v47, %v3872_v4  ;;  %v3734_v18 = vsel %vm13876_vm9, %v3733_v23, %v3729_v15  ;;  %v3743_v20 = vrot.slane %v13877_v13, %v8942_v51  ;;  %v3808_v35 = vsel %vm13870_vm7, %v3807_v0, %v3803_v60  ;;  %vm13880_vm12 = vmmov %vm13876_vm9 }
 0x4bb   : > { %v3881_v34 = vrot.slane %v3262_v43, %v13800_v45  ;;  %vm13878_vm8 = vcmask 654912   ;;  %v3738_v57 = vrot.slane %v13879_v3, %v13808_v22  ;;  %v3886_v40 = vrot.slane %v3265_v61, %v13804_v58 }
 0x4bc   : > { %v3813_v29 = vsel %vm13880_vm12, %v3812_v2, %v3808_v35  ;;  %v3822_v44 = vrot.slane %v10481_v1, %v8942_v51  ;;  %v3595_v36 = vrot.slane %v13881_v10, %v13817_v41  ;;  %v3660_v28 = vsel %vm1751_vm14, %v3659_v38, %v3655_v5  ;;  %v3277_v5 = vpop.permute.xlu0 %3276  ;;  %v13891_v10 = vld [vmem:[#allocation8_spill] sm:$0xff] }
 0x4bd   : > { %v3882_v16 = vsel %vm13878_vm8, %v3881_v34, %v3877_v26  ;;  %v3817_v33 = vrot.slane %v10346_v17, %v13808_v22  ;;  %v3665_v61 = vsel %vm1758_vm15, %v3664_v39, %v3660_v28  ;;  %v3674_v23 = vrot.slane %v13882_v56, %v13817_v41  ;;  %vm13883_vm8 = vmmov %vm13870_vm7  ;;  %v13892_v28 = vld [vmem:[#allocation12_spill] sm:$0xff]  ;;  %v13894_v56 = vld [vmem:[#allocation10_spill] sm:$0xff] }
 0x4be   : > { %v3268_v11 = vpop.permute.xlu1 %3267  ;;  %v3739_v1 = vsel %vm1751_vm14, %v3738_v57, %v3734_v18  ;;  %v3887_v32 = vsel %vm13883_vm8, %v3886_v40, %v3882_v16  ;;  %v3753_v54 = vrot.slane %v13884_v50, %v13817_v41  ;;  %v3748_v47 = vrot.slane %v13885_v27, %v13499_v53 }
 0x4bf   : > { %v3891_v37 = vrot.slane %v3268_v11, %v13803_v9  ;;  %v3744_v4 = vsel %vm1758_vm15, %v3743_v20, %v3739_v1  ;;  %v3818_v38 = vsel %vm1751_vm14, %v3817_v33, %v3813_v29  ;;  %v3896_v60 = vrot.slane %v3271_v48, %v13808_v22  ;;  %v13896_v1 = vld [vmem:[#allocation9_spill] sm:$0xff] }
 0x4c0   : > { %v3823_v2 = vsel %vm1758_vm15, %v3822_v44, %v3818_v38  ;;  %v3832_v43 = vrot.slane %v10517_v62, %v13817_v41  ;;  %v3596_v21 = vsel %vm1772_vm2, %v3595_v36, %v3591_v42  ;;  %v3670_v0 = vsel %vm1765_vm0, %v3669_v8, %v3665_v61  ;;  %v10716_v29 = vpop.permute.xlu0 %4155 }
 0x4c1   : > { %v3892_v17 = vsel %vm13876_vm9, %v3891_v37, %v3887_v32  ;;  %v3827_v34 = vrot.slane %v10385_v25, %v13499_v53  ;;  %vm13886_vm10 = vcmask 1041409   ;;  %v3675_v15 = vsel %vm1772_vm2, %v3674_v23, %v3670_v0  ;;  %v13893_v37 = vld [vmem:[#allocation13_spill] sm:$0xff] }
 0x4c2   : > { %v3274_v6 = vpop.permute.xlu1 %3273  ;;  %v3913_v39 = vsel %vm13886_vm10, %v10489_v30, %v10484_v14  ;;  %v3749_v26 = vsel %vm1765_vm0, %v3748_v47, %v3744_v4  ;;  %v3897_v62 = vsel %vm1751_vm14, %v3896_v60, %v3892_v17  ;;  %vm13887_vm1 = vcmask 1042434   ;;  %v13898_v4 = vld [vmem:[#allocation121_spill] sm:$0xff]  ;;  %v13900_v17 = vld [vmem:[#allocation136_spill] sm:$0xff]  ;;  %v13902_v47 = vld [vmem:[#allocation11_spill] sm:$0xff] }
 0x4c3   : > { %v3901_v12 = vrot.slane %v3274_v6, %v8942_v51  ;;  %v3914_v42 = vsel %vm13887_vm1, %v10509_v46, %v3913_v39  ;;  %v3754_v8 = vsel %vm1772_vm2, %v3753_v54, %v3749_v26  ;;  %v3828_v18 = vsel %vm1765_vm0, %v3827_v34, %v3823_v2  ;;  %v13899_v54 = vld [vmem:[#allocation16_spill] sm:$0xff]  ;;  %v13904_v2 = vld [vmem:[#allocation74_spill] sm:$0xff] }
 0x4c4   : > { %v3915_v13 = vsel %vm2331_vm11, %v3596_v21, %v3914_v42  ;;  %v3906_v20 = vrot.slane %v3277_v5, %v13499_v53  ;;  %v3833_v30 = vsel %vm1772_vm2, %v3832_v43, %v3828_v18  ;;  %vm13888_vm7 = vcmask 1045509   ;;  %v13905_v6 = vld [vmem:[#allocation122_spill] sm:$0xff]  ;;  %v13906_v34 = vld [vmem:[#allocation140_spill] sm:$0xff]  ;;  %v13914_v18 = vld [vmem:[#allocation59_spill] sm:$0xff] }
 0x4c5   : > { %v3902_v25 = vsel %vm1758_vm15, %v3901_v12, %v3897_v62  ;;  %v3916_v48 = vsel %vm2333_vm13, %v3675_v15, %v3915_v13  ;;  %vm13889_vm12 = vcmask 1046534   ;;  %vm13890_vm8 = vcmask 1047559   ;;  %v13908_v12 = vld [vmem:[#allocation27_spill] sm:$0xff]  ;;  %v13910_v15 = vld [vmem:[#allocation125_spill] sm:$0xff]  ;;  %v13911_v62 = vld [vmem:[#allocation90_spill] sm:$0xff] }
 0x4c6   : > { %v3280_v14 = vpop.permute.xlu1 %3279  ;;  %v3907_v16 = vsel %vm1765_vm0, %v3906_v20, %v3902_v25  ;;  %v3917_v46 = vsel %vm13888_vm7, %v3754_v8, %v3916_v48  ;;  %v13912_v8 = vld [vmem:[#allocation142_spill] sm:$0xff]  ;;  %v13916_v20 = vld [vmem:[#allocation17_spill] sm:$0xff]  ;;  %vm14217_vm9 = vcmask 392512   ;;  %vm14218_vm10 = vcmask 458112  }
 0x4c7   : > { %v3911_v35 = vrot.slane %v3280_v14, %v13817_v41  ;;  %v3918_v57 = vsel %vm13889_vm12, %v3833_v30, %v3917_v46  ;;  %v13917_v30 = vld [vmem:[#allocation127_spill] sm:$0xff]  ;;  %vm14219_vm1 = vmmov %vm14217_vm9  ;;  %vm14220_vm7 = vcmask 523712  }
 0x4c8   : > { %vm14221_vm12 = vmmov %vm14218_vm10 }
 0x4c9   : > { %v3912_v3 = vsel %vm1772_vm2, %v3911_v35, %v3907_v16  ;;  %v13918_v16 = vld [vmem:[#allocation144_spill] sm:$0xff] }
 0x4ca   : > { %v3919_v40 = vsel %vm13890_vm8, %v3912_v3, %v3918_v57  ;;  %v10744_v0 = vpop.permute.xlu1 %4143  ;;  %v13920_v3 = vld [vmem:[#allocation100_spill] sm:$0xff]  ;;  %vm14223_vm8 = vcmask 589312  }
 0x4cb   : > { %3921 = vadd.xlane.f32.xlu0 %v3919_v40  ;;  %v13922_v40 = vld [vmem:[#allocation15_spill] sm:$0xff] }
 0x4ce   : > { %v10764_v48 = vpop.permute.xlu1 %4147 }
 0x558   : > { %v3922_v44 = vpop.xlane.xlu0 %3921 }
 0x559   : > { %7767 = vrcp.f32 %v3922_v44 }
 0x563   : > { %v10718_v11 = vpop.eup %7767 }
 0x564   : > { %v3928_v36 = vrot.slane %v10718_v11, %v13891_v10 }
 0x566   : > { %v3966_v33 = vmul.f32 %v13892_v28, %v3928_v36  ;;  %v3965_v61 = vmul.f32 %v13893_v37, %v3928_v36  ;;  %v3968_v50 = vmul.f32 %v13898_v4, %v3928_v36  ;;  %v3967_v38 = vmul.f32 %v13899_v54, %v3928_v36  ;;  %v13923_v28 = vld [vmem:[#allocation19_spill] sm:$0xff]  ;;  %v10778_v37 = vpop.permute.xlu1 %4151  ;;  %v13927_v54 = vld [vmem:[#allocation18_spill] sm:$0xff] }
 0x567   : > { %v3970_v43 = vmul.f32 %v13904_v2, %v3928_v36  ;;  %v3969_v21 = vmul.f32 %v13905_v6, %v3928_v36  ;;  %v3972_v26 = vmul.f32 %v13910_v15, %v3928_v36  ;;  %v3971_v42 = vmul.f32 %v13911_v62, %v3928_v36  ;;  %v13928_v2 = vld [vmem:[#allocation20_spill] sm:$0xff]  ;;  %v13929_v6 = vld [vmem:[#allocation14_spill] sm:$0xff]  ;;  %v13932_v62 = vld [vmem:[#allocation73_spill] sm:$0xff] }
 0x568   : > { %v10725_v23 = vmul.f32 %v13894_v56, %v3966_v33  ;;  %v10728_v32 = vmul.f32 %v13896_v1, %v3965_v61  ;;  %v10735_v27 = vmul.f32 %v13900_v17, %v3968_v50  ;;  %v10738_v60 = vmul.f32 %v13902_v47, %v3967_v38  ;;  %v13924_v61 = vld [vmem:[#allocation149_spill] sm:$0xff] }
 0x569   : > { %v10747_v5 = vmul.f32 %v13906_v34, %v3970_v43  ;;  %v10750_v39 = vmul.f32 %v13908_v12, %v3969_v21  ;;  %v10757_v25 = vmul.f32 %v13912_v8, %v3972_v26  ;;  %v10760_v13 = vmul.f32 %v13914_v18, %v3971_v42 }
 0x56a   : > { %13895 = vst [vmem:[#allocation104_spill] sm:$0xff] %v10725_v23  ;;  %13897 = vst [vmem:[#allocation105_spill] sm:$0xff] %v10728_v32  ;;  %4437 = vperm.xlu1 %7253, %v10725_v23   ;;  %4434 = vperm.xlu0 %7254, %v10728_v32   ;;  %v3974_v14 = vmul.f32 %v13916_v20, %v3928_v36  ;;  %v3973_v35 = vmul.f32 %v13917_v30, %v3928_v36  ;;  %v13933_v20 = vld [vmem:[#allocation54_spill] sm:$0xff]  ;;  %v10800_v30 = vpop.permute.xlu1 %4159 }
 0x56b   : > { %13901 = vst [vmem:[#allocation107_spill] sm:$0xff] %v10735_v27  ;;  %13903 = vst [vmem:[#allocation108_spill] sm:$0xff] %v10738_v60  ;;  %v3975_v44 = vmul.f32 %v13922_v40, %v3928_v36  ;;  %v3976_v33 = vmul.f32 %v13923_v28, %v3928_v36  ;;  %v3977_v38 = vmul.f32 %v13927_v54, %v3928_v36 }
 0x56c   : > { %13907 = vst [vmem:[#allocation109_spill] sm:$0xff] %v10747_v5  ;;  %13909 = vst [vmem:[#allocation111_spill] sm:$0xff] %v10750_v39  ;;  %v10769_v46 = vmul.f32 %v13918_v16, %v3974_v14  ;;  %v10772_v57 = vmul.f32 %v13920_v3, %v3973_v35  ;;  %v3978_v43 = vmul.f32 %v13928_v2, %v3928_v36  ;;  %v13940_v2 = vld [vmem:[#allocation91_spill] sm:$0xff] }
 0x56d   : > { %13913 = vst [vmem:[#allocation113_spill] sm:$0xff] %v10757_v25  ;;  %13915 = vst [vmem:[#allocation114_spill] sm:$0xff] %v10760_v13  ;;  %v10781_v4 = vmul.f32 %v13924_v61, %v3975_v44  ;;  %v10784_v50 = vmul.f32 %v10744_v0, %v3976_v33  ;;  %v3932_v21 = vrot.slane %v10718_v11, %v13929_v6  ;;  %v13936_v44 = vld [vmem:[#allocation75_spill] sm:$0xff]  ;;  %v13937_v33 = vld [vmem:[#allocation76_spill] sm:$0xff] }
 0x56e   : > { %4443 = vperm.xlu1 %7253, %v10735_v27   ;;  %4440 = vperm.xlu0 %7254, %v10738_v60   ;;  %13919 = vst [vmem:[#allocation165_spill] sm:$0xff] %v10769_v46  ;;  %13921 = vst [vmem:[#allocation173_spill] sm:$0xff] %v10772_v57  ;;  %v10793_v15 = vmul.f32 %v10764_v48, %v3977_v38  ;;  %v10796_v26 = vmul.f32 %v10778_v37, %v3978_v43  ;;  %v14067_v60 = vld [vmem:[#allocation155_spill] sm:$0xff] }
 0x56f   : > { %13925 = vst [vmem:[#allocation156_spill] sm:$0xff] %v10781_v4  ;;  %13926 = vst [vmem:[#allocation50_spill] sm:$0xff] %v10784_v50  ;;  %v3979_v42 = vmul.f32 %v13932_v62, %v3928_v36  ;;  %v3980_v14 = vmul.f32 %v13933_v20, %v3928_v36  ;;  %v3981_v28 = vmul.f32 %v13936_v44, %v3932_v21  ;;  %v13941_v62 = vld [vmem:[#allocation92_spill] sm:$0xff] }
 0x570   : > { %13930 = vst [vmem:[#allocation162_spill] sm:$0xff] %v10793_v15  ;;  %13931 = vst [vmem:[#allocation62_spill] sm:$0xff] %v10796_v26  ;;  %v3982_v54 = vmul.f32 %v13937_v33, %v3932_v21  ;;  %v3983_v43 = vmul.f32 %v13940_v2, %v3932_v21  ;;  %v13944_v44 = vld [vmem:[#allocation124_spill] sm:$0xff]  ;;  %v13945_v33 = vld [vmem:[#allocation130_spill] sm:$0xff] }
 0x571   : > { %v10805_v35 = vmul.f32 %v10716_v29, %v3979_v42  ;;  %v10808_v40 = vmul.f32 %v10800_v30, %v3980_v14  ;;  %v10815_v36 = vmul.f32 %v13896_v1, %v3981_v28  ;;  %v3984_v42 = vmul.f32 %v13941_v62, %v3932_v21  ;;  %v13948_v62 = vld [vmem:[#allocation126_spill] sm:$0xff] }
 0x572   : > { %4449 = vperm.xlu1 %7253, %v10747_v5   ;;  %4446 = vperm.xlu0 %7254, %v10750_v39   ;;  %v10818_v38 = vmul.f32 %v13894_v56, %v3982_v54  ;;  %v10825_v20 = vmul.f32 %v13902_v47, %v3983_v43  ;;  %v3985_v28 = vmul.f32 %v13944_v44, %v3932_v21 }
 0x573   : > { %13934 = vst [vmem:[#allocation185_spill] sm:$0xff] %v10805_v35  ;;  %13935 = vst [vmem:[#allocation167_spill] sm:$0xff] %v10808_v40  ;;  %v10828_v14 = vmul.f32 %v13900_v17, %v3984_v42  ;;  %v3987_v43 = vmul.f32 %v13948_v62, %v3932_v21  ;;  %v13956_v62 = vld [vmem:[#allocation23_spill] sm:$0xff] }
 0x574   : > { %13938 = vst [vmem:[#allocation176_spill] sm:$0xff] %v10815_v36  ;;  %13939 = vst [vmem:[#allocation64_spill] sm:$0xff] %v10818_v38  ;;  %v10835_v54 = vmul.f32 %v13908_v12, %v3985_v28 }
 0x575   : > { %13942 = vst [vmem:[#allocation169_spill] sm:$0xff] %v10825_v20  ;;  %13943 = vst [vmem:[#allocation171_spill] sm:$0xff] %v10828_v14  ;;  %v10845_v42 = vmul.f32 %v13914_v18, %v3987_v43  ;;  %v3991_v43 = vmul.f32 %v13956_v62, %v3932_v21 }
 0x576   : > { %4455 = vperm.xlu1 %7253, %v10757_v25   ;;  %4452 = vperm.xlu0 %7254, %v10760_v13   ;;  %13946 = vst [vmem:[#allocation174_spill] sm:$0xff] %v10835_v54 }
 0x577   : > { %13950 = vst [vmem:[#allocation188_spill] sm:$0xff] %v10845_v42 }
 0x57a   : > { %4461 = vperm.xlu1 %7253, %v10769_v46   ;;  %4458 = vperm.xlu0 %7254, %v10772_v57   ;;  %v13966_v46 = vld [vmem:[#allocation56_spill] sm:$0xff] }
 0x57b   : > { %v3996_v25 = vmul.f32 %v13966_v46, %v3932_v21 }
 0x57e   : > { %4464 = vperm.xlu0 %7254, %v10781_v4   ;;  %4467 = vperm.xlu1 %7253, %v10784_v50  }
 0x582   : > { %4470 = vperm.xlu0 %7254, %v10793_v15   ;;  %4473 = vperm.xlu1 %7253, %v10796_v26  }
 0x586   : > { %4476 = vperm.xlu0 %7254, %v10805_v35   ;;  %4479 = vperm.xlu1 %7253, %v10808_v40   ;;  %v3986_v35 = vmul.f32 %v13945_v33, %v3932_v21  ;;  %v13952_v33 = vld [vmem:[#allocation21_spill] sm:$0xff] }
 0x587   : > { %v3989_v28 = vmul.f32 %v13952_v33, %v3932_v21  ;;  %v13960_v33 = vld [vmem:[#allocation25_spill] sm:$0xff] }
 0x588   : > { %v10838_v2 = vmul.f32 %v13906_v34, %v3986_v35 }
 0x589   : > { %v10855_v35 = vmul.f32 %v13920_v3, %v3989_v28  ;;  %v3993_v28 = vmul.f32 %v13960_v33, %v3932_v21  ;;  %v10890_v33 = vmul.f32 %v10800_v30, %v3996_v25 }
 0x58a   : > { %4482 = vperm.xlu0 %7254, %v10815_v36   ;;  %4485 = vperm.xlu1 %7253, %v10818_v38   ;;  %13947 = vst [vmem:[#allocation196_spill] sm:$0xff] %v10838_v2  ;;  %v13949_v36 = vld [vmem:[#allocation132_spill] sm:$0xff] }
 0x58b   : > { %v3988_v26 = vmul.f32 %v13949_v36, %v3932_v21  ;;  %13954 = vst [vmem:[#allocation88_spill] sm:$0xff] %v10855_v35  ;;  %v10877_v62 = vmul.f32 %v10764_v48, %v3993_v28  ;;  %13968 = vst [vmem:[#allocation211_spill] sm:$0xff] %v10890_v33 }
 0x58d   : > { %v10848_v44 = vmul.f32 %v13912_v8, %v3988_v26  ;;  %v10865_v26 = vmul.f32 %v13924_v61, %v3991_v43  ;;  %13963 = vst [vmem:[#allocation183_spill] sm:$0xff] %v10877_v62 }
 0x58e   : > { %4488 = vperm.xlu0 %7254, %v10825_v20   ;;  %4491 = vperm.xlu1 %7253, %v10828_v14   ;;  %v13953_v20 = vld [vmem:[#allocation22_spill] sm:$0xff] }
 0x58f   : > { %13951 = vst [vmem:[#allocation212_spill] sm:$0xff] %v10848_v44  ;;  %v3990_v15 = vmul.f32 %v13953_v20, %v3932_v21  ;;  %13958 = vst [vmem:[#allocation179_spill] sm:$0xff] %v10865_v26 }
 0x591   : > { %v10858_v36 = vmul.f32 %v13918_v16, %v3990_v15  ;;  %v13962_v15 = vld [vmem:[#allocation123_spill] sm:$0xff] }
 0x592   : > { %4494 = vperm.xlu0 %7254, %v10835_v54   ;;  %4497 = vperm.xlu1 %7253, %v10838_v2   ;;  %v13957_v54 = vld [vmem:[#allocation24_spill] sm:$0xff] }
 0x593   : > { %13955 = vst [vmem:[#allocation112_spill] sm:$0xff] %v10858_v36  ;;  %v3992_v50 = vmul.f32 %v13957_v54, %v3932_v21  ;;  %v3936_v54 = vrot.slane %v10718_v11, %v13962_v15  ;;  %v13970_v15 = vld [vmem:[#allocation78_spill] sm:$0xff] }
 0x595   : > { %v10868_v20 = vmul.f32 %v10744_v0, %v3992_v50 }
 0x596   : > { %4500 = vperm.xlu0 %7254, %v10845_v42   ;;  %4503 = vperm.xlu1 %7253, %v10848_v44   ;;  %v13961_v42 = vld [vmem:[#allocation26_spill] sm:$0xff] }
 0x597   : > { %13959 = vst [vmem:[#allocation181_spill] sm:$0xff] %v10868_v20  ;;  %v3994_v4 = vmul.f32 %v13961_v42, %v3932_v21 }
 0x599   : > { %v10880_v43 = vmul.f32 %v10778_v37, %v3994_v4 }
 0x59a   : > { %4506 = vperm.xlu0 %7254, %v10855_v35   ;;  %4509 = vperm.xlu1 %7253, %v10858_v36   ;;  %v13965_v35 = vld [vmem:[#allocation55_spill] sm:$0xff] }
 0x59b   : > { %13964 = vst [vmem:[#allocation195_spill] sm:$0xff] %v10880_v43  ;;  %v3995_v50 = vmul.f32 %v13965_v35, %v3932_v21  ;;  %v13973_v21 = vld [vmem:[#allocation93_spill] sm:$0xff] }
 0x59c   : > { %v3999_v35 = vmul.f32 %v13973_v21, %v3936_v54 }
 0x59d   : > { %v10887_v42 = vmul.f32 %v10716_v29, %v3995_v50  ;;  %v13974_v50 = vld [vmem:[#allocation94_spill] sm:$0xff] }
 0x59e   : > { %4512 = vperm.xlu0 %7254, %v10865_v26   ;;  %4515 = vperm.xlu1 %7253, %v10868_v20   ;;  %v13969_v26 = vld [vmem:[#allocation77_spill] sm:$0xff]  ;;  %v3998_v20 = vmul.f32 %v13970_v15, %v3936_v54  ;;  %v10907_v25 = vmul.f32 %v13902_v47, %v3999_v35 }
 0x59f   : > { %13967 = vst [vmem:[#allocation198_spill] sm:$0xff] %v10887_v42  ;;  %v3997_v28 = vmul.f32 %v13969_v26, %v3936_v54  ;;  %v13977_v15 = vld [vmem:[#allocation129_spill] sm:$0xff] }
 0x5a0   : > { %v10900_v4 = vmul.f32 %v13894_v56, %v3998_v20  ;;  %13975 = vst [vmem:[#allocation189_spill] sm:$0xff] %v10907_v25 }
 0x5a1   : > { %v10897_v46 = vmul.f32 %v13896_v1, %v3997_v28  ;;  %v4001_v28 = vmul.f32 %v13977_v15, %v3936_v54  ;;  %v13985_v15 = vld [vmem:[#allocation33_spill] sm:$0xff] }
 0x5a2   : > { %4518 = vperm.xlu0 %7254, %v10877_v62   ;;  %4521 = vperm.xlu1 %7253, %v10880_v43   ;;  %13972 = vst [vmem:[#allocation213_spill] sm:$0xff] %v10900_v4  ;;  %v4000_v62 = vmul.f32 %v13974_v50, %v3936_v54  ;;  %v13981_v50 = vld [vmem:[#allocation131_spill] sm:$0xff] }
 0x5a3   : > { %13971 = vst [vmem:[#allocation186_spill] sm:$0xff] %v10897_v46  ;;  %v10917_v20 = vmul.f32 %v13908_v12, %v4001_v28  ;;  %v4003_v35 = vmul.f32 %v13981_v50, %v3936_v54  ;;  %v4005_v28 = vmul.f32 %v13985_v15, %v3936_v54  ;;  %v13989_v50 = vld [vmem:[#allocation35_spill] sm:$0xff]  ;;  %v13993_v15 = vld [vmem:[#allocation37_spill] sm:$0xff] }
 0x5a4   : > { %v10910_v26 = vmul.f32 %v13900_v17, %v4000_v62 }
 0x5a5   : > { %13979 = vst [vmem:[#allocation214_spill] sm:$0xff] %v10917_v20  ;;  %v10927_v62 = vmul.f32 %v13914_v18, %v4003_v35  ;;  %v4007_v35 = vmul.f32 %v13989_v50, %v3936_v54 }
 0x5a6   : > { %4524 = vperm.xlu0 %7254, %v10887_v42   ;;  %4527 = vperm.xlu1 %7253, %v10890_v33   ;;  %13976 = vst [vmem:[#allocation197_spill] sm:$0xff] %v10910_v26  ;;  %v13978_v42 = vld [vmem:[#allocation135_spill] sm:$0xff] }
 0x5a7   : > { %v4002_v33 = vmul.f32 %v13978_v42, %v3936_v54  ;;  %13983 = vst [vmem:[#allocation215_spill] sm:$0xff] %v10927_v62 }
 0x5a9   : > { %v10920_v21 = vmul.f32 %v13906_v34, %v4002_v33  ;;  %v10937_v33 = vmul.f32 %v13920_v3, %v4005_v28  ;;  %v4009_v28 = vmul.f32 %v13993_v15, %v3936_v54 }
 0x5aa   : > { %4530 = vperm.xlu0 %7254, %v10897_v46   ;;  %4533 = vperm.xlu1 %7253, %v10900_v4   ;;  %v13982_v46 = vld [vmem:[#allocation138_spill] sm:$0xff] }
 0x5ab   : > { %13980 = vst [vmem:[#allocation200_spill] sm:$0xff] %v10920_v21  ;;  %v4004_v4 = vmul.f32 %v13982_v46, %v3936_v54  ;;  %13987 = vst [vmem:[#allocation191_spill] sm:$0xff] %v10937_v33  ;;  %v10959_v50 = vmul.f32 %v10764_v48, %v4009_v28 }
 0x5ad   : > { %v10930_v42 = vmul.f32 %v13912_v8, %v4004_v4  ;;  %v10947_v4 = vmul.f32 %v13924_v61, %v4007_v35  ;;  %13996 = vst [vmem:[#allocation201_spill] sm:$0xff] %v10959_v50 }
 0x5ae   : > { %4536 = vperm.xlu0 %7254, %v10907_v25   ;;  %4539 = vperm.xlu1 %7253, %v10910_v26   ;;  %v13986_v25 = vld [vmem:[#allocation139_spill] sm:$0xff] }
 0x5af   : > { %13984 = vst [vmem:[#allocation199_spill] sm:$0xff] %v10930_v42  ;;  %v4006_v26 = vmul.f32 %v13986_v25, %v3936_v54  ;;  %13991 = vst [vmem:[#allocation202_spill] sm:$0xff] %v10947_v4 }
 0x5b1   : > { %v10940_v46 = vmul.f32 %v13918_v16, %v4006_v26  ;;  %v13995_v26 = vld [vmem:[#allocation128_spill] sm:$0xff] }
 0x5b2   : > { %4542 = vperm.xlu0 %7254, %v10917_v20   ;;  %4545 = vperm.xlu1 %7253, %v10920_v21   ;;  %v13990_v20 = vld [vmem:[#allocation36_spill] sm:$0xff] }
 0x5b3   : > { %13988 = vst [vmem:[#allocation216_spill] sm:$0xff] %v10940_v46  ;;  %v4008_v21 = vmul.f32 %v13990_v20, %v3936_v54  ;;  %v3940_v20 = vrot.slane %v10718_v11, %v13995_v26  ;;  %v14003_v26 = vld [vmem:[#allocation80_spill] sm:$0xff] }
 0x5b5   : > { %v10950_v25 = vmul.f32 %v10744_v0, %v4008_v21 }
 0x5b6   : > { %4548 = vperm.xlu0 %7254, %v10927_v62   ;;  %4551 = vperm.xlu1 %7253, %v10930_v42   ;;  %v13994_v62 = vld [vmem:[#allocation38_spill] sm:$0xff] }
 0x5b7   : > { %13992 = vst [vmem:[#allocation217_spill] sm:$0xff] %v10950_v25  ;;  %v4010_v42 = vmul.f32 %v13994_v62, %v3936_v54 }
 0x5b9   : > { %v10962_v35 = vmul.f32 %v10778_v37, %v4010_v42 }
 0x5ba   : > { %4554 = vperm.xlu0 %7254, %v10937_v33   ;;  %4557 = vperm.xlu1 %7253, %v10940_v46   ;;  %v13998_v33 = vld [vmem:[#allocation57_spill] sm:$0xff] }
 0x5bb   : > { %13997 = vst [vmem:[#allocation219_spill] sm:$0xff] %v10962_v35  ;;  %v4011_v21 = vmul.f32 %v13998_v33, %v3936_v54  ;;  %v13999_v46 = vld [vmem:[#allocation141_spill] sm:$0xff]  ;;  %v14006_v33 = vld [vmem:[#allocation95_spill] sm:$0xff] }
 0x5bc   : > { %v4012_v43 = vmul.f32 %v13999_v46, %v3936_v54  ;;  %v4015_v46 = vmul.f32 %v14006_v33, %v3940_v20 }
 0x5bd   : > { %v10969_v62 = vmul.f32 %v10716_v29, %v4011_v21  ;;  %v14007_v21 = vld [vmem:[#allocation96_spill] sm:$0xff] }
 0x5be   : > { %4560 = vperm.xlu0 %7254, %v10947_v4   ;;  %4563 = vperm.xlu1 %7253, %v10950_v25   ;;  %v10972_v15 = vmul.f32 %v10800_v30, %v4012_v43  ;;  %v14002_v4 = vld [vmem:[#allocation79_spill] sm:$0xff]  ;;  %v4014_v25 = vmul.f32 %v14003_v26, %v3940_v20  ;;  %v10989_v43 = vmul.f32 %v13902_v47, %v4015_v46  ;;  %v14010_v26 = vld [vmem:[#allocation134_spill] sm:$0xff] }
 0x5bf   : > { %14000 = vst [vmem:[#allocation204_spill] sm:$0xff] %v10969_v62  ;;  %v4013_v28 = vmul.f32 %v14002_v4, %v3940_v20 }
 0x5c0   : > { %14001 = vst [vmem:[#allocation218_spill] sm:$0xff] %v10972_v15  ;;  %v10982_v42 = vmul.f32 %v13894_v56, %v4014_v25  ;;  %14008 = vst [vmem:[#allocation221_spill] sm:$0xff] %v10989_v43 }
 0x5c1   : > { %v10979_v54 = vmul.f32 %v13896_v1, %v4013_v28  ;;  %v4017_v28 = vmul.f32 %v14010_v26, %v3940_v20  ;;  %v14018_v26 = vld [vmem:[#allocation34_spill] sm:$0xff] }
 0x5c2   : > { %4566 = vperm.xlu0 %7254, %v10959_v50   ;;  %4569 = vperm.xlu1 %7253, %v10962_v35   ;;  %14005 = vst [vmem:[#allocation192_spill] sm:$0xff] %v10982_v42  ;;  %v4016_v50 = vmul.f32 %v14007_v21, %v3940_v20  ;;  %v14014_v21 = vld [vmem:[#allocation137_spill] sm:$0xff] }
 0x5c3   : > { %14004 = vst [vmem:[#allocation203_spill] sm:$0xff] %v10979_v54  ;;  %v10999_v25 = vmul.f32 %v13908_v12, %v4017_v28  ;;  %v4019_v46 = vmul.f32 %v14014_v21, %v3940_v20  ;;  %v4021_v28 = vmul.f32 %v14018_v26, %v3940_v20  ;;  %v14022_v21 = vld [vmem:[#allocation29_spill] sm:$0xff]  ;;  %v14026_v26 = vld [vmem:[#allocation31_spill] sm:$0xff] }
 0x5c4   : > { %v10992_v4 = vmul.f32 %v13900_v17, %v4016_v50 }
 0x5c5   : > { %14012 = vst [vmem:[#allocation220_spill] sm:$0xff] %v10999_v25  ;;  %v11009_v50 = vmul.f32 %v13914_v18, %v4019_v46  ;;  %v4023_v46 = vmul.f32 %v14022_v21, %v3940_v20 }
 0x5c6   : > { %4572 = vperm.xlu0 %7254, %v10969_v62   ;;  %4575 = vperm.xlu1 %7253, %v10972_v15   ;;  %14009 = vst [vmem:[#allocation206_spill] sm:$0xff] %v10992_v4  ;;  %v14011_v62 = vld [vmem:[#allocation146_spill] sm:$0xff] }
 0x5c7   : > { %v4018_v15 = vmul.f32 %v14011_v62, %v3940_v20  ;;  %14016 = vst [vmem:[#allocation102_spill] sm:$0xff] %v11009_v50 }
 0x5c9   : > { %v11002_v33 = vmul.f32 %v13906_v34, %v4018_v15  ;;  %v11019_v15 = vmul.f32 %v13920_v3, %v4021_v28  ;;  %v4025_v28 = vmul.f32 %v14026_v26, %v3940_v20 }
 0x5ca   : > { %4578 = vperm.xlu0 %7254, %v10979_v54   ;;  %4581 = vperm.xlu1 %7253, %v10982_v42   ;;  %v14015_v54 = vld [vmem:[#allocation148_spill] sm:$0xff] }
 0x5cb   : > { %14013 = vst [vmem:[#allocation205_spill] sm:$0xff] %v11002_v33  ;;  %v4020_v42 = vmul.f32 %v14015_v54, %v3940_v20  ;;  %14020 = vst [vmem:[#allocation222_spill] sm:$0xff] %v11019_v15  ;;  %v11043_v21 = vmul.f32 %v10764_v48, %v4025_v28  ;;  %v14035_v28 = vld [vmem:[#allocation81_spill] sm:$0xff] }
 0x5cd   : > { %v11012_v62 = vmul.f32 %v13912_v8, %v4020_v42  ;;  %v11029_v42 = vmul.f32 %v13924_v61, %v4023_v46  ;;  %14029 = vst [vmem:[#allocation99_spill] sm:$0xff] %v11043_v21 }
 0x5ce   : > { %4584 = vperm.xlu0 %7254, %v10989_v43   ;;  %4587 = vperm.xlu1 %7253, %v10992_v4   ;;  %v14019_v43 = vld [vmem:[#allocation28_spill] sm:$0xff] }
 0x5cf   : > { %14017 = vst [vmem:[#allocation208_spill] sm:$0xff] %v11012_v62  ;;  %v4022_v4 = vmul.f32 %v14019_v43, %v3940_v20  ;;  %14024 = vst [vmem:[#allocation194_spill] sm:$0xff] %v11029_v42 }
 0x5d1   : > { %v11022_v54 = vmul.f32 %v13918_v16, %v4022_v4  ;;  %v14028_v4 = vld [vmem:[#allocation133_spill] sm:$0xff] }
 0x5d2   : > { %4590 = vperm.xlu0 %7254, %v10999_v25   ;;  %4593 = vperm.xlu1 %7253, %v11002_v33   ;;  %v14023_v25 = vld [vmem:[#allocation30_spill] sm:$0xff] }
 0x5d3   : > { %14021 = vst [vmem:[#allocation207_spill] sm:$0xff] %v11022_v54  ;;  %v4024_v33 = vmul.f32 %v14023_v25, %v3940_v20  ;;  %v11040_v25 = vrot.slane %v10718_v11, %v14028_v4 }
 0x5d5   : > { %v11032_v43 = vmul.f32 %v10744_v0, %v4024_v33  ;;  %v14031_v33 = vld [vmem:[#allocation58_spill] sm:$0xff]  ;;  %v4044_v38 = vmul.f32 %v14067_v60, %v11040_v25 }
 0x5d6   : > { %4596 = vperm.xlu0 %7254, %v11009_v50   ;;  %4599 = vperm.xlu1 %7253, %v11012_v62   ;;  %v14027_v50 = vld [vmem:[#allocation32_spill] sm:$0xff] }
 0x5d7   : > { %14025 = vst [vmem:[#allocation210_spill] sm:$0xff] %v11032_v43  ;;  %v4026_v62 = vmul.f32 %v14027_v50, %v3940_v20 }
 0x5d9   : > { %v11046_v46 = vmul.f32 %v10778_v37, %v4026_v62  ;;  %v14036_v62 = vld [vmem:[#allocation82_spill] sm:$0xff] }
 0x5da   : > { %4602 = vperm.xlu0 %7254, %v11019_v15   ;;  %4605 = vperm.xlu1 %7253, %v11022_v54   ;;  %v4027_v15 = vmul.f32 %v14031_v33, %v3940_v20  ;;  %v14032_v54 = vld [vmem:[#allocation60_spill] sm:$0xff]  ;;  %v4030_v4 = vmul.f32 %v14036_v62, %v11040_v25  ;;  %v14043_v62 = vld [vmem:[#allocation145_spill] sm:$0xff] }
 0x5db   : > { %14030 = vst [vmem:[#allocation209_spill] sm:$0xff] %v11046_v46  ;;  %v4028_v26 = vmul.f32 %v14032_v54, %v3940_v20 }
 0x5dc   : > { %v11053_v50 = vmul.f32 %v10716_v29, %v4027_v15  ;;  %v11068_v54 = vmul.f32 %v13894_v56, %v4030_v4  ;;  %v14039_v15 = vld [vmem:[#allocation97_spill] sm:$0xff] }
 0x5dd   : > { %v4031_v33 = vmul.f32 %v14039_v15, %v11040_v25  ;;  %v4033_v15 = vmul.f32 %v14043_v62, %v11040_v25 }
 0x5de   : > { %4608 = vperm.xlu0 %7254, %v11029_v42   ;;  %4611 = vperm.xlu1 %7253, %v11032_v43   ;;  %14033 = vst [vmem:[#allocation12_spill] sm:$0xff] %v11053_v50  ;;  %v11056_v42 = vmul.f32 %v10800_v30, %v4028_v26  ;;  %v4029_v43 = vmul.f32 %v14035_v28, %v11040_v25  ;;  %14038 = vst [vmem:[#allocation9_spill] sm:$0xff] %v11068_v54  ;;  %v14040_v26 = vld [vmem:[#allocation150_spill] sm:$0xff] }
 0x5e0   : > { %14034 = vst [vmem:[#allocation13_spill] sm:$0xff] %v11056_v42  ;;  %v11065_v20 = vmul.f32 %v13896_v1, %v4029_v43  ;;  %v11081_v43 = vmul.f32 %v13902_v47, %v4031_v33  ;;  %v11097_v33 = vmul.f32 %v13908_v12, %v4033_v15 }
 0x5e2   : > { %4614 = vperm.xlu0 %7254, %v11043_v21   ;;  %4617 = vperm.xlu1 %7253, %v11046_v46   ;;  %14037 = vst [vmem:[#allocation10_spill] sm:$0xff] %v11065_v20  ;;  %v4032_v21 = vmul.f32 %v14040_v26, %v11040_v25  ;;  %14041 = vst [vmem:[#allocation121_spill] sm:$0xff] %v11081_v43 }
 0x5e3   : > { %14045 = vst [vmem:[#allocation136_spill] sm:$0xff] %v11097_v33 }
 0x5e4   : > { %v11084_v4 = vmul.f32 %v13900_v17, %v4032_v21 }
 0x5e6   : > { %4620 = vperm.xlu0 %7254, %v11053_v50   ;;  %4623 = vperm.xlu1 %7253, %v11056_v42   ;;  %14042 = vst [vmem:[#allocation16_spill] sm:$0xff] %v11084_v4  ;;  %v14044_v50 = vld [vmem:[#allocation153_spill] sm:$0xff] }
 0x5e7   : > { %v4034_v26 = vmul.f32 %v14044_v50, %v11040_v25 }
 0x5e9   : > { %v11074_v28 = vpop.permute.xlu0 %4434  ;;  %v11076_v46 = vpop.permute.xlu1 %4437  ;;  %v11100_v21 = vmul.f32 %v13906_v34, %v4034_v26 }
 0x5ea   : > { %4626 = vperm.xlu0 %7254, %v11065_v20   ;;  %4629 = vperm.xlu1 %7253, %v11068_v54   ;;  %v14047_v20 = vld [vmem:[#allocation147_spill] sm:$0xff]  ;;  %v14048_v54 = vld [vmem:[#allocation154_spill] sm:$0xff] }
 0x5eb   : > { %14046 = vst [vmem:[#allocation11_spill] sm:$0xff] %v11100_v21  ;;  %v4035_v62 = vmul.f32 %v14047_v20, %v11040_v25  ;;  %v4036_v50 = vmul.f32 %v14048_v54, %v11040_v25 }
 0x5ed   : > { %v11090_v42 = vpop.permute.xlu0 %4440  ;;  %v11092_v35 = vpop.permute.xlu1 %4443  ;;  %v11113_v15 = vmul.f32 %v13914_v18, %v4035_v62  ;;  %v11116_v26 = vmul.f32 %v13912_v8, %v4036_v50 }
 0x5ee   : > { %4632 = vperm.xlu0 %7254, %v11081_v43   ;;  %4635 = vperm.xlu1 %7253, %v11084_v4   ;;  %v14051_v43 = vld [vmem:[#allocation39_spill] sm:$0xff]  ;;  %v14052_v4 = vld [vmem:[#allocation40_spill] sm:$0xff] }
 0x5ef   : > { %14049 = vst [vmem:[#allocation74_spill] sm:$0xff] %v11113_v15  ;;  %14050 = vst [vmem:[#allocation122_spill] sm:$0xff] %v11116_v26  ;;  %v4037_v20 = vmul.f32 %v14051_v43, %v11040_v25  ;;  %v4038_v54 = vmul.f32 %v14052_v4, %v11040_v25 }
 0x5f1   : > { %v11106_v13 = vpop.permute.xlu0 %4446  ;;  %v11108_v36 = vpop.permute.xlu1 %4449  ;;  %v11129_v62 = vmul.f32 %v13920_v3, %v4037_v20  ;;  %v11132_v50 = vmul.f32 %v13918_v16, %v4038_v54 }
 0x5f2   : > { %4638 = vperm.xlu0 %7254, %v11097_v33   ;;  %4641 = vperm.xlu1 %7253, %v11100_v21   ;;  %v14055_v21 = vld [vmem:[#allocation41_spill] sm:$0xff]  ;;  %v14056_v33 = vld [vmem:[#allocation42_spill] sm:$0xff] }
 0x5f3   : > { %14053 = vst [vmem:[#allocation140_spill] sm:$0xff] %v11129_v62  ;;  %14054 = vst [vmem:[#allocation27_spill] sm:$0xff] %v11132_v50  ;;  %v4039_v43 = vmul.f32 %v14055_v21, %v11040_v25  ;;  %v4040_v4 = vmul.f32 %v14056_v33, %v11040_v25 }
 0x5f5   : > { %v11122_v5 = vpop.permute.xlu0 %4452  ;;  %v11124_v44 = vpop.permute.xlu1 %4455  ;;  %v11145_v20 = vmul.f32 %v13924_v61, %v4039_v43  ;;  %v11148_v54 = vmul.f32 %v10744_v0, %v4040_v4 }
 0x5f6   : > { %4644 = vperm.xlu0 %7254, %v11113_v15   ;;  %4647 = vperm.xlu1 %7253, %v11116_v26   ;;  %v14059_v15 = vld [vmem:[#allocation43_spill] sm:$0xff]  ;;  %v14060_v26 = vld [vmem:[#allocation44_spill] sm:$0xff] }
 0x5f7   : > { %14057 = vst [vmem:[#allocation125_spill] sm:$0xff] %v11145_v20  ;;  %14058 = vst [vmem:[#allocation90_spill] sm:$0xff] %v11148_v54  ;;  %v4041_v21 = vmul.f32 %v14059_v15, %v11040_v25  ;;  %v4042_v33 = vmul.f32 %v14060_v26, %v11040_v25  ;;  %v14066_v26 = vld [vmem:[#allocation61_spill] sm:$0xff] }
 0x5f9   : > { %v11138_v39 = vpop.permute.xlu0 %4458  ;;  %v11140_v2 = vpop.permute.xlu1 %4461  ;;  %v11165_v4 = vmul.f32 %v10764_v48, %v4041_v21  ;;  %v11168_v15 = vmul.f32 %v10778_v37, %v4042_v33  ;;  %v11184_v33 = vmul.f32 %v10800_v30, %v4044_v38 }
 0x5fa   : > { %4650 = vperm.xlu0 %7254, %v11129_v62   ;;  %4653 = vperm.xlu1 %7253, %v11132_v50   ;;  %v14063_v62 = vld [vmem:[#allocation143_spill] sm:$0xff]  ;;  %v4043_v50 = vmul.f32 %v14066_v26, %v11040_v25 }
 0x5fb   : > { %v11162_v43 = vrot.slane %v10718_v11, %v14063_v62  ;;  %14064 = vst [vmem:[#allocation17_spill] sm:$0xff] %v11165_v4  ;;  %14065 = vst [vmem:[#allocation127_spill] sm:$0xff] %v11168_v15  ;;  %v14073_v62 = vld [vmem:[#allocation84_spill] sm:$0xff] }
 0x5fc   : > { %v11181_v21 = vmul.f32 %v10716_v29, %v4043_v50  ;;  %14071 = vst [vmem:[#allocation19_spill] sm:$0xff] %v11184_v33 }
 0x5fd   : > { %v11154_v27 = vpop.permute.xlu0 %4464  ;;  %v11156_v14 = vpop.permute.xlu1 %4467  ;;  %v4046_v60 = vmul.f32 %v14073_v62, %v11162_v43 }
 0x5fe   : > { %14061 = vst [vmem:[#allocation142_spill] sm:$0xff] %v11154_v27  ;;  %14062 = vst [vmem:[#allocation59_spill] sm:$0xff] %v11156_v14  ;;  %4656 = vperm.xlu0 %7254, %v11145_v20   ;;  %4659 = vperm.xlu1 %7253, %v11148_v54   ;;  %v14072_v54 = vld [vmem:[#allocation83_spill] sm:$0xff] }
 0x5ff   : > { %14070 = vst [vmem:[#allocation15_spill] sm:$0xff] %v11181_v21  ;;  %v4045_v26 = vmul.f32 %v14072_v54, %v11162_v43  ;;  %v11200_v38 = vmul.f32 %v13894_v56, %v4046_v60 }
 0x601   : > { %v11174_v6 = vpop.permute.xlu0 %4470  ;;  %v11176_v20 = vpop.permute.xlu1 %4473  ;;  %v11197_v50 = vmul.f32 %v13896_v1, %v4045_v26  ;;  %14077 = vst [vmem:[#allocation73_spill] sm:$0xff] %v11200_v38 }
 0x602   : > { %14068 = vst [vmem:[#allocation144_spill] sm:$0xff] %v11174_v6  ;;  %14069 = vst [vmem:[#allocation100_spill] sm:$0xff] %v11176_v20  ;;  %4662 = vperm.xlu0 %7254, %v11165_v4   ;;  %4665 = vperm.xlu1 %7253, %v11168_v15   ;;  %v14078_v4 = vld [vmem:[#allocation98_spill] sm:$0xff]  ;;  %v14079_v15 = vld [vmem:[#allocation101_spill] sm:$0xff] }
 0x603   : > { %14076 = vst [vmem:[#allocation20_spill] sm:$0xff] %v11197_v50  ;;  %v4047_v54 = vmul.f32 %v14078_v4, %v11162_v43  ;;  %v4048_v62 = vmul.f32 %v14079_v15, %v11162_v43 }
 0x605   : > { %v11190_v25 = vpop.permute.xlu0 %4476  ;;  %v11192_v23 = vpop.permute.xlu1 %4479  ;;  %v11213_v26 = vmul.f32 %v13902_v47, %v4047_v54  ;;  %v11216_v60 = vmul.f32 %v13900_v17, %v4048_v62 }
 0x606   : > { %14074 = vst [vmem:[#allocation149_spill] sm:$0xff] %v11190_v25  ;;  %14075 = vst [vmem:[#allocation18_spill] sm:$0xff] %v11192_v23  ;;  %4668 = vperm.xlu0 %7254, %v11181_v21   ;;  %4671 = vperm.xlu1 %7253, %v11184_v33   ;;  %v14082_v33 = vld [vmem:[#allocation152_spill] sm:$0xff]  ;;  %v14083_v21 = vld [vmem:[#allocation51_spill] sm:$0xff] }
 0x607   : > { %14080 = vst [vmem:[#allocation54_spill] sm:$0xff] %v11213_v26  ;;  %14081 = vst [vmem:[#allocation75_spill] sm:$0xff] %v11216_v60  ;;  %v4049_v4 = vmul.f32 %v14082_v33, %v11162_v43  ;;  %v4050_v15 = vmul.f32 %v14083_v21, %v11162_v43 }
 0x609   : > { %v11206_v40 = vpop.permute.xlu0 %4482  ;;  %v11208_v32 = vpop.permute.xlu1 %4485  ;;  %v11229_v54 = vmul.f32 %v13908_v12, %v4049_v4  ;;  %v11232_v62 = vmul.f32 %v13906_v34, %v4050_v15 }
 0x60a   : > { %4674 = vperm.xlu0 %7254, %v11197_v50   ;;  %4677 = vperm.xlu1 %7253, %v11200_v38   ;;  %v14086_v38 = vld [vmem:[#allocation89_spill] sm:$0xff]  ;;  %v14087_v50 = vld [vmem:[#allocation159_spill] sm:$0xff] }
 0x60b   : > { %14084 = vst [vmem:[#allocation76_spill] sm:$0xff] %v11229_v54  ;;  %14085 = vst [vmem:[#allocation91_spill] sm:$0xff] %v11232_v62  ;;  %v4051_v33 = vmul.f32 %v14086_v38, %v11162_v43  ;;  %v4052_v21 = vmul.f32 %v14087_v50, %v11162_v43 }
 0x60d   : > { %v11222_v57 = vpop.permute.xlu0 %4488  ;;  %v11224_v10 = vpop.permute.xlu1 %4491  ;;  %v11245_v4 = vmul.f32 %v13914_v18, %v4051_v33  ;;  %v11248_v15 = vmul.f32 %v13912_v8, %v4052_v21 }
 0x60e   : > { %4680 = vperm.xlu0 %7254, %v11213_v26   ;;  %4683 = vperm.xlu1 %7253, %v11216_v60   ;;  %v14090_v60 = vld [vmem:[#allocation45_spill] sm:$0xff]  ;;  %v14091_v26 = vld [vmem:[#allocation46_spill] sm:$0xff] }
 0x60f   : > { %14088 = vst [vmem:[#allocation92_spill] sm:$0xff] %v11245_v4  ;;  %14089 = vst [vmem:[#allocation124_spill] sm:$0xff] %v11248_v15  ;;  %v4053_v38 = vmul.f32 %v14090_v60, %v11162_v43  ;;  %v4054_v50 = vmul.f32 %v14091_v26, %v11162_v43 }
 0x611   : > { %v11238_v23 = vpop.permute.xlu0 %4494  ;;  %v11240_v41 = vpop.permute.xlu1 %4497  ;;  %v11261_v33 = vmul.f32 %v13920_v3, %v4053_v38  ;;  %v11264_v21 = vmul.f32 %v13918_v16, %v4054_v50 }
 0x612   : > { %4686 = vperm.xlu0 %7254, %v11229_v54   ;;  %4689 = vperm.xlu1 %7253, %v11232_v62   ;;  %v14094_v54 = vld [vmem:[#allocation47_spill] sm:$0xff]  ;;  %v14095_v62 = vld [vmem:[#allocation48_spill] sm:$0xff] }
 0x613   : > { %14092 = vst [vmem:[#allocation130_spill] sm:$0xff] %v11261_v33  ;;  %14093 = vst [vmem:[#allocation126_spill] sm:$0xff] %v11264_v21  ;;  %v4055_v60 = vmul.f32 %v14094_v54, %v11162_v43  ;;  %v4056_v26 = vmul.f32 %v14095_v62, %v11162_v43 }
 0x615   : > { %v11254_v25 = vpop.permute.xlu0 %4500  ;;  %v11256_v53 = vpop.permute.xlu1 %4503  ;;  %v11277_v38 = vmul.f32 %v13924_v61, %v4055_v60  ;;  %v11280_v50 = vmul.f32 %v10744_v0, %v4056_v26 }
 0x616   : > { %4692 = vperm.xlu0 %7254, %v11245_v4   ;;  %4695 = vperm.xlu1 %7253, %v11248_v15   ;;  %v14100_v4 = vld [vmem:[#allocation49_spill] sm:$0xff]  ;;  %v14101_v15 = vld [vmem:[#allocation160_spill] sm:$0xff] }
 0x617   : > { %14098 = vst [vmem:[#allocation22_spill] sm:$0xff] %v11277_v38  ;;  %14099 = vst [vmem:[#allocation23_spill] sm:$0xff] %v11280_v50  ;;  %v4057_v54 = vmul.f32 %v14100_v4, %v11162_v43  ;;  %v4058_v62 = vmul.f32 %v14101_v15, %v11162_v43  ;;  %v14107_v15 = vld [vmem:[#allocation63_spill] sm:$0xff] }
 0x619   : > { %v11270_v20 = vpop.permute.xlu0 %4506  ;;  %v11272_v51 = vpop.permute.xlu1 %4509  ;;  %v11297_v26 = vmul.f32 %v10764_v48, %v4057_v54  ;;  %v11300_v4 = vmul.f32 %v10778_v37, %v4058_v62 }
 0x61a   : > { %14096 = vst [vmem:[#allocation132_spill] sm:$0xff] %v11270_v20  ;;  %14097 = vst [vmem:[#allocation21_spill] sm:$0xff] %v11272_v51  ;;  %4698 = vperm.xlu0 %7254, %v11261_v33   ;;  %4701 = vperm.xlu1 %7253, %v11264_v21   ;;  %v14104_v33 = vld [vmem:[#allocation151_spill] sm:$0xff]  ;;  %v4059_v21 = vmul.f32 %v14107_v15, %v11162_v43 }
 0x61b   : > { %v11294_v60 = vrot.slane %v10718_v11, %v14104_v33  ;;  %14105 = vst [vmem:[#allocation26_spill] sm:$0xff] %v11297_v26  ;;  %14106 = vst [vmem:[#allocation55_spill] sm:$0xff] %v11300_v4  ;;  %v14114_v33 = vld [vmem:[#allocation86_spill] sm:$0xff] }
 0x61c   : > { %v11313_v54 = vmul.f32 %v10716_v29, %v4059_v21 }
 0x61d   : > { %v11286_v6 = vpop.permute.xlu0 %4512  ;;  %v11288_v22 = vpop.permute.xlu1 %4515 }
 0x61e   : > { %14102 = vst [vmem:[#allocation24_spill] sm:$0xff] %v11286_v6  ;;  %14103 = vst [vmem:[#allocation25_spill] sm:$0xff] %v11288_v22  ;;  %4704 = vperm.xlu0 %7254, %v11277_v38   ;;  %4707 = vperm.xlu1 %7253, %v11280_v50   ;;  %v14108_v6 = vld [vmem:[#allocation161_spill] sm:$0xff] }
 0x61f   : > { %v4060_v22 = vmul.f32 %v14108_v6, %v11162_v43  ;;  %14111 = vst [vmem:[#allocation78_spill] sm:$0xff] %v11313_v54  ;;  %v14113_v50 = vld [vmem:[#allocation85_spill] sm:$0xff]  ;;  %v4062_v6 = vmul.f32 %v14114_v33, %v11294_v60 }
 0x620   : > { %v4061_v15 = vmul.f32 %v14113_v50, %v11294_v60 }
 0x621   : > { %v11306_v14 = vpop.permute.xlu0 %4518  ;;  %v11308_v38 = vpop.permute.xlu1 %4521  ;;  %v11316_v62 = vmul.f32 %v10800_v30, %v4060_v22  ;;  %v11332_v22 = vmul.f32 %v13894_v56, %v4062_v6 }
 0x622   : > { %14109 = vst [vmem:[#allocation56_spill] sm:$0xff] %v11306_v14  ;;  %14110 = vst [vmem:[#allocation77_spill] sm:$0xff] %v11308_v38  ;;  %4710 = vperm.xlu0 %7254, %v11297_v26   ;;  %4713 = vperm.xlu1 %7253, %v11300_v4   ;;  %v11329_v21 = vmul.f32 %v13896_v1, %v4061_v15  ;;  %v14119_v26 = vld [vmem:[#allocation103_spill] sm:$0xff]  ;;  %v14120_v4 = vld [vmem:[#allocation106_spill] sm:$0xff] }
 0x623   : > { %14112 = vst [vmem:[#allocation93_spill] sm:$0xff] %v11316_v62  ;;  %14118 = vst [vmem:[#allocation131_spill] sm:$0xff] %v11332_v22  ;;  %v4063_v50 = vmul.f32 %v14119_v26, %v11294_v60  ;;  %v4064_v33 = vmul.f32 %v14120_v4, %v11294_v60 }
 0x624   : > { %14117 = vst [vmem:[#allocation135_spill] sm:$0xff] %v11329_v21 }
 0x625   : > { %v11322_v43 = vpop.permute.xlu0 %4524  ;;  %v11324_v14 = vpop.permute.xlu1 %4527  ;;  %v11345_v15 = vmul.f32 %v13902_v47, %v4063_v50  ;;  %v11348_v6 = vmul.f32 %v13900_v17, %v4064_v33 }
 0x626   : > { %14115 = vst [vmem:[#allocation94_spill] sm:$0xff] %v11322_v43  ;;  %14116 = vst [vmem:[#allocation129_spill] sm:$0xff] %v11324_v14  ;;  %4716 = vperm.xlu0 %7254, %v11313_v54   ;;  %4719 = vperm.xlu1 %7253, %v11316_v62   ;;  %v14123_v62 = vld [vmem:[#allocation53_spill] sm:$0xff]  ;;  %v14124_v54 = vld [vmem:[#allocation163_spill] sm:$0xff] }
 0x627   : > { %14121 = vst [vmem:[#allocation138_spill] sm:$0xff] %v11345_v15  ;;  %14122 = vst [vmem:[#allocation33_spill] sm:$0xff] %v11348_v6  ;;  %v4065_v26 = vmul.f32 %v14123_v62, %v11294_v60  ;;  %v4066_v4 = vmul.f32 %v14124_v54, %v11294_v60 }
 0x629   : > { %v11338_v38 = vpop.permute.xlu0 %4530  ;;  %v11340_v43 = vpop.permute.xlu1 %4533  ;;  %v11361_v50 = vmul.f32 %v13908_v12, %v4065_v26  ;;  %v11364_v33 = vmul.f32 %v13906_v34, %v4066_v4 }
 0x62a   : > { %4722 = vperm.xlu0 %7254, %v11329_v21   ;;  %4725 = vperm.xlu1 %7253, %v11332_v22   ;;  %v14127_v22 = vld [vmem:[#allocation158_spill] sm:$0xff] }
 0x62b   : > { %14125 = vst [vmem:[#allocation139_spill] sm:$0xff] %v11361_v50  ;;  %14126 = vst [vmem:[#allocation35_spill] sm:$0xff] %v11364_v33  ;;  %v4067_v62 = vmul.f32 %v14127_v22, %v11294_v60  ;;  %v14128_v21 = vld [vmem:[#allocation166_spill] sm:$0xff] }
 0x62c   : > { %v4068_v54 = vmul.f32 %v14128_v21, %v11294_v60 }
 0x62d   : > { %v11354_v14 = vpop.permute.xlu0 %4536  ;;  %v11356_v9 = vpop.permute.xlu1 %4539  ;;  %v11377_v26 = vmul.f32 %v13914_v18, %v4067_v62 }
 0x62e   : > { %4728 = vperm.xlu0 %7254, %v11345_v15   ;;  %4731 = vperm.xlu1 %7253, %v11348_v6   ;;  %v11380_v4 = vmul.f32 %v13912_v8, %v4068_v54  ;;  %v14132_v6 = vld [vmem:[#allocation65_spill] sm:$0xff]  ;;  %v14133_v15 = vld [vmem:[#allocation168_spill] sm:$0xff] }
 0x62f   : > { %14130 = vst [vmem:[#allocation37_spill] sm:$0xff] %v11377_v26  ;;  %v4069_v22 = vmul.f32 %v14132_v6, %v11294_v60  ;;  %v4070_v21 = vmul.f32 %v14133_v15, %v11294_v60 }
 0x630   : > { %14131 = vst [vmem:[#allocation38_spill] sm:$0xff] %v11380_v4 }
 0x631   : > { %v11370_v51 = vpop.permute.xlu0 %4542  ;;  %v11372_v27 = vpop.permute.xlu1 %4545  ;;  %v11393_v62 = vmul.f32 %v13920_v3, %v4069_v22  ;;  %v11396_v54 = vmul.f32 %v13918_v16, %v4070_v21 }
 0x632   : > { %14129 = vst [vmem:[#allocation36_spill] sm:$0xff] %v11372_v27  ;;  %4734 = vperm.xlu0 %7254, %v11361_v50   ;;  %4737 = vperm.xlu1 %7253, %v11364_v33   ;;  %v14138_v50 = vld [vmem:[#allocation67_spill] sm:$0xff]  ;;  %v14139_v33 = vld [vmem:[#allocation170_spill] sm:$0xff] }
 0x633   : > { %14136 = vst [vmem:[#allocation79_spill] sm:$0xff] %v11393_v62  ;;  %14137 = vst [vmem:[#allocation80_spill] sm:$0xff] %v11396_v54  ;;  %v4071_v6 = vmul.f32 %v14138_v50, %v11294_v60  ;;  %v4072_v15 = vmul.f32 %v14139_v33, %v11294_v60 }
 0x635   : > { %v11386_v58 = vpop.permute.xlu0 %4548  ;;  %v11388_v20 = vpop.permute.xlu1 %4551  ;;  %v11409_v22 = vmul.f32 %v13924_v61, %v4071_v6  ;;  %v11412_v21 = vmul.f32 %v10744_v0, %v4072_v15 }
 0x636   : > { %14134 = vst [vmem:[#allocation57_spill] sm:$0xff] %v11386_v58  ;;  %14135 = vst [vmem:[#allocation141_spill] sm:$0xff] %v11388_v20  ;;  %4740 = vperm.xlu0 %7254, %v11377_v26   ;;  %4743 = vperm.xlu1 %7253, %v11380_v4   ;;  %v14144_v26 = vld [vmem:[#allocation69_spill] sm:$0xff]  ;;  %v14145_v4 = vld [vmem:[#allocation172_spill] sm:$0xff] }
 0x637   : > { %14142 = vst [vmem:[#allocation134_spill] sm:$0xff] %v11409_v22  ;;  %14143 = vst [vmem:[#allocation146_spill] sm:$0xff] %v11412_v21  ;;  %v4073_v50 = vmul.f32 %v14144_v26, %v11294_v60  ;;  %v4074_v33 = vmul.f32 %v14145_v4, %v11294_v60  ;;  %v14151_v4 = vld [vmem:[#allocation71_spill] sm:$0xff] }
 0x639   : > { %v11402_v27 = vpop.permute.xlu0 %4554  ;;  %v11404_v58 = vpop.permute.xlu1 %4557  ;;  %v11429_v15 = vmul.f32 %v10764_v48, %v4073_v50  ;;  %v11432_v26 = vmul.f32 %v10778_v37, %v4074_v33  ;;  %v14156_v33 = vld [vmem:[#allocation87_spill] sm:$0xff] }
 0x63a   : > { %14140 = vst [vmem:[#allocation95_spill] sm:$0xff] %v11402_v27  ;;  %14141 = vst [vmem:[#allocation96_spill] sm:$0xff] %v11404_v58  ;;  %4746 = vperm.xlu0 %7254, %v11393_v62   ;;  %4749 = vperm.xlu1 %7253, %v11396_v54   ;;  %v14148_v62 = vld [vmem:[#allocation157_spill] sm:$0xff]  ;;  %v4075_v54 = vmul.f32 %v14151_v4, %v11294_v60 }
 0x63b   : > { %v11426_v6 = vrot.slane %v10718_v11, %v14148_v62  ;;  %14149 = vst [vmem:[#allocation34_spill] sm:$0xff] %v11429_v15  ;;  %14150 = vst [vmem:[#allocation28_spill] sm:$0xff] %v11432_v26 }
 0x63c   : > { %v11445_v11 = vmul.f32 %v10716_v29, %v4075_v54 }
 0x63d   : > { %v11418_v20 = vpop.permute.xlu0 %4560  ;;  %v11420_v27 = vpop.permute.xlu1 %4563  ;;  %v4077_v4 = vmul.f32 %v14156_v33, %v11426_v6 }
 0x63e   : > { %14146 = vst [vmem:[#allocation137_spill] sm:$0xff] %v11418_v20  ;;  %14147 = vst [vmem:[#allocation148_spill] sm:$0xff] %v11420_v27  ;;  %4752 = vperm.xlu0 %7254, %v11409_v22   ;;  %4755 = vperm.xlu1 %7253, %v11412_v21   ;;  %v14152_v20 = vld [vmem:[#allocation175_spill] sm:$0xff]  ;;  %v14157_v21 = vld [vmem:[#allocation177_spill] sm:$0xff] }
 0x63f   : > { %v4076_v27 = vmul.f32 %v14152_v20, %v11294_v60  ;;  %14154 = vst [vmem:[#allocation30_spill] sm:$0xff] %v11445_v11  ;;  %v4078_v20 = vmul.f32 %v14157_v21, %v11426_v6  ;;  %v11461_v54 = vmul.f32 %v13896_v1, %v4077_v4  ;;  %v14166_v4 = vld [vmem:[#allocation52_spill] sm:$0xff] }
 0x641   : > { %v11438_v58 = vpop.permute.xlu0 %4566  ;;  %v11440_v22 = vpop.permute.xlu1 %4569  ;;  %v11448_v50 = vmul.f32 %v10800_v30, %v4076_v27  ;;  %14160 = vst [vmem:[#allocation60_spill] sm:$0xff] %v11461_v54  ;;  %v11464_v27 = vmul.f32 %v13894_v56, %v4078_v20  ;;  %v14167_v20 = vld [vmem:[#allocation180_spill] sm:$0xff] }
 0x642   : > { %14153 = vst [vmem:[#allocation29_spill] sm:$0xff] %v11440_v22  ;;  %4758 = vperm.xlu0 %7254, %v11429_v15   ;;  %4761 = vperm.xlu1 %7253, %v11432_v26   ;;  %v14162_v26 = vld [vmem:[#allocation110_spill] sm:$0xff] }
 0x643   : > { %14155 = vst [vmem:[#allocation31_spill] sm:$0xff] %v11448_v50  ;;  %14161 = vst [vmem:[#allocation81_spill] sm:$0xff] %v11464_v27  ;;  %v4079_v33 = vmul.f32 %v14162_v26, %v11426_v6  ;;  %v14163_v15 = vld [vmem:[#allocation178_spill] sm:$0xff]  ;;  %v4081_v26 = vmul.f32 %v14166_v4, %v11426_v6 }
 0x644   : > { %v4080_v21 = vmul.f32 %v14163_v15, %v11426_v6  ;;  %v4082_v15 = vmul.f32 %v14167_v20, %v11426_v6  ;;  %v14171_v4 = vld [vmem:[#allocation182_spill] sm:$0xff] }
 0x645   : > { %v11454_v60 = vpop.permute.xlu0 %4572  ;;  %v11456_v62 = vpop.permute.xlu1 %4575  ;;  %v11477_v1 = vmul.f32 %v13902_v47, %v4079_v33  ;;  %v11493_v47 = vmul.f32 %v13908_v12, %v4081_v26  ;;  %v14170_v33 = vld [vmem:[#allocation164_spill] sm:$0xff]  ;;  %v4084_v20 = vmul.f32 %v14171_v4, %v11426_v6  ;;  %v14174_v26 = vld [vmem:[#allocation66_spill] sm:$0xff] }
 0x646   : > { %14158 = vst [vmem:[#allocation32_spill] sm:$0xff] %v11454_v60  ;;  %14159 = vst [vmem:[#allocation58_spill] sm:$0xff] %v11456_v62  ;;  %4764 = vperm.xlu0 %7254, %v11445_v11   ;;  %4767 = vperm.xlu1 %7253, %v11448_v50   ;;  %v11480_v56 = vmul.f32 %v13900_v17, %v4080_v21  ;;  %v11496_v17 = vmul.f32 %v13906_v34, %v4082_v15 }
 0x647   : > { %14164 = vst [vmem:[#allocation82_spill] sm:$0xff] %v11477_v1  ;;  %14168 = vst [vmem:[#allocation150_spill] sm:$0xff] %v11493_v47  ;;  %v4083_v21 = vmul.f32 %v14170_v33, %v11426_v6  ;;  %v11512_v34 = vmul.f32 %v13912_v8, %v4084_v20  ;;  %v4085_v15 = vmul.f32 %v14174_v26, %v11426_v6  ;;  %v14175_v33 = vld [vmem:[#allocation184_spill] sm:$0xff]  ;;  %v14179_v26 = vld [vmem:[#allocation187_spill] sm:$0xff] }
 0x648   : > { %14165 = vst [vmem:[#allocation97_spill] sm:$0xff] %v11480_v56  ;;  %14169 = vst [vmem:[#allocation145_spill] sm:$0xff] %v11496_v17  ;;  %v4086_v4 = vmul.f32 %v14175_v33, %v11426_v6  ;;  %v4088_v33 = vmul.f32 %v14179_v26, %v11426_v6  ;;  %v4820_v62 = vrot.slane %v11074_v28, %v13790_v55 }
 0x649   : > { %v11470_v22 = vpop.permute.xlu0 %4578  ;;  %v11472_v60 = vpop.permute.xlu1 %4581  ;;  %v11509_v12 = vmul.f32 %v13914_v18, %v4083_v21  ;;  %14173 = vst [vmem:[#allocation147_spill] sm:$0xff] %v11512_v34  ;;  %v11525_v18 = vmul.f32 %v13920_v3, %v4085_v15  ;;  %v14178_v21 = vld [vmem:[#allocation68_spill] sm:$0xff]  ;;  %v14182_v15 = vld [vmem:[#allocation70_spill] sm:$0xff]  ;;  %v4834_v28 = vrot.slane %v11092_v35, %v13793_v7  ;;  %v4844_v35 = vrot.slane %v11108_v36, %v13796_v24 }
 0x64a   : > { %4770 = vperm.xlu0 %7254, %v11461_v54   ;;  %4773 = vperm.xlu1 %7253, %v11464_v27   ;;  %v11528_v8 = vmul.f32 %v13918_v16, %v4086_v4  ;;  %v4087_v20 = vmul.f32 %v14178_v21, %v11426_v6  ;;  %v11544_v16 = vmul.f32 %v10744_v0, %v4088_v33  ;;  %v14183_v21 = vld [vmem:[#allocation190_spill] sm:$0xff] }
 0x64b   : > { %14172 = vst [vmem:[#allocation153_spill] sm:$0xff] %v11509_v12  ;;  %14176 = vst [vmem:[#allocation154_spill] sm:$0xff] %v11525_v18  ;;  %v4089_v4 = vmul.f32 %v14182_v15, %v11426_v6  ;;  %v4090_v26 = vmul.f32 %v14183_v21, %v11426_v6  ;;  %v14187_v15 = vld [vmem:[#allocation193_spill] sm:$0xff]  ;;  %v4987_v36 = vrot.slane %v11354_v14, %v13791_v31 }
 0x64c   : > { %14177 = vst [vmem:[#allocation39_spill] sm:$0xff] %v11528_v8  ;;  %v11541_v3 = vmul.f32 %v13924_v61, %v4087_v20  ;;  %14181 = vst [vmem:[#allocation41_spill] sm:$0xff] %v11544_v16  ;;  %v14186_v20 = vld [vmem:[#allocation72_spill] sm:$0xff]  ;;  %v4092_v21 = vmul.f32 %v14187_v15, %v11426_v6  ;;  %v4859_v14 = vrot.slane %v11138_v39, %v13799_v59 }
 0x64d   : > { %v11486_v50 = vpop.permute.xlu0 %4584  ;;  %v11488_v11 = vpop.permute.xlu1 %4587  ;;  %v11557_v61 = vmul.f32 %v10764_v48, %v4089_v4  ;;  %v11560_v0 = vmul.f32 %v10778_v37, %v4090_v26  ;;  %v4091_v33 = vmul.f32 %v14186_v20, %v11426_v6 }
 0x64e   : > { %4776 = vperm.xlu0 %7254, %v11477_v1   ;;  %4779 = vperm.xlu1 %7253, %v11480_v56   ;;  %14180 = vst [vmem:[#allocation40_spill] sm:$0xff] %v11541_v3  ;;  %v11576_v37 = vmul.f32 %v10800_v30, %v4092_v21 }
 0x64f   : > { %14184 = vst [vmem:[#allocation42_spill] sm:$0xff] %v11557_v61  ;;  %14185 = vst [vmem:[#allocation43_spill] sm:$0xff] %v11560_v0  ;;  %v11573_v48 = vmul.f32 %v10716_v29, %v4091_v33 }
 0x650   : > { %14191 = vst [vmem:[#allocation83_spill] sm:$0xff] %v11576_v37 }
 0x651   : > { %v11502_v54 = vpop.permute.xlu0 %4590  ;;  %v11504_v27 = vpop.permute.xlu1 %4593  ;;  %14190 = vst [vmem:[#allocation155_spill] sm:$0xff] %v11573_v48 }
 0x652   : > { %4782 = vperm.xlu0 %7254, %v11493_v47   ;;  %4785 = vperm.xlu1 %7253, %v11496_v17  }
 0x655   : > { %v11518_v1 = vpop.permute.xlu0 %4596  ;;  %v11520_v56 = vpop.permute.xlu1 %4599 }
 0x656   : > { %4788 = vperm.xlu0 %7254, %v11509_v12   ;;  %4791 = vperm.xlu1 %7253, %v11512_v34  }
 0x659   : > { %v11534_v47 = vpop.permute.xlu0 %4602  ;;  %v11536_v17 = vpop.permute.xlu1 %4605 }
 0x65a   : > { %4794 = vperm.xlu0 %7254, %v11525_v18   ;;  %4797 = vperm.xlu1 %7253, %v11528_v8  }
 0x65d   : > { %v11550_v12 = vpop.permute.xlu0 %4608  ;;  %v11552_v34 = vpop.permute.xlu1 %4611 }
 0x65e   : > { %4800 = vperm.xlu0 %7254, %v11541_v3   ;;  %4803 = vperm.xlu1 %7253, %v11544_v16  }
 0x661   : > { %v11566_v18 = vpop.permute.xlu0 %4614  ;;  %v11568_v8 = vpop.permute.xlu1 %4617 }
 0x662   : > { %14188 = vst [vmem:[#allocation44_spill] sm:$0xff] %v11566_v18  ;;  %14189 = vst [vmem:[#allocation61_spill] sm:$0xff] %v11568_v8  ;;  %4806 = vperm.xlu0 %7254, %v11557_v61   ;;  %4809 = vperm.xlu1 %7253, %v11560_v0  }
 0x665   : > { %v11578_v4 = vpop.permute.xlu0 %4620  ;;  %v11580_v26 = vpop.permute.xlu1 %4623 }
 0x666   : > { %14192 = vst [vmem:[#allocation84_spill] sm:$0xff] %v11578_v4  ;;  %14193 = vst [vmem:[#allocation98_spill] sm:$0xff] %v11580_v26  ;;  %4812 = vperm.xlu0 %7254, %v11573_v48   ;;  %4815 = vperm.xlu1 %7253, %v11576_v37  }
 0x669   : > { %v11584_v6 = vpop.permute.xlu0 %4626  ;;  %v11586_v20 = vpop.permute.xlu1 %4629 }
 0x66d   : > { %v11588_v15 = vpop.permute.xlu0 %4632  ;;  %v11590_v0 = vpop.permute.xlu1 %4635 }
 0x671   : > { %v11592_v29 = vpop.permute.xlu0 %4638  ;;  %v11594_v30 = vpop.permute.xlu1 %4641 }
 0x672   : > { %14194 = vst [vmem:[#allocation101_spill] sm:$0xff] %v11594_v30 }
 0x675   : > { %v11596_v33 = vpop.permute.xlu0 %4644  ;;  %v11598_v21 = vpop.permute.xlu1 %4647 }
 0x676   : > { %14195 = vst [vmem:[#allocation152_spill] sm:$0xff] %v11596_v33  ;;  %14196 = vst [vmem:[#allocation51_spill] sm:$0xff] %v11598_v21 }
 0x679   : > { %v11600_v3 = vpop.permute.xlu0 %4650  ;;  %v11602_v48 = vpop.permute.xlu1 %4653 }
 0x67a   : > { %14197 = vst [vmem:[#allocation89_spill] sm:$0xff] %v11600_v3  ;;  %14198 = vst [vmem:[#allocation159_spill] sm:$0xff] %v11602_v48 }
 0x67d   : > { %v11604_v37 = vpop.permute.xlu0 %4656  ;;  %v11606_v61 = vpop.permute.xlu1 %4659 }
 0x67e   : > { %14199 = vst [vmem:[#allocation45_spill] sm:$0xff] %v11604_v37  ;;  %14200 = vst [vmem:[#allocation46_spill] sm:$0xff] %v11606_v61 }
 0x681   : > { %v11608_v16 = vpop.permute.xlu0 %4662  ;;  %v11610_v26 = vpop.permute.xlu1 %4665 }
 0x682   : > { %14201 = vst [vmem:[#allocation47_spill] sm:$0xff] %v11608_v16  ;;  %14202 = vst [vmem:[#allocation48_spill] sm:$0xff] %v11610_v26 }
 0x685   : > { %v11612_v4 = vpop.permute.xlu0 %4668  ;;  %v11614_v8 = vpop.permute.xlu1 %4671 }
 0x686   : > { %14203 = vst [vmem:[#allocation49_spill] sm:$0xff] %v11612_v4  ;;  %14204 = vst [vmem:[#allocation160_spill] sm:$0xff] %v11614_v8 }
 0x689   : > { %v11616_v18 = vpop.permute.xlu0 %4674  ;;  %v11618_v33 = vpop.permute.xlu1 %4677 }
 0x68d   : > { %v11620_v21 = vpop.permute.xlu0 %4680  ;;  %v11622_v3 = vpop.permute.xlu1 %4683 }
 0x691   : > { %v11624_v48 = vpop.permute.xlu0 %4686  ;;  %v11626_v37 = vpop.permute.xlu1 %4689 }
 0x692   : > { %14205 = vst [vmem:[#allocation63_spill] sm:$0xff] %v11624_v48  ;;  %14206 = vst [vmem:[#allocation161_spill] sm:$0xff] %v11626_v37  ;;  %v4824_v48 = vrot.slane %v11076_v46, %v13789_v19  ;;  %v4829_v37 = vrot.slane %v11090_v42, %v13791_v31  ;;  %v4908_v46 = vrot.slane %v11222_v57, %v13791_v31 }
 0x695   : > { %v11628_v61 = vpop.permute.xlu0 %4692  ;;  %v11630_v16 = vpop.permute.xlu1 %4695 }
 0x696   : > { %14207 = vst [vmem:[#allocation85_spill] sm:$0xff] %v11628_v61  ;;  %14208 = vst [vmem:[#allocation86_spill] sm:$0xff] %v11630_v16 }
 0x699   : > { %v11632_v26 = vpop.permute.xlu0 %4698  ;;  %v11634_v4 = vpop.permute.xlu1 %4701 }
 0x69a   : > { %14209 = vst [vmem:[#allocation103_spill] sm:$0xff] %v11632_v26  ;;  %14210 = vst [vmem:[#allocation106_spill] sm:$0xff] %v11634_v4  ;;  %v4899_v4 = vrot.slane %v11206_v40, %v13790_v55 }
 0x69d   : > { %v11636_v8 = vpop.permute.xlu0 %4704  ;;  %v11638_v30 = vpop.permute.xlu1 %4707 }
 0x69e   : > { %14211 = vst [vmem:[#allocation53_spill] sm:$0xff] %v11636_v8  ;;  %14212 = vst [vmem:[#allocation163_spill] sm:$0xff] %v11638_v30  ;;  %v4903_v8 = vrot.slane %v11208_v32, %v13789_v19  ;;  %v4825_v30 = vsel %vm1674_vm3, %v4824_v48, %v4820_v62  ;;  %v4913_v32 = vrot.slane %v11224_v10, %v13793_v7 }
 0x69f   : > { %v4830_v42 = vsel %vm1681_vm4, %v4829_v37, %v4825_v30  ;;  %v4918_v48 = vrot.slane %v11238_v23, %v13795_v49  ;;  %v4849_v37 = vrot.slane %v11122_v5, %v13797_v52  ;;  %v4982_v10 = vrot.slane %v11340_v43, %v13789_v19 }
 0x6a0   : > { %v4904_v40 = vsel %vm1674_vm3, %v4903_v8, %v4899_v4  ;;  %v4835_v62 = vsel %vm1688_vm5, %v4834_v28, %v4830_v42  ;;  %v4978_v8 = vrot.slane %v11338_v38, %v13790_v55  ;;  %v4854_v38 = vrot.slane %v11124_v44, %v13798_v63 }
 0x6a1   : > { %v11646_v61 = vpop.permute.xlu0 %4710  ;;  %v11648_v16 = vpop.permute.xlu1 %4713  ;;  %v4909_v57 = vsel %vm1681_vm4, %v4908_v46, %v4904_v40  ;;  %v4928_v43 = vrot.slane %v11254_v25, %v13797_v52 }
 0x6a2   : > { %14213 = vst [vmem:[#allocation158_spill] sm:$0xff] %v11646_v61  ;;  %14214 = vst [vmem:[#allocation166_spill] sm:$0xff] %v11648_v16  ;;  %v4839_v61 = vrot.slane %v11106_v13, %v13795_v49  ;;  %v4914_v23 = vsel %vm1688_vm5, %v4913_v32, %v4909_v57  ;;  %v4983_v42 = vsel %vm1674_vm3, %v4982_v10, %v4978_v8  ;;  %v14224_v8 = vld [vmem:[#allocation115_spill] sm:$0xff]  ;;  %v14225_v10 = vld [vmem:[#allocation142_spill] sm:$0xff] }
 0x6a3   : > { %v4919_v28 = vsel %vm1695_vm6, %v4918_v48, %v4914_v23  ;;  %v4988_v44 = vsel %vm1681_vm4, %v4987_v36, %v4983_v42  ;;  %v4864_v57 = vrot.slane %v11140_v2, %v13800_v45  ;;  %v14222_v48 = vld [vmem:[#allocation132_spill] sm:$0xff]  ;;  %v14229_v42 = vld [vmem:[#allocation21_spill] sm:$0xff] }
 0x6a4   : > { %v4840_v13 = vsel %vm1695_vm6, %v4839_v61, %v4835_v62  ;;  %v4923_v61 = vrot.slane %v11240_v41, %v13796_v24  ;;  %v4992_v41 = vrot.slane %v11356_v9, %v13793_v7  ;;  %v4997_v62 = vrot.slane %v11370_v51, %v13795_v49  ;;  %v14226_v23 = vld [vmem:[#allocation36_spill] sm:$0xff] }
 0x6a5   : > { %v11662_v16 = vpop.permute.xlu0 %4716  ;;  %v11664_v26 = vpop.permute.xlu1 %4719  ;;  %v4845_v5 = vsel %vm14217_vm9, %v4844_v35, %v4840_v13  ;;  %v4933_v35 = vrot.slane %v11256_v53, %v13798_v63  ;;  %v4938_v13 = vrot.slane %v14222_v48, %v13799_v59  ;;  %v4869_v51 = vrot.slane %v14225_v10, %v14224_v8  ;;  %vm14228_vm9 = vmmov %vm14220_vm7 }
 0x6a6   : > { %14215 = vst [vmem:[#allocation65_spill] sm:$0xff] %v11662_v16  ;;  %14216 = vst [vmem:[#allocation168_spill] sm:$0xff] %v11664_v26  ;;  %v4850_v46 = vsel %vm14218_vm10, %v4849_v37, %v4845_v5  ;;  %v4924_v25 = vsel %vm14219_vm1, %v4923_v61, %v4919_v28  ;;  %v4993_v36 = vsel %vm1688_vm5, %v4992_v41, %v4988_v44  ;;  %vm14230_vm10 = vcmask 654912   ;;  %v14251_v16 = vld [vmem:[#allocation149_spill] sm:$0xff] }
 0x6a7   : > { %v4855_v39 = vsel %vm14220_vm7, %v4854_v38, %v4850_v46  ;;  %v4929_v9 = vsel %vm14221_vm12, %v4928_v43, %v4924_v25  ;;  %v5002_v53 = vrot.slane %v14226_v23, %v13796_v24  ;;  %v4998_v2 = vsel %vm1695_vm6, %v4997_v62, %v4993_v36  ;;  %v14227_v38 = vld [vmem:[#allocation57_spill] sm:$0xff]  ;;  %v14231_v62 = vld [vmem:[#allocation116_spill] sm:$0xff]  ;;  %vm14233_vm1 = vmmov %vm14223_vm8 }
 0x6a8   : > { %v4860_v37 = vsel %vm14223_vm8, %v4859_v14, %v4855_v39  ;;  %v5007_v28 = vrot.slane %v14227_v38, %v13797_v52  ;;  %v5057_v43 = vrot.slane %v11470_v22, %v13790_v55  ;;  %v5061_v46 = vrot.slane %v11472_v60, %v13789_v19  ;;  %v14232_v39 = vld [vmem:[#allocation59_spill] sm:$0xff]  ;;  %v14234_v22 = vld [vmem:[#allocation24_spill] sm:$0xff]  ;;  %v14236_v23 = vld [vmem:[#allocation117_spill] sm:$0xff] }
 0x6a9   : > { %v11682_v4 = vpop.permute.xlu0 %4722  ;;  %v11684_v30 = vpop.permute.xlu1 %4725  ;;  %v4934_v14 = vsel %vm14228_vm9, %v4933_v35, %v4929_v9  ;;  %v4943_v41 = vrot.slane %v14229_v42, %v13800_v45  ;;  %v5066_v44 = vrot.slane %v11486_v50, %v13791_v31  ;;  %v4865_v25 = vsel %vm14230_vm10, %v4864_v57, %v4860_v37  ;;  %v14237_v35 = vld [vmem:[#allocation144_spill] sm:$0xff]  ;;  %v14239_v42 = vld [vmem:[#allocation141_spill] sm:$0xff]  ;;  %vm14243_vm9 = vmmov %vm14230_vm10 }
 0x6aa   : > { %v4874_v48 = vrot.slane %v14232_v39, %v14231_v62  ;;  %v4939_v10 = vsel %vm14233_vm1, %v4938_v13, %v4934_v14  ;;  %v4948_v36 = vrot.slane %v14234_v22, %v14224_v8  ;;  %vm14235_vm7 = vcmask 720512   ;;  %v14242_v13 = vld [vmem:[#allocation95_spill] sm:$0xff] }
 0x6ab   : > { %v4870_v60 = vsel %vm14235_vm7, %v4869_v51, %v4865_v25  ;;  %v4879_v9 = vrot.slane %v14237_v35, %v14236_v23  ;;  %vm14238_vm12 = vcmask 392512   ;;  %v5012_v50 = vrot.slane %v14239_v42, %v13798_v63  ;;  %v14247_v42 = vld [vmem:[#allocation100_spill] sm:$0xff]  ;;  %vm14248_vm1 = vmmov %vm14235_vm7 }
 0x6ac   : > { %v5003_v38 = vsel %vm14238_vm12, %v5002_v53, %v4998_v2  ;;  %vm14241_vm8 = vcmask 458112   ;;  %v5017_v14 = vrot.slane %v14242_v13, %v13799_v59  ;;  %v5062_v39 = vsel %vm1674_vm3, %v5061_v46, %v5057_v43  ;;  %v14244_v53 = vld [vmem:[#allocation25_spill] sm:$0xff]  ;;  %v14249_v46 = vld [vmem:[#allocation56_spill] sm:$0xff] }
 0x6ad   : > { %v11703_v40 = vpop.permute.xlu0 %4728  ;;  %v11705_v32 = vpop.permute.xlu1 %4731  ;;  %v5008_v37 = vsel %vm14241_vm8, %v5007_v28, %v5003_v38  ;;  %v5071_v51 = vrot.slane %v11488_v11, %v13793_v7  ;;  %v4944_v25 = vsel %vm14243_vm9, %v4943_v41, %v4939_v10  ;;  %v4953_v2 = vrot.slane %v14244_v53, %v14231_v62  ;;  %v14246_v38 = vld [vmem:[#allocation118_spill] sm:$0xff]  ;;  %v14250_v10 = vld [vmem:[#allocation119_spill] sm:$0xff] }
 0x6ae   : > { %v5067_v22 = vsel %vm1681_vm4, %v5066_v44, %v5062_v39  ;;  %v5076_v35 = vrot.slane %v11502_v54, %v13795_v49  ;;  %vm14245_vm10 = vcmask 786112   ;;  %v4884_v13 = vrot.slane %v14247_v42, %v14246_v38  ;;  %v14253_v39 = vld [vmem:[#allocation96_spill] sm:$0xff] }
 0x6af   : > { %v4875_v28 = vsel %vm14245_vm10, %v4874_v48, %v4870_v60  ;;  %v4949_v43 = vsel %vm14248_vm1, %v4948_v36, %v4944_v25  ;;  %v4958_v11 = vrot.slane %v14249_v46, %v14236_v23  ;;  %v4889_v53 = vrot.slane %v14251_v16, %v14250_v10  ;;  %v14255_v36 = vld [vmem:[#allocation137_spill] sm:$0xff]  ;;  %vm14256_vm8 = vmmov %vm14245_vm10 }
 0x6b0   : > { %v4880_v41 = vsel %vm1751_vm14, %v4879_v9, %v4875_v28  ;;  %vm14252_vm7 = vcmask 523712   ;;  %v5022_v54 = vrot.slane %v14253_v39, %v13800_v45  ;;  %vm14254_vm12 = vcmask 589312   ;;  %v14258_v39 = vld [vmem:[#allocation94_spill] sm:$0xff]  ;;  %vm14262_vm10 = vmmov %vm14248_vm1 }
 0x6b1   : > { %v11725_v61 = vpop.permute.xlu0 %4734  ;;  %v11727_v5 = vpop.permute.xlu1 %4737  ;;  %v5013_v44 = vsel %vm14252_vm7, %v5012_v50, %v5008_v37  ;;  %v5027_v25 = vrot.slane %v14255_v36, %v14224_v8  ;;  %v5072_v42 = vsel %vm1688_vm5, %v5071_v51, %v5067_v22  ;;  %v5081_v9 = vrot.slane %v11504_v27, %v13796_v24  ;;  %v14257_v50 = vld [vmem:[#allocation77_spill] sm:$0xff]  ;;  %v14259_v27 = vld [vmem:[#allocation120_spill] sm:$0xff]  ;;  %v14260_v36 = vld [vmem:[#allocation18_spill] sm:$0xff] }
 0x6b2   : > { %v5018_v60 = vsel %vm14254_vm12, %v5017_v14, %v5013_v44  ;;  %v4954_v16 = vsel %vm14256_vm8, %v4953_v2, %v4949_v43  ;;  %v4963_v37 = vrot.slane %v14257_v50, %v14246_v38  ;;  %v5077_v28 = vsel %vm1695_vm6, %v5076_v35, %v5072_v42  ;;  %v14261_v50 = vld [vmem:[#allocation148_spill] sm:$0xff]  ;;  %vm14266_vm12 = vmmov %vm14256_vm8 }
 0x6b3   : > { %v5086_v46 = vrot.slane %v11518_v1, %v13797_v52  ;;  %v4885_v14 = vsel %vm1758_vm15, %v4884_v13, %v4880_v41  ;;  %v4959_v44 = vsel %vm1751_vm14, %v4958_v11, %v4954_v16  ;;  %v4968_v51 = vrot.slane %v14258_v39, %v14250_v10 }
 0x6b4   : > { %v4890_v22 = vsel %vm1765_vm0, %v4889_v53, %v4885_v14  ;;  %v4894_v2 = vrot.slane %v14260_v36, %v14259_v27  ;;  %v5023_v43 = vsel %vm14243_vm9, %v5022_v54, %v5018_v60  ;;  %v5032_v35 = vrot.slane %v14261_v50, %v14231_v62  ;;  %v14264_v54 = vld [vmem:[#allocation129_spill] sm:$0xff]  ;;  %v14269_v50 = vld [vmem:[#allocation32_spill] sm:$0xff] }
 0x6b5   : > { %v11753_v26 = vpop.permute.xlu0 %4740  ;;  %v11755_v57 = vpop.permute.xlu1 %4743  ;;  %v5028_v13 = vsel %vm14262_vm10, %v5027_v25, %v5023_v43  ;;  %v5037_v11 = vrot.slane %v11438_v58, %v14236_v23  ;;  %vm14263_vm1 = vcmask 392512   ;;  %v5091_v53 = vrot.slane %v11520_v56, %v13798_v63 }
 0x6b6   : > { %14240 = vst [vmem:[#allocation67_spill] sm:$0xff] %v11755_v57  ;;  %v5082_v41 = vsel %vm14263_vm1, %v5081_v9, %v5077_v28  ;;  %v4964_v16 = vsel %vm1758_vm15, %v4963_v37, %v4959_v44  ;;  %v4973_v60 = vrot.slane %v14264_v54, %v14259_v27  ;;  %vm14265_vm7 = vcmask 458112   ;;  %v14267_v37 = vld [vmem:[#allocation29_spill] sm:$0xff] }
 0x6b7   : > { %v5087_v14 = vsel %vm14265_vm7, %v5086_v46, %v5082_v41  ;;  %v5096_v39 = vrot.slane %v11534_v47, %v13799_v59  ;;  %v4969_v25 = vsel %vm1765_vm0, %v4968_v51, %v4964_v16  ;;  %v5136_v58 = vrot.slane %v11584_v6, %v13790_v55  ;;  %vm14277_vm7 = vmmov %vm14266_vm12 }
 0x6b8   : > { %v5140_v9 = vrot.slane %v11586_v20, %v13789_v19  ;;  %v5033_v56 = vsel %vm14266_vm12, %v5032_v35, %v5028_v13  ;;  %v5042_v28 = vrot.slane %v14267_v37, %v14246_v38  ;;  %v5145_v44 = vrot.slane %v11588_v15, %v13791_v31 }
 0x6b9   : > { %v11781_v57 = vpop.permute.xlu0 %4746  ;;  %v11783_v48 = vpop.permute.xlu1 %4749  ;;  %v11838_v47 = vsel %vm1772_vm2, %v4894_v2, %v4890_v22  ;;  %v5038_v6 = vsel %vm1751_vm14, %v5037_v11, %v5033_v56  ;;  %vm14268_vm8 = vcmask 523712   ;;  %v5101_v20 = vrot.slane %v11536_v17, %v13800_v45 }
 0x6ba   : > { %v5092_v51 = vsel %vm14268_vm8, %v5091_v53, %v5087_v14  ;;  %v11845_v43 = vsel %vm1772_vm2, %v4973_v60, %v4969_v25  ;;  %v5047_v15 = vrot.slane %v14269_v50, %v14250_v10  ;;  %vm14270_vm9 = vcmask 589312  }
 0x6bb   : > { %v5097_v35 = vsel %vm14270_vm9, %v5096_v39, %v5092_v51  ;;  %v5106_v13 = vrot.slane %v11550_v12, %v14224_v8  ;;  %v5141_v22 = vsel %vm1674_vm3, %v5140_v9, %v5136_v58  ;;  %v5150_v2 = vrot.slane %v11590_v0, %v13793_v7  ;;  %v14276_v51 = vld [vmem:[#allocation63_spill] sm:$0xff] }
 0x6bc   : > { %v5215_v11 = vrot.slane %v11616_v18, %v13790_v55  ;;  %v5219_v17 = vrot.slane %v11618_v33, %v13789_v19  ;;  %v5043_v41 = vsel %vm1758_vm15, %v5042_v28, %v5038_v6  ;;  %v5146_v53 = vsel %vm1681_vm4, %v5145_v44, %v5141_v22  ;;  %v14275_v28 = vld [vmem:[#allocation152_spill] sm:$0xff] }
 0x6bd   : > { %v11807_v42 = vpop.permute.xlu0 %4752  ;;  %v11809_v1 = vpop.permute.xlu1 %4755  ;;  %v5155_v16 = vrot.slane %v11592_v29, %v13795_v49  ;;  %v5224_v12 = vrot.slane %v11620_v21, %v13791_v31  ;;  %vm14271_vm10 = vcmask 654912   ;;  %v5111_v18 = vrot.slane %v11552_v34, %v14231_v62  ;;  %v14272_v21 = vld [vmem:[#allocation58_spill] sm:$0xff]  ;;  %v14274_v34 = vld [vmem:[#allocation101_spill] sm:$0xff] }
 0x6be   : > { %v5102_v0 = vsel %vm14271_vm10, %v5101_v20, %v5097_v35  ;;  %v5294_v33 = vrot.slane %v11682_v4, %v13790_v55  ;;  %v5298_v14 = vrot.slane %v11684_v30, %v13789_v19  ;;  %v11877_v29 = vsel %vm1765_vm0, %v5047_v15, %v5043_v41  ;;  %v14278_v35 = vld [vmem:[#allocation44_spill] sm:$0xff] }
 0x6bf   : > { %v5052_v39 = vrot.slane %v14272_v21, %v14259_v27  ;;  %vm14273_vm1 = vcmask 720512   ;;  %v5303_v58 = vrot.slane %v11703_v40, %v13791_v31  ;;  %v5151_v9 = vsel %vm1688_vm5, %v5150_v2, %v5146_v53  ;;  %v14279_v53 = vld [vmem:[#allocation61_spill] sm:$0xff] }
 0x6c0   : > { %v5107_v25 = vsel %vm14273_vm1, %v5106_v13, %v5102_v0  ;;  %v5160_v56 = vrot.slane %v14274_v34, %v13796_v24  ;;  %v5220_v4 = vsel %vm1674_vm3, %v5219_v17, %v5215_v11  ;;  %v5229_v30 = vrot.slane %v11622_v3, %v13793_v7 }
 0x6c1   : > { %v11833_v46 = vpop.permute.xlu0 %4758  ;;  %v11835_v36 = vpop.permute.xlu1 %4761  ;;  %v5156_v37 = vsel %vm1695_vm6, %v5155_v16, %v5151_v9  ;;  %v5165_v44 = vrot.slane %v14275_v28, %v13797_v52  ;;  %v5225_v6 = vsel %vm1681_vm4, %v5224_v12, %v5220_v4  ;;  %v5234_v40 = vrot.slane %v14276_v51, %v13795_v49  ;;  %v14285_v28 = vld [vmem:[#allocation89_spill] sm:$0xff] }
 0x6c2   : > { %v5112_v15 = vsel %vm14277_vm7, %v5111_v18, %v5107_v25  ;;  %v5116_v13 = vrot.slane %v14278_v35, %v14236_v23  ;;  %v5299_v22 = vsel %vm1674_vm3, %v5298_v14, %v5294_v33  ;;  %v5308_v3 = vrot.slane %v11705_v32, %v13793_v7  ;;  %v14281_v18 = vld [vmem:[#allocation161_spill] sm:$0xff]  ;;  %v14283_v14 = vld [vmem:[#allocation51_spill] sm:$0xff] }
 0x6c3   : > { %v5304_v2 = vsel %vm1681_vm4, %v5303_v58, %v5299_v22  ;;  %v5313_v11 = vrot.slane %v11725_v61, %v13795_v49  ;;  %v5121_v16 = vrot.slane %v14279_v53, %v14246_v38  ;;  %vm14280_vm12 = vcmask 392512   ;;  %v14284_v58 = vld [vmem:[#allocation85_spill] sm:$0xff]  ;;  %v14287_v22 = vld [vmem:[#allocation86_spill] sm:$0xff] }
 0x6c4   : > { %v5161_v12 = vsel %vm14280_vm12, %v5160_v56, %v5156_v37  ;;  %v5230_v0 = vsel %vm1688_vm5, %v5229_v30, %v5225_v6  ;;  %v5239_v33 = vrot.slane %v14281_v18, %v13796_v24  ;;  %vm14282_vm8 = vcmask 458112   ;;  %vm14286_vm9 = vmmov %vm14280_vm12  ;;  %v14294_v18 = vld [vmem:[#allocation67_spill] sm:$0xff] }
 0x6c5   : > { %v11865_v54 = vpop.permute.xlu0 %4764  ;;  %v11867_v60 = vpop.permute.xlu1 %4767  ;;  %v5166_v32 = vsel %vm14282_vm8, %v5165_v44, %v5161_v12  ;;  %v5170_v25 = vrot.slane %v14283_v14, %v13798_v63  ;;  %v5235_v61 = vsel %vm1695_vm6, %v5234_v40, %v5230_v0  ;;  %v5244_v9 = vrot.slane %v14284_v58, %v13797_v52  ;;  %vm14290_vm1 = vmmov %vm14282_vm8 }
 0x6c6   : > { %v5175_v56 = vrot.slane %v14285_v28, %v13799_v59  ;;  %v5309_v30 = vsel %vm1688_vm5, %v5308_v3, %v5304_v2  ;;  %v5318_v37 = vrot.slane %v11727_v5, %v13796_v24  ;;  %v5323_v51 = vrot.slane %v11753_v26, %v13797_v52  ;;  %vm14293_vm12 = vmmov %vm14286_vm9 }
 0x6c7   : > { %v5314_v6 = vsel %vm1695_vm6, %v5313_v11, %v5309_v30  ;;  %v5240_v35 = vsel %vm14286_vm9, %v5239_v33, %v5235_v61  ;;  %v5249_v3 = vrot.slane %v14287_v22, %v13798_v63  ;;  %vm14288_vm10 = vcmask 523712   ;;  %v14289_v11 = vld [vmem:[#allocation159_spill] sm:$0xff]  ;;  %vm14295_vm8 = vmmov %vm14290_vm1  ;;  %v14298_v30 = vld [vmem:[#allocation84_spill] sm:$0xff] }
 0x6c8   : > { %v5171_v2 = vsel %vm14288_vm10, %v5170_v25, %v5166_v32  ;;  %v5180_v53 = vrot.slane %v14289_v11, %v13800_v45  ;;  %v5245_v26 = vsel %vm14290_vm1, %v5244_v9, %v5240_v35  ;;  %vm14292_vm7 = vcmask 589312   ;;  %vm14296_vm9 = vmmov %vm14288_vm10 }
 0x6c9   : > { %v4771_v20 = vpop.permute.xlu0 %4770  ;;  %v4774_v50 = vpop.permute.xlu1 %4773  ;;  %v5328_v33 = vrot.slane %v14294_v18, %v13798_v63  ;;  %v5333_v25 = vrot.slane %v11781_v57, %v13799_v59  ;;  %vm14300_vm10 = vmmov %vm14292_vm7  ;;  %vm14302_vm1 = vcmask 654912   ;;  %v5338_v22 = vrot.slane %v11783_v48, %v13800_v45 }
 0x6ca   : > { %v5373_v17 = vrot.slane %v4771_v20, %v13790_v55  ;;  %v5377_v41 = vrot.slane %v4774_v50, %v13789_v19  ;;  %v5117_v50 = vsel %vm1751_vm14, %v5116_v13, %v5112_v15  ;;  %v5176_v15 = vsel %vm14292_vm7, %v5175_v56, %v5171_v2  ;;  %vm14303_vm7 = vmmov %vm14296_vm9 }
 0x6cb   : > { %v5319_v13 = vsel %vm14293_vm12, %v5318_v37, %v5314_v6  ;;  %v5122_v9 = vsel %vm1758_vm15, %v5121_v16, %v5117_v50  ;;  %v5126_v37 = vrot.slane %v14298_v30, %v14250_v10  ;;  %v5181_v50 = vsel %vm14302_vm1, %v5180_v53, %v5176_v15  ;;  %vm14304_vm12 = vmmov %vm14300_vm10 }
 0x6cc   : > { %v5378_v40 = vsel %vm1674_vm3, %v5377_v41, %v5373_v17  ;;  %v14291_v17 = vld [vmem:[#allocation103_spill] sm:$0xff]  ;;  %v5324_v32 = vsel %vm14295_vm8, %v5323_v51, %v5319_v13  ;;  %v14301_v51 = vld [vmem:[#allocation53_spill] sm:$0xff]  ;;  %v5343_v2 = vrot.slane %v11807_v42, %v14224_v8  ;;  %vm14305_vm8 = vcmask 392512  }
 0x6cd   : > { %v4777_v34 = vpop.permute.xlu0 %4776  ;;  %v4780_v4 = vpop.permute.xlu1 %4779  ;;  %v5254_v41 = vrot.slane %v14291_v17, %v13799_v59  ;;  %v5329_v35 = vsel %vm14303_vm7, %v5328_v33, %v5324_v32  ;;  %v14306_v17 = vld [vmem:[#allocation46_spill] sm:$0xff]  ;;  %v14311_v13 = vld [vmem:[#allocation47_spill] sm:$0xff]  ;;  %v5353_v30 = vrot.slane %v11833_v46, %v14236_v23 }
 0x6ce   : > { %v5382_v44 = vrot.slane %v4777_v34, %v13791_v31  ;;  %v5387_v20 = vrot.slane %v4780_v4, %v13793_v7  ;;  %v5250_v34 = vsel %vm14296_vm9, %v5249_v3, %v5245_v26  ;;  %v14297_v4 = vld [vmem:[#allocation106_spill] sm:$0xff]  ;;  %vm14307_vm9 = vmmov %vm14302_vm1  ;;  %vm14310_vm1 = vcmask 720512  }
 0x6cf   : > { %v5259_v28 = vrot.slane %v14297_v4, %v13800_v45  ;;  %v5255_v57 = vsel %vm14300_vm10, %v5254_v41, %v5250_v34  ;;  %v5190_v41 = vrot.slane %v14306_v17, %v14231_v62  ;;  %vm14309_vm10 = vcmask 458112   ;;  %vm14312_vm7 = vmmov %vm14310_vm1  ;;  %v14313_v33 = vld [vmem:[#allocation158_spill] sm:$0xff] }
 0x6d0   : > { %v5383_v5 = vsel %vm1681_vm4, %v5382_v44, %v5378_v40  ;;  %v14299_v44 = vld [vmem:[#allocation45_spill] sm:$0xff]  ;;  %v5264_v40 = vrot.slane %v14301_v51, %v14224_v8  ;;  %v5195_v18 = vrot.slane %v14311_v13, %v14236_v23  ;;  %v5348_v4 = vrot.slane %v11809_v1, %v14231_v62  ;;  %v14319_v51 = vld [vmem:[#allocation48_spill] sm:$0xff] }
 0x6d1   : > { %v4783_v12 = vpop.permute.xlu0 %4782  ;;  %v4786_v0 = vpop.permute.xlu1 %4785  ;;  %v5388_v61 = vsel %vm1688_vm5, %v5387_v20, %v5383_v5  ;;  %v5185_v6 = vrot.slane %v14299_v44, %v14224_v8  ;;  %v5334_v5 = vsel %vm14304_vm12, %v5333_v25, %v5329_v35  ;;  %v5260_v53 = vsel %vm14307_vm9, %v5259_v28, %v5255_v57  ;;  %vm14315_vm12 = vmmov %vm14307_vm9 }
 0x6d2   : > { %v5392_v14 = vrot.slane %v4783_v12, %v13795_v49  ;;  %v5397_v58 = vrot.slane %v4786_v0, %v13796_v24  ;;  %v14308_v12 = vld [vmem:[#allocation163_spill] sm:$0xff]  ;;  %v5265_v42 = vsel %vm14312_vm7, %v5264_v40, %v5260_v53  ;;  %v5339_v34 = vsel %vm14315_vm12, %v5338_v22, %v5334_v5  ;;  %v14323_v22 = vld [vmem:[#allocation166_spill] sm:$0xff] }
 0x6d3   : > { %v5269_v0 = vrot.slane %v14308_v12, %v14231_v62  ;;  %v5186_v15 = vsel %vm14310_vm1, %v5185_v6, %v5181_v50  ;;  %vm14317_vm9 = vcmask 523712   ;;  %v5200_v40 = vrot.slane %v14319_v51, %v14246_v38  ;;  %v14322_v50 = vld [vmem:[#allocation49_spill] sm:$0xff] }
 0x6d4   : > { %v5393_v56 = vsel %vm1695_vm6, %v5392_v14, %v5388_v61  ;;  %v5274_v14 = vrot.slane %v14313_v33, %v14236_v23  ;;  %v14314_v61 = vld [vmem:[#allocation98_spill] sm:$0xff]  ;;  %vm14321_vm7 = vcmask 589312   ;;  %v5205_v35 = vrot.slane %v14322_v50, %v14250_v10 }
 0x6d5   : > { %v4789_v20 = vpop.permute.xlu0 %4788  ;;  %v4792_v16 = vpop.permute.xlu1 %4791  ;;  %v5398_v11 = vsel %vm14305_vm8, %v5397_v58, %v5393_v56  ;;  %v5131_v58 = vrot.slane %v14314_v61, %v14259_v27  ;;  %vm14316_vm8 = vmmov %vm14310_vm1  ;;  %v5127_v13 = vsel %vm1765_vm0, %v5126_v37, %v5122_v9 }
 0x6d6   : > { %v5402_v3 = vrot.slane %v4789_v20, %v13797_v52  ;;  %v5407_v26 = vrot.slane %v4792_v16, %v13798_v63  ;;  %v5344_v56 = vsel %vm14316_vm8, %v5343_v2, %v5339_v34  ;;  %vm14326_vm8 = vcmask 654912  }
 0x6d8   : > { %v5403_v48 = vsel %vm14309_vm10, %v5402_v3, %v5398_v11  ;;  %vm14318_vm10 = vcmask 786112   ;;  %v5279_v3 = vrot.slane %v14323_v22, %v14246_v38  ;;  %v14324_v11 = vld [vmem:[#allocation65_spill] sm:$0xff] }
 0x6d9   : > { %v4795_v32 = vpop.permute.xlu0 %4794  ;;  %v4798_v25 = vpop.permute.xlu1 %4797  ;;  %v5408_v44 = vsel %vm14317_vm9, %v5407_v26, %v5403_v48  ;;  %v5191_v57 = vsel %vm14318_vm10, %v5190_v41, %v5186_v15  ;;  %vm14320_vm1 = vmmov %vm14318_vm10  ;;  %v5284_v26 = vrot.slane %v14324_v11, %v14250_v10  ;;  %v5358_v41 = vrot.slane %v11835_v36, %v14246_v38 }
 0x6da   : > { %v5412_v28 = vrot.slane %v4795_v32, %v13799_v59  ;;  %v5417_v6 = vrot.slane %v4798_v25, %v13800_v45  ;;  %v5270_v20 = vsel %vm14320_vm1, %v5269_v0, %v5265_v42  ;;  %v5196_v16 = vsel %vm1751_vm14, %v5195_v18, %v5191_v57  ;;  %vm14325_vm12 = vmmov %vm14320_vm1  ;;  %v14327_v42 = vld [vmem:[#allocation160_spill] sm:$0xff] }
 0x6db   : > { %v5275_v46 = vsel %vm1751_vm14, %v5274_v14, %v5270_v20  ;;  %v5349_v17 = vsel %vm14325_vm12, %v5348_v4, %v5344_v56  ;;  %v5363_v0 = vrot.slane %v11865_v54, %v14250_v10  ;;  %v5201_v18 = vsel %vm1758_vm15, %v5200_v40, %v5196_v16  ;;  %v14329_v25 = vld [vmem:[#allocation168_spill] sm:$0xff]  ;;  %vm14330_vm10 = vmmov %vm14320_vm1 }
 0x6dc   : > { %v5413_v1 = vsel %vm14321_vm7, %v5412_v28, %v5408_v44  ;;  %v5354_v12 = vsel %vm1751_vm14, %v5353_v30, %v5349_v17  ;;  %v5210_v33 = vrot.slane %v14327_v42, %v14259_v27  ;;  %vm14328_vm9 = vcmask 720512   ;;  %v14341_v42 = vld [vmem:[#allocation14_spill] sm:$0xff] }
 0x6dd   : > { %v4801_v5 = vpop.permute.xlu0 %4800  ;;  %v4804_v2 = vpop.permute.xlu1 %4803  ;;  %v5418_v48 = vsel %vm14326_vm8, %v5417_v6, %v5413_v1  ;;  %v5053_v14 = vsel %vm1772_vm2, %v5052_v39, %v11877_v29  ;;  %v5206_v54 = vsel %vm1765_vm0, %v5205_v35, %v5201_v18  ;;  %v5280_v32 = vsel %vm1758_vm15, %v5279_v3, %v5275_v46 }
 0x6de   : > { %v5422_v53 = vrot.slane %v4801_v5, %v14224_v8  ;;  %v5427_v15 = vrot.slane %v4804_v2, %v14231_v62  ;;  %v5289_v9 = vrot.slane %v14329_v25, %v14259_v27  ;;  %v5285_v34 = vsel %vm1765_vm0, %v5284_v26, %v5280_v32  ;;  %v14336_v26 = vld [vmem:[#allocation8_spill] sm:$0xff]  ;;  %v14344_v25 = vld [vmem:[#allocation171_spill] sm:$0xff] }
 0x6df   : > { %v5359_v4 = vsel %vm1758_vm15, %v5358_v41, %v5354_v12  ;;  %v5368_v28 = vrot.slane %v11867_v60, %v14259_v27  ;;  %v5132_v29 = vsel %vm1772_vm2, %v5131_v58, %v5127_v13  ;;  %vm14331_vm1 = vcmask 1041409   ;;  %v14337_v41 = vld [vmem:[#allocation173_spill] sm:$0xff]  ;;  %v14340_v13 = vld [vmem:[#allocation104_spill] sm:$0xff] }
 0x6e0   : > { %v5423_v36 = vsel %vm14328_vm9, %v5422_v53, %v5418_v48  ;;  %v5364_v39 = vsel %vm1765_vm0, %v5363_v0, %v5359_v4  ;;  %v5449_v44 = vsel %vm14331_vm1, %v11845_v43, %v11838_v47  ;;  %v5211_v6 = vsel %vm1772_vm2, %v5210_v33, %v5206_v54  ;;  %v14338_v12 = vld [vmem:[#allocation105_spill] sm:$0xff]  ;;  %v14339_v48 = vld [vmem:[#allocation167_spill] sm:$0xff]  ;;  %v14343_v54 = vld [vmem:[#allocation108_spill] sm:$0xff] }
 0x6e1   : > { %v4807_v37 = vpop.permute.xlu0 %4806  ;;  %v4810_v61 = vpop.permute.xlu1 %4809  ;;  %v5428_v56 = vsel %vm14330_vm10, %v5427_v15, %v5423_v36  ;;  %vm14332_vm7 = vcmask 1042434   ;;  %v5290_v51 = vsel %vm1772_vm2, %v5289_v9, %v5285_v34  ;;  %v5369_v50 = vsel %vm1772_vm2, %v5368_v28, %v5364_v39  ;;  %v14342_v36 = vld [vmem:[#allocation64_spill] sm:$0xff]  ;;  %v14347_v28 = vld [vmem:[#allocation111_spill] sm:$0xff] }
 0x6e2   : > { %v5432_v21 = vrot.slane %v4807_v37, %v14236_v23  ;;  %v5437_v30 = vrot.slane %v4810_v61, %v14246_v38  ;;  %v5450_v60 = vsel %vm14332_vm7, %v5053_v14, %v5449_v44  ;;  %vm14333_vm12 = vcmask 1045509   ;;  %v14345_v37 = vld [vmem:[#allocation107_spill] sm:$0xff]  ;;  %v14346_v34 = vld [vmem:[#allocation196_spill] sm:$0xff] }
 0x6e3   : > { %v5451_v20 = vsel %vm2331_vm11, %v5132_v29, %v5450_v60  ;;  %vm14334_vm8 = vcmask 1046534   ;;  %vm14335_vm9 = vcmask 1047559   ;;  %v14348_v29 = vld [vmem:[#allocation212_spill] sm:$0xff]  ;;  %vm14445_vm10 = vcmask 392512  }
 0x6e4   : > { %v5433_v57 = vsel %vm1751_vm14, %v5432_v21, %v5428_v56  ;;  %v5452_v43 = vsel %vm2333_vm13, %v5211_v6, %v5451_v20  ;;  %v14349_v56 = vld [vmem:[#allocation109_spill] sm:$0xff]  ;;  %v14350_v44 = vld [vmem:[#allocation112_spill] sm:$0xff]  ;;  %vm14446_vm1 = vcmask 458112   ;;  %vm14449_vm7 = vcmask 523712  }
 0x6e5   : > { %v4813_v40 = vpop.permute.xlu0 %4812  ;;  %v4816_v58 = vpop.permute.xlu1 %4815  ;;  %v5438_v47 = vsel %vm1758_vm15, %v5437_v30, %v5433_v57  ;;  %v5453_v46 = vsel %vm14333_vm12, %v5290_v51, %v5452_v43  ;;  %v14351_v57 = vld [vmem:[#allocation114_spill] sm:$0xff]  ;;  %v14352_v51 = vld [vmem:[#allocation181_spill] sm:$0xff]  ;;  %v14356_v43 = vld [vmem:[#allocation211_spill] sm:$0xff]  ;;  %vm14450_vm12 = vcmask 589312  }
 0x6e6   : > { %v5442_v1 = vrot.slane %v4813_v40, %v14250_v10  ;;  %v5447_v16 = vrot.slane %v4816_v58, %v14259_v27  ;;  %v5454_v3 = vsel %vm14334_vm8, %v5369_v50, %v5453_v46  ;;  %v14353_v58 = vld [vmem:[#allocation113_spill] sm:$0xff]  ;;  %v14357_v46 = vld [vmem:[#allocation156_spill] sm:$0xff]  ;;  %vm14453_vm8 = vcmask 654912  }
 0x6e7   : > { %v14355_v50 = vld [vmem:[#allocation165_spill] sm:$0xff] }
 0x6e8   : > { %v5443_v35 = vsel %vm1765_vm0, %v5442_v1, %v5438_v47  ;;  %v14354_v1 = vld [vmem:[#allocation195_spill] sm:$0xff] }
 0x6e9   : > { %v5448_v22 = vsel %vm1772_vm2, %v5447_v16, %v5443_v35 }
 0x6ea   : > { %v5455_v5 = vsel %vm14335_vm9, %v5448_v22, %v5454_v3  ;;  %v14358_v3 = vld [vmem:[#allocation123_spill] sm:$0xff]  ;;  %vm14454_vm9 = vcmask 720512  }
 0x6eb   : > { %5457 = vadd.xlane.f32.xlu0 %v5455_v5 }
 0x778   : > { %v5458_v2 = vpop.xlane.xlu0 %5457 }
 0x779   : > { %7769 = vrcp.f32 %v5458_v2  ;;  %v14359_v2 = vld [vmem:[#allocation213_spill] sm:$0xff] }
 0x783   : > { %v12059_v11 = vpop.eup %7769 }
 0x784   : > { %v5464_v17 = vrot.slane %v12059_v11, %v14336_v26  ;;  %v12069_v33 = vrot.slane %v12059_v11, %v14341_v42  ;;  %v12097_v5 = vrot.slane %v12059_v11, %v14358_v3  ;;  %v14364_v42 = vld [vmem:[#allocation62_spill] sm:$0xff]  ;;  %v14381_v3 = vld [vmem:[#allocation183_spill] sm:$0xff] }
 0x786   : > { %v5509_v53 = vmul.f32 %v5464_v17, %v14337_v41  ;;  %v5501_v0 = vmul.f32 %v5464_v17, %v14338_v12  ;;  %v5516_v15 = vmul.f32 %v5464_v17, %v14339_v48  ;;  %v5502_v18 = vmul.f32 %v5464_v17, %v14340_v13  ;;  %v14360_v41 = vld [vmem:[#allocation50_spill] sm:$0xff]  ;;  %v14361_v12 = vld [vmem:[#allocation197_spill] sm:$0xff]  ;;  %v14363_v13 = vld [vmem:[#allocation200_spill] sm:$0xff] }
 0x787   : > { %v5518_v14 = vmul.f32 %v12069_v33, %v14342_v36  ;;  %v5503_v32 = vmul.f32 %v5464_v17, %v14343_v54  ;;  %v5520_v9 = vmul.f32 %v12069_v33, %v14344_v25  ;;  %v5504_v61 = vmul.f32 %v5464_v17, %v14345_v37  ;;  %v14362_v48 = vld [vmem:[#allocation162_spill] sm:$0xff] }
 0x788   : > { %5782 = vperm.xlu0 %7254, %v5509_v53   ;;  %5758 = vperm.xlu1 %7253, %v5501_v0   ;;  %v5522_v4 = vmul.f32 %v12069_v33, %v14346_v34  ;;  %v5505_v21 = vmul.f32 %v5464_v17, %v14347_v28  ;;  %v5524_v39 = vmul.f32 %v12069_v33, %v14348_v29 }
 0x789   : > { %v5506_v30 = vmul.f32 %v5464_v17, %v14349_v56  ;;  %v5526_v6 = vmul.f32 %v12069_v33, %v14350_v44  ;;  %v5507_v60 = vmul.f32 %v5464_v17, %v14351_v57  ;;  %v5528_v40 = vmul.f32 %v12069_v33, %v14352_v51  ;;  %v14372_v56 = vld [vmem:[#allocation174_spill] sm:$0xff]  ;;  %v14374_v57 = vld [vmem:[#allocation188_spill] sm:$0xff] }
 0x78a   : > { %v5508_v20 = vmul.f32 %v5464_v17, %v14353_v58  ;;  %v5530_v16 = vmul.f32 %v12069_v33, %v14354_v1  ;;  %v5510_v47 = vmul.f32 %v5464_v17, %v14355_v50  ;;  %v5532_v35 = vmul.f32 %v12069_v33, %v14356_v43  ;;  %v14373_v44 = vld [vmem:[#allocation218_spill] sm:$0xff]  ;;  %v14375_v51 = vld [vmem:[#allocation128_spill] sm:$0xff]  ;;  %v14379_v43 = vld [vmem:[#allocation179_spill] sm:$0xff] }
 0x78b   : > { %v5511_v22 = vmul.f32 %v5464_v17, %v14357_v46  ;;  %v5534_v26 = vmul.f32 %v12097_v5, %v14359_v2  ;;  %v5512_v53 = vmul.f32 %v5464_v17, %v14360_v41  ;;  %v5536_v0 = vmul.f32 %v12097_v5, %v14361_v12  ;;  %v14376_v58 = vld [vmem:[#allocation192_spill] sm:$0xff]  ;;  %v14378_v50 = vld [vmem:[#allocation206_spill] sm:$0xff]  ;;  %v14380_v46 = vld [vmem:[#allocation205_spill] sm:$0xff] }
 0x78c   : > { %5803 = vperm.xlu0 %7254, %v5516_v15   ;;  %5761 = vperm.xlu1 %7253, %v5502_v18   ;;  %v5513_v15 = vmul.f32 %v5464_v17, %v14362_v48  ;;  %v5538_v18 = vmul.f32 %v12097_v5, %v14363_v13  ;;  %v5514_v36 = vmul.f32 %v5464_v17, %v14364_v42  ;;  %v14377_v1 = vld [vmem:[#allocation88_spill] sm:$0xff] }
 0x78d   : > { %v5529_v2 = vmul.f32 %v12069_v33, %v14381_v3  ;;  %v14404_v3 = vld [vmem:[#allocation208_spill] sm:$0xff] }
 0x790   : > { %5809 = vperm.xlu0 %7254, %v5518_v14   ;;  %5764 = vperm.xlu1 %7253, %v5503_v32   ;;  %v14365_v14 = vld [vmem:[#allocation199_spill] sm:$0xff]  ;;  %v14366_v32 = vld [vmem:[#allocation185_spill] sm:$0xff] }
 0x791   : > { %v5540_v54 = vmul.f32 %v12097_v5, %v14365_v14  ;;  %v5515_v25 = vmul.f32 %v5464_v17, %v14366_v32 }
 0x794   : > { %5815 = vperm.xlu0 %7254, %v5520_v9   ;;  %5767 = vperm.xlu1 %7253, %v5504_v61   ;;  %v14367_v9 = vld [vmem:[#allocation216_spill] sm:$0xff] }
 0x795   : > { %v5542_v37 = vmul.f32 %v12097_v5, %v14367_v9  ;;  %v14368_v61 = vld [vmem:[#allocation176_spill] sm:$0xff]  ;;  %v14390_v9 = vld [vmem:[#allocation151_spill] sm:$0xff] }
 0x796   : > { %v5517_v34 = vmul.f32 %v12069_v33, %v14368_v61  ;;  %v14391_v61 = vld [vmem:[#allocation135_spill] sm:$0xff] }
 0x798   : > { %5821 = vperm.xlu0 %7254, %v5522_v4   ;;  %5770 = vperm.xlu1 %7253, %v5505_v21   ;;  %v14369_v4 = vld [vmem:[#allocation217_spill] sm:$0xff] }
 0x799   : > { %v5544_v28 = vmul.f32 %v12097_v5, %v14369_v4  ;;  %v14370_v21 = vld [vmem:[#allocation169_spill] sm:$0xff]  ;;  %v14392_v4 = vld [vmem:[#allocation214_spill] sm:$0xff] }
 0x79a   : > { %v5519_v29 = vmul.f32 %v12069_v33, %v14370_v21  ;;  %v14393_v21 = vld [vmem:[#allocation136_spill] sm:$0xff] }
 0x79c   : > { %5827 = vperm.xlu0 %7254, %v5524_v39   ;;  %5773 = vperm.xlu1 %7253, %v5506_v30   ;;  %v14371_v39 = vld [vmem:[#allocation219_spill] sm:$0xff]  ;;  %v5521_v30 = vmul.f32 %v12069_v33, %v14372_v56  ;;  %v14395_v56 = vld [vmem:[#allocation138_spill] sm:$0xff] }
 0x79d   : > { %v5546_v17 = vmul.f32 %v12097_v5, %v14371_v39  ;;  %v14394_v39 = vld [vmem:[#allocation215_spill] sm:$0xff] }
 0x7a0   : > { %5833 = vperm.xlu0 %7254, %v5526_v6   ;;  %5776 = vperm.xlu1 %7253, %v5507_v60   ;;  %v5548_v6 = vmul.f32 %v12097_v5, %v14373_v44  ;;  %v5523_v60 = vmul.f32 %v12069_v33, %v14374_v57  ;;  %v14396_v44 = vld [vmem:[#allocation191_spill] sm:$0xff]  ;;  %v14397_v57 = vld [vmem:[#allocation157_spill] sm:$0xff] }
 0x7a4   : > { %5839 = vperm.xlu0 %7254, %v5528_v40   ;;  %5779 = vperm.xlu1 %7253, %v5508_v20   ;;  %v12129_v40 = vrot.slane %v12059_v11, %v14375_v51  ;;  %v14398_v51 = vld [vmem:[#allocation81_spill] sm:$0xff] }
 0x7a6   : > { %v5550_v20 = vmul.f32 %v12129_v40, %v14376_v58 }
 0x7a8   : > { %5845 = vperm.xlu0 %7254, %v5530_v16   ;;  %5785 = vperm.xlu1 %7253, %v5510_v47   ;;  %v5525_v16 = vmul.f32 %v12069_v33, %v14377_v1  ;;  %v5552_v47 = vmul.f32 %v12129_v40, %v14378_v50 }
 0x7ac   : > { %5851 = vperm.xlu0 %7254, %v5532_v35   ;;  %5788 = vperm.xlu1 %7253, %v5511_v22   ;;  %v5527_v35 = vmul.f32 %v12069_v33, %v14379_v43  ;;  %v5554_v22 = vmul.f32 %v12129_v40, %v14380_v46  ;;  %v14403_v46 = vld [vmem:[#allocation204_spill] sm:$0xff] }
 0x7b0   : > { %5857 = vperm.xlu0 %7254, %v5534_v26   ;;  %5791 = vperm.xlu1 %7253, %v5512_v53   ;;  %v14382_v26 = vld [vmem:[#allocation133_spill] sm:$0xff] }
 0x7b1   : > { %v12145_v41 = vrot.slane %v12059_v11, %v14382_v26  ;;  %v14383_v53 = vld [vmem:[#allocation9_spill] sm:$0xff]  ;;  %v14405_v26 = vld [vmem:[#allocation203_spill] sm:$0xff] }
 0x7b3   : > { %v5566_v12 = vmul.f32 %v12145_v41, %v14383_v53  ;;  %v5549_v53 = vmul.f32 %v12129_v40, %v14405_v26 }
 0x7b4   : > { %5863 = vperm.xlu0 %7254, %v5536_v0   ;;  %5794 = vperm.xlu1 %7253, %v5513_v15   ;;  %v14384_v0 = vld [vmem:[#allocation198_spill] sm:$0xff]  ;;  %v14385_v15 = vld [vmem:[#allocation143_spill] sm:$0xff] }
 0x7b5   : > { %v5531_v48 = vmul.f32 %v12069_v33, %v14384_v0  ;;  %v12153_v13 = vrot.slane %v12059_v11, %v14385_v15 }
 0x7b8   : > { %5869 = vperm.xlu0 %7254, %v5538_v18   ;;  %5797 = vperm.xlu1 %7253, %v5514_v36   ;;  %v14386_v18 = vld [vmem:[#allocation20_spill] sm:$0xff]  ;;  %v14387_v36 = vld [vmem:[#allocation186_spill] sm:$0xff] }
 0x7b9   : > { %v5581_v42 = vmul.f32 %v12153_v13, %v14386_v18  ;;  %v5533_v14 = vmul.f32 %v12097_v5, %v14387_v36  ;;  %v14408_v18 = vld [vmem:[#allocation97_spill] sm:$0xff] }
 0x7bc   : > { %5875 = vperm.xlu0 %7254, %v5540_v54   ;;  %5800 = vperm.xlu1 %7253, %v5515_v25   ;;  %v14388_v54 = vld [vmem:[#allocation16_spill] sm:$0xff]  ;;  %v14389_v25 = vld [vmem:[#allocation189_spill] sm:$0xff] }
 0x7bd   : > { %v5568_v32 = vmul.f32 %v12145_v41, %v14388_v54  ;;  %v5535_v33 = vmul.f32 %v12097_v5, %v14389_v25 }
 0x7c0   : > { %5881 = vperm.xlu0 %7254, %v5542_v37   ;;  %5806 = vperm.xlu1 %7253, %v5517_v34   ;;  %v12165_v37 = vrot.slane %v12059_v11, %v14390_v9 }
 0x7c2   : > { %v5597_v34 = vmul.f32 %v12165_v37, %v14391_v61 }
 0x7c4   : > { %5887 = vperm.xlu0 %7254, %v5544_v28   ;;  %5812 = vperm.xlu1 %7253, %v5519_v29   ;;  %v5537_v28 = vmul.f32 %v12097_v5, %v14392_v4  ;;  %v5569_v29 = vmul.f32 %v12145_v41, %v14393_v21  ;;  %v14413_v4 = vld [vmem:[#allocation35_spill] sm:$0xff]  ;;  %v14414_v21 = vld [vmem:[#allocation121_spill] sm:$0xff] }
 0x7c8   : > { %5893 = vperm.xlu0 %7254, %v5546_v17   ;;  %5818 = vperm.xlu1 %7253, %v5521_v30   ;;  %v5539_v17 = vmul.f32 %v12097_v5, %v14394_v39  ;;  %v5599_v30 = vmul.f32 %v12165_v37, %v14395_v56  ;;  %v14415_v56 = vld [vmem:[#allocation207_spill] sm:$0xff] }
 0x7cc   : > { %5899 = vperm.xlu0 %7254, %v5548_v6   ;;  %5824 = vperm.xlu1 %7253, %v5523_v60   ;;  %v5541_v6 = vmul.f32 %v12097_v5, %v14396_v44  ;;  %v12181_v60 = vrot.slane %v12059_v11, %v14397_v57  ;;  %v14402_v11 = vld [vmem:[#allocation33_spill] sm:$0xff] }
 0x7cd   : > { %v14416_v44 = vld [vmem:[#allocation73_spill] sm:$0xff] }
 0x7ce   : > { %v5614_v58 = vmul.f32 %v12181_v60, %v14398_v51 }
 0x7d0   : > { %5905 = vperm.xlu0 %7254, %v5550_v20   ;;  %5830 = vperm.xlu1 %7253, %v5525_v16   ;;  %v14399_v20 = vld [vmem:[#allocation202_spill] sm:$0xff]  ;;  %v14400_v16 = vld [vmem:[#allocation11_spill] sm:$0xff] }
 0x7d1   : > { %v5543_v1 = vmul.f32 %v12097_v5, %v14399_v20  ;;  %v5570_v50 = vmul.f32 %v12145_v41, %v14400_v16 }
 0x7d4   : > { %5911 = vperm.xlu0 %7254, %v5552_v47   ;;  %5836 = vperm.xlu1 %7253, %v5527_v35   ;;  %v14401_v47 = vld [vmem:[#allocation201_spill] sm:$0xff]  ;;  %v5600_v35 = vmul.f32 %v12165_v37, %v14402_v11 }
 0x7d5   : > { %v5545_v43 = vmul.f32 %v12097_v5, %v14401_v47 }
 0x7d8   : > { %5917 = vperm.xlu0 %7254, %v5554_v22   ;;  %5842 = vperm.xlu1 %7253, %v5529_v2   ;;  %v5547_v22 = vmul.f32 %v12097_v5, %v14403_v46  ;;  %v5556_v2 = vmul.f32 %v12129_v40, %v14404_v3  ;;  %v5616_v5 = vmul.f32 %v12181_v60, %v14408_v18 }
 0x7dc   : > { %5953 = vperm.xlu0 %7254, %v5566_v12   ;;  %5848 = vperm.xlu1 %7253, %v5531_v48   ;;  %v14406_v12 = vld [vmem:[#allocation91_spill] sm:$0xff]  ;;  %v14407_v48 = vld [vmem:[#allocation221_spill] sm:$0xff] }
 0x7dd   : > { %v5586_v0 = vmul.f32 %v12153_v13, %v14406_v12  ;;  %v5551_v15 = vmul.f32 %v12129_v40, %v14407_v48 }
 0x7e0   : > { %5998 = vperm.xlu0 %7254, %v5581_v42   ;;  %5854 = vperm.xlu1 %7253, %v5533_v14   ;;  %v14409_v42 = vld [vmem:[#allocation220_spill] sm:$0xff] }
 0x7e1   : > { %v5553_v36 = vmul.f32 %v12129_v40, %v14409_v42 }
 0x7e4   : > { %5959 = vperm.xlu0 %7254, %v5568_v32   ;;  %5860 = vperm.xlu1 %7253, %v5535_v33   ;;  %v14410_v32 = vld [vmem:[#allocation122_spill] sm:$0xff] }
 0x7e5   : > { %v5572_v25 = vmul.f32 %v12145_v41, %v14410_v32  ;;  %v14411_v33 = vld [vmem:[#allocation10_spill] sm:$0xff] }
 0x7e6   : > { %v5565_v9 = vmul.f32 %v12145_v41, %v14411_v33 }
 0x7e8   : > { %6046 = vperm.xlu0 %7254, %v5597_v34   ;;  %5866 = vperm.xlu1 %7253, %v5537_v28   ;;  %v5602_v28 = vmul.f32 %v12165_v37, %v14413_v4 }
 0x7ec   : > { %5962 = vperm.xlu0 %7254, %v5569_v29   ;;  %5872 = vperm.xlu1 %7253, %v5539_v17   ;;  %v5567_v29 = vmul.f32 %v12145_v41, %v14414_v21 }
 0x7f0   : > { %6052 = vperm.xlu0 %7254, %v5599_v30   ;;  %5878 = vperm.xlu1 %7253, %v5541_v6   ;;  %v5558_v30 = vmul.f32 %v12129_v40, %v14415_v56  ;;  %v5582_v6 = vmul.f32 %v12153_v13, %v14416_v44 }
 0x7f4   : > { %6097 = vperm.xlu0 %7254, %v5614_v58   ;;  %5884 = vperm.xlu1 %7253, %v5543_v1   ;;  %v14417_v58 = vld [vmem:[#allocation124_spill] sm:$0xff]  ;;  %v14418_v1 = vld [vmem:[#allocation54_spill] sm:$0xff] }
 0x7f5   : > { %v5588_v20 = vmul.f32 %v12153_v13, %v14417_v58  ;;  %v5583_v16 = vmul.f32 %v12153_v13, %v14418_v1 }
 0x7f8   : > { %5965 = vperm.xlu0 %7254, %v5570_v50   ;;  %5890 = vperm.xlu1 %7253, %v5545_v43   ;;  %v14419_v43 = vld [vmem:[#allocation145_spill] sm:$0xff] }
 0x7f9   : > { %v5618_v11 = vmul.f32 %v12181_v60, %v14419_v43 }
 0x7fc   : > { %6055 = vperm.xlu0 %7254, %v5600_v35   ;;  %5896 = vperm.xlu1 %7253, %v5547_v22   ;;  %v14420_v35 = vld [vmem:[#allocation131_spill] sm:$0xff] }
 0x7fd   : > { %v5598_v46 = vmul.f32 %v12165_v37, %v14420_v35 }
 0x800   : > { %5923 = vperm.xlu0 %7254, %v5556_v2   ;;  %5902 = vperm.xlu1 %7253, %v5549_v53   ;;  %v14421_v2 = vld [vmem:[#allocation27_spill] sm:$0xff] }
 0x801   : > { %v5574_v26 = vmul.f32 %v12145_v41, %v14421_v2  ;;  %v14422_v53 = vld [vmem:[#allocation75_spill] sm:$0xff] }
 0x802   : > { %v5584_v12 = vmul.f32 %v12153_v13, %v14422_v53 }
 0x804   : > { %6013 = vperm.xlu0 %7254, %v5586_v0   ;;  %5908 = vperm.xlu1 %7253, %v5551_v15   ;;  %v14423_v15 = vld [vmem:[#allocation38_spill] sm:$0xff] }
 0x805   : > { %v5604_v18 = vmul.f32 %v12165_v37, %v14423_v15 }
 0x807   : > { %v12207_v14 = vpop.permute.xlu0 %5782  ;;  %v12209_v54 = vpop.permute.xlu1 %5758 }
 0x808   : > { %6103 = vperm.xlu0 %7254, %v5616_v5   ;;  %5914 = vperm.xlu1 %7253, %v5553_v36   ;;  %v14424_v5 = vld [vmem:[#allocation60_spill] sm:$0xff] }
 0x809   : > { %v5613_v42 = vmul.f32 %v12181_v60, %v14424_v5 }
 0x80b   : > { %v12215_v61 = vpop.permute.xlu0 %5803  ;;  %v12217_v34 = vpop.permute.xlu1 %5761 }
 0x80c   : > { %14412 = vst [vmem:[#allocation170_spill] sm:$0xff] %v12215_v61  ;;  %5971 = vperm.xlu0 %7254, %v5572_v25   ;;  %5950 = vperm.xlu1 %7253, %v5565_v9   ;;  %v14425_v25 = vld [vmem:[#allocation210_spill] sm:$0xff] }
 0x80d   : > { %v5560_v33 = vmul.f32 %v12129_v40, %v14425_v25  ;;  %v14426_v9 = vld [vmem:[#allocation102_spill] sm:$0xff] }
 0x80e   : > { %v5555_v4 = vmul.f32 %v12129_v40, %v14426_v9 }
 0x80f   : > { %v12223_v39 = vpop.permute.xlu0 %5809  ;;  %v12225_v17 = vpop.permute.xlu1 %5764 }
 0x810   : > { %6061 = vperm.xlu0 %7254, %v5602_v28   ;;  %5956 = vperm.xlu1 %7253, %v5567_v29   ;;  %v14427_v29 = vld [vmem:[#allocation126_spill] sm:$0xff] }
 0x811   : > { %v5590_v56 = vmul.f32 %v12153_v13, %v14427_v29 }
 0x813   : > { %v12231_v57 = vpop.permute.xlu0 %5815  ;;  %v12233_v51 = vpop.permute.xlu1 %5767 }
 0x814   : > { %5929 = vperm.xlu0 %7254, %v5558_v30   ;;  %6001 = vperm.xlu1 %7253, %v5582_v6   ;;  %v14428_v30 = vld [vmem:[#allocation76_spill] sm:$0xff] }
 0x815   : > { %v5585_v44 = vmul.f32 %v12153_v13, %v14428_v30 }
 0x817   : > { %v12239_v50 = vpop.permute.xlu0 %5821  ;;  %v12241_v47 = vpop.permute.xlu1 %5770 }
 0x818   : > { %6019 = vperm.xlu0 %7254, %v5588_v20   ;;  %6004 = vperm.xlu1 %7253, %v5583_v16   ;;  %v14429_v20 = vld [vmem:[#allocation147_spill] sm:$0xff]  ;;  %v14430_v16 = vld [vmem:[#allocation82_spill] sm:$0xff] }
 0x819   : > { %v5620_v1 = vmul.f32 %v12181_v60, %v14429_v20  ;;  %v5615_v43 = vmul.f32 %v12181_v60, %v14430_v16 }
 0x81b   : > { %v12247_v22 = vpop.permute.xlu0 %5827  ;;  %v12249_v3 = vpop.permute.xlu1 %5773 }
 0x81c   : > { %6109 = vperm.xlu0 %7254, %v5618_v11   ;;  %6049 = vperm.xlu1 %7253, %v5598_v46   ;;  %v14431_v46 = vld [vmem:[#allocation90_spill] sm:$0xff] }
 0x81d   : > { %v5576_v2 = vmul.f32 %v12145_v41, %v14431_v46 }
 0x81f   : > { %v12255_v0 = vpop.permute.xlu0 %5833  ;;  %v12257_v48 = vpop.permute.xlu1 %5776 }
 0x820   : > { %5977 = vperm.xlu0 %7254, %v5574_v26   ;;  %6007 = vperm.xlu1 %7253, %v5584_v12   ;;  %v14432_v26 = vld [vmem:[#allocation74_spill] sm:$0xff] }
 0x821   : > { %v5571_v53 = vmul.f32 %v12145_v41, %v14432_v26 }
 0x823   : > { %v12263_v36 = vpop.permute.xlu0 %5839  ;;  %v12265_v32 = vpop.permute.xlu1 %5779 }
 0x824   : > { %6067 = vperm.xlu0 %7254, %v5604_v18   ;;  %6094 = vperm.xlu1 %7253, %v5613_v42   ;;  %v14433_v18 = vld [vmem:[#allocation80_spill] sm:$0xff]  ;;  %v14434_v42 = vld [vmem:[#allocation139_spill] sm:$0xff] }
 0x825   : > { %v5606_v5 = vmul.f32 %v12165_v37, %v14433_v18  ;;  %v5601_v25 = vmul.f32 %v12165_v37, %v14434_v42  ;;  %v14439_v18 = vld [vmem:[#allocation39_spill] sm:$0xff]  ;;  %v14440_v42 = vld [vmem:[#allocation150_spill] sm:$0xff] }
 0x827   : > { %v12271_v28 = vpop.permute.xlu0 %5845  ;;  %v12273_v21 = vpop.permute.xlu1 %5785 }
 0x828   : > { %5935 = vperm.xlu0 %7254, %v5560_v33   ;;  %5920 = vperm.xlu1 %7253, %v5555_v4   ;;  %v14435_v4 = vld [vmem:[#allocation209_spill] sm:$0xff] }
 0x829   : > { %v5562_v29 = vmul.f32 %v12129_v40, %v14435_v4  ;;  %v6227_v4 = vrot.slane %v12223_v39, %v13789_v19  ;;  %v6237_v39 = vrot.slane %v12231_v57, %v13793_v7  ;;  %v6247_v57 = vrot.slane %v12239_v50, %v13796_v24 }
 0x82a   : > { %v6257_v50 = vrot.slane %v12247_v22, %v13798_v63  ;;  %v6267_v22 = vrot.slane %v12255_v0, %v13800_v45  ;;  %v6277_v0 = vrot.slane %v12263_v36, %v14231_v62  ;;  %v6287_v36 = vrot.slane %v12271_v28, %v14246_v38 }
 0x82b   : > { %v12279_v6 = vpop.permute.xlu0 %5851  ;;  %v12281_v58 = vpop.permute.xlu1 %5788 }
 0x82c   : > { %6025 = vperm.xlu0 %7254, %v5590_v56   ;;  %6010 = vperm.xlu1 %7253, %v5585_v44   ;;  %v14436_v56 = vld [vmem:[#allocation222_spill] sm:$0xff] }
 0x82d   : > { %v5557_v30 = vmul.f32 %v12129_v40, %v14436_v56 }
 0x82f   : > { %v12287_v11 = vpop.permute.xlu0 %5857  ;;  %v12289_v35 = vpop.permute.xlu1 %5791 }
 0x830   : > { %6115 = vperm.xlu0 %7254, %v5620_v1   ;;  %6100 = vperm.xlu1 %7253, %v5615_v43   ;;  %v14437_v1 = vld [vmem:[#allocation23_spill] sm:$0xff]  ;;  %v14438_v43 = vld [vmem:[#allocation92_spill] sm:$0xff] }
 0x831   : > { %v5592_v16 = vmul.f32 %v12153_v13, %v14437_v1  ;;  %v5587_v46 = vmul.f32 %v12153_v13, %v14438_v43  ;;  %v14441_v43 = vld [vmem:[#allocation127_spill] sm:$0xff] }
 0x833   : > { %v12295_v12 = vpop.permute.xlu0 %5863  ;;  %v12297_v15 = vpop.permute.xlu1 %5794 }
 0x834   : > { %5983 = vperm.xlu0 %7254, %v5576_v2   ;;  %5968 = vperm.xlu1 %7253, %v5571_v53  }
 0x837   : > { %v12303_v33 = vpop.permute.xlu0 %5869  ;;  %v12305_v9 = vpop.permute.xlu1 %5797 }
 0x838   : > { %6073 = vperm.xlu0 %7254, %v5606_v5   ;;  %6058 = vperm.xlu1 %7253, %v5601_v25   ;;  %v5622_v5 = vmul.f32 %v12181_v60, %v14439_v18  ;;  %v5617_v25 = vmul.f32 %v12181_v60, %v14440_v42 }
 0x83b   : > { %v12311_v44 = vpop.permute.xlu0 %5875  ;;  %v12313_v20 = vpop.permute.xlu1 %5800 }
 0x83c   : > { %5941 = vperm.xlu0 %7254, %v5562_v29   ;;  %5926 = vperm.xlu1 %7253, %v5557_v30  }
 0x83f   : > { %v12319_v2 = vpop.permute.xlu0 %5881  ;;  %v5807_v26 = vpop.permute.xlu1 %5806 }
 0x840   : > { %6031 = vperm.xlu0 %7254, %v5592_v16   ;;  %6016 = vperm.xlu1 %7253, %v5587_v46   ;;  %v6223_v53 = vrot.slane %v5807_v26, %v13790_v55  ;;  %v5578_v46 = vmul.f32 %v12145_v41, %v14441_v43  ;;  %v14442_v26 = vld [vmem:[#allocation140_spill] sm:$0xff] }
 0x841   : > { %v5573_v18 = vmul.f32 %v12145_v41, %v14442_v26 }
 0x842   : > { %v6228_v1 = vsel %vm1674_vm3, %v6227_v4, %v6223_v53 }
 0x843   : > { %v12328_v29 = vpop.permute.xlu0 %5887  ;;  %v5813_v56 = vpop.permute.xlu1 %5812 }
 0x844   : > { %v6232_v30 = vrot.slane %v5813_v56, %v13791_v31  ;;  %6121 = vperm.xlu0 %7254, %v5622_v5   ;;  %6106 = vperm.xlu1 %7253, %v5617_v25   ;;  %v14443_v25 = vld [vmem:[#allocation146_spill] sm:$0xff] }
 0x845   : > { %v5608_v4 = vmul.f32 %v12165_v37, %v14443_v25 }
 0x846   : > { %v6233_v16 = vsel %vm1681_vm4, %v6232_v30, %v6228_v1  ;;  %v14444_v30 = vld [vmem:[#allocation37_spill] sm:$0xff] }
 0x847   : > { %v12339_v42 = vpop.permute.xlu0 %5893  ;;  %v5819_v61 = vpop.permute.xlu1 %5818  ;;  %v6238_v53 = vsel %vm1688_vm5, %v6237_v39, %v6233_v16  ;;  %v5603_v1 = vmul.f32 %v12165_v37, %v14444_v30 }
 0x848   : > { %v6242_v56 = vrot.slane %v5819_v61, %v13795_v49  ;;  %5989 = vperm.xlu0 %7254, %v5578_v46   ;;  %5974 = vperm.xlu1 %7253, %v5573_v18   ;;  %v14447_v18 = vld [vmem:[#allocation13_spill] sm:$0xff] }
 0x849   : > { %v5564_v39 = vmul.f32 %v12129_v40, %v14447_v18 }
 0x84a   : > { %v6243_v5 = vsel %vm1695_vm6, %v6242_v56, %v6238_v53  ;;  %v14448_v56 = vld [vmem:[#allocation194_spill] sm:$0xff] }
 0x84b   : > { %v12350_v43 = vpop.permute.xlu0 %5899  ;;  %v5825_v26 = vpop.permute.xlu1 %5824  ;;  %v6248_v16 = vsel %vm14445_vm10, %v6247_v57, %v6243_v5  ;;  %v5559_v53 = vmul.f32 %v12129_v40, %v14448_v56  ;;  %vm14457_vm10 = vcmask 786112  }
 0x84c   : > { %v6252_v61 = vrot.slane %v5825_v26, %v13797_v52  ;;  %6079 = vperm.xlu0 %7254, %v5608_v4   ;;  %6064 = vperm.xlu1 %7253, %v5603_v1   ;;  %v14451_v1 = vld [vmem:[#allocation55_spill] sm:$0xff] }
 0x84d   : > { %v5594_v57 = vmul.f32 %v12153_v13, %v14451_v1 }
 0x84e   : > { %v6253_v46 = vsel %vm14446_vm1, %v6252_v61, %v6248_v16  ;;  %v14452_v61 = vld [vmem:[#allocation130_spill] sm:$0xff]  ;;  %vm14468_vm1 = vcmask 392512  }
 0x84f   : > { %v12361_v25 = vpop.permute.xlu0 %5905  ;;  %v5831_v30 = vpop.permute.xlu1 %5830  ;;  %v6258_v5 = vsel %vm14449_vm7, %v6257_v50, %v6253_v46  ;;  %v5589_v16 = vmul.f32 %v12153_v13, %v14452_v61  ;;  %vm14469_vm7 = vcmask 458112  }
 0x850   : > { %v6262_v26 = vrot.slane %v5831_v30, %v13799_v59  ;;  %5947 = vperm.xlu0 %7254, %v5564_v39   ;;  %5932 = vperm.xlu1 %7253, %v5559_v53   ;;  %v14455_v53 = vld [vmem:[#allocation41_spill] sm:$0xff] }
 0x851   : > { %v5624_v50 = vmul.f32 %v12181_v60, %v14455_v53 }
 0x852   : > { %v6263_v4 = vsel %vm14450_vm12, %v6262_v26, %v6258_v5  ;;  %v14456_v26 = vld [vmem:[#allocation153_spill] sm:$0xff]  ;;  %vm14471_vm12 = vcmask 523712  }
 0x853   : > { %v12372_v18 = vpop.permute.xlu0 %5911  ;;  %v5837_v56 = vpop.permute.xlu1 %5836  ;;  %v6268_v46 = vsel %vm14453_vm8, %v6267_v22, %v6263_v4  ;;  %v5619_v5 = vmul.f32 %v12181_v60, %v14456_v26  ;;  %vm14472_vm8 = vmmov %vm14468_vm1 }
 0x854   : > { %v6272_v30 = vrot.slane %v5837_v56, %v14224_v8  ;;  %6037 = vperm.xlu0 %7254, %v5594_v57   ;;  %6022 = vperm.xlu1 %7253, %v5589_v16   ;;  %v14458_v16 = vld [vmem:[#allocation78_spill] sm:$0xff] }
 0x855   : > { %v5595_v22 = vmul.f32 %v12153_v13, %v14458_v16 }
 0x856   : > { %v6273_v39 = vsel %vm14454_vm9, %v6272_v30, %v6268_v46  ;;  %v14459_v30 = vld [vmem:[#allocation125_spill] sm:$0xff]  ;;  %vm14473_vm9 = vmmov %vm14469_vm7 }
 0x857   : > { %v12383_v1 = vpop.permute.xlu0 %5917  ;;  %v5843_v61 = vpop.permute.xlu1 %5842  ;;  %v6278_v4 = vsel %vm14457_vm10, %v6277_v0, %v6273_v39  ;;  %v5575_v46 = vmul.f32 %v12145_v41, %v14459_v30  ;;  %v6297_v39 = vrot.slane %v12279_v6, %v14259_v27  ;;  %v14460_v0 = vld [vmem:[#allocation42_spill] sm:$0xff]  ;;  %vm14474_vm10 = vmmov %vm14471_vm12 }
 0x858   : > { %v6282_v56 = vrot.slane %v5843_v61, %v14236_v23  ;;  %6127 = vperm.xlu0 %7254, %v5624_v50   ;;  %6112 = vperm.xlu1 %7253, %v5619_v5  }
 0x85a   : > { %v6283_v57 = vsel %vm1751_vm14, %v6282_v56, %v6278_v4  ;;  %v5625_v56 = vmul.f32 %v12181_v60, %v14460_v0  ;;  %v14461_v4 = vld [vmem:[#allocation79_spill] sm:$0xff] }
 0x85b   : > { %v12394_v53 = vpop.permute.xlu0 %5953  ;;  %v5849_v26 = vpop.permute.xlu1 %5848  ;;  %v6288_v50 = vsel %vm1758_vm15, %v6287_v36, %v6283_v57  ;;  %v5605_v28 = vmul.f32 %v12165_v37, %v14461_v4  ;;  %v14462_v36 = vld [vmem:[#allocation30_spill] sm:$0xff]  ;;  %v14464_v4 = vld [vmem:[#allocation31_spill] sm:$0xff] }
 0x85c   : > { %v6292_v61 = vrot.slane %v5849_v26, %v14250_v10  ;;  %6040 = vperm.xlu0 %7254, %v5595_v22   ;;  %5980 = vperm.xlu1 %7253, %v5575_v46   ;;  %v6306_v46 = vrot.slane %v12287_v11, %v13789_v19  ;;  %v5611_v26 = vmul.f32 %v12165_v37, %v14462_v36 }
 0x85d   : > { %v6316_v11 = vrot.slane %v12295_v12, %v13793_v7  ;;  %v6153_v12 = vrot.slane %v12225_v17, %v13791_v31  ;;  %v6163_v17 = vrot.slane %v12241_v47, %v13795_v49  ;;  %v6336_v47 = vrot.slane %v12311_v44, %v13798_v63 }
 0x85e   : > { %v6293_v5 = vsel %vm1765_vm0, %v6292_v61, %v6288_v50  ;;  %v14463_v61 = vld [vmem:[#allocation99_spill] sm:$0xff] }
 0x85f   : > { %v12406_v16 = vsel %vm1772_vm2, %v6297_v39, %v6293_v5  ;;  %v12408_v30 = vpop.permute.xlu0 %5998  ;;  %v5855_v22 = vpop.permute.xlu1 %5854  ;;  %v5561_v50 = vmul.f32 %v12129_v40, %v14463_v61 }
 0x860   : > { %v6302_v6 = vrot.slane %v5855_v22, %v13790_v55  ;;  %6130 = vperm.xlu0 %7254, %v5625_v56   ;;  %6070 = vperm.xlu1 %7253, %v5605_v28   ;;  %v5612_v28 = vmul.f32 %v12165_v37, %v14464_v4  ;;  %v14465_v22 = vld [vmem:[#allocation22_spill] sm:$0xff] }
 0x861   : > { %v14467_v4 = vld [vmem:[#allocation154_spill] sm:$0xff] }
 0x862   : > { %v6307_v57 = vsel %vm1674_vm3, %v6306_v46, %v6302_v6  ;;  %v5591_v46 = vmul.f32 %v12153_v13, %v14465_v22 }
 0x863   : > { %v12418_v39 = vpop.permute.xlu0 %5959  ;;  %v5861_v5 = vpop.permute.xlu1 %5860 }
 0x864   : > { %v6311_v0 = vrot.slane %v5861_v5, %v13791_v31  ;;  %6088 = vperm.xlu0 %7254, %v5611_v26   ;;  %5938 = vperm.xlu1 %7253, %v5561_v50   ;;  %v6148_v26 = vrot.slane %v12217_v34, %v13789_v19  ;;  %v14466_v5 = vld [vmem:[#allocation83_spill] sm:$0xff] }
 0x866   : > { %v6312_v56 = vsel %vm1681_vm4, %v6311_v0, %v6307_v57  ;;  %v6326_v57 = vrot.slane %v12303_v33, %v13796_v24  ;;  %v5628_v0 = vmul.f32 %v12181_v60, %v14466_v5 }
 0x867   : > { %v12428_v6 = vpop.permute.xlu0 %6046  ;;  %v6317_v36 = vsel %vm1688_vm5, %v6316_v11, %v6312_v56  ;;  %v5867_v61 = vpop.permute.xlu1 %5866  ;;  %v6144_v11 = vrot.slane %v12209_v54, %v13790_v55  ;;  %v6158_v56 = vrot.slane %v12233_v51, %v13793_v7  ;;  %v6168_v54 = vrot.slane %v12249_v3, %v13796_v24  ;;  %v14470_v3 = vld [vmem:[#allocation17_spill] sm:$0xff] }
 0x868   : > { %v6321_v50 = vrot.slane %v5867_v61, %v13795_v49  ;;  %6091 = vperm.xlu0 %7254, %v5612_v28   ;;  %6028 = vperm.xlu1 %7253, %v5591_v46   ;;  %v5621_v28 = vmul.f32 %v12181_v60, %v14467_v4 }
 0x869   : > { %v6149_v61 = vsel %vm1674_vm3, %v6148_v26, %v6144_v11  ;;  %v6178_v26 = vrot.slane %v12265_v32, %v13798_v63  ;;  %v5577_v11 = vmul.f32 %v12145_v41, %v14470_v3  ;;  %v6346_v32 = vrot.slane %v12319_v2, %v13800_v45 }
 0x86a   : > { %v6322_v34 = vsel %vm1695_vm6, %v6321_v50, %v6317_v36  ;;  %v6154_v36 = vsel %vm1681_vm4, %v6153_v12, %v6149_v61  ;;  %v6173_v50 = vrot.slane %v12257_v48, %v13797_v52 }
 0x86b   : > { %v12449_v22 = vpop.permute.xlu0 %5962  ;;  %v6327_v33 = vsel %vm14468_vm1, %v6326_v57, %v6322_v34  ;;  %v5873_v46 = vpop.permute.xlu1 %5872  ;;  %v6159_v57 = vsel %vm1688_vm5, %v6158_v56, %v6154_v36  ;;  %vm14475_vm1 = vcmask 589312  }
 0x86c   : > { %v6331_v51 = vrot.slane %v5873_v46, %v13797_v52  ;;  %6139 = vperm.xlu0 %7254, %v5628_v0   ;;  %6118 = vperm.xlu1 %7253, %v5621_v28   ;;  %v6164_v0 = vsel %vm1695_vm6, %v6163_v17, %v6159_v57  ;;  %v6188_v17 = vrot.slane %v12273_v21, %v13800_v45  ;;  %v14476_v46 = vld [vmem:[#allocation134_spill] sm:$0xff] }
 0x86d   : > { %v6169_v4 = vsel %vm14472_vm8, %v6168_v54, %v6164_v0  ;;  %v5607_v61 = vmul.f32 %v12165_v37, %v14476_v46  ;;  %v6183_v54 = vrot.slane %v12207_v14, %v13799_v59  ;;  %v6356_v14 = vrot.slane %v12328_v29, %v14231_v62 }
 0x86e   : > { %v6332_v5 = vsel %vm14469_vm7, %v6331_v51, %v6327_v33  ;;  %v6174_v56 = vsel %vm14473_vm9, %v6173_v50, %v6169_v4  ;;  %v6193_v51 = vrot.slane %v12281_v58, %v14224_v8  ;;  %vm14477_vm7 = vcmask 654912  }
 0x86f   : > { %v12468_v34 = vpop.permute.xlu0 %6052  ;;  %v6337_v12 = vsel %vm14471_vm12, %v6336_v47, %v6332_v5  ;;  %v5879_v48 = vpop.permute.xlu1 %5878  ;;  %v6179_v28 = vsel %vm14474_vm10, %v6178_v26, %v6174_v56  ;;  %v6198_v47 = vrot.slane %v12289_v35, %v14231_v62  ;;  %vm14478_vm12 = vmmov %vm14475_vm1  ;;  %v6203_v26 = vrot.slane %v12297_v15, %v14236_v23 }
 0x870   : > { %v6341_v44 = vrot.slane %v5879_v48, %v13799_v59  ;;  %5986 = vperm.xlu1 %7253, %v5577_v11   ;;  %v6184_v57 = vsel %vm14478_vm12, %v6183_v54, %v6179_v28  ;;  %vm14479_vm8 = vmmov %vm14477_vm7  ;;  %v6208_v5 = vrot.slane %v12305_v9, %v14246_v38  ;;  %vm14480_vm9 = vcmask 720512   ;;  %v14481_v11 = vld [vmem:[#allocation12_spill] sm:$0xff]  ;;  %v14486_v54 = vld [vmem:[#allocation170_spill] sm:$0xff] }
 0x871   : > { %v6189_v58 = vsel %vm14479_vm8, %v6188_v17, %v6184_v57  ;;  %v5563_v35 = vmul.f32 %v12129_v40, %v14481_v11  ;;  %vm14482_vm10 = vmmov %vm14480_vm9  ;;  %v6366_v40 = vrot.slane %v12339_v42, %v14246_v38  ;;  %v6376_v42 = vrot.slane %v12350_v43, %v14259_v27 }
 0x872   : > { %v6342_v33 = vsel %vm14475_vm1, %v6341_v44, %v6337_v12  ;;  %v6194_v0 = vsel %vm14482_vm10, %v6193_v51, %v6189_v58  ;;  %v6213_v12 = vrot.slane %v12313_v20, %v14250_v10  ;;  %vm14483_vm1 = vcmask 786112   ;;  %v14485_v20 = vld [vmem:[#allocation26_spill] sm:$0xff] }
 0x873   : > { %v12486_v36 = vpop.permute.xlu0 %6097  ;;  %v6347_v2 = vsel %vm14477_vm7, %v6346_v32, %v6342_v33  ;;  %v5885_v50 = vpop.permute.xlu1 %5884  ;;  %vm14484_vm7 = vmmov %vm14483_vm1  ;;  %v5593_v28 = vmul.f32 %v12153_v13, %v14485_v20  ;;  %v6218_v51 = vrot.slane %v14486_v54, %v14259_v27  ;;  %vm14488_vm12 = vcmask 1041409  }
 0x874   : > { %v6351_v21 = vrot.slane %v5885_v50, %v14224_v8  ;;  %6076 = vperm.xlu1 %7253, %v5607_v61   ;;  %v6199_v4 = vsel %vm14484_vm7, %v6198_v47, %v6194_v0  ;;  %vm14489_vm8 = vcmask 1042434   ;;  %v14490_v0 = vld [vmem:[#allocation15_spill] sm:$0xff]  ;;  %vm14500_vm7 = vcmask 523712  }
 0x875   : > { %v6204_v9 = vsel %vm1751_vm14, %v6203_v26, %v6199_v4 }
 0x876   : > { %v6352_v3 = vsel %vm14480_vm9, %v6351_v21, %v6347_v2  ;;  %v6209_v56 = vsel %vm1758_vm15, %v6208_v5, %v6204_v9  ;;  %v14487_v21 = vld [vmem:[#allocation40_spill] sm:$0xff]  ;;  %vm14493_vm9 = vcmask 392512  }
 0x877   : > { %v12506_v48 = vpop.permute.xlu0 %5965  ;;  %v6357_v15 = vsel %vm14483_vm1, %v6356_v14, %v6352_v3  ;;  %v5891_v29 = vpop.permute.xlu1 %5890  ;;  %v6214_v17 = vsel %vm1765_vm0, %v6213_v12, %v6209_v56  ;;  %v5623_v57 = vmul.f32 %v12181_v60, %v14487_v21  ;;  %v6385_v3 = vrot.slane %v12361_v25, %v13789_v19  ;;  %vm14496_vm10 = vmmov %vm14493_vm9 }
 0x878   : > { %v6361_v44 = vrot.slane %v5891_v29, %v14236_v23  ;;  %5944 = vperm.xlu1 %7253, %v5563_v35   ;;  %v6219_v50 = vsel %vm1772_vm2, %v6218_v51, %v6214_v17  ;;  %v5579_v12 = vmul.f32 %v12145_v41, %v14490_v0  ;;  %v6395_v25 = vrot.slane %v12372_v18, %v13793_v7 }
 0x879   : > { %v6773_v26 = vsel %vm14488_vm12, %v12406_v16, %v6219_v50  ;;  %v6539_v0 = vrot.slane %v12408_v30, %v13790_v55  ;;  %vm14499_vm1 = vcmask 458112  }
 0x87a   : > { %v6362_v32 = vsel %vm1751_vm14, %v6361_v44, %v6357_v15  ;;  %v14491_v44 = vld [vmem:[#allocation34_spill] sm:$0xff]  ;;  %vm14502_vm12 = vmmov %vm14499_vm1 }
 0x87b   : > { %v12519_v33 = vpop.permute.xlu0 %6055  ;;  %v6367_v46 = vsel %vm1758_vm15, %v6366_v40, %v6362_v32  ;;  %v5897_v61 = vpop.permute.xlu1 %5896  ;;  %v5609_v9 = vmul.f32 %v12165_v37, %v14491_v44 }
 0x87c   : > { %v6371_v2 = vrot.slane %v5897_v61, %v14250_v10  ;;  %6034 = vperm.xlu1 %7253, %v5593_v28   ;;  %v6405_v28 = vrot.slane %v12383_v1, %v13796_v24 }
 0x87e   : > { %v6372_v47 = vsel %vm1765_vm0, %v6371_v2, %v6367_v46  ;;  %v14492_v46 = vld [vmem:[#allocation19_spill] sm:$0xff]  ;;  %v6464_v2 = vrot.slane %v12394_v53, %v13789_v19  ;;  %v6479_v53 = vrot.slane %v12449_v22, %v13795_v49 }
 0x87f   : > { %v6377_v14 = vsel %vm1772_vm2, %v6376_v42, %v6372_v47  ;;  %v12534_v58 = vpop.permute.xlu0 %5923  ;;  %v5903_v5 = vpop.permute.xlu1 %5902  ;;  %v5580_v18 = vmul.f32 %v12145_v41, %v14492_v46  ;;  %v14494_v47 = vld [vmem:[#allocation28_spill] sm:$0xff]  ;;  %v6632_v46 = vrot.slane %v12519_v33, %v13793_v7 }
 0x880   : > { %v12539_v43 = vsel %vm14489_vm8, %v6377_v14, %v6773_v26  ;;  %v6381_v11 = vrot.slane %v5903_v5, %v13790_v55  ;;  %6124 = vperm.xlu1 %7253, %v5623_v57   ;;  %v5610_v1 = vmul.f32 %v12165_v37, %v14494_v47  ;;  %v6474_v26 = vrot.slane %v12418_v39, %v13793_v7  ;;  %v14495_v5 = vld [vmem:[#allocation93_spill] sm:$0xff]  ;;  %vm14503_vm8 = vmmov %vm14500_vm7 }
 0x881   : > { %v6484_v37 = vrot.slane %v12506_v48, %v13796_v24 }
 0x882   : > { %v6386_v35 = vsel %vm1674_vm3, %v6385_v3, %v6381_v11  ;;  %v5596_v3 = vmul.f32 %v12153_v13, %v14495_v5 }
 0x883   : > { %v12545_v16 = vpop.permute.xlu0 %6013  ;;  %v5909_v15 = vpop.permute.xlu1 %5908 }
 0x884   : > { %v6390_v29 = vrot.slane %v5909_v15, %v13791_v31  ;;  %5992 = vperm.xlu1 %7253, %v5579_v12  }
 0x886   : > { %v6391_v4 = vsel %vm1681_vm4, %v6390_v29, %v6386_v35  ;;  %v14497_v29 = vld [vmem:[#allocation43_spill] sm:$0xff] }
 0x887   : > { %v12553_v40 = vpop.permute.xlu0 %6103  ;;  %v6396_v56 = vsel %vm1688_vm5, %v6395_v25, %v6391_v4  ;;  %v5915_v32 = vpop.permute.xlu1 %5914  ;;  %v5626_v48 = vmul.f32 %v12181_v60, %v14497_v29 }
 0x888   : > { %v6400_v20 = vrot.slane %v5915_v32, %v13795_v49  ;;  %6082 = vperm.xlu1 %7253, %v5609_v9   ;;  %v14498_v9 = vld [vmem:[#allocation155_spill] sm:$0xff] }
 0x88a   : > { %v6401_v17 = vsel %vm1695_vm6, %v6400_v20, %v6396_v56  ;;  %v5627_v56 = vmul.f32 %v12181_v60, %v14498_v9  ;;  %v6618_v20 = vrot.slane %v12428_v6, %v13790_v55 }
 0x88b   : > { %v12562_v61 = vpop.permute.xlu0 %5971  ;;  %v5951_v54 = vpop.permute.xlu1 %5950  ;;  %v6406_v51 = vsel %vm14493_vm9, %v6405_v28, %v6401_v17  ;;  %v6627_v17 = vrot.slane %v12468_v34, %v13791_v31 }
 0x88c   : > { %v6460_v42 = vrot.slane %v5951_v54, %v13790_v55  ;;  %5995 = vperm.xlu1 %7253, %v5580_v18  }
 0x88e   : > { %v6465_v50 = vsel %vm1674_vm3, %v6464_v2, %v6460_v42 }
 0x88f   : > { %v12571_v21 = vpop.permute.xlu0 %6061  ;;  %v5957_v57 = vpop.permute.xlu1 %5956 }
 0x890   : > { %v6469_v41 = vrot.slane %v5957_v57, %v13791_v31  ;;  %6085 = vperm.xlu1 %7253, %v5610_v1   ;;  %v6701_v1 = vrot.slane %v12486_v36, %v13789_v19 }
 0x892   : > { %v6470_v14 = vsel %vm1681_vm4, %v6469_v41, %v6465_v50 }
 0x893   : > { %v6475_v11 = vsel %vm1688_vm5, %v6474_v26, %v6470_v14  ;;  %v6002_v35 = vpop.permute.xlu1 %6001  ;;  %v12586_v12 = vpop.permute.xlu0 %5929 }
 0x894   : > { %v6543_v39 = vrot.slane %v6002_v35, %v13789_v19  ;;  %6043 = vperm.xlu1 %7253, %v5596_v3   ;;  %v6480_v22 = vsel %vm1695_vm6, %v6479_v53, %v6475_v11  ;;  %v6415_v53 = vrot.slane %v12534_v58, %v13798_v63  ;;  %v6711_v58 = vrot.slane %v12553_v40, %v13793_v7 }
 0x895   : > { %v6485_v15 = vsel %vm14496_vm10, %v6484_v37, %v6480_v22  ;;  %v6642_v40 = vrot.slane %v12571_v21, %v13796_v24  ;;  %vm14507_vm10 = vmmov %vm14499_vm1 }
 0x896   : > { %v6544_v13 = vsel %vm1674_vm3, %v6543_v39, %v6539_v0 }
 0x897   : > { %v6005_v25 = vpop.permute.xlu1 %6004  ;;  %v6020_v44 = vpop.permute.xlu0 %6019 }
 0x898   : > { %v6548_v4 = vrot.slane %v6005_v25, %v13791_v31  ;;  %6133 = vperm.xlu1 %7253, %v5626_v48   ;;  %v6573_v21 = vrot.slane %v6020_v44, %v13798_v63 }
 0x89a   : > { %v6549_v30 = vsel %vm1681_vm4, %v6548_v4, %v6544_v13 }
 0x89b   : > { %v6050_v32 = vpop.permute.xlu1 %6049  ;;  %v6110_v42 = vpop.permute.xlu0 %6109 }
 0x89c   : > { %v6622_v28 = vrot.slane %v6050_v32, %v13789_v19  ;;  %6136 = vperm.xlu1 %7253, %v5627_v56  }
 0x89e   : > { %v6623_v18 = vsel %vm1674_vm3, %v6622_v28, %v6618_v20 }
 0x89f   : > { %v6628_v54 = vsel %vm1681_vm4, %v6627_v17, %v6623_v18  ;;  %v6008_v2 = vpop.permute.xlu1 %6007  ;;  %v5978_v57 = vpop.permute.xlu0 %5977 }
 0x8a0   : > { %v6553_v60 = vrot.slane %v6008_v2, %v13793_v7  ;;  %v6633_v50 = vsel %vm1688_vm5, %v6632_v46, %v6628_v54  ;;  %v6504_v44 = vrot.slane %v5978_v57, %v13800_v45 }
 0x8a2   : > { %v6554_v6 = vsel %vm1688_vm5, %v6553_v60, %v6549_v30 }
 0x8a3   : > { %v6095_v47 = vpop.permute.xlu1 %6094  ;;  %v12619_v37 = vpop.permute.xlu0 %6067 }
 0x8a4   : > { %v6697_v34 = vrot.slane %v6095_v47, %v13790_v55  ;;  %v6563_v55 = vrot.slane %v12545_v16, %v13796_v24  ;;  %v6494_v16 = vrot.slane %v12562_v61, %v13798_v63  ;;  %v6425_v61 = vrot.slane %v12586_v12, %v13800_v45 }
 0x8a6   : > { %v6702_v33 = vsel %vm1674_vm3, %v6701_v1, %v6697_v34  ;;  %vm14501_vm3 = vmmov %vm14493_vm9  ;;  %vm14506_vm9 = vcmask 654912  }
 0x8a7   : > { %v5921_v41 = vpop.permute.xlu1 %5920 }
 0x8a8   : > { %v6410_v26 = vrot.slane %v5921_v41, %v13797_v52 }
 0x8aa   : > { %v6411_v14 = vsel %vm14499_vm1, %v6410_v26, %v6406_v51  ;;  %v12629_v51 = vpop.permute.xlu0 %5935  ;;  %vm14508_vm1 = vmmov %vm14500_vm7 }
 0x8ab   : > { %v6011_v5 = vpop.permute.xlu1 %6010  ;;  %v6416_v3 = vsel %vm14500_vm7, %v6415_v53, %v6411_v14  ;;  %vm14509_vm7 = vmmov %vm14501_vm3 }
 0x8ac   : > { %v6558_v19 = vrot.slane %v6011_v5, %v13795_v49 }
 0x8ae   : > { %v6559_v36 = vsel %vm1695_vm6, %v6558_v19, %v6554_v6  ;;  %v12638_v4 = vpop.permute.xlu0 %6025 }
 0x8af   : > { %v6101_v11 = vpop.permute.xlu1 %6100  ;;  %v6564_v35 = vsel %vm14501_vm3, %v6563_v55, %v6559_v36 }
 0x8b0   : > { %v6706_v0 = vrot.slane %v6101_v11, %v13791_v31 }
 0x8b2   : > { %v6707_v39 = vsel %vm1681_vm4, %v6706_v0, %v6702_v33  ;;  %vm14504_vm4 = vmmov %vm14501_vm3 }
 0x8b3   : > { %v5969_v22 = vpop.permute.xlu1 %5968  ;;  %v6712_v13 = vsel %vm1688_vm5, %v6711_v58, %v6707_v39  ;;  %vm14505_vm5 = vcmask 589312  }
 0x8b4   : > { %v6489_v29 = vrot.slane %v5969_v22, %v13797_v52  ;;  %vm14510_vm3 = vmmov %vm14505_vm5 }
 0x8b6   : > { %v6490_v48 = vsel %vm14502_vm12, %v6489_v29, %v6485_v15  ;;  %v12648_v15 = vpop.permute.xlu0 %6115  ;;  %vm14511_vm12 = vmmov %vm14506_vm9 }
 0x8b7   : > { %v6059_v25 = vpop.permute.xlu1 %6058  ;;  %v6495_v31 = vsel %vm14503_vm8, %v6494_v16, %v6490_v48  ;;  %vm14512_vm8 = vmmov %vm14507_vm10 }
 0x8b8   : > { %v6637_v7 = vrot.slane %v6059_v25, %v13795_v49 }
 0x8ba   : > { %v6638_v30 = vsel %vm1695_vm6, %v6637_v7, %v6633_v50  ;;  %v12656_v60 = vpop.permute.xlu0 %5983  ;;  %v6721_v50 = vrot.slane %v6110_v42, %v13796_v24  ;;  %v6435_v7 = vrot.slane %v12629_v51, %v14231_v62 }
 0x8bb   : > { %v5927_v9 = vpop.permute.xlu1 %5926  ;;  %v6643_v56 = vsel %vm14504_vm4, %v6642_v40, %v6638_v30  ;;  %vm14514_vm4 = vmmov %vm14510_vm3 }
 0x8bc   : > { %v6420_v32 = vrot.slane %v5927_v9, %v13799_v59 }
 0x8be   : > { %v6421_v20 = vsel %vm14505_vm5, %v6420_v32, %v6416_v3  ;;  %v12666_v33 = vpop.permute.xlu0 %6073  ;;  %vm14515_vm5 = vcmask 786112  }
 0x8bf   : > { %v6017_v28 = vpop.permute.xlu1 %6016  ;;  %v6426_v17 = vsel %vm14506_vm9, %v6425_v61, %v6421_v20 }
 0x8c0   : > { %v6568_v46 = vrot.slane %v6017_v28, %v13797_v52 }
 0x8c2   : > { %v6569_v18 = vsel %vm14507_vm10, %v6568_v46, %v6564_v35  ;;  %v5942_v14 = vpop.permute.xlu0 %5941  ;;  %vm14518_vm10 = vmmov %vm14515_vm5 }
 0x8c3   : > { %v6107_v54 = vpop.permute.xlu1 %6106  ;;  %v6574_v2 = vsel %vm14508_vm1, %v6573_v21, %v6569_v18  ;;  %v6445_v32 = vrot.slane %v5942_v14, %v14246_v38  ;;  %v6583_v14 = vrot.slane %v12638_v4, %v13800_v45 }
 0x8c4   : > { %v6716_v12 = vrot.slane %v6107_v54, %v13795_v49 }
 0x8c6   : > { %v6717_v6 = vsel %vm1695_vm6, %v6716_v12, %v6712_v13  ;;  %vm14513_vm6 = vcmask 720512   ;;  %v12675_v55 = vpop.permute.xlu0 %6031 }
 0x8c7   : > { %v5975_v47 = vpop.permute.xlu1 %5974  ;;  %v12662_v1 = vsel %vm14509_vm7, %v6721_v50, %v6717_v6  ;;  %vm14516_vm9 = vmmov %vm14513_vm6 }
 0x8c8   : > { %v6499_v34 = vrot.slane %v5975_v47, %v13799_v59  ;;  %vm14520_vm7 = vmmov %vm14511_vm12 }
 0x8ca   : > { %v6500_v41 = vsel %vm14510_vm3, %v6499_v34, %v6495_v31  ;;  %v12680_v0 = vpop.permute.xlu0 %6121 }
 0x8cb   : > { %v6065_v26 = vpop.permute.xlu1 %6064  ;;  %v6505_v53 = vsel %vm14511_vm12, %v6504_v44, %v6500_v41  ;;  %v6652_v41 = vrot.slane %v12619_v37, %v13798_v63  ;;  %vm14522_vm12 = vmmov %vm14520_vm7 }
 0x8cc   : > { %v6647_v49 = vrot.slane %v6065_v26, %v13797_v52  ;;  %v6514_v26 = vrot.slane %v12656_v60, %v14231_v62 }
 0x8ce   : > { %v6648_v24 = vsel %vm14512_vm8, %v6647_v49, %v6643_v56  ;;  %v5990_v39 = vpop.permute.xlu0 %5989 }
 0x8cf   : > { %v5933_v42 = vpop.permute.xlu1 %5932 }
 0x8d0   : > { %v6430_v5 = vrot.slane %v5933_v42, %v14224_v8 }
 0x8d2   : > { %v6431_v3 = vsel %vm14513_vm6, %v6430_v5, %v6426_v17  ;;  %v12682_v29 = vpop.permute.xlu0 %6079 }
 0x8d3   : > { %v6023_v19 = vpop.permute.xlu1 %6022  ;;  %v6436_v9 = vsel %vm14515_vm5, %v6435_v7, %v6431_v3 }
 0x8d4   : > { %v6578_v57 = vrot.slane %v6023_v19, %v13799_v59 }
 0x8d6   : > { %v6579_v36 = vsel %vm14514_vm4, %v6578_v57, %v6574_v2  ;;  %v5948_v48 = vpop.permute.xlu0 %5947  ;;  %v6662_v57 = vrot.slane %v12666_v33, %v13800_v45  ;;  %vm14525_vm4 = vmmov %vm14515_vm5 }
 0x8d7   : > { %v12678_v11 = vpop.permute.xlu1 %6112  ;;  %v6455_v28 = vrot.slane %v5948_v48, %v14259_v27  ;;  %v6593_v48 = vrot.slane %v12675_v55, %v14231_v62  ;;  %vm14526_vm5 = vmmov %vm14525_vm4 }
 0x8d8   : > { %v6726_v4 = vrot.slane %v12678_v11, %v13797_v52  ;;  %v6672_v52 = vrot.slane %v12682_v29, %v14231_v62 }
 0x8da   : > { %v12689_v30 = vpop.permute.xlu0 %6037 }
 0x8db   : > { %v5981_v35 = vpop.permute.xlu1 %5980 }
 0x8dc   : > { %v6509_v50 = vrot.slane %v5981_v35, %v14224_v8  ;;  %v6524_v35 = vrot.slane %v5990_v39, %v14246_v38 }
 0x8de   : > { %v12697_v46 = vpop.permute.xlu0 %6127  ;;  %v6510_v47 = vsel %vm14516_vm9, %v6509_v50, %v6505_v53 }
 0x8df   : > { %v6071_v58 = vpop.permute.xlu1 %6070  ;;  %v6515_v5 = vsel %vm14518_vm10, %v6514_v26, %v6510_v47 }
 0x8e0   : > { %v6657_v34 = vrot.slane %v6071_v58, %v13799_v59 }
 0x8e2   : > { %v6041_v12 = vpop.permute.xlu0 %6040 }
 0x8e3   : > { %v5939_v22 = vpop.permute.xlu1 %5938  ;;  %v6608_v50 = vrot.slane %v6041_v12, %v14250_v10 }
 0x8e4   : > { %v6440_v31 = vrot.slane %v5939_v22, %v14236_v23 }
 0x8e6   : > { %v6441_v56 = vsel %vm1751_vm14, %v6440_v31, %v6436_v9  ;;  %v12713_v49 = vpop.permute.xlu0 %6130 }
 0x8e7   : > { %v6029_v13 = vpop.permute.xlu1 %6028  ;;  %v6446_v17 = vsel %vm1758_vm15, %v6445_v32, %v6441_v56  ;;  %v6731_v32 = vrot.slane %v12648_v15, %v13798_v63 }
 0x8eb   : > { %v12684_v16 = vpop.permute.xlu1 %6118 }
 0x8ec   : > { %v6736_v55 = vrot.slane %v12684_v16, %v13799_v59 }
 0x8ef   : > { %v5987_v25 = vpop.permute.xlu1 %5986 }
 0x8f0   : > { %v6519_v44 = vrot.slane %v5987_v25, %v14236_v23  ;;  %v6089_v25 = vpop.permute.xlu0 %6088 }
 0x8f1   : > { %v6687_v59 = vrot.slane %v6089_v25, %v14250_v10 }
 0x8f2   : > { %v6520_v19 = vsel %vm1751_vm14, %v6519_v44, %v6515_v5 }
 0x8f3   : > { %v6077_v40 = vpop.permute.xlu1 %6076  ;;  %v6525_v33 = vsel %vm1758_vm15, %v6524_v35, %v6520_v19 }
 0x8f4   : > { %v6667_v37 = vrot.slane %v6077_v40, %v14224_v8 }
 0x8f7   : > { %v5945_v61 = vpop.permute.xlu1 %5944 }
 0x8f8   : > { %v6450_v20 = vrot.slane %v5945_v61, %v14250_v10 }
 0x8fa   : > { %v6451_v51 = vsel %vm1765_vm0, %v6450_v20, %v6446_v17 }
 0x8fb   : > { %v6456_v21 = vsel %vm1772_vm2, %v6455_v28, %v6451_v51  ;;  %v6035_v18 = vpop.permute.xlu1 %6034  ;;  %v6603_v28 = vrot.slane %v12689_v30, %v14246_v38 }
 0x8fc   : > { %v6775_v54 = vsel %vm2331_vm11, %v6456_v21, %v12539_v43  ;;  %v6588_v43 = vrot.slane %v6029_v13, %v14224_v8  ;;  %vm14517_vm11 = vmmov %vm14508_vm1  ;;  %v6598_v22 = vrot.slane %v6035_v18, %v14236_v23  ;;  %v6092_v21 = vpop.permute.xlu0 %6091 }
 0x8fd   : > { %v6653_v53 = vsel %vm14517_vm11, %v6652_v41, %v6648_v24  ;;  %vm14519_vm1 = vmmov %vm14510_vm3  ;;  %v6584_v24 = vsel %vm14520_vm7, %v6583_v14, %v6579_v36  ;;  %v6692_v44 = vrot.slane %v6092_v21, %v14259_v27 }
 0x8fe   : > { %v6658_v3 = vsel %vm14519_vm1, %v6657_v34, %v6653_v53  ;;  %vm14521_vm3 = vmmov %vm14513_vm6  ;;  %vm14524_vm6 = vcmask 458112  }
 0x8ff   : > { %v12703_v2 = vpop.permute.xlu1 %6124  ;;  %v6589_v58 = vsel %vm14521_vm3, %v6588_v43, %v6584_v24  ;;  %v6663_v31 = vsel %vm14522_vm12, %v6662_v57, %v6658_v3  ;;  %vm14523_vm8 = vmmov %vm14521_vm3  ;;  %v6727_v40 = vsel %vm14524_vm6, %v6726_v4, %v12662_v1  ;;  %vm14534_vm12 = vcmask 1047559  }
 0x900   : > { %v6668_v36 = vsel %vm14523_vm8, %v6667_v37, %v6663_v31  ;;  %v6594_v9 = vsel %vm14525_vm4, %v6593_v48, %v6589_v58  ;;  %vm14527_vm9 = vmmov %vm14517_vm11  ;;  %v6746_v18 = vrot.slane %v12703_v2, %v14224_v8 }
 0x901   : > { %v6599_v29 = vsel %vm1751_vm14, %v6598_v22, %v6594_v9  ;;  %v6673_v1 = vsel %vm14526_vm5, %v6672_v52, %v6668_v36  ;;  %v6732_v16 = vsel %vm14527_vm9, %v6731_v32, %v6727_v40  ;;  %vm14528_vm11 = vmmov %vm14519_vm1  ;;  %vm14531_vm1 = vcmask 1045509  }
 0x902   : > { %v6737_v63 = vsel %vm14528_vm11, %v6736_v55, %v6732_v16  ;;  %v6604_v15 = vsel %vm1758_vm15, %v6603_v28, %v6599_v29  ;;  %vm14530_vm10 = vmmov %vm14521_vm3 }
 0x903   : > { %v5993_v6 = vpop.permute.xlu1 %5992  ;;  %v6609_v26 = vsel %vm1765_vm0, %v6608_v50, %v6604_v15  ;;  %vm14533_vm3 = vmmov %vm14525_vm4 }
 0x904   : > { %v6529_v60 = vrot.slane %v5993_v6, %v14250_v10 }
 0x906   : > { %v6530_v11 = vsel %vm1765_vm0, %v6529_v60, %v6525_v33 }
 0x907   : > { %v6083_v42 = vpop.permute.xlu1 %6082 }
 0x908   : > { %v6677_v7 = vrot.slane %v6083_v42, %v14236_v23 }
 0x90a   : > { %v6678_v51 = vsel %vm1751_vm14, %v6677_v7, %v6673_v1 }
 0x90b   : > { %v5996_v13 = vpop.permute.xlu1 %5995 }
 0x90c   : > { %v6534_v39 = vrot.slane %v5996_v13, %v14259_v27 }
 0x90e   : > { %v6535_v56 = vsel %vm1772_vm2, %v6534_v39, %v6530_v11 }
 0x90f   : > { %v6776_v61 = vsel %vm2333_vm13, %v6535_v56, %v6775_v54  ;;  %v6086_v20 = vpop.permute.xlu1 %6085  ;;  %v6741_v54 = vrot.slane %v12680_v0, %v13800_v45  ;;  %vm14529_vm13 = vmmov %vm14520_vm7  ;;  %v6751_v45 = vrot.slane %v12697_v46, %v14231_v62  ;;  %vm14532_vm7 = vcmask 1046534   ;;  %v6140_v46 = vpop.permute.xlu0 %6139 }
 0x910   : > { %v6682_v17 = vrot.slane %v6086_v20, %v14246_v38  ;;  %v6756_v62 = vrot.slane %v12713_v49, %v14236_v23  ;;  %v6771_v37 = vrot.slane %v6140_v46, %v14259_v27 }
 0x911   : > { %v6742_v41 = vsel %vm14529_vm13, %v6741_v54, %v6737_v63 }
 0x912   : > { %v6683_v30 = vsel %vm1758_vm15, %v6682_v17, %v6678_v51  ;;  %v6747_v8 = vsel %vm14530_vm10, %v6746_v18, %v6742_v41 }
 0x913   : > { %v6044_v6 = vpop.permute.xlu1 %6043  ;;  %v6688_v47 = vsel %vm1765_vm0, %v6687_v59, %v6683_v30  ;;  %v6752_v14 = vsel %vm14533_vm3, %v6751_v45, %v6747_v8 }
 0x914   : > { %v6613_v34 = vrot.slane %v6044_v6, %v14259_v27  ;;  %v6693_v0 = vsel %vm1772_vm2, %v6692_v44, %v6688_v47  ;;  %v6757_v3 = vsel %vm1751_vm14, %v6756_v62, %v6752_v14 }
 0x916   : > { %v6614_v2 = vsel %vm1772_vm2, %v6613_v34, %v6609_v26 }
 0x917   : > { %v6777_v12 = vsel %vm14531_vm1, %v6614_v2, %v6776_v61  ;;  %v6134_v43 = vpop.permute.xlu1 %6133 }
 0x918   : > { %v6778_v42 = vsel %vm14532_vm7, %v6693_v0, %v6777_v12  ;;  %v6761_v53 = vrot.slane %v6134_v43, %v14246_v38 }
 0x91a   : > { %v6762_v60 = vsel %vm1758_vm15, %v6761_v53, %v6757_v3 }
 0x91b   : > { %v6137_v5 = vpop.permute.xlu1 %6136 }
 0x91c   : > { %v6766_v19 = vrot.slane %v6137_v5, %v14250_v10 }
 0x91e   : > { %v6767_v57 = vsel %vm1765_vm0, %v6766_v19, %v6762_v60 }
 0x91f   : > { %v6772_v38 = vsel %vm1772_vm2, %v6771_v37, %v6767_v57 }
 0x920   : > { %v6779_v35 = vsel %vm14534_vm12, %v6772_v38, %v6778_v42 }
 0x921   : > { %7155 = vmatmul.mubr.f32.vlgmr.msra.gmra.mrb[16].mxu0 %v6779_v35  ;;  %6781 = vst [vmem:[%s357_s23] sm:$0xff] %v6779_v35 }
 0x922   : > { %7787 = shalt.err (!%p7784_p5)
}
 0x923   : > { %s7788_s23 = scalar_lea.hbm %s12802_s11, 128  ;;  %s7792_s19 = scalar_lea.hbm %s12886_s8, 256 }
 0x924   : > { %p7789_p6 = scmp.ne.s32.totalorder %s12802_s11, %s7788_s23  ;;  %p7793_p10 = scmp.lt.u32.totalorder %s12802_s11, %s12886_s8 }
 0x925   : > { %p7794_p11 = scmp.lt.u32.totalorder %s7792_s19, %s7788_s23  ;;  %p7796_p13 = scmp.lt.u32.totalorder %s7788_s23, %s12802_s11 }
 0x926   : > { %p7790_p7 = pnand %p7789_p6, %p7978_p4 }
 0x927   : > { %p7795_p12 = por %p7794_p11, %p7793_p10 }
 0x928   : > { %p7791_p9 = pneg %p7790_p7 }
 0x929   : > { %p7797_p0 = por %p7796_p13, %p7795_p12 }
 0x92b   : > { %p7798_p1 = pnand %p7797_p0, %p7791_p9 }
 0x92d   : > { %7801 = shalt.err (!%p7798_p1)
}
 0x92e   : > { %7189 = dma.vmem_to_hbm [thread:$0]  (%p7978_p4), %s6888_s12, 128, %s12802_s11, %s6859_s14   ;;  %vm14537_vm14 = vcmask 130048  }
 0x92f   : > { %s14535_s22 = sshll.u32 %s12780_s21, 3  ;;  %s14536_s26 = sshll.u32 %s7876_s30, 7 }
 0x930   : > { %s350_s16 = scalar_lea.vmem [#allocation2], %s14535_s22  ;;  %s12829_s19 = scalar_lea.hbm %s12885_s7, %s14536_s26 }
 0x931   : > { %s6873_s25 = sshll.u32 %s350_s16, 4  ;;  %s6854_s23 = scalar_lea.sflag [#allocation3], %s12780_s21  ;;  %s12831_s25 = int_to_ptr.vmem [resolvable:$true] %s6873_s25 }
 0x932   : > { %s7802_s11 = scalar_lea.vmem %s12831_s25, 128  ;;  %s7892_s30 = smov [#allocation2]  }
 0x933   : > { %p7803_p2 = scmp.ne.s32.totalorder %s12831_s25, %s7802_s11  ;;  %s7806_s12 = sshll.u32 %s7892_s30, 4  ;;  %s7807_s12 = int_to_ptr.vmem [resolvable:$false] %s7806_s12 }
 0x934   : > { %s7808_s14 = scalar_lea.vmem %s7807_s12, 256  ;;  %p7809_p6 = scmp.lt.s32.totalorder %s12831_s25, %s7807_s12 }
 0x935   : > { %p7804_p3 = pnand %p7803_p2, %p7978_p4  ;;  %p7810_p7 = scmp.lt.s32.totalorder %s7808_s14, %s7802_s11 }
 0x937   : > { %p7805_p5 = pneg %p7804_p3  ;;  %p7811_p9 = por %p7810_p7, %p7809_p6 }
 0x939   : > { %p7812_p10 = pnand %p7811_p9, %p7805_p5 }
 0x9f4   : > { %v6848_v23 = vpop.f32.mrb[16].mxu0 }
 0x9f5   : > { %6852 = vst.msk [vmem:[%s350_s16] sm:$0xff] %vm14537_vm14, %v6848_v23  ;;  %v7156_v10 = vpop.f32.mrb[17].mxu0 }
 0x9f6   : > { %7815 = shalt.err (!%p7812_p10)
}
 0x9f7   : > { %s7816_s21 = scalar_lea.hbm %s12829_s19, 128  ;;  %s7820_s26 = scalar_lea.hbm %s12885_s7, 256 }
 0x9f8   : > { %p7817_p11 = scmp.ne.s32.totalorder %s12829_s19, %s7816_s21  ;;  %p7821_p0 = scmp.lt.u32.totalorder %s12829_s19, %s12885_s7 }
 0x9f9   : > { %p7822_p1 = scmp.lt.u32.totalorder %s7820_s26, %s7816_s21  ;;  %p7824_p3 = scmp.lt.u32.totalorder %s7816_s21, %s12829_s19 }
 0x9fa   : > { %p7818_p12 = pnand %p7817_p11, %p7978_p4 }
 0x9fb   : > { %p7823_p2 = por %p7822_p1, %p7821_p0 }
 0x9fc   : > { %p7819_p13 = pneg %p7818_p12 }
 0x9fd   : > { %p7825_p5 = por %p7824_p3, %p7823_p2 }
 0x9ff   : > { %p7826_p6 = pnand %p7825_p5, %p7819_p13 }
 0xa01   : > { %7829 = shalt.err (!%p7826_p6)
}
 0xa02   : > { %7188 = dma.vmem_to_hbm [thread:$0]  (%p7978_p4), %s12831_s25, 128, %s12829_s19, %s6854_s23  }
 0xa03 PF: > { %p7199_p7 = scmp.ge.s32.totalorder %s7884_s10, 2  ;;  %s6899_s11 = sand.u32 1, %s7864_s27  }
 0xa04   : > { %s6900_s30 = scalar_lea.sflag [#allocation3], %s6899_s11 }
 0xa05   : > { %p7193_p9 = pnand %p7199_p7, %p7985_p8 }
 0xa07   : > { %7855 = dma.done.wait (!%p7193_p9), %s6900_s30, 128  }
 0xa08   : > { %7857 = vsyncadd (!%p7193_p9), %s6900_s30, 4294967168  ;;  %s6909_s12 = scalar_lea.sflag [#allocation5], %s6899_s11 }
 0xa09   : > { %7859 = dma.done.wait (!%p7193_p9), %s6909_s12, 128  }
 0xa0a   : > { %7861 = vsyncadd (!%p7193_p9), %s6909_s12, 4294967168  ;;  %s25_s10 = sadd.s32 1, %s7884_s10   ;;  %s14538_s27 = smov %s7868_s28 }
 0xa0b   : > { %p22_p10 = scmp.ge.s32.totalorder %s25_s10, 4   ;;  %s14539_s28 = smov %s7872_s29 }
 0xa0c   : > { %s14540_s29 = smov %s7991_s18  ;;  %s14541_s30 = smov %s7880_s9 }
 0xa0d   : > { %s14542_s9 = smov %s14544_s13  ;;  %24 = sbr.rel (!%p22_p10) target bundleno = 6 (0x6), region = 106 }
 0xa14   :  { %6914 = vsyncpa [#allocation3], 1 }
 0xa15   :  { %6916 = vsyncpa [#allocation3 + $0x1], 1 }
 0xa16   :  { %6917 = vsyncpa [#allocation5], 1 }
 0xa17   :  { %6919 = vsyncpa [#allocation5 + $0x1], 1 }

</bundles_post_ra>
